<compile_context>
chip_gen: v5e
topology: v5e:2x2
jax: 0.10.0
libtpu: 0.0.40
codegen_flags: <defaults>
</compile_context>

<pallas_src>
import functools

import jax
import jax.numpy as jnp
from jax.experimental import pallas as pl
from jax.experimental.pallas import tpu as pltpu

_G = 2  # guard-ring width == kernel_size // 2 for the 5x5 convolutions
# TODO(synk): kernel_size is fixed at 5 (guard ring of 2), matching the default
# Key.Net config; other kernel sizes would need a different guard width.

_PYR_K = (
    (1.0, 4.0, 6.0, 4.0, 1.0),
    (4.0, 16.0, 24.0, 16.0, 4.0),
    (6.0, 24.0, 36.0, 24.0, 6.0),
    (4.0, 16.0, 24.0, 16.0, 4.0),
    (1.0, 4.0, 6.0, 4.0, 1.0),
)


def _ext_dims(H, W):
    """Extended (zero-guarded) grid dims: (H+4, W+4) flattened row-major."""
    Hp, Wp = H + 2 * _G, W + 2 * _G
    return Hp, Wp, Hp * Wp


# ----------------------------------------------------------------------------
# In-kernel helpers (operate on (C, Lg) flat activations resident in VMEM)
# ----------------------------------------------------------------------------
def _flat_shift(a, s):
    """b[:, q] = a[:, q + s]; zero where q + s falls outside the array."""
    if s == 0:
        return a
    C, L = a.shape
    if s > 0:
        return jnp.concatenate([a[:, s:], jnp.zeros((C, s), a.dtype)], axis=1)
    return jnp.concatenate([jnp.zeros((C, -s), a.dtype), a[:, :L + s]], axis=1)


def _grid_coords(H, W):
    """Per-flat-position (row, col) coordinates of the extended grid (f32)."""
    _, Wp, Lg = _ext_dims(H, W)
    q = jax.lax.broadcasted_iota(jnp.int32, (1, Lg), 1).astype(jnp.float32)
    row = jnp.floor(q / float(Wp))
    col = q - row * float(Wp)
    return row, col


def _valid_mask(row, col, H, W):
    return ((row >= _G) & (row <= H + _G - 1) &
            (col >= _G) & (col <= W + _G - 1))


def _replicate_fill1(a, row, col, H, W, Wp):
    """Fill the 1-wide ring around the valid region with edge-replicated values
    (kornia spatial_gradient uses replicate padding). `a` must be zero there."""
    in_r = (row >= _G) & (row <= H + _G - 1)
    in_c = (col >= _G) & (col <= W + _G - 1)
    top, bot = row == _G - 1, row == H + _G
    lft, rgt = col == _G - 1, col == W + _G
    out = a
    out = out + jnp.where(lft & in_r, _flat_shift(a, 1), 0.0)
    out = out + jnp.where(rgt & in_r, _flat_shift(a, -1), 0.0)
    out = out + jnp.where(top & in_c, _flat_shift(a, Wp), 0.0)
    out = out + jnp.where(bot & in_c, _flat_shift(a, -Wp), 0.0)
    out = out + jnp.where(top & lft, _flat_shift(a, Wp + 1), 0.0)
    out = out + jnp.where(top & rgt, _flat_shift(a, Wp - 1), 0.0)
    out = out + jnp.where(bot & lft, _flat_shift(a, -Wp + 1), 0.0)
    out = out + jnp.where(bot & rgt, _flat_shift(a, -Wp - 1), 0.0)
    return out


def _sobel_flat(a, row, col, valid, H, W, Wp):
    """Kornia-style normalized Sobel gradients (replicate pad): pure VPU work."""
    ar = _replicate_fill1(a, row, col, H, W, Wp)
    s = lambda off: _flat_shift(ar, off)
    tl, tc, tr = s(-Wp - 1), s(-Wp), s(-Wp + 1)
    ml, mr = s(-1), s(1)
    bl, bc, br = s(Wp - 1), s(Wp), s(Wp + 1)
    gx = ((tr - tl) + 2.0 * (mr - ml) + (br - bl)) * 0.125
    gy = ((bl - tl) + 2.0 * (bc - tc) + (br - tr)) * 0.125
    return jnp.where(valid, gx, 0.0), jnp.where(valid, gy, 0.0)


def _conv5x5_flat(act, w2d, bias, valid, Wp):
    """5x5 conv (zero pad 2) + bias + ReLU as a single lane-dense MXU matmul.

    act: (Cin, Lg) f32, valid-masked (zero guard ring == zero padding).
    w2d: (Cout, 25*Cin) bf16, taps outer / input channel inner.
    """
    taps = [_flat_shift(act, (i - 2) * Wp + (j - 2))
            for i in range(5) for j in range(5)]
    patches = jnp.concatenate(taps, axis=0).astype(jnp.bfloat16)   # (25*Cin, Lg)
    out = jnp.dot(w2d, patches, preferred_element_type=jnp.float32)  # (Cout, Lg)
    out = jnp.maximum(out + bias, 0.0)
    return jnp.where(valid, out, 0.0)


def _features_flat(x, w_refs, b_refs, H, W):
    """Handcrafted block + 3x (Conv5x5 + folded-BN + ReLU), all in VMEM."""
    _, Wp, _ = _ext_dims(H, W)
    row, col = _grid_coords(H, W)
    valid = _valid_mask(row, col, H, W)
    dx, dy = _sobel_flat(x, row, col, valid, H, W, Wp)
    dxx, dxy = _sobel_flat(dx, row, col, valid, H, W, Wp)
    _, dyy = _sobel_flat(dy, row, col, valid, H, W, Wp)
    hc = jnp.concatenate(
        [dx, dy, dx * dx, dy * dy, dx * dy, dxx, dyy, dxx * dyy, dxy, dxy * dxy],
        axis=0)                                                    # (10, Lg)
    f = hc
    for w_ref, b_ref in zip(w_refs, b_refs):
        f = _conv5x5_flat(f, w_ref[...], b_ref[...], valid, Wp)
    return f                                                       # (NF, Lg)


def _pyrdown_flat(x, down, H, W):
    """custom_pyrdown: 5x5 Gaussian blur (reflect border, VPU shift-adds) +
    bilinear resize (one small MXU matmul) into the next level's flat layout."""
    _, Wp, _ = _ext_dims(H, W)
    row, col = _grid_coords(H, W)
    in_r = (row >= _G) & (row <= H + _G - 1)
    in_c = (col >= _G) & (col <= W + _G - 1)
    # reflect-fill the 2-wide guard ring (separable; matches F.pad 'reflect')
    h = x
    h = h + jnp.where(in_r & (col == 1), _flat_shift(x, 2), 0.0)
    h = h + jnp.where(in_r & (col == 0), _flat_shift(x, 4), 0.0)
    h = h + jnp.where(in_r & (col == W + 2), _flat_shift(x, -2), 0.0)
    h = h + jnp.where(in_r & (col == W + 3), _flat_shift(x, -4), 0.0)
    v = h
    v = v + jnp.where(row == 1, _flat_shift(h, 2 * Wp), 0.0)
    v = v + jnp.where(row == 0, _flat_shift(h, 4 * Wp), 0.0)
    v = v + jnp.where(row == H + 2, _flat_shift(h, -2 * Wp), 0.0)
    v = v + jnp.where(row == H + 3, _flat_shift(h, -4 * Wp), 0.0)
    # 5x5 pyramid Gaussian blur (kernel / 256): scalar-weighted shift-adds
    acc = jnp.zeros_like(x)
    for i in range(5):
        for j in range(5):
            acc = acc + (_PYR_K[i][j] / 256.0) * _flat_shift(v, (i - 2) * Wp + (j - 2))
    acc = jnp.where(in_r & in_c, acc, 0.0)
    # bilinear downsample (align_corners=False) as one (1, Lg_in)x(Lg_in, Lg_out)
    return jnp.dot(acc, down, preferred_element_type=jnp.float32)


# ----------------------------------------------------------------------------
# Pallas kernels (one per pyramid level + score head)
# ----------------------------------------------------------------------------
def _level0_kernel(x_ref, w1, b1, w2, b2, w3, b3, feat_ref, *, H, W):
    feat_ref[0] = _features_flat(x_ref[0], (w1, w2, w3), (b1, b2, b3), H, W)


def _leveli_kernel(x_ref, w1, b1, w2, b2, w3, b3, down_ref, up_ref,
                   feat_ref, xd_ref, *, Hprev, Wprev, H, W):
    # pyrdown of the previous level's image, kept in VMEM
    xd = _pyrdown_flat(x_ref[0], down_ref[...], Hprev, Wprev)      # (1, Lg_cur)
    xd_ref[0] = xd
    f = _features_flat(xd, (w1, w2, w3), (b1, b2, b3), H, W)       # (NF, Lg_cur)
    # bilinear upsample back to full resolution, still in VMEM, lane-dense out
    feat_ref[0] = jnp.dot(f, up_ref[...], preferred_element_type=jnp.float32)


def _last_kernel(*refs, nl, H, W):
    feat_refs = refs[:nl]
    wl_ref, bl_ref, o_ref = refs[nl], refs[nl + 1], refs[nl + 2]
    _, Wp, _ = _ext_dims(H, W)
    row, col = _grid_coords(H, W)
    valid = _valid_mask(row, col, H, W)
    # concat the per-level features in VMEM (never materialized in HBM)
    feats = jnp.concatenate([r[0] for r in feat_refs], axis=0)     # (NF*nl, Lg)
    o_ref[0] = _conv5x5_flat(feats, wl_ref[...], bl_ref[...], valid, Wp)


# ----------------------------------------------------------------------------
# pallas_call wrappers
# ----------------------------------------------------------------------------
def _weight_args(params):
    args, specs = [], []
    for w, bia in zip(params["lb_w"], params["lb_b"]):
        args += [w, bia]
        specs += [pl.BlockSpec(w.shape, lambda i: (0, 0)),
                  pl.BlockSpec(bia.shape, lambda i: (0, 0))]
    return args, specs


def _call_level0(x_ext, params, H, W):
    B = x_ext.shape[0]
    NF = params["num_filters"]
    _, _, Lg = _ext_dims(H, W)
    wargs, wspecs = _weight_args(params)
    kernel = functools.partial(_level0_kernel, H=H, W=W)
    return pl.pallas_call(
        kernel,
        out_shape=jax.ShapeDtypeStruct((B, NF, Lg), jnp.float32),
        grid=(B,),
        in_specs=[pl.BlockSpec((1, 1, Lg), lambda i: (i, 0, 0))] + wspecs,
        out_specs=pl.BlockSpec((1, NF, Lg), lambda i: (i, 0, 0)),
        compiler_params=pltpu.CompilerParams(dimension_semantics=("parallel",)),
    )(x_ext, *wargs)


def _call_level(x_prev_ext, params, Hprev, Wprev, H, W, H0, W0, down, up):
    B = x_prev_ext.shape[0]
    NF = params["num_filters"]
    _, _, Lg_prev = _ext_dims(Hprev, Wprev)
    _, _, Lg_cur = _ext_dims(H, W)
    _, _, Lg0 = _ext_dims(H0, W0)
    wargs, wspecs = _weight_args(params)
    kernel = functools.partial(_leveli_kernel, Hprev=Hprev, Wprev=Wprev, H=H, W=W)
    return pl.pallas_call(
        kernel,
        out_shape=(jax.ShapeDtypeStruct((B, NF, Lg0), jnp.float32),
                   jax.ShapeDtypeStruct((B, 1, Lg_cur), jnp.float32)),
        grid=(B,),
        in_specs=([pl.BlockSpec((1, 1, Lg_prev), lambda i: (i, 0, 0))] + wspecs +
                  [pl.BlockSpec(down.shape, lambda i: (0, 0)),
                   pl.BlockSpec(up.shape, lambda i: (0, 0))]),
        out_specs=(pl.BlockSpec((1, NF, Lg0), lambda i: (i, 0, 0)),
                   pl.BlockSpec((1, 1, Lg_cur), lambda i: (i, 0, 0))),
        compiler_params=pltpu.CompilerParams(dimension_semantics=("parallel",)),
    )(x_prev_ext, *wargs, down, up)


def _call_last(feats_list, params, H, W):
    B = feats_list[0].shape[0]
    NF = params["num_filters"]
    nl = len(feats_list)
    _, _, Lg = _ext_dims(H, W)
    kernel = functools.partial(_last_kernel, nl=nl, H=H, W=W)
    in_specs = ([pl.BlockSpec((1, NF, Lg), lambda i: (i, 0, 0)) for _ in range(nl)] +
                [pl.BlockSpec(params["last_w"].shape, lambda i: (0, 0)),
                 pl.BlockSpec(params["last_b"].shape, lambda i: (0, 0))])
    return pl.pallas_call(
        kernel,
        out_shape=jax.ShapeDtypeStruct((B, 1, Lg), jnp.float32),
        grid=(B,),
        in_specs=in_specs,
        out_specs=pl.BlockSpec((1, 1, Lg), lambda i: (i, 0, 0)),
        compiler_params=pltpu.CompilerParams(dimension_semantics=("parallel",)),
    )(*feats_list, params["last_w"], params["last_b"])


# ----------------------------------------------------------------------------
# Host-side glue (tiny: layout embedding + bilinear resize operators)
# ----------------------------------------------------------------------------
def _interp_matrix(out_size, in_size):
    # matches torch F.interpolate(mode='bilinear', align_corners=False), no AA
    i = jnp.arange(out_size, dtype=jnp.float32)
    src = (i + 0.5) * (float(in_size) / float(out_size)) - 0.5
    src = jnp.maximum(src, 0.0)
    i0 = jnp.minimum(jnp.floor(src).astype(jnp.int32), in_size - 1)
    i1 = jnp.minimum(i0 + 1, in_size - 1)
    t = src - i0.astype(jnp.float32)
    rows = jnp.arange(out_size)
    m = jnp.zeros((out_size, in_size), jnp.float32)
    m = m.at[rows, i0].add(1.0 - t)
    m = m.at[rows, i1].add(t)
    return m


def _ext_flat_index(H, W):
    _, Wp, _ = _ext_dims(H, W)
    return ((jnp.arange(H)[:, None] + _G) * Wp +
            (jnp.arange(W)[None, :] + _G)).reshape(-1)


def _resize_matrix_ext(Hin, Win, Hout, Wout):
    # Dense (Lg_in, Lg_out) bilinear-resize operator between extended layouts.
    # TODO(synk): for large images replace this dense kron operator with
    # separable row/col interpolation matmuls and tile the flat pixel dim
    # (and re-derive the VMEM budget, esp. for v7x's 64 MiB).
    my = _interp_matrix(Hout, Hin)
    mx = _interp_matrix(Wout, Win)
    k = jnp.kron(my, mx)                               # (Hout*Wout, Hin*Win)
    src = _ext_flat_index(Hin, Win)
    dst = _ext_flat_index(Hout, Wout)
    _, _, Lg_in = _ext_dims(Hin, Win)
    _, _, Lg_out = _ext_dims(Hout, Wout)
    m = jnp.zeros((Lg_in, Lg_out), jnp.float32)
    return m.at[src[:, None], dst[None, :]].set(k.T)


def keynet_forward(x, params):
    """KeyNet forward pass: multi-scale handcrafted+learned features + head."""
    B, C, H, W = x.shape
    assert C == 1, "KeyNet expects a grayscale image"
    num_levels = params["num_levels"]
    Hp0, Wp0, Lg0 = _ext_dims(H, W)
    # embed the image into the zero-guarded extended flat layout (host, tiny)
    x_ext = jnp.pad(x, ((0, 0), (0, 0), (_G, _G), (_G, _G))).reshape(B, 1, Lg0)

    sizes = [(H, W)]
    for _ in range(1, num_levels):
        ph, pw = sizes[-1]
        sizes.append((int(ph // 1.2), int(pw // 1.2)))

    feats, cur = [], x_ext
    for lvl in range(num_levels):
        Hl, Wl = sizes[lvl]
        if lvl == 0:
            feats.append(_call_level0(cur, params, H, W))
        else:
            Hprev, Wprev = sizes[lvl - 1]
            down = _resize_matrix_ext(Hprev, Wprev, Hl, Wl)
            up = _resize_matrix_ext(Hl, Wl, H, W)
            f, cur = _call_level(cur, params, Hprev, Wprev, Hl, Wl, H, W, down, up)
            feats.append(f)

    scores_ext = _call_last(feats, params, H, W)                   # (B, 1, Lg0)
    scores = scores_ext.reshape(B, 1, Hp0, Wp0)[:, :, _G:_G + H, _G:_G + W]
    return scores


# ----------------------------------------------------------------------------
# Deterministic parameter initialization (synthetic; eval-mode BN folded)
# ----------------------------------------------------------------------------
def init_params(key, num_filters=8, num_levels=3, kernel_size=5):
    assert kernel_size == 5, "this implementation supports the default 5x5 head"
    eps = 1e-5
    keys = jax.random.split(key, 12)

    def conv_init(k, cout, cin, ks, scale=0.1):
        kw_, kb_ = jax.random.split(k)
        w = scale * jax.random.normal(kw_, (cout, cin, ks, ks), jnp.float32)
        b = scale * jax.random.normal(kb_, (cout,), jnp.float32)
        return w, b

    def flatten_w(w):  # (Cout, Cin, k, k) -> (Cout, k*k*Cin), taps outer
        co, ci, kh, kw_ = w.shape
        return jnp.transpose(w, (0, 2, 3, 1)).reshape(co, kh * kw_ * ci)

    lb_w, lb_b = [], []
    cins = [10, num_filters, num_filters]
    for li, cin in enumerate(cins):
        w, b = conv_init(keys[li], num_filters, cin, 5)
        # deterministic eval-mode BatchNorm params, folded into the conv
        kg, kb2, km, kv = jax.random.split(keys[li + 4], 4)
        gamma = 1.0 + 0.1 * jax.random.normal(kg, (num_filters,), jnp.float32)
        beta = 0.1 * jax.random.normal(kb2, (num_filters,), jnp.float32)
        mean = 0.1 * jax.random.normal(km, (num_filters,), jnp.float32)
        var = 1.0 + 0.1 * jax.random.uniform(kv, (num_filters,), jnp.float32)
        scale = gamma / jnp.sqrt(var + eps)
        wf = w * scale[:, None, None, None]
        bf = (b - mean) * scale + beta
        lb_w.append(flatten_w(wf).astype(jnp.bfloat16))     # bf16 MXU operand
        lb_b.append(bf.reshape(num_filters, 1))              # f32 epilogue

    last_w, last_b = conv_init(keys[10], 1, num_filters * num_levels, kernel_size)
    return {
        "lb_w": lb_w, "lb_b": lb_b,
        "last_w": flatten_w(last_w).astype(jnp.bfloat16),
        "last_b": last_b.reshape(1, 1),
        "num_filters": num_filters,
        "num_levels": num_levels,
        "kernel_size": kernel_size,
    }


if __name__ == "__main__":
    key = jax.random.PRNGKey(0)
    kx, kp = jax.random.split(key)
    # KeyNet expects a grayscale image: (B, 1, H, W), NCHW like PyTorch.
    x = jax.random.uniform(kx, (2, 1, 16, 16), jnp.float32)
    params = init_params(kp, num_filters=8, num_levels=3, kernel_size=5)

    scores = keynet_forward(x, params)
    scores = jax.block_until_ready(scores)
    assert scores.shape == (2, 1, 16, 16)
    assert bool(jnp.all(scores >= 0.0))          # final ReLU
    print("KERNEL_OK")
</pallas_src>

<mosaic_0001>
module attributes {stable_mosaic.version = 11 : i64} {
  func.func @_level0_kernel(%arg0: i32, %arg1: memref<1x1x400xf32, #tpu.memory_space<vmem>>, %arg2: memref<8x250xbf16, #tpu.memory_space<vmem>>, %arg3: memref<8x1xf32, #tpu.memory_space<vmem>>, %arg4: memref<8x200xbf16, #tpu.memory_space<vmem>>, %arg5: memref<8x1xf32, #tpu.memory_space<vmem>>, %arg6: memref<8x200xbf16, #tpu.memory_space<vmem>>, %arg7: memref<8x1xf32, #tpu.memory_space<vmem>>, %arg8: memref<1x8x400xf32, #tpu.memory_space<vmem>>) attributes {dimension_semantics = [#tpu.dimension_semantics<parallel>], iteration_bounds = array<i64: 2>, scalar_prefetch = 0 : i64, scratch_operands = 0 : i64, tpu.core_type = #tpu.core_type<tc>, window_params = [{transform_indices = @transform_0, window_bounds = array<i64: 1, 1, 400>}, {pipeline_mode = #tpu.pipeline_mode<synchronous>, transform_indices = @transform_1, window_bounds = array<i64: 8, 250>}, {pipeline_mode = #tpu.pipeline_mode<synchronous>, transform_indices = @transform_2, window_bounds = array<i64: 8, 1>}, {pipeline_mode = #tpu.pipeline_mode<synchronous>, transform_indices = @transform_3, window_bounds = array<i64: 8, 200>}, {pipeline_mode = #tpu.pipeline_mode<synchronous>, transform_indices = @transform_4, window_bounds = array<i64: 8, 1>}, {pipeline_mode = #tpu.pipeline_mode<synchronous>, transform_indices = @transform_5, window_bounds = array<i64: 8, 200>}, {pipeline_mode = #tpu.pipeline_mode<synchronous>, transform_indices = @transform_6, window_bounds = array<i64: 8, 1>}, {transform_indices = @transform_7, window_bounds = array<i64: 1, 8, 400>}]} {
    %c0 = arith.constant 0 : index
    %c0_0 = arith.constant 0 : index
    %c0_1 = arith.constant 0 : index
    %0 = vector.load %arg1[%c0, %c0_0, %c0_1] : memref<1x1x400xf32, #tpu.memory_space<vmem>>, vector<1x1x400xf32>
    %1 = vector.shape_cast %0 : vector<1x1x400xf32> to vector<1x400xf32>
    %2 = tpu.iota {dimensions = array<i32: 1>} : vector<1x400xi32>
    %3 = arith.sitofp %2 : vector<1x400xi32> to vector<1x400xf32>
    %cst = arith.constant 2.000000e+01 : f32
    %4 = vector.broadcast %cst : f32 to vector<1x400xf32>
    %5 = arith.divf %3, %4 : vector<1x400xf32>
    %6 = math.floor %5 : vector<1x400xf32>
    %cst_2 = arith.constant 2.000000e+01 : f32
    %7 = vector.broadcast %cst_2 : f32 to vector<1x400xf32>
    %8 = arith.mulf %6, %7 : vector<1x400xf32>
    %9 = arith.subf %3, %8 : vector<1x400xf32>
    %cst_3 = arith.constant 2.000000e+00 : f32
    %10 = vector.broadcast %cst_3 : f32 to vector<1x400xf32>
    %11 = arith.cmpf oge, %6, %10 : vector<1x400xf32>
    %cst_4 = arith.constant 1.700000e+01 : f32
    %12 = vector.broadcast %cst_4 : f32 to vector<1x400xf32>
    %13 = arith.cmpf ole, %6, %12 : vector<1x400xf32>
    %14 = arith.andi %11, %13 : vector<1x400xi1>
    %cst_5 = arith.constant 2.000000e+00 : f32
    %15 = vector.broadcast %cst_5 : f32 to vector<1x400xf32>
    %16 = arith.cmpf oge, %9, %15 : vector<1x400xf32>
    %17 = arith.andi %14, %16 : vector<1x400xi1>
    %cst_6 = arith.constant 1.700000e+01 : f32
    %18 = vector.broadcast %cst_6 : f32 to vector<1x400xf32>
    %19 = arith.cmpf ole, %9, %18 : vector<1x400xf32>
    %20 = arith.andi %17, %19 : vector<1x400xi1>
    %cst_7 = arith.constant 2.000000e+00 : f32
    %21 = vector.broadcast %cst_7 : f32 to vector<1x400xf32>
    %22 = arith.cmpf oge, %6, %21 : vector<1x400xf32>
    %cst_8 = arith.constant 1.700000e+01 : f32
    %23 = vector.broadcast %cst_8 : f32 to vector<1x400xf32>
    %24 = arith.cmpf ole, %6, %23 : vector<1x400xf32>
    %25 = arith.andi %22, %24 : vector<1x400xi1>
    %cst_9 = arith.constant 2.000000e+00 : f32
    %26 = vector.broadcast %cst_9 : f32 to vector<1x400xf32>
    %27 = arith.cmpf oge, %9, %26 : vector<1x400xf32>
    %cst_10 = arith.constant 1.700000e+01 : f32
    %28 = vector.broadcast %cst_10 : f32 to vector<1x400xf32>
    %29 = arith.cmpf ole, %9, %28 : vector<1x400xf32>
    %30 = arith.andi %27, %29 : vector<1x400xi1>
    %cst_11 = arith.constant 1.000000e+00 : f32
    %31 = vector.broadcast %cst_11 : f32 to vector<1x400xf32>
    %32 = arith.cmpf oeq, %6, %31 : vector<1x400xf32>
    %cst_12 = arith.constant 1.800000e+01 : f32
    %33 = vector.broadcast %cst_12 : f32 to vector<1x400xf32>
    %34 = arith.cmpf oeq, %6, %33 : vector<1x400xf32>
    %cst_13 = arith.constant 1.000000e+00 : f32
    %35 = vector.broadcast %cst_13 : f32 to vector<1x400xf32>
    %36 = arith.cmpf oeq, %9, %35 : vector<1x400xf32>
    %cst_14 = arith.constant 1.800000e+01 : f32
    %37 = vector.broadcast %cst_14 : f32 to vector<1x400xf32>
    %38 = arith.cmpf oeq, %9, %37 : vector<1x400xf32>
    %39 = arith.andi %36, %25 : vector<1x400xi1>
    %40 = vector.extract_strided_slice %1 {offsets = [0, 1], sizes = [1, 399], strides = [1, 1]} : vector<1x400xf32> to vector<1x399xf32>
    %cst_15 = arith.constant 0.000000e+00 : f32
    %41 = vector.broadcast %cst_15 : f32 to vector<1x1xf32>
    %42 = tpu.concatenate %40, %41 in 1 : vector<1x399xf32>, vector<1x1xf32> -> vector<1x400xf32>
    %cst_16 = arith.constant 0.000000e+00 : f32
    %43 = vector.broadcast %cst_16 : f32 to vector<1x400xf32>
    %44 = arith.select %39, %42, %43 : vector<1x400xi1>, vector<1x400xf32>
    %45 = arith.addf %1, %44 : vector<1x400xf32>
    %46 = arith.andi %38, %25 : vector<1x400xi1>
    %cst_17 = arith.constant 0.000000e+00 : f32
    %47 = vector.broadcast %cst_17 : f32 to vector<1x1xf32>
    %48 = vector.extract_strided_slice %1 {offsets = [0, 0], sizes = [1, 399], strides = [1, 1]} : vector<1x400xf32> to vector<1x399xf32>
    %49 = tpu.concatenate %47, %48 in 1 : vector<1x1xf32>, vector<1x399xf32> -> vector<1x400xf32>
    %cst_18 = arith.constant 0.000000e+00 : f32
    %50 = vector.broadcast %cst_18 : f32 to vector<1x400xf32>
    %51 = arith.select %46, %49, %50 : vector<1x400xi1>, vector<1x400xf32>
    %52 = arith.addf %45, %51 : vector<1x400xf32>
    %53 = arith.andi %32, %30 : vector<1x400xi1>
    %54 = vector.extract_strided_slice %1 {offsets = [0, 20], sizes = [1, 380], strides = [1, 1]} : vector<1x400xf32> to vector<1x380xf32>
    %cst_19 = arith.constant 0.000000e+00 : f32
    %55 = vector.broadcast %cst_19 : f32 to vector<1x20xf32>
    %56 = tpu.concatenate %54, %55 in 1 : vector<1x380xf32>, vector<1x20xf32> -> vector<1x400xf32>
    %cst_20 = arith.constant 0.000000e+00 : f32
    %57 = vector.broadcast %cst_20 : f32 to vector<1x400xf32>
    %58 = arith.select %53, %56, %57 : vector<1x400xi1>, vector<1x400xf32>
    %59 = arith.addf %52, %58 : vector<1x400xf32>
    %60 = arith.andi %34, %30 : vector<1x400xi1>
    %cst_21 = arith.constant 0.000000e+00 : f32
    %61 = vector.broadcast %cst_21 : f32 to vector<1x20xf32>
    %62 = vector.extract_strided_slice %1 {offsets = [0, 0], sizes = [1, 380], strides = [1, 1]} : vector<1x400xf32> to vector<1x380xf32>
    %63 = tpu.concatenate %61, %62 in 1 : vector<1x20xf32>, vector<1x380xf32> -> vector<1x400xf32>
    %cst_22 = arith.constant 0.000000e+00 : f32
    %64 = vector.broadcast %cst_22 : f32 to vector<1x400xf32>
    %65 = arith.select %60, %63, %64 : vector<1x400xi1>, vector<1x400xf32>
    %66 = arith.addf %59, %65 : vector<1x400xf32>
    %67 = arith.andi %32, %36 : vector<1x400xi1>
    %68 = vector.extract_strided_slice %1 {offsets = [0, 21], sizes = [1, 379], strides = [1, 1]} : vector<1x400xf32> to vector<1x379xf32>
    %cst_23 = arith.constant 0.000000e+00 : f32
    %69 = vector.broadcast %cst_23 : f32 to vector<1x21xf32>
    %70 = tpu.concatenate %68, %69 in 1 : vector<1x379xf32>, vector<1x21xf32> -> vector<1x400xf32>
    %cst_24 = arith.constant 0.000000e+00 : f32
    %71 = vector.broadcast %cst_24 : f32 to vector<1x400xf32>
    %72 = arith.select %67, %70, %71 : vector<1x400xi1>, vector<1x400xf32>
    %73 = arith.addf %66, %72 : vector<1x400xf32>
    %74 = arith.andi %32, %38 : vector<1x400xi1>
    %75 = vector.extract_strided_slice %1 {offsets = [0, 19], sizes = [1, 381], strides = [1, 1]} : vector<1x400xf32> to vector<1x381xf32>
    %cst_25 = arith.constant 0.000000e+00 : f32
    %76 = vector.broadcast %cst_25 : f32 to vector<1x19xf32>
    %77 = tpu.concatenate %75, %76 in 1 : vector<1x381xf32>, vector<1x19xf32> -> vector<1x400xf32>
    %cst_26 = arith.constant 0.000000e+00 : f32
    %78 = vector.broadcast %cst_26 : f32 to vector<1x400xf32>
    %79 = arith.select %74, %77, %78 : vector<1x400xi1>, vector<1x400xf32>
    %80 = arith.addf %73, %79 : vector<1x400xf32>
    %81 = arith.andi %34, %36 : vector<1x400xi1>
    %cst_27 = arith.constant 0.000000e+00 : f32
    %82 = vector.broadcast %cst_27 : f32 to vector<1x19xf32>
    %83 = vector.extract_strided_slice %1 {offsets = [0, 0], sizes = [1, 381], strides = [1, 1]} : vector<1x400xf32> to vector<1x381xf32>
    %84 = tpu.concatenate %82, %83 in 1 : vector<1x19xf32>, vector<1x381xf32> -> vector<1x400xf32>
    %cst_28 = arith.constant 0.000000e+00 : f32
    %85 = vector.broadcast %cst_28 : f32 to vector<1x400xf32>
    %86 = arith.select %81, %84, %85 : vector<1x400xi1>, vector<1x400xf32>
    %87 = arith.addf %80, %86 : vector<1x400xf32>
    %88 = arith.andi %34, %38 : vector<1x400xi1>
    %cst_29 = arith.constant 0.000000e+00 : f32
    %89 = vector.broadcast %cst_29 : f32 to vector<1x21xf32>
    %90 = vector.extract_strided_slice %1 {offsets = [0, 0], sizes = [1, 379], strides = [1, 1]} : vector<1x400xf32> to vector<1x379xf32>
    %91 = tpu.concatenate %89, %90 in 1 : vector<1x21xf32>, vector<1x379xf32> -> vector<1x400xf32>
    %cst_30 = arith.constant 0.000000e+00 : f32
    %92 = vector.broadcast %cst_30 : f32 to vector<1x400xf32>
    %93 = arith.select %88, %91, %92 : vector<1x400xi1>, vector<1x400xf32>
    %94 = arith.addf %87, %93 : vector<1x400xf32>
    %cst_31 = arith.constant 0.000000e+00 : f32
    %95 = vector.broadcast %cst_31 : f32 to vector<1x21xf32>
    %96 = vector.extract_strided_slice %94 {offsets = [0, 0], sizes = [1, 379], strides = [1, 1]} : vector<1x400xf32> to vector<1x379xf32>
    %97 = tpu.concatenate %95, %96 in 1 : vector<1x21xf32>, vector<1x379xf32> -> vector<1x400xf32>
    %cst_32 = arith.constant 0.000000e+00 : f32
    %98 = vector.broadcast %cst_32 : f32 to vector<1x20xf32>
    %99 = vector.extract_strided_slice %94 {offsets = [0, 0], sizes = [1, 380], strides = [1, 1]} : vector<1x400xf32> to vector<1x380xf32>
    %100 = tpu.concatenate %98, %99 in 1 : vector<1x20xf32>, vector<1x380xf32> -> vector<1x400xf32>
    %cst_33 = arith.constant 0.000000e+00 : f32
    %101 = vector.broadcast %cst_33 : f32 to vector<1x19xf32>
    %102 = vector.extract_strided_slice %94 {offsets = [0, 0], sizes = [1, 381], strides = [1, 1]} : vector<1x400xf32> to vector<1x381xf32>
    %103 = tpu.concatenate %101, %102 in 1 : vector<1x19xf32>, vector<1x381xf32> -> vector<1x400xf32>
    %cst_34 = arith.constant 0.000000e+00 : f32
    %104 = vector.broadcast %cst_34 : f32 to vector<1x1xf32>
    %105 = vector.extract_strided_slice %94 {offsets = [0, 0], sizes = [1, 399], strides = [1, 1]} : vector<1x400xf32> to vector<1x399xf32>
    %106 = tpu.concatenate %104, %105 in 1 : vector<1x1xf32>, vector<1x399xf32> -> vector<1x400xf32>
    %107 = vector.extract_strided_slice %94 {offsets = [0, 1], sizes = [1, 399], strides = [1, 1]} : vector<1x400xf32> to vector<1x399xf32>
    %cst_35 = arith.constant 0.000000e+00 : f32
    %108 = vector.broadcast %cst_35 : f32 to vector<1x1xf32>
    %109 = tpu.concatenate %107, %108 in 1 : vector<1x399xf32>, vector<1x1xf32> -> vector<1x400xf32>
    %110 = vector.extract_strided_slice %94 {offsets = [0, 19], sizes = [1, 381], strides = [1, 1]} : vector<1x400xf32> to vector<1x381xf32>
    %cst_36 = arith.constant 0.000000e+00 : f32
    %111 = vector.broadcast %cst_36 : f32 to vector<1x19xf32>
    %112 = tpu.concatenate %110, %111 in 1 : vector<1x381xf32>, vector<1x19xf32> -> vector<1x400xf32>
    %113 = vector.extract_strided_slice %94 {offsets = [0, 20], sizes = [1, 380], strides = [1, 1]} : vector<1x400xf32> to vector<1x380xf32>
    %cst_37 = arith.constant 0.000000e+00 : f32
    %114 = vector.broadcast %cst_37 : f32 to vector<1x20xf32>
    %115 = tpu.concatenate %113, %114 in 1 : vector<1x380xf32>, vector<1x20xf32> -> vector<1x400xf32>
    %116 = vector.extract_strided_slice %94 {offsets = [0, 21], sizes = [1, 379], strides = [1, 1]} : vector<1x400xf32> to vector<1x379xf32>
    %cst_38 = arith.constant 0.000000e+00 : f32
    %117 = vector.broadcast %cst_38 : f32 to vector<1x21xf32>
    %118 = tpu.concatenate %116, %117 in 1 : vector<1x379xf32>, vector<1x21xf32> -> vector<1x400xf32>
    %119 = arith.subf %103, %97 : vector<1x400xf32>
    %120 = arith.subf %109, %106 : vector<1x400xf32>
    %cst_39 = arith.constant 2.000000e+00 : f32
    %121 = vector.broadcast %cst_39 : f32 to vector<1x400xf32>
    %122 = arith.mulf %121, %120 : vector<1x400xf32>
    %123 = arith.addf %119, %122 : vector<1x400xf32>
    %124 = arith.subf %118, %112 : vector<1x400xf32>
    %125 = arith.addf %123, %124 : vector<1x400xf32>
    %cst_40 = arith.constant 1.250000e-01 : f32
    %126 = vector.broadcast %cst_40 : f32 to vector<1x400xf32>
    %127 = arith.mulf %125, %126 : vector<1x400xf32>
    %128 = arith.subf %112, %97 : vector<1x400xf32>
    %129 = arith.subf %115, %100 : vector<1x400xf32>
    %cst_41 = arith.constant 2.000000e+00 : f32
    %130 = vector.broadcast %cst_41 : f32 to vector<1x400xf32>
    %131 = arith.mulf %130, %129 : vector<1x400xf32>
    %132 = arith.addf %128, %131 : vector<1x400xf32>
    %133 = arith.subf %118, %103 : vector<1x400xf32>
    %134 = arith.addf %132, %133 : vector<1x400xf32>
    %cst_42 = arith.constant 1.250000e-01 : f32
    %135 = vector.broadcast %cst_42 : f32 to vector<1x400xf32>
    %136 = arith.mulf %134, %135 : vector<1x400xf32>
    %cst_43 = arith.constant 0.000000e+00 : f32
    %137 = vector.broadcast %cst_43 : f32 to vector<1x400xf32>
    %138 = arith.select %20, %127, %137 : vector<1x400xi1>, vector<1x400xf32>
    %cst_44 = arith.constant 0.000000e+00 : f32
    %139 = vector.broadcast %cst_44 : f32 to vector<1x400xf32>
    %140 = arith.select %20, %136, %139 : vector<1x400xi1>, vector<1x400xf32>
    %cst_45 = arith.constant 2.000000e+00 : f32
    %141 = vector.broadcast %cst_45 : f32 to vector<1x400xf32>
    %142 = arith.cmpf oge, %6, %141 : vector<1x400xf32>
    %cst_46 = arith.constant 1.700000e+01 : f32
    %143 = vector.broadcast %cst_46 : f32 to vector<1x400xf32>
    %144 = arith.cmpf ole, %6, %143 : vector<1x400xf32>
    %145 = arith.andi %142, %144 : vector<1x400xi1>
    %cst_47 = arith.constant 2.000000e+00 : f32
    %146 = vector.broadcast %cst_47 : f32 to vector<1x400xf32>
    %147 = arith.cmpf oge, %9, %146 : vector<1x400xf32>
    %cst_48 = arith.constant 1.700000e+01 : f32
    %148 = vector.broadcast %cst_48 : f32 to vector<1x400xf32>
    %149 = arith.cmpf ole, %9, %148 : vector<1x400xf32>
    %150 = arith.andi %147, %149 : vector<1x400xi1>
    %cst_49 = arith.constant 1.000000e+00 : f32
    %151 = vector.broadcast %cst_49 : f32 to vector<1x400xf32>
    %152 = arith.cmpf oeq, %6, %151 : vector<1x400xf32>
    %cst_50 = arith.constant 1.800000e+01 : f32
    %153 = vector.broadcast %cst_50 : f32 to vector<1x400xf32>
    %154 = arith.cmpf oeq, %6, %153 : vector<1x400xf32>
    %cst_51 = arith.constant 1.000000e+00 : f32
    %155 = vector.broadcast %cst_51 : f32 to vector<1x400xf32>
    %156 = arith.cmpf oeq, %9, %155 : vector<1x400xf32>
    %cst_52 = arith.constant 1.800000e+01 : f32
    %157 = vector.broadcast %cst_52 : f32 to vector<1x400xf32>
    %158 = arith.cmpf oeq, %9, %157 : vector<1x400xf32>
    %159 = arith.andi %156, %145 : vector<1x400xi1>
    %160 = vector.extract_strided_slice %138 {offsets = [0, 1], sizes = [1, 399], strides = [1, 1]} : vector<1x400xf32> to vector<1x399xf32>
    %cst_53 = arith.constant 0.000000e+00 : f32
    %161 = vector.broadcast %cst_53 : f32 to vector<1x1xf32>
    %162 = tpu.concatenate %160, %161 in 1 : vector<1x399xf32>, vector<1x1xf32> -> vector<1x400xf32>
    %cst_54 = arith.constant 0.000000e+00 : f32
    %163 = vector.broadcast %cst_54 : f32 to vector<1x400xf32>
    %164 = arith.select %159, %162, %163 : vector<1x400xi1>, vector<1x400xf32>
    %165 = arith.addf %138, %164 : vector<1x400xf32>
    %166 = arith.andi %158, %145 : vector<1x400xi1>
    %cst_55 = arith.constant 0.000000e+00 : f32
    %167 = vector.broadcast %cst_55 : f32 to vector<1x1xf32>
    %168 = vector.extract_strided_slice %138 {offsets = [0, 0], sizes = [1, 399], strides = [1, 1]} : vector<1x400xf32> to vector<1x399xf32>
    %169 = tpu.concatenate %167, %168 in 1 : vector<1x1xf32>, vector<1x399xf32> -> vector<1x400xf32>
    %cst_56 = arith.constant 0.000000e+00 : f32
    %170 = vector.broadcast %cst_56 : f32 to vector<1x400xf32>
    %171 = arith.select %166, %169, %170 : vector<1x400xi1>, vector<1x400xf32>
    %172 = arith.addf %165, %171 : vector<1x400xf32>
    %173 = arith.andi %152, %150 : vector<1x400xi1>
    %174 = vector.extract_strided_slice %138 {offsets = [0, 20], sizes = [1, 380], strides = [1, 1]} : vector<1x400xf32> to vector<1x380xf32>
    %cst_57 = arith.constant 0.000000e+00 : f32
    %175 = vector.broadcast %cst_57 : f32 to vector<1x20xf32>
    %176 = tpu.concatenate %174, %175 in 1 : vector<1x380xf32>, vector<1x20xf32> -> vector<1x400xf32>
    %cst_58 = arith.constant 0.000000e+00 : f32
    %177 = vector.broadcast %cst_58 : f32 to vector<1x400xf32>
    %178 = arith.select %173, %176, %177 : vector<1x400xi1>, vector<1x400xf32>
    %179 = arith.addf %172, %178 : vector<1x400xf32>
    %180 = arith.andi %154, %150 : vector<1x400xi1>
    %cst_59 = arith.constant 0.000000e+00 : f32
    %181 = vector.broadcast %cst_59 : f32 to vector<1x20xf32>
    %182 = vector.extract_strided_slice %138 {offsets = [0, 0], sizes = [1, 380], strides = [1, 1]} : vector<1x400xf32> to vector<1x380xf32>
    %183 = tpu.concatenate %181, %182 in 1 : vector<1x20xf32>, vector<1x380xf32> -> vector<1x400xf32>
    %cst_60 = arith.constant 0.000000e+00 : f32
    %184 = vector.broadcast %cst_60 : f32 to vector<1x400xf32>
    %185 = arith.select %180, %183, %184 : vector<1x400xi1>, vector<1x400xf32>
    %186 = arith.addf %179, %185 : vector<1x400xf32>
    %187 = arith.andi %152, %156 : vector<1x400xi1>
    %188 = vector.extract_strided_slice %138 {offsets = [0, 21], sizes = [1, 379], strides = [1, 1]} : vector<1x400xf32> to vector<1x379xf32>
    %cst_61 = arith.constant 0.000000e+00 : f32
    %189 = vector.broadcast %cst_61 : f32 to vector<1x21xf32>
    %190 = tpu.concatenate %188, %189 in 1 : vector<1x379xf32>, vector<1x21xf32> -> vector<1x400xf32>
    %cst_62 = arith.constant 0.000000e+00 : f32
    %191 = vector.broadcast %cst_62 : f32 to vector<1x400xf32>
    %192 = arith.select %187, %190, %191 : vector<1x400xi1>, vector<1x400xf32>
    %193 = arith.addf %186, %192 : vector<1x400xf32>
    %194 = arith.andi %152, %158 : vector<1x400xi1>
    %195 = vector.extract_strided_slice %138 {offsets = [0, 19], sizes = [1, 381], strides = [1, 1]} : vector<1x400xf32> to vector<1x381xf32>
    %cst_63 = arith.constant 0.000000e+00 : f32
    %196 = vector.broadcast %cst_63 : f32 to vector<1x19xf32>
    %197 = tpu.concatenate %195, %196 in 1 : vector<1x381xf32>, vector<1x19xf32> -> vector<1x400xf32>
    %cst_64 = arith.constant 0.000000e+00 : f32
    %198 = vector.broadcast %cst_64 : f32 to vector<1x400xf32>
    %199 = arith.select %194, %197, %198 : vector<1x400xi1>, vector<1x400xf32>
    %200 = arith.addf %193, %199 : vector<1x400xf32>
    %201 = arith.andi %154, %156 : vector<1x400xi1>
    %cst_65 = arith.constant 0.000000e+00 : f32
    %202 = vector.broadcast %cst_65 : f32 to vector<1x19xf32>
    %203 = vector.extract_strided_slice %138 {offsets = [0, 0], sizes = [1, 381], strides = [1, 1]} : vector<1x400xf32> to vector<1x381xf32>
    %204 = tpu.concatenate %202, %203 in 1 : vector<1x19xf32>, vector<1x381xf32> -> vector<1x400xf32>
    %cst_66 = arith.constant 0.000000e+00 : f32
    %205 = vector.broadcast %cst_66 : f32 to vector<1x400xf32>
    %206 = arith.select %201, %204, %205 : vector<1x400xi1>, vector<1x400xf32>
    %207 = arith.addf %200, %206 : vector<1x400xf32>
    %208 = arith.andi %154, %158 : vector<1x400xi1>
    %cst_67 = arith.constant 0.000000e+00 : f32
    %209 = vector.broadcast %cst_67 : f32 to vector<1x21xf32>
    %210 = vector.extract_strided_slice %138 {offsets = [0, 0], sizes = [1, 379], strides = [1, 1]} : vector<1x400xf32> to vector<1x379xf32>
    %211 = tpu.concatenate %209, %210 in 1 : vector<1x21xf32>, vector<1x379xf32> -> vector<1x400xf32>
    %cst_68 = arith.constant 0.000000e+00 : f32
    %212 = vector.broadcast %cst_68 : f32 to vector<1x400xf32>
    %213 = arith.select %208, %211, %212 : vector<1x400xi1>, vector<1x400xf32>
    %214 = arith.addf %207, %213 : vector<1x400xf32>
    %cst_69 = arith.constant 0.000000e+00 : f32
    %215 = vector.broadcast %cst_69 : f32 to vector<1x21xf32>
    %216 = vector.extract_strided_slice %214 {offsets = [0, 0], sizes = [1, 379], strides = [1, 1]} : vector<1x400xf32> to vector<1x379xf32>
    %217 = tpu.concatenate %215, %216 in 1 : vector<1x21xf32>, vector<1x379xf32> -> vector<1x400xf32>
    %cst_70 = arith.constant 0.000000e+00 : f32
    %218 = vector.broadcast %cst_70 : f32 to vector<1x20xf32>
    %219 = vector.extract_strided_slice %214 {offsets = [0, 0], sizes = [1, 380], strides = [1, 1]} : vector<1x400xf32> to vector<1x380xf32>
    %220 = tpu.concatenate %218, %219 in 1 : vector<1x20xf32>, vector<1x380xf32> -> vector<1x400xf32>
    %cst_71 = arith.constant 0.000000e+00 : f32
    %221 = vector.broadcast %cst_71 : f32 to vector<1x19xf32>
    %222 = vector.extract_strided_slice %214 {offsets = [0, 0], sizes = [1, 381], strides = [1, 1]} : vector<1x400xf32> to vector<1x381xf32>
    %223 = tpu.concatenate %221, %222 in 1 : vector<1x19xf32>, vector<1x381xf32> -> vector<1x400xf32>
    %cst_72 = arith.constant 0.000000e+00 : f32
    %224 = vector.broadcast %cst_72 : f32 to vector<1x1xf32>
    %225 = vector.extract_strided_slice %214 {offsets = [0, 0], sizes = [1, 399], strides = [1, 1]} : vector<1x400xf32> to vector<1x399xf32>
    %226 = tpu.concatenate %224, %225 in 1 : vector<1x1xf32>, vector<1x399xf32> -> vector<1x400xf32>
    %227 = vector.extract_strided_slice %214 {offsets = [0, 1], sizes = [1, 399], strides = [1, 1]} : vector<1x400xf32> to vector<1x399xf32>
    %cst_73 = arith.constant 0.000000e+00 : f32
    %228 = vector.broadcast %cst_73 : f32 to vector<1x1xf32>
    %229 = tpu.concatenate %227, %228 in 1 : vector<1x399xf32>, vector<1x1xf32> -> vector<1x400xf32>
    %230 = vector.extract_strided_slice %214 {offsets = [0, 19], sizes = [1, 381], strides = [1, 1]} : vector<1x400xf32> to vector<1x381xf32>
    %cst_74 = arith.constant 0.000000e+00 : f32
    %231 = vector.broadcast %cst_74 : f32 to vector<1x19xf32>
    %232 = tpu.concatenate %230, %231 in 1 : vector<1x381xf32>, vector<1x19xf32> -> vector<1x400xf32>
    %233 = vector.extract_strided_slice %214 {offsets = [0, 20], sizes = [1, 380], strides = [1, 1]} : vector<1x400xf32> to vector<1x380xf32>
    %cst_75 = arith.constant 0.000000e+00 : f32
    %234 = vector.broadcast %cst_75 : f32 to vector<1x20xf32>
    %235 = tpu.concatenate %233, %234 in 1 : vector<1x380xf32>, vector<1x20xf32> -> vector<1x400xf32>
    %236 = vector.extract_strided_slice %214 {offsets = [0, 21], sizes = [1, 379], strides = [1, 1]} : vector<1x400xf32> to vector<1x379xf32>
    %cst_76 = arith.constant 0.000000e+00 : f32
    %237 = vector.broadcast %cst_76 : f32 to vector<1x21xf32>
    %238 = tpu.concatenate %236, %237 in 1 : vector<1x379xf32>, vector<1x21xf32> -> vector<1x400xf32>
    %239 = arith.subf %223, %217 : vector<1x400xf32>
    %240 = arith.subf %229, %226 : vector<1x400xf32>
    %cst_77 = arith.constant 2.000000e+00 : f32
    %241 = vector.broadcast %cst_77 : f32 to vector<1x400xf32>
    %242 = arith.mulf %241, %240 : vector<1x400xf32>
    %243 = arith.addf %239, %242 : vector<1x400xf32>
    %244 = arith.subf %238, %232 : vector<1x400xf32>
    %245 = arith.addf %243, %244 : vector<1x400xf32>
    %cst_78 = arith.constant 1.250000e-01 : f32
    %246 = vector.broadcast %cst_78 : f32 to vector<1x400xf32>
    %247 = arith.mulf %245, %246 : vector<1x400xf32>
    %248 = arith.subf %232, %217 : vector<1x400xf32>
    %249 = arith.subf %235, %220 : vector<1x400xf32>
    %cst_79 = arith.constant 2.000000e+00 : f32
    %250 = vector.broadcast %cst_79 : f32 to vector<1x400xf32>
    %251 = arith.mulf %250, %249 : vector<1x400xf32>
    %252 = arith.addf %248, %251 : vector<1x400xf32>
    %253 = arith.subf %238, %223 : vector<1x400xf32>
    %254 = arith.addf %252, %253 : vector<1x400xf32>
    %cst_80 = arith.constant 1.250000e-01 : f32
    %255 = vector.broadcast %cst_80 : f32 to vector<1x400xf32>
    %256 = arith.mulf %254, %255 : vector<1x400xf32>
    %cst_81 = arith.constant 0.000000e+00 : f32
    %257 = vector.broadcast %cst_81 : f32 to vector<1x400xf32>
    %258 = arith.select %20, %247, %257 : vector<1x400xi1>, vector<1x400xf32>
    %cst_82 = arith.constant 0.000000e+00 : f32
    %259 = vector.broadcast %cst_82 : f32 to vector<1x400xf32>
    %260 = arith.select %20, %256, %259 : vector<1x400xi1>, vector<1x400xf32>
    %cst_83 = arith.constant 2.000000e+00 : f32
    %261 = vector.broadcast %cst_83 : f32 to vector<1x400xf32>
    %262 = arith.cmpf oge, %6, %261 : vector<1x400xf32>
    %cst_84 = arith.constant 1.700000e+01 : f32
    %263 = vector.broadcast %cst_84 : f32 to vector<1x400xf32>
    %264 = arith.cmpf ole, %6, %263 : vector<1x400xf32>
    %265 = arith.andi %262, %264 : vector<1x400xi1>
    %cst_85 = arith.constant 2.000000e+00 : f32
    %266 = vector.broadcast %cst_85 : f32 to vector<1x400xf32>
    %267 = arith.cmpf oge, %9, %266 : vector<1x400xf32>
    %cst_86 = arith.constant 1.700000e+01 : f32
    %268 = vector.broadcast %cst_86 : f32 to vector<1x400xf32>
    %269 = arith.cmpf ole, %9, %268 : vector<1x400xf32>
    %270 = arith.andi %267, %269 : vector<1x400xi1>
    %cst_87 = arith.constant 1.000000e+00 : f32
    %271 = vector.broadcast %cst_87 : f32 to vector<1x400xf32>
    %272 = arith.cmpf oeq, %6, %271 : vector<1x400xf32>
    %cst_88 = arith.constant 1.800000e+01 : f32
    %273 = vector.broadcast %cst_88 : f32 to vector<1x400xf32>
    %274 = arith.cmpf oeq, %6, %273 : vector<1x400xf32>
    %cst_89 = arith.constant 1.000000e+00 : f32
    %275 = vector.broadcast %cst_89 : f32 to vector<1x400xf32>
    %276 = arith.cmpf oeq, %9, %275 : vector<1x400xf32>
    %cst_90 = arith.constant 1.800000e+01 : f32
    %277 = vector.broadcast %cst_90 : f32 to vector<1x400xf32>
    %278 = arith.cmpf oeq, %9, %277 : vector<1x400xf32>
    %279 = arith.andi %276, %265 : vector<1x400xi1>
    %280 = vector.extract_strided_slice %140 {offsets = [0, 1], sizes = [1, 399], strides = [1, 1]} : vector<1x400xf32> to vector<1x399xf32>
    %cst_91 = arith.constant 0.000000e+00 : f32
    %281 = vector.broadcast %cst_91 : f32 to vector<1x1xf32>
    %282 = tpu.concatenate %280, %281 in 1 : vector<1x399xf32>, vector<1x1xf32> -> vector<1x400xf32>
    %cst_92 = arith.constant 0.000000e+00 : f32
    %283 = vector.broadcast %cst_92 : f32 to vector<1x400xf32>
    %284 = arith.select %279, %282, %283 : vector<1x400xi1>, vector<1x400xf32>
    %285 = arith.addf %140, %284 : vector<1x400xf32>
    %286 = arith.andi %278, %265 : vector<1x400xi1>
    %cst_93 = arith.constant 0.000000e+00 : f32
    %287 = vector.broadcast %cst_93 : f32 to vector<1x1xf32>
    %288 = vector.extract_strided_slice %140 {offsets = [0, 0], sizes = [1, 399], strides = [1, 1]} : vector<1x400xf32> to vector<1x399xf32>
    %289 = tpu.concatenate %287, %288 in 1 : vector<1x1xf32>, vector<1x399xf32> -> vector<1x400xf32>
    %cst_94 = arith.constant 0.000000e+00 : f32
    %290 = vector.broadcast %cst_94 : f32 to vector<1x400xf32>
    %291 = arith.select %286, %289, %290 : vector<1x400xi1>, vector<1x400xf32>
    %292 = arith.addf %285, %291 : vector<1x400xf32>
    %293 = arith.andi %272, %270 : vector<1x400xi1>
    %294 = vector.extract_strided_slice %140 {offsets = [0, 20], sizes = [1, 380], strides = [1, 1]} : vector<1x400xf32> to vector<1x380xf32>
    %cst_95 = arith.constant 0.000000e+00 : f32
    %295 = vector.broadcast %cst_95 : f32 to vector<1x20xf32>
    %296 = tpu.concatenate %294, %295 in 1 : vector<1x380xf32>, vector<1x20xf32> -> vector<1x400xf32>
    %cst_96 = arith.constant 0.000000e+00 : f32
    %297 = vector.broadcast %cst_96 : f32 to vector<1x400xf32>
    %298 = arith.select %293, %296, %297 : vector<1x400xi1>, vector<1x400xf32>
    %299 = arith.addf %292, %298 : vector<1x400xf32>
    %300 = arith.andi %274, %270 : vector<1x400xi1>
    %cst_97 = arith.constant 0.000000e+00 : f32
    %301 = vector.broadcast %cst_97 : f32 to vector<1x20xf32>
    %302 = vector.extract_strided_slice %140 {offsets = [0, 0], sizes = [1, 380], strides = [1, 1]} : vector<1x400xf32> to vector<1x380xf32>
    %303 = tpu.concatenate %301, %302 in 1 : vector<1x20xf32>, vector<1x380xf32> -> vector<1x400xf32>
    %cst_98 = arith.constant 0.000000e+00 : f32
    %304 = vector.broadcast %cst_98 : f32 to vector<1x400xf32>
    %305 = arith.select %300, %303, %304 : vector<1x400xi1>, vector<1x400xf32>
    %306 = arith.addf %299, %305 : vector<1x400xf32>
    %307 = arith.andi %272, %276 : vector<1x400xi1>
    %308 = vector.extract_strided_slice %140 {offsets = [0, 21], sizes = [1, 379], strides = [1, 1]} : vector<1x400xf32> to vector<1x379xf32>
    %cst_99 = arith.constant 0.000000e+00 : f32
    %309 = vector.broadcast %cst_99 : f32 to vector<1x21xf32>
    %310 = tpu.concatenate %308, %309 in 1 : vector<1x379xf32>, vector<1x21xf32> -> vector<1x400xf32>
    %cst_100 = arith.constant 0.000000e+00 : f32
    %311 = vector.broadcast %cst_100 : f32 to vector<1x400xf32>
    %312 = arith.select %307, %310, %311 : vector<1x400xi1>, vector<1x400xf32>
    %313 = arith.addf %306, %312 : vector<1x400xf32>
    %314 = arith.andi %272, %278 : vector<1x400xi1>
    %315 = vector.extract_strided_slice %140 {offsets = [0, 19], sizes = [1, 381], strides = [1, 1]} : vector<1x400xf32> to vector<1x381xf32>
    %cst_101 = arith.constant 0.000000e+00 : f32
    %316 = vector.broadcast %cst_101 : f32 to vector<1x19xf32>
    %317 = tpu.concatenate %315, %316 in 1 : vector<1x381xf32>, vector<1x19xf32> -> vector<1x400xf32>
    %cst_102 = arith.constant 0.000000e+00 : f32
    %318 = vector.broadcast %cst_102 : f32 to vector<1x400xf32>
    %319 = arith.select %314, %317, %318 : vector<1x400xi1>, vector<1x400xf32>
    %320 = arith.addf %313, %319 : vector<1x400xf32>
    %321 = arith.andi %274, %276 : vector<1x400xi1>
    %cst_103 = arith.constant 0.000000e+00 : f32
    %322 = vector.broadcast %cst_103 : f32 to vector<1x19xf32>
    %323 = vector.extract_strided_slice %140 {offsets = [0, 0], sizes = [1, 381], strides = [1, 1]} : vector<1x400xf32> to vector<1x381xf32>
    %324 = tpu.concatenate %322, %323 in 1 : vector<1x19xf32>, vector<1x381xf32> -> vector<1x400xf32>
    %cst_104 = arith.constant 0.000000e+00 : f32
    %325 = vector.broadcast %cst_104 : f32 to vector<1x400xf32>
    %326 = arith.select %321, %324, %325 : vector<1x400xi1>, vector<1x400xf32>
    %327 = arith.addf %320, %326 : vector<1x400xf32>
    %328 = arith.andi %274, %278 : vector<1x400xi1>
    %cst_105 = arith.constant 0.000000e+00 : f32
    %329 = vector.broadcast %cst_105 : f32 to vector<1x21xf32>
    %330 = vector.extract_strided_slice %140 {offsets = [0, 0], sizes = [1, 379], strides = [1, 1]} : vector<1x400xf32> to vector<1x379xf32>
    %331 = tpu.concatenate %329, %330 in 1 : vector<1x21xf32>, vector<1x379xf32> -> vector<1x400xf32>
    %cst_106 = arith.constant 0.000000e+00 : f32
    %332 = vector.broadcast %cst_106 : f32 to vector<1x400xf32>
    %333 = arith.select %328, %331, %332 : vector<1x400xi1>, vector<1x400xf32>
    %334 = arith.addf %327, %333 : vector<1x400xf32>
    %cst_107 = arith.constant 0.000000e+00 : f32
    %335 = vector.broadcast %cst_107 : f32 to vector<1x21xf32>
    %336 = vector.extract_strided_slice %334 {offsets = [0, 0], sizes = [1, 379], strides = [1, 1]} : vector<1x400xf32> to vector<1x379xf32>
    %337 = tpu.concatenate %335, %336 in 1 : vector<1x21xf32>, vector<1x379xf32> -> vector<1x400xf32>
    %cst_108 = arith.constant 0.000000e+00 : f32
    %338 = vector.broadcast %cst_108 : f32 to vector<1x20xf32>
    %339 = vector.extract_strided_slice %334 {offsets = [0, 0], sizes = [1, 380], strides = [1, 1]} : vector<1x400xf32> to vector<1x380xf32>
    %340 = tpu.concatenate %338, %339 in 1 : vector<1x20xf32>, vector<1x380xf32> -> vector<1x400xf32>
    %cst_109 = arith.constant 0.000000e+00 : f32
    %341 = vector.broadcast %cst_109 : f32 to vector<1x19xf32>
    %342 = vector.extract_strided_slice %334 {offsets = [0, 0], sizes = [1, 381], strides = [1, 1]} : vector<1x400xf32> to vector<1x381xf32>
    %343 = tpu.concatenate %341, %342 in 1 : vector<1x19xf32>, vector<1x381xf32> -> vector<1x400xf32>
    %344 = vector.extract_strided_slice %334 {offsets = [0, 19], sizes = [1, 381], strides = [1, 1]} : vector<1x400xf32> to vector<1x381xf32>
    %cst_110 = arith.constant 0.000000e+00 : f32
    %345 = vector.broadcast %cst_110 : f32 to vector<1x19xf32>
    %346 = tpu.concatenate %344, %345 in 1 : vector<1x381xf32>, vector<1x19xf32> -> vector<1x400xf32>
    %347 = vector.extract_strided_slice %334 {offsets = [0, 20], sizes = [1, 380], strides = [1, 1]} : vector<1x400xf32> to vector<1x380xf32>
    %cst_111 = arith.constant 0.000000e+00 : f32
    %348 = vector.broadcast %cst_111 : f32 to vector<1x20xf32>
    %349 = tpu.concatenate %347, %348 in 1 : vector<1x380xf32>, vector<1x20xf32> -> vector<1x400xf32>
    %350 = vector.extract_strided_slice %334 {offsets = [0, 21], sizes = [1, 379], strides = [1, 1]} : vector<1x400xf32> to vector<1x379xf32>
    %cst_112 = arith.constant 0.000000e+00 : f32
    %351 = vector.broadcast %cst_112 : f32 to vector<1x21xf32>
    %352 = tpu.concatenate %350, %351 in 1 : vector<1x379xf32>, vector<1x21xf32> -> vector<1x400xf32>
    %353 = arith.subf %346, %337 : vector<1x400xf32>
    %354 = arith.subf %349, %340 : vector<1x400xf32>
    %cst_113 = arith.constant 2.000000e+00 : f32
    %355 = vector.broadcast %cst_113 : f32 to vector<1x400xf32>
    %356 = arith.mulf %355, %354 : vector<1x400xf32>
    %357 = arith.addf %353, %356 : vector<1x400xf32>
    %358 = arith.subf %352, %343 : vector<1x400xf32>
    %359 = arith.addf %357, %358 : vector<1x400xf32>
    %cst_114 = arith.constant 1.250000e-01 : f32
    %360 = vector.broadcast %cst_114 : f32 to vector<1x400xf32>
    %361 = arith.mulf %359, %360 : vector<1x400xf32>
    %cst_115 = arith.constant 0.000000e+00 : f32
    %362 = vector.broadcast %cst_115 : f32 to vector<1x400xf32>
    %363 = arith.select %20, %361, %362 : vector<1x400xi1>, vector<1x400xf32>
    %364 = arith.mulf %138, %138 : vector<1x400xf32>
    %365 = arith.mulf %140, %140 : vector<1x400xf32>
    %366 = arith.mulf %138, %140 : vector<1x400xf32>
    %367 = arith.mulf %258, %363 : vector<1x400xf32>
    %368 = arith.mulf %260, %260 : vector<1x400xf32>
    %369 = tpu.concatenate %138, %140, %364, %365, %366, %258, %363, %367, %260, %368 in 0 : vector<1x400xf32>, vector<1x400xf32>, vector<1x400xf32>, vector<1x400xf32>, vector<1x400xf32>, vector<1x400xf32>, vector<1x400xf32>, vector<1x400xf32>, vector<1x400xf32>, vector<1x400xf32> -> vector<10x400xf32>
    %c0_116 = arith.constant 0 : index
    %c0_117 = arith.constant 0 : index
    %370 = vector.load %arg2[%c0_116, %c0_117] : memref<8x250xbf16, #tpu.memory_space<vmem>>, vector<8x250xbf16>
    %c0_118 = arith.constant 0 : index
    %c0_119 = arith.constant 0 : index
    %371 = vector.load %arg3[%c0_118, %c0_119] : memref<8x1xf32, #tpu.memory_space<vmem>>, vector<8x1xf32>
    %cst_120 = arith.constant 0.000000e+00 : f32
    %372 = vector.broadcast %cst_120 : f32 to vector<10x42xf32>
    %373 = vector.extract_strided_slice %369 {offsets = [0, 0], sizes = [10, 358], strides = [1, 1]} : vector<10x400xf32> to vector<10x358xf32>
    %374 = tpu.concatenate %372, %373 in 1 : vector<10x42xf32>, vector<10x358xf32> -> vector<10x400xf32>
    %cst_121 = arith.constant 0.000000e+00 : f32
    %375 = vector.broadcast %cst_121 : f32 to vector<10x41xf32>
    %376 = vector.extract_strided_slice %369 {offsets = [0, 0], sizes = [10, 359], strides = [1, 1]} : vector<10x400xf32> to vector<10x359xf32>
    %377 = tpu.concatenate %375, %376 in 1 : vector<10x41xf32>, vector<10x359xf32> -> vector<10x400xf32>
    %cst_122 = arith.constant 0.000000e+00 : f32
    %378 = vector.broadcast %cst_122 : f32 to vector<10x40xf32>
    %379 = vector.extract_strided_slice %369 {offsets = [0, 0], sizes = [10, 360], strides = [1, 1]} : vector<10x400xf32> to vector<10x360xf32>
    %380 = tpu.concatenate %378, %379 in 1 : vector<10x40xf32>, vector<10x360xf32> -> vector<10x400xf32>
    %cst_123 = arith.constant 0.000000e+00 : f32
    %381 = vector.broadcast %cst_123 : f32 to vector<10x39xf32>
    %382 = vector.extract_strided_slice %369 {offsets = [0, 0], sizes = [10, 361], strides = [1, 1]} : vector<10x400xf32> to vector<10x361xf32>
    %383 = tpu.concatenate %381, %382 in 1 : vector<10x39xf32>, vector<10x361xf32> -> vector<10x400xf32>
    %cst_124 = arith.constant 0.000000e+00 : f32
    %384 = vector.broadcast %cst_124 : f32 to vector<10x38xf32>
    %385 = vector.extract_strided_slice %369 {offsets = [0, 0], sizes = [10, 362], strides = [1, 1]} : vector<10x400xf32> to vector<10x362xf32>
    %386 = tpu.concatenate %384, %385 in 1 : vector<10x38xf32>, vector<10x362xf32> -> vector<10x400xf32>
    %cst_125 = arith.constant 0.000000e+00 : f32
    %387 = vector.broadcast %cst_125 : f32 to vector<10x22xf32>
    %388 = vector.extract_strided_slice %369 {offsets = [0, 0], sizes = [10, 378], strides = [1, 1]} : vector<10x400xf32> to vector<10x378xf32>
    %389 = tpu.concatenate %387, %388 in 1 : vector<10x22xf32>, vector<10x378xf32> -> vector<10x400xf32>
    %cst_126 = arith.constant 0.000000e+00 : f32
    %390 = vector.broadcast %cst_126 : f32 to vector<10x21xf32>
    %391 = vector.extract_strided_slice %369 {offsets = [0, 0], sizes = [10, 379], strides = [1, 1]} : vector<10x400xf32> to vector<10x379xf32>
    %392 = tpu.concatenate %390, %391 in 1 : vector<10x21xf32>, vector<10x379xf32> -> vector<10x400xf32>
    %cst_127 = arith.constant 0.000000e+00 : f32
    %393 = vector.broadcast %cst_127 : f32 to vector<10x20xf32>
    %394 = vector.extract_strided_slice %369 {offsets = [0, 0], sizes = [10, 380], strides = [1, 1]} : vector<10x400xf32> to vector<10x380xf32>
    %395 = tpu.concatenate %393, %394 in 1 : vector<10x20xf32>, vector<10x380xf32> -> vector<10x400xf32>
    %cst_128 = arith.constant 0.000000e+00 : f32
    %396 = vector.broadcast %cst_128 : f32 to vector<10x19xf32>
    %397 = vector.extract_strided_slice %369 {offsets = [0, 0], sizes = [10, 381], strides = [1, 1]} : vector<10x400xf32> to vector<10x381xf32>
    %398 = tpu.concatenate %396, %397 in 1 : vector<10x19xf32>, vector<10x381xf32> -> vector<10x400xf32>
    %cst_129 = arith.constant 0.000000e+00 : f32
    %399 = vector.broadcast %cst_129 : f32 to vector<10x18xf32>
    %400 = vector.extract_strided_slice %369 {offsets = [0, 0], sizes = [10, 382], strides = [1, 1]} : vector<10x400xf32> to vector<10x382xf32>
    %401 = tpu.concatenate %399, %400 in 1 : vector<10x18xf32>, vector<10x382xf32> -> vector<10x400xf32>
    %cst_130 = arith.constant 0.000000e+00 : f32
    %402 = vector.broadcast %cst_130 : f32 to vector<10x2xf32>
    %403 = vector.extract_strided_slice %369 {offsets = [0, 0], sizes = [10, 398], strides = [1, 1]} : vector<10x400xf32> to vector<10x398xf32>
    %404 = tpu.concatenate %402, %403 in 1 : vector<10x2xf32>, vector<10x398xf32> -> vector<10x400xf32>
    %cst_131 = arith.constant 0.000000e+00 : f32
    %405 = vector.broadcast %cst_131 : f32 to vector<10x1xf32>
    %406 = vector.extract_strided_slice %369 {offsets = [0, 0], sizes = [10, 399], strides = [1, 1]} : vector<10x400xf32> to vector<10x399xf32>
    %407 = tpu.concatenate %405, %406 in 1 : vector<10x1xf32>, vector<10x399xf32> -> vector<10x400xf32>
    %408 = vector.extract_strided_slice %369 {offsets = [0, 1], sizes = [10, 399], strides = [1, 1]} : vector<10x400xf32> to vector<10x399xf32>
    %cst_132 = arith.constant 0.000000e+00 : f32
    %409 = vector.broadcast %cst_132 : f32 to vector<10x1xf32>
    %410 = tpu.concatenate %408, %409 in 1 : vector<10x399xf32>, vector<10x1xf32> -> vector<10x400xf32>
    %411 = vector.extract_strided_slice %369 {offsets = [0, 2], sizes = [10, 398], strides = [1, 1]} : vector<10x400xf32> to vector<10x398xf32>
    %cst_133 = arith.constant 0.000000e+00 : f32
    %412 = vector.broadcast %cst_133 : f32 to vector<10x2xf32>
    %413 = tpu.concatenate %411, %412 in 1 : vector<10x398xf32>, vector<10x2xf32> -> vector<10x400xf32>
    %414 = vector.extract_strided_slice %369 {offsets = [0, 18], sizes = [10, 382], strides = [1, 1]} : vector<10x400xf32> to vector<10x382xf32>
    %cst_134 = arith.constant 0.000000e+00 : f32
    %415 = vector.broadcast %cst_134 : f32 to vector<10x18xf32>
    %416 = tpu.concatenate %414, %415 in 1 : vector<10x382xf32>, vector<10x18xf32> -> vector<10x400xf32>
    %417 = vector.extract_strided_slice %369 {offsets = [0, 19], sizes = [10, 381], strides = [1, 1]} : vector<10x400xf32> to vector<10x381xf32>
    %cst_135 = arith.constant 0.000000e+00 : f32
    %418 = vector.broadcast %cst_135 : f32 to vector<10x19xf32>
    %419 = tpu.concatenate %417, %418 in 1 : vector<10x381xf32>, vector<10x19xf32> -> vector<10x400xf32>
    %420 = vector.extract_strided_slice %369 {offsets = [0, 20], sizes = [10, 380], strides = [1, 1]} : vector<10x400xf32> to vector<10x380xf32>
    %cst_136 = arith.constant 0.000000e+00 : f32
    %421 = vector.broadcast %cst_136 : f32 to vector<10x20xf32>
    %422 = tpu.concatenate %420, %421 in 1 : vector<10x380xf32>, vector<10x20xf32> -> vector<10x400xf32>
    %423 = vector.extract_strided_slice %369 {offsets = [0, 21], sizes = [10, 379], strides = [1, 1]} : vector<10x400xf32> to vector<10x379xf32>
    %cst_137 = arith.constant 0.000000e+00 : f32
    %424 = vector.broadcast %cst_137 : f32 to vector<10x21xf32>
    %425 = tpu.concatenate %423, %424 in 1 : vector<10x379xf32>, vector<10x21xf32> -> vector<10x400xf32>
    %426 = vector.extract_strided_slice %369 {offsets = [0, 22], sizes = [10, 378], strides = [1, 1]} : vector<10x400xf32> to vector<10x378xf32>
    %cst_138 = arith.constant 0.000000e+00 : f32
    %427 = vector.broadcast %cst_138 : f32 to vector<10x22xf32>
    %428 = tpu.concatenate %426, %427 in 1 : vector<10x378xf32>, vector<10x22xf32> -> vector<10x400xf32>
    %429 = vector.extract_strided_slice %369 {offsets = [0, 38], sizes = [10, 362], strides = [1, 1]} : vector<10x400xf32> to vector<10x362xf32>
    %cst_139 = arith.constant 0.000000e+00 : f32
    %430 = vector.broadcast %cst_139 : f32 to vector<10x38xf32>
    %431 = tpu.concatenate %429, %430 in 1 : vector<10x362xf32>, vector<10x38xf32> -> vector<10x400xf32>
    %432 = vector.extract_strided_slice %369 {offsets = [0, 39], sizes = [10, 361], strides = [1, 1]} : vector<10x400xf32> to vector<10x361xf32>
    %cst_140 = arith.constant 0.000000e+00 : f32
    %433 = vector.broadcast %cst_140 : f32 to vector<10x39xf32>
    %434 = tpu.concatenate %432, %433 in 1 : vector<10x361xf32>, vector<10x39xf32> -> vector<10x400xf32>
    %435 = vector.extract_strided_slice %369 {offsets = [0, 40], sizes = [10, 360], strides = [1, 1]} : vector<10x400xf32> to vector<10x360xf32>
    %cst_141 = arith.constant 0.000000e+00 : f32
    %436 = vector.broadcast %cst_141 : f32 to vector<10x40xf32>
    %437 = tpu.concatenate %435, %436 in 1 : vector<10x360xf32>, vector<10x40xf32> -> vector<10x400xf32>
    %438 = vector.extract_strided_slice %369 {offsets = [0, 41], sizes = [10, 359], strides = [1, 1]} : vector<10x400xf32> to vector<10x359xf32>
    %cst_142 = arith.constant 0.000000e+00 : f32
    %439 = vector.broadcast %cst_142 : f32 to vector<10x41xf32>
    %440 = tpu.concatenate %438, %439 in 1 : vector<10x359xf32>, vector<10x41xf32> -> vector<10x400xf32>
    %441 = vector.extract_strided_slice %369 {offsets = [0, 42], sizes = [10, 358], strides = [1, 1]} : vector<10x400xf32> to vector<10x358xf32>
    %cst_143 = arith.constant 0.000000e+00 : f32
    %442 = vector.broadcast %cst_143 : f32 to vector<10x42xf32>
    %443 = tpu.concatenate %441, %442 in 1 : vector<10x358xf32>, vector<10x42xf32> -> vector<10x400xf32>
    %444 = tpu.concatenate %374, %377, %380, %383, %386, %389, %392, %395, %398, %401, %404, %407, %369, %410, %413, %416 in 0 : vector<10x400xf32>, vector<10x400xf32>, vector<10x400xf32>, vector<10x400xf32>, vector<10x400xf32>, vector<10x400xf32>, vector<10x400xf32>, vector<10x400xf32>, vector<10x400xf32>, vector<10x400xf32>, vector<10x400xf32>, vector<10x400xf32>, vector<10x400xf32>, vector<10x400xf32>, vector<10x400xf32>, vector<10x400xf32> -> vector<160x400xf32>
    %445 = tpu.concatenate %419, %422, %425, %428, %431, %434, %437, %440, %443 in 0 : vector<10x400xf32>, vector<10x400xf32>, vector<10x400xf32>, vector<10x400xf32>, vector<10x400xf32>, vector<10x400xf32>, vector<10x400xf32>, vector<10x400xf32>, vector<10x400xf32> -> vector<90x400xf32>
    %446 = tpu.concatenate %444, %445 in 0 : vector<160x400xf32>, vector<90x400xf32> -> vector<250x400xf32>
    %447 = arith.truncf %446 : vector<250x400xf32> to vector<250x400xbf16>
    %cst_144 = arith.constant dense<0.000000e+00> : vector<8x400xf32>
    %448 = tpu.matmul %370, %447, %cst_144 {dimension_numbers = #tpu.dot_dimension_numbers<[1], [0], [0], [1], [0, 0, 1, 1], [], []>} : vector<8x250xbf16>, vector<250x400xbf16>, vector<8x400xf32> -> vector<8x400xf32>
    %449 = vector.broadcast %371 : vector<8x1xf32> to vector<8x400xf32>
    %450 = arith.addf %448, %449 : vector<8x400xf32>
    %cst_145 = arith.constant 0.000000e+00 : f32
    %451 = vector.broadcast %cst_145 : f32 to vector<8x400xf32>
    %452 = arith.maximumf %450, %451 : vector<8x400xf32>
    %cst_146 = arith.constant 0.000000e+00 : f32
    %453 = vector.shape_cast %20 : vector<1x400xi1> to vector<1x400xi1>
    %454 = vector.broadcast %453 : vector<1x400xi1> to vector<8x400xi1>
    %455 = vector.broadcast %cst_146 : f32 to vector<8x400xf32>
    %456 = arith.select %454, %452, %455 : vector<8x400xi1>, vector<8x400xf32>
    %c0_147 = arith.constant 0 : index
    %c0_148 = arith.constant 0 : index
    %457 = vector.load %arg4[%c0_147, %c0_148] : memref<8x200xbf16, #tpu.memory_space<vmem>>, vector<8x200xbf16>
    %c0_149 = arith.constant 0 : index
    %c0_150 = arith.constant 0 : index
    %458 = vector.load %arg5[%c0_149, %c0_150] : memref<8x1xf32, #tpu.memory_space<vmem>>, vector<8x1xf32>
    %cst_151 = arith.constant 0.000000e+00 : f32
    %459 = vector.broadcast %cst_151 : f32 to vector<8x42xf32>
    %460 = vector.extract_strided_slice %456 {offsets = [0, 0], sizes = [8, 358], strides = [1, 1]} : vector<8x400xf32> to vector<8x358xf32>
    %461 = tpu.concatenate %459, %460 in 1 : vector<8x42xf32>, vector<8x358xf32> -> vector<8x400xf32>
    %cst_152 = arith.constant 0.000000e+00 : f32
    %462 = vector.broadcast %cst_152 : f32 to vector<8x41xf32>
    %463 = vector.extract_strided_slice %456 {offsets = [0, 0], sizes = [8, 359], strides = [1, 1]} : vector<8x400xf32> to vector<8x359xf32>
    %464 = tpu.concatenate %462, %463 in 1 : vector<8x41xf32>, vector<8x359xf32> -> vector<8x400xf32>
    %cst_153 = arith.constant 0.000000e+00 : f32
    %465 = vector.broadcast %cst_153 : f32 to vector<8x40xf32>
    %466 = vector.extract_strided_slice %456 {offsets = [0, 0], sizes = [8, 360], strides = [1, 1]} : vector<8x400xf32> to vector<8x360xf32>
    %467 = tpu.concatenate %465, %466 in 1 : vector<8x40xf32>, vector<8x360xf32> -> vector<8x400xf32>
    %cst_154 = arith.constant 0.000000e+00 : f32
    %468 = vector.broadcast %cst_154 : f32 to vector<8x39xf32>
    %469 = vector.extract_strided_slice %456 {offsets = [0, 0], sizes = [8, 361], strides = [1, 1]} : vector<8x400xf32> to vector<8x361xf32>
    %470 = tpu.concatenate %468, %469 in 1 : vector<8x39xf32>, vector<8x361xf32> -> vector<8x400xf32>
    %cst_155 = arith.constant 0.000000e+00 : f32
    %471 = vector.broadcast %cst_155 : f32 to vector<8x38xf32>
    %472 = vector.extract_strided_slice %456 {offsets = [0, 0], sizes = [8, 362], strides = [1, 1]} : vector<8x400xf32> to vector<8x362xf32>
    %473 = tpu.concatenate %471, %472 in 1 : vector<8x38xf32>, vector<8x362xf32> -> vector<8x400xf32>
    %cst_156 = arith.constant 0.000000e+00 : f32
    %474 = vector.broadcast %cst_156 : f32 to vector<8x22xf32>
    %475 = vector.extract_strided_slice %456 {offsets = [0, 0], sizes = [8, 378], strides = [1, 1]} : vector<8x400xf32> to vector<8x378xf32>
    %476 = tpu.concatenate %474, %475 in 1 : vector<8x22xf32>, vector<8x378xf32> -> vector<8x400xf32>
    %cst_157 = arith.constant 0.000000e+00 : f32
    %477 = vector.broadcast %cst_157 : f32 to vector<8x21xf32>
    %478 = vector.extract_strided_slice %456 {offsets = [0, 0], sizes = [8, 379], strides = [1, 1]} : vector<8x400xf32> to vector<8x379xf32>
    %479 = tpu.concatenate %477, %478 in 1 : vector<8x21xf32>, vector<8x379xf32> -> vector<8x400xf32>
    %cst_158 = arith.constant 0.000000e+00 : f32
    %480 = vector.broadcast %cst_158 : f32 to vector<8x20xf32>
    %481 = vector.extract_strided_slice %456 {offsets = [0, 0], sizes = [8, 380], strides = [1, 1]} : vector<8x400xf32> to vector<8x380xf32>
    %482 = tpu.concatenate %480, %481 in 1 : vector<8x20xf32>, vector<8x380xf32> -> vector<8x400xf32>
    %cst_159 = arith.constant 0.000000e+00 : f32
    %483 = vector.broadcast %cst_159 : f32 to vector<8x19xf32>
    %484 = vector.extract_strided_slice %456 {offsets = [0, 0], sizes = [8, 381], strides = [1, 1]} : vector<8x400xf32> to vector<8x381xf32>
    %485 = tpu.concatenate %483, %484 in 1 : vector<8x19xf32>, vector<8x381xf32> -> vector<8x400xf32>
    %cst_160 = arith.constant 0.000000e+00 : f32
    %486 = vector.broadcast %cst_160 : f32 to vector<8x18xf32>
    %487 = vector.extract_strided_slice %456 {offsets = [0, 0], sizes = [8, 382], strides = [1, 1]} : vector<8x400xf32> to vector<8x382xf32>
    %488 = tpu.concatenate %486, %487 in 1 : vector<8x18xf32>, vector<8x382xf32> -> vector<8x400xf32>
    %cst_161 = arith.constant 0.000000e+00 : f32
    %489 = vector.broadcast %cst_161 : f32 to vector<8x2xf32>
    %490 = vector.extract_strided_slice %456 {offsets = [0, 0], sizes = [8, 398], strides = [1, 1]} : vector<8x400xf32> to vector<8x398xf32>
    %491 = tpu.concatenate %489, %490 in 1 : vector<8x2xf32>, vector<8x398xf32> -> vector<8x400xf32>
    %cst_162 = arith.constant 0.000000e+00 : f32
    %492 = vector.broadcast %cst_162 : f32 to vector<8x1xf32>
    %493 = vector.extract_strided_slice %456 {offsets = [0, 0], sizes = [8, 399], strides = [1, 1]} : vector<8x400xf32> to vector<8x399xf32>
    %494 = tpu.concatenate %492, %493 in 1 : vector<8x1xf32>, vector<8x399xf32> -> vector<8x400xf32>
    %495 = vector.extract_strided_slice %456 {offsets = [0, 1], sizes = [8, 399], strides = [1, 1]} : vector<8x400xf32> to vector<8x399xf32>
    %cst_163 = arith.constant 0.000000e+00 : f32
    %496 = vector.broadcast %cst_163 : f32 to vector<8x1xf32>
    %497 = tpu.concatenate %495, %496 in 1 : vector<8x399xf32>, vector<8x1xf32> -> vector<8x400xf32>
    %498 = vector.extract_strided_slice %456 {offsets = [0, 2], sizes = [8, 398], strides = [1, 1]} : vector<8x400xf32> to vector<8x398xf32>
    %cst_164 = arith.constant 0.000000e+00 : f32
    %499 = vector.broadcast %cst_164 : f32 to vector<8x2xf32>
    %500 = tpu.concatenate %498, %499 in 1 : vector<8x398xf32>, vector<8x2xf32> -> vector<8x400xf32>
    %501 = vector.extract_strided_slice %456 {offsets = [0, 18], sizes = [8, 382], strides = [1, 1]} : vector<8x400xf32> to vector<8x382xf32>
    %cst_165 = arith.constant 0.000000e+00 : f32
    %502 = vector.broadcast %cst_165 : f32 to vector<8x18xf32>
    %503 = tpu.concatenate %501, %502 in 1 : vector<8x382xf32>, vector<8x18xf32> -> vector<8x400xf32>
    %504 = vector.extract_strided_slice %456 {offsets = [0, 19], sizes = [8, 381], strides = [1, 1]} : vector<8x400xf32> to vector<8x381xf32>
    %cst_166 = arith.constant 0.000000e+00 : f32
    %505 = vector.broadcast %cst_166 : f32 to vector<8x19xf32>
    %506 = tpu.concatenate %504, %505 in 1 : vector<8x381xf32>, vector<8x19xf32> -> vector<8x400xf32>
    %507 = vector.extract_strided_slice %456 {offsets = [0, 20], sizes = [8, 380], strides = [1, 1]} : vector<8x400xf32> to vector<8x380xf32>
    %cst_167 = arith.constant 0.000000e+00 : f32
    %508 = vector.broadcast %cst_167 : f32 to vector<8x20xf32>
    %509 = tpu.concatenate %507, %508 in 1 : vector<8x380xf32>, vector<8x20xf32> -> vector<8x400xf32>
    %510 = vector.extract_strided_slice %456 {offsets = [0, 21], sizes = [8, 379], strides = [1, 1]} : vector<8x400xf32> to vector<8x379xf32>
    %cst_168 = arith.constant 0.000000e+00 : f32
    %511 = vector.broadcast %cst_168 : f32 to vector<8x21xf32>
    %512 = tpu.concatenate %510, %511 in 1 : vector<8x379xf32>, vector<8x21xf32> -> vector<8x400xf32>
    %513 = vector.extract_strided_slice %456 {offsets = [0, 22], sizes = [8, 378], strides = [1, 1]} : vector<8x400xf32> to vector<8x378xf32>
    %cst_169 = arith.constant 0.000000e+00 : f32
    %514 = vector.broadcast %cst_169 : f32 to vector<8x22xf32>
    %515 = tpu.concatenate %513, %514 in 1 : vector<8x378xf32>, vector<8x22xf32> -> vector<8x400xf32>
    %516 = vector.extract_strided_slice %456 {offsets = [0, 38], sizes = [8, 362], strides = [1, 1]} : vector<8x400xf32> to vector<8x362xf32>
    %cst_170 = arith.constant 0.000000e+00 : f32
    %517 = vector.broadcast %cst_170 : f32 to vector<8x38xf32>
    %518 = tpu.concatenate %516, %517 in 1 : vector<8x362xf32>, vector<8x38xf32> -> vector<8x400xf32>
    %519 = vector.extract_strided_slice %456 {offsets = [0, 39], sizes = [8, 361], strides = [1, 1]} : vector<8x400xf32> to vector<8x361xf32>
    %cst_171 = arith.constant 0.000000e+00 : f32
    %520 = vector.broadcast %cst_171 : f32 to vector<8x39xf32>
    %521 = tpu.concatenate %519, %520 in 1 : vector<8x361xf32>, vector<8x39xf32> -> vector<8x400xf32>
    %522 = vector.extract_strided_slice %456 {offsets = [0, 40], sizes = [8, 360], strides = [1, 1]} : vector<8x400xf32> to vector<8x360xf32>
    %cst_172 = arith.constant 0.000000e+00 : f32
    %523 = vector.broadcast %cst_172 : f32 to vector<8x40xf32>
    %524 = tpu.concatenate %522, %523 in 1 : vector<8x360xf32>, vector<8x40xf32> -> vector<8x400xf32>
    %525 = vector.extract_strided_slice %456 {offsets = [0, 41], sizes = [8, 359], strides = [1, 1]} : vector<8x400xf32> to vector<8x359xf32>
    %cst_173 = arith.constant 0.000000e+00 : f32
    %526 = vector.broadcast %cst_173 : f32 to vector<8x41xf32>
    %527 = tpu.concatenate %525, %526 in 1 : vector<8x359xf32>, vector<8x41xf32> -> vector<8x400xf32>
    %528 = vector.extract_strided_slice %456 {offsets = [0, 42], sizes = [8, 358], strides = [1, 1]} : vector<8x400xf32> to vector<8x358xf32>
    %cst_174 = arith.constant 0.000000e+00 : f32
    %529 = vector.broadcast %cst_174 : f32 to vector<8x42xf32>
    %530 = tpu.concatenate %528, %529 in 1 : vector<8x358xf32>, vector<8x42xf32> -> vector<8x400xf32>
    %531 = tpu.concatenate %461, %464, %467, %470, %473, %476, %479, %482, %485, %488, %491, %494, %456, %497, %500, %503 in 0 : vector<8x400xf32>, vector<8x400xf32>, vector<8x400xf32>, vector<8x400xf32>, vector<8x400xf32>, vector<8x400xf32>, vector<8x400xf32>, vector<8x400xf32>, vector<8x400xf32>, vector<8x400xf32>, vector<8x400xf32>, vector<8x400xf32>, vector<8x400xf32>, vector<8x400xf32>, vector<8x400xf32>, vector<8x400xf32> -> vector<128x400xf32>
    %532 = tpu.concatenate %506, %509, %512, %515, %518, %521, %524, %527, %530 in 0 : vector<8x400xf32>, vector<8x400xf32>, vector<8x400xf32>, vector<8x400xf32>, vector<8x400xf32>, vector<8x400xf32>, vector<8x400xf32>, vector<8x400xf32>, vector<8x400xf32> -> vector<72x400xf32>
    %533 = tpu.concatenate %531, %532 in 0 : vector<128x400xf32>, vector<72x400xf32> -> vector<200x400xf32>
    %534 = arith.truncf %533 : vector<200x400xf32> to vector<200x400xbf16>
    %cst_175 = arith.constant dense<0.000000e+00> : vector<8x400xf32>
    %535 = tpu.matmul %457, %534, %cst_175 {dimension_numbers = #tpu.dot_dimension_numbers<[1], [0], [0], [1], [0, 0, 1, 1], [], []>} : vector<8x200xbf16>, vector<200x400xbf16>, vector<8x400xf32> -> vector<8x400xf32>
    %536 = vector.broadcast %458 : vector<8x1xf32> to vector<8x400xf32>
    %537 = arith.addf %535, %536 : vector<8x400xf32>
    %cst_176 = arith.constant 0.000000e+00 : f32
    %538 = vector.broadcast %cst_176 : f32 to vector<8x400xf32>
    %539 = arith.maximumf %537, %538 : vector<8x400xf32>
    %cst_177 = arith.constant 0.000000e+00 : f32
    %540 = vector.shape_cast %20 : vector<1x400xi1> to vector<1x400xi1>
    %541 = vector.broadcast %540 : vector<1x400xi1> to vector<8x400xi1>
    %542 = vector.broadcast %cst_177 : f32 to vector<8x400xf32>
    %543 = arith.select %541, %539, %542 : vector<8x400xi1>, vector<8x400xf32>
    %c0_178 = arith.constant 0 : index
    %c0_179 = arith.constant 0 : index
    %544 = vector.load %arg6[%c0_178, %c0_179] : memref<8x200xbf16, #tpu.memory_space<vmem>>, vector<8x200xbf16>
    %c0_180 = arith.constant 0 : index
    %c0_181 = arith.constant 0 : index
    %545 = vector.load %arg7[%c0_180, %c0_181] : memref<8x1xf32, #tpu.memory_space<vmem>>, vector<8x1xf32>
    %cst_182 = arith.constant 0.000000e+00 : f32
    %546 = vector.broadcast %cst_182 : f32 to vector<8x42xf32>
    %547 = vector.extract_strided_slice %543 {offsets = [0, 0], sizes = [8, 358], strides = [1, 1]} : vector<8x400xf32> to vector<8x358xf32>
    %548 = tpu.concatenate %546, %547 in 1 : vector<8x42xf32>, vector<8x358xf32> -> vector<8x400xf32>
    %cst_183 = arith.constant 0.000000e+00 : f32
    %549 = vector.broadcast %cst_183 : f32 to vector<8x41xf32>
    %550 = vector.extract_strided_slice %543 {offsets = [0, 0], sizes = [8, 359], strides = [1, 1]} : vector<8x400xf32> to vector<8x359xf32>
    %551 = tpu.concatenate %549, %550 in 1 : vector<8x41xf32>, vector<8x359xf32> -> vector<8x400xf32>
    %cst_184 = arith.constant 0.000000e+00 : f32
    %552 = vector.broadcast %cst_184 : f32 to vector<8x40xf32>
    %553 = vector.extract_strided_slice %543 {offsets = [0, 0], sizes = [8, 360], strides = [1, 1]} : vector<8x400xf32> to vector<8x360xf32>
    %554 = tpu.concatenate %552, %553 in 1 : vector<8x40xf32>, vector<8x360xf32> -> vector<8x400xf32>
    %cst_185 = arith.constant 0.000000e+00 : f32
    %555 = vector.broadcast %cst_185 : f32 to vector<8x39xf32>
    %556 = vector.extract_strided_slice %543 {offsets = [0, 0], sizes = [8, 361], strides = [1, 1]} : vector<8x400xf32> to vector<8x361xf32>
    %557 = tpu.concatenate %555, %556 in 1 : vector<8x39xf32>, vector<8x361xf32> -> vector<8x400xf32>
    %cst_186 = arith.constant 0.000000e+00 : f32
    %558 = vector.broadcast %cst_186 : f32 to vector<8x38xf32>
    %559 = vector.extract_strided_slice %543 {offsets = [0, 0], sizes = [8, 362], strides = [1, 1]} : vector<8x400xf32> to vector<8x362xf32>
    %560 = tpu.concatenate %558, %559 in 1 : vector<8x38xf32>, vector<8x362xf32> -> vector<8x400xf32>
    %cst_187 = arith.constant 0.000000e+00 : f32
    %561 = vector.broadcast %cst_187 : f32 to vector<8x22xf32>
    %562 = vector.extract_strided_slice %543 {offsets = [0, 0], sizes = [8, 378], strides = [1, 1]} : vector<8x400xf32> to vector<8x378xf32>
    %563 = tpu.concatenate %561, %562 in 1 : vector<8x22xf32>, vector<8x378xf32> -> vector<8x400xf32>
    %cst_188 = arith.constant 0.000000e+00 : f32
    %564 = vector.broadcast %cst_188 : f32 to vector<8x21xf32>
    %565 = vector.extract_strided_slice %543 {offsets = [0, 0], sizes = [8, 379], strides = [1, 1]} : vector<8x400xf32> to vector<8x379xf32>
    %566 = tpu.concatenate %564, %565 in 1 : vector<8x21xf32>, vector<8x379xf32> -> vector<8x400xf32>
    %cst_189 = arith.constant 0.000000e+00 : f32
    %567 = vector.broadcast %cst_189 : f32 to vector<8x20xf32>
    %568 = vector.extract_strided_slice %543 {offsets = [0, 0], sizes = [8, 380], strides = [1, 1]} : vector<8x400xf32> to vector<8x380xf32>
    %569 = tpu.concatenate %567, %568 in 1 : vector<8x20xf32>, vector<8x380xf32> -> vector<8x400xf32>
    %cst_190 = arith.constant 0.000000e+00 : f32
    %570 = vector.broadcast %cst_190 : f32 to vector<8x19xf32>
    %571 = vector.extract_strided_slice %543 {offsets = [0, 0], sizes = [8, 381], strides = [1, 1]} : vector<8x400xf32> to vector<8x381xf32>
    %572 = tpu.concatenate %570, %571 in 1 : vector<8x19xf32>, vector<8x381xf32> -> vector<8x400xf32>
    %cst_191 = arith.constant 0.000000e+00 : f32
    %573 = vector.broadcast %cst_191 : f32 to vector<8x18xf32>
    %574 = vector.extract_strided_slice %543 {offsets = [0, 0], sizes = [8, 382], strides = [1, 1]} : vector<8x400xf32> to vector<8x382xf32>
    %575 = tpu.concatenate %573, %574 in 1 : vector<8x18xf32>, vector<8x382xf32> -> vector<8x400xf32>
    %cst_192 = arith.constant 0.000000e+00 : f32
    %576 = vector.broadcast %cst_192 : f32 to vector<8x2xf32>
    %577 = vector.extract_strided_slice %543 {offsets = [0, 0], sizes = [8, 398], strides = [1, 1]} : vector<8x400xf32> to vector<8x398xf32>
    %578 = tpu.concatenate %576, %577 in 1 : vector<8x2xf32>, vector<8x398xf32> -> vector<8x400xf32>
    %cst_193 = arith.constant 0.000000e+00 : f32
    %579 = vector.broadcast %cst_193 : f32 to vector<8x1xf32>
    %580 = vector.extract_strided_slice %543 {offsets = [0, 0], sizes = [8, 399], strides = [1, 1]} : vector<8x400xf32> to vector<8x399xf32>
    %581 = tpu.concatenate %579, %580 in 1 : vector<8x1xf32>, vector<8x399xf32> -> vector<8x400xf32>
    %582 = vector.extract_strided_slice %543 {offsets = [0, 1], sizes = [8, 399], strides = [1, 1]} : vector<8x400xf32> to vector<8x399xf32>
    %cst_194 = arith.constant 0.000000e+00 : f32
    %583 = vector.broadcast %cst_194 : f32 to vector<8x1xf32>
    %584 = tpu.concatenate %582, %583 in 1 : vector<8x399xf32>, vector<8x1xf32> -> vector<8x400xf32>
    %585 = vector.extract_strided_slice %543 {offsets = [0, 2], sizes = [8, 398], strides = [1, 1]} : vector<8x400xf32> to vector<8x398xf32>
    %cst_195 = arith.constant 0.000000e+00 : f32
    %586 = vector.broadcast %cst_195 : f32 to vector<8x2xf32>
    %587 = tpu.concatenate %585, %586 in 1 : vector<8x398xf32>, vector<8x2xf32> -> vector<8x400xf32>
    %588 = vector.extract_strided_slice %543 {offsets = [0, 18], sizes = [8, 382], strides = [1, 1]} : vector<8x400xf32> to vector<8x382xf32>
    %cst_196 = arith.constant 0.000000e+00 : f32
    %589 = vector.broadcast %cst_196 : f32 to vector<8x18xf32>
    %590 = tpu.concatenate %588, %589 in 1 : vector<8x382xf32>, vector<8x18xf32> -> vector<8x400xf32>
    %591 = vector.extract_strided_slice %543 {offsets = [0, 19], sizes = [8, 381], strides = [1, 1]} : vector<8x400xf32> to vector<8x381xf32>
    %cst_197 = arith.constant 0.000000e+00 : f32
    %592 = vector.broadcast %cst_197 : f32 to vector<8x19xf32>
    %593 = tpu.concatenate %591, %592 in 1 : vector<8x381xf32>, vector<8x19xf32> -> vector<8x400xf32>
    %594 = vector.extract_strided_slice %543 {offsets = [0, 20], sizes = [8, 380], strides = [1, 1]} : vector<8x400xf32> to vector<8x380xf32>
    %cst_198 = arith.constant 0.000000e+00 : f32
    %595 = vector.broadcast %cst_198 : f32 to vector<8x20xf32>
    %596 = tpu.concatenate %594, %595 in 1 : vector<8x380xf32>, vector<8x20xf32> -> vector<8x400xf32>
    %597 = vector.extract_strided_slice %543 {offsets = [0, 21], sizes = [8, 379], strides = [1, 1]} : vector<8x400xf32> to vector<8x379xf32>
    %cst_199 = arith.constant 0.000000e+00 : f32
    %598 = vector.broadcast %cst_199 : f32 to vector<8x21xf32>
    %599 = tpu.concatenate %597, %598 in 1 : vector<8x379xf32>, vector<8x21xf32> -> vector<8x400xf32>
    %600 = vector.extract_strided_slice %543 {offsets = [0, 22], sizes = [8, 378], strides = [1, 1]} : vector<8x400xf32> to vector<8x378xf32>
    %cst_200 = arith.constant 0.000000e+00 : f32
    %601 = vector.broadcast %cst_200 : f32 to vector<8x22xf32>
    %602 = tpu.concatenate %600, %601 in 1 : vector<8x378xf32>, vector<8x22xf32> -> vector<8x400xf32>
    %603 = vector.extract_strided_slice %543 {offsets = [0, 38], sizes = [8, 362], strides = [1, 1]} : vector<8x400xf32> to vector<8x362xf32>
    %cst_201 = arith.constant 0.000000e+00 : f32
    %604 = vector.broadcast %cst_201 : f32 to vector<8x38xf32>
    %605 = tpu.concatenate %603, %604 in 1 : vector<8x362xf32>, vector<8x38xf32> -> vector<8x400xf32>
    %606 = vector.extract_strided_slice %543 {offsets = [0, 39], sizes = [8, 361], strides = [1, 1]} : vector<8x400xf32> to vector<8x361xf32>
    %cst_202 = arith.constant 0.000000e+00 : f32
    %607 = vector.broadcast %cst_202 : f32 to vector<8x39xf32>
    %608 = tpu.concatenate %606, %607 in 1 : vector<8x361xf32>, vector<8x39xf32> -> vector<8x400xf32>
    %609 = vector.extract_strided_slice %543 {offsets = [0, 40], sizes = [8, 360], strides = [1, 1]} : vector<8x400xf32> to vector<8x360xf32>
    %cst_203 = arith.constant 0.000000e+00 : f32
    %610 = vector.broadcast %cst_203 : f32 to vector<8x40xf32>
    %611 = tpu.concatenate %609, %610 in 1 : vector<8x360xf32>, vector<8x40xf32> -> vector<8x400xf32>
    %612 = vector.extract_strided_slice %543 {offsets = [0, 41], sizes = [8, 359], strides = [1, 1]} : vector<8x400xf32> to vector<8x359xf32>
    %cst_204 = arith.constant 0.000000e+00 : f32
    %613 = vector.broadcast %cst_204 : f32 to vector<8x41xf32>
    %614 = tpu.concatenate %612, %613 in 1 : vector<8x359xf32>, vector<8x41xf32> -> vector<8x400xf32>
    %615 = vector.extract_strided_slice %543 {offsets = [0, 42], sizes = [8, 358], strides = [1, 1]} : vector<8x400xf32> to vector<8x358xf32>
    %cst_205 = arith.constant 0.000000e+00 : f32
    %616 = vector.broadcast %cst_205 : f32 to vector<8x42xf32>
    %617 = tpu.concatenate %615, %616 in 1 : vector<8x358xf32>, vector<8x42xf32> -> vector<8x400xf32>
    %618 = tpu.concatenate %548, %551, %554, %557, %560, %563, %566, %569, %572, %575, %578, %581, %543, %584, %587, %590 in 0 : vector<8x400xf32>, vector<8x400xf32>, vector<8x400xf32>, vector<8x400xf32>, vector<8x400xf32>, vector<8x400xf32>, vector<8x400xf32>, vector<8x400xf32>, vector<8x400xf32>, vector<8x400xf32>, vector<8x400xf32>, vector<8x400xf32>, vector<8x400xf32>, vector<8x400xf32>, vector<8x400xf32>, vector<8x400xf32> -> vector<128x400xf32>
    %619 = tpu.concatenate %593, %596, %599, %602, %605, %608, %611, %614, %617 in 0 : vector<8x400xf32>, vector<8x400xf32>, vector<8x400xf32>, vector<8x400xf32>, vector<8x400xf32>, vector<8x400xf32>, vector<8x400xf32>, vector<8x400xf32>, vector<8x400xf32> -> vector<72x400xf32>
    %620 = tpu.concatenate %618, %619 in 0 : vector<128x400xf32>, vector<72x400xf32> -> vector<200x400xf32>
    %621 = arith.truncf %620 : vector<200x400xf32> to vector<200x400xbf16>
    %cst_206 = arith.constant dense<0.000000e+00> : vector<8x400xf32>
    %622 = tpu.matmul %544, %621, %cst_206 {dimension_numbers = #tpu.dot_dimension_numbers<[1], [0], [0], [1], [0, 0, 1, 1], [], []>} : vector<8x200xbf16>, vector<200x400xbf16>, vector<8x400xf32> -> vector<8x400xf32>
    %623 = vector.broadcast %545 : vector<8x1xf32> to vector<8x400xf32>
    %624 = arith.addf %622, %623 : vector<8x400xf32>
    %cst_207 = arith.constant 0.000000e+00 : f32
    %625 = vector.broadcast %cst_207 : f32 to vector<8x400xf32>
    %626 = arith.maximumf %624, %625 : vector<8x400xf32>
    %cst_208 = arith.constant 0.000000e+00 : f32
    %627 = vector.shape_cast %20 : vector<1x400xi1> to vector<1x400xi1>
    %628 = vector.broadcast %627 : vector<1x400xi1> to vector<8x400xi1>
    %629 = vector.broadcast %cst_208 : f32 to vector<8x400xf32>
    %630 = arith.select %628, %626, %629 : vector<8x400xi1>, vector<8x400xf32>
    %c0_209 = arith.constant 0 : index
    %c0_210 = arith.constant 0 : index
    %c0_211 = arith.constant 0 : index
    %631 = vector.load %arg8[%c0_209, %c0_210, %c0_211] : memref<1x8x400xf32, #tpu.memory_space<vmem>>, vector<1x8x400xf32>
    %632 = vector.shape_cast %631 : vector<1x8x400xf32> to vector<8x400xf32>
    %633 = vector.shape_cast %630 : vector<8x400xf32> to vector<1x8x400xf32>
    tpu.vector_store %arg8[%c0_209, %c0_210, %c0_211], %633 {strides = array<i32>} : memref<1x8x400xf32, #tpu.memory_space<vmem>>, vector<1x8x400xf32>,
    return
  }
  func.func @transform_0(%arg0: i32) -> (i32, i32, i32) {
    %c0_i32 = arith.constant 0 : i32
    %c0_i32_0 = arith.constant 0 : i32
    %c0_i32_1 = arith.constant 0 : i32
    return %arg0, %c0_i32, %c0_i32_0 : i32, i32, i32
  }
  func.func @transform_1(%arg0: i32) -> (i32, i32) {
    %c0_i32 = arith.constant 0 : i32
    %c0_i32_0 = arith.constant 0 : i32
    %c0_i32_1 = arith.constant 0 : i32
    return %c0_i32, %c0_i32_0 : i32, i32
  }
  func.func @transform_2(%arg0: i32) -> (i32, i32) {
    %c0_i32 = arith.constant 0 : i32
    %c0_i32_0 = arith.constant 0 : i32
    %c0_i32_1 = arith.constant 0 : i32
    return %c0_i32, %c0_i32_0 : i32, i32
  }
  func.func @transform_3(%arg0: i32) -> (i32, i32) {
    %c0_i32 = arith.constant 0 : i32
    %c0_i32_0 = arith.constant 0 : i32
    %c0_i32_1 = arith.constant 0 : i32
    return %c0_i32, %c0_i32_0 : i32, i32
  }
  func.func @transform_4(%arg0: i32) -> (i32, i32) {
    %c0_i32 = arith.constant 0 : i32
    %c0_i32_0 = arith.constant 0 : i32
    %c0_i32_1 = arith.constant 0 : i32
    return %c0_i32, %c0_i32_0 : i32, i32
  }
  func.func @transform_5(%arg0: i32) -> (i32, i32) {
    %c0_i32 = arith.constant 0 : i32
    %c0_i32_0 = arith.constant 0 : i32
    %c0_i32_1 = arith.constant 0 : i32
    return %c0_i32, %c0_i32_0 : i32, i32
  }
  func.func @transform_6(%arg0: i32) -> (i32, i32) {
    %c0_i32 = arith.constant 0 : i32
    %c0_i32_0 = arith.constant 0 : i32
    %c0_i32_1 = arith.constant 0 : i32
    return %c0_i32, %c0_i32_0 : i32, i32
  }
  func.func @transform_7(%arg0: i32) -> (i32, i32, i32) {
    %c0_i32 = arith.constant 0 : i32
    %c0_i32_0 = arith.constant 0 : i32
    %c0_i32_1 = arith.constant 0 : i32
    return %arg0, %c0_i32, %c0_i32_0 : i32, i32, i32
  }
}

</mosaic_0001>

<bundles_post_ra>
// kernel: tpu_custom_call.1
= control target key start
LH: loop header
LB: loop body
LE: loop exit
PB: predicated region body
PF: predicated region fallthrough
CT: control target
= control target key end

     0   :  { %s9844_s0 = inlined_call_operand.vmem [shape: f32[2,1,400], index: 0, kind: input, shape index: {}]   ;;  %s9845_s1 = inlined_call_operand.vmem [shape: bf16[8,250], index: 1, kind: input, shape index: {}]   ;;  %s9846_s2 = inlined_call_operand.vmem [shape: f32[8,1], index: 2, kind: input, shape index: {}]   ;;  %s9847_s3 = inlined_call_operand.vmem [shape: bf16[8,200], index: 3, kind: input, shape index: {}]   ;;  %s9848_s4 = inlined_call_operand.vmem [shape: f32[8,1], index: 4, kind: input, shape index: {}]   ;;  %s9849_s5 = inlined_call_operand.hbm [shape: bf16[8,200], index: 5, kind: input, shape index: {}]   ;;  %s9850_s6 = inlined_call_operand.vmem [shape: f32[8,1], index: 6, kind: input, shape index: {}]   ;;  %s9851_s7 = inlined_call_operand.hbm [shape: f32[2,8,400], index: 7, kind: output, shape index: {}]  }
   0x1   :  { %10229 = sst [smem:[#allocation60_spill]] %s9844_s0 }
   0x2   :  { %10230 = sst [smem:[#allocation61_spill]] %s9845_s1 }
   0x3   :  { %10231 = sst [smem:[#allocation62_spill]] %s9846_s2 }
   0x4   :  { %10232 = sst [smem:[#allocation63_spill]] %s9847_s3 }
   0x5   :  { %10233 = sst [smem:[#allocation64_spill]] %s9848_s4 }
   0x6   :  { %10234 = sst [smem:[#allocation65_spill]] %s9849_s5 }
   0x7   :  { %12 = vsyncpa [#allocation3], 0 }
   0x8   :  { %13 = vsyncpa [#allocation4], 0 }
   0x9   :  { %15 = vsyncpa [#allocation4 + $0x1], 0  ;;  %s5295_s24 = smov 0   ;;  %s5297_s25 = smov 0  }
   0xa   :  { %s5299_s26 = smov 0   ;;  %s5301_s27 = smov 0  }
   0xb LB: > { %10235 = sst [smem:[#allocation8_spill]] %s5219_s26  ;;  %s5316_s28 = sadd.s32 4294967295, %s5223_s27   ;;  %s5223_s27 = sphi %s5301_s27, %s11406_s27   ;;  %s5219_s26 = sphi %s5299_s26, %s11408_s26   ;;  %s5215_s25 = sphi %s5297_s25, %s11410_s25   ;;  %s5211_s24 = sphi %s5295_s24, %s11409_s24  }
   0xc   : > { %s4092_s29 = sadd.s32 4294967294, %s5223_s27   ;;  %s5320_s30 = sadd.s32 1, %s5223_s27  }
   0xd   : > { %10236 = sst [smem:[#allocation9_spill]] %s5320_s30  ;;  %s180_s8 = sadd.s32 1, %s5219_s26 }
   0xe   : > { %s177_s9 = ssub.s32 %s5223_s27, %s5320_s30  ;;  %p190_p0 = scmp.ne.s32.totalorder %s5219_s26, %s5215_s25 }
   0xf   : > { %p178_p1 = scmp.eq.s32.totalorder %s177_s9, 0  ;;  %p191_p2 = scmp.eq.s32.totalorder %s5316_s28, 1 }
  0x10   : > { %p196_p3 = scmp.ne.s32.totalorder %s5215_s25, %s5211_s24  ;;  %p197_p4 = scmp.eq.s32.totalorder %s4092_s29, 1 }
  0x11   : > { %s5331_s10 = scalar_select %p178_p1, %s5219_s26, %s180_s8  }
  0x12   : > { %p5333_p5 = por %p191_p2, %p190_p0  ;;  %p5337_p6 = por %p197_p4, %p196_p3 }
  0x13   : > { %10237 = sst [smem:[#allocation10_spill]] %s5331_s10  ;;  %p4093_p7 = scmp.ge.s32.totalorder %s5223_s27, 1 }
  0x14   : > { %s10239_s12 = scalar_select %p5337_p6, 1, 0 }
  0x15   : > { %p204_p8 = scmp.lt.s32.totalorder %s5223_s27, 3  ;;  %p4278_p9 = scmp.eq.s32.totalorder %s5316_s28, 0 }
  0x16   : > { %10240 = sst [smem:[#allocation11_spill]] %s10239_s12  ;;  %s5225_s16 = smov [#allocation2]  }
  0x17   : > { %p205_p10 = pnand %p4093_p7, %p204_p8  ;;  %s10241_s5 = sld [smem:[#allocation65_spill]] }
  0x18   : > { %s230_s17 = sshll.u32 %s5225_s16, 4  ;;  %s231_s17 = int_to_ptr.vmem [resolvable:$true] %s230_s17 }
  0x19   : > { %p4270_p11 = pneg %p205_p10 }
  0x1a   : > { %253 = sbr.rel (%p205_p10) target bundleno = 2167 (0x877), region = 48 }
  0x1b   : > { %p4271_p12 = pnand %p4278_p9, %p4270_p11 }
  0x1d   : > { %s228_s15 = sshll.u32 %s10241_s5, 4  ;;  %s229_s15 = int_to_ptr.hbm [resolvable:$true] %s228_s15 }
  0x1e   : > { %4273 = dma.hbm_to_vmem [thread:$0]  (!%p4271_p12), %s229_s15, 128, %s231_s17, [#allocation3]  }
  0x1f   : > { %5202 = dma.done.wait (%p4278_p9), [#allocation3], 128  }
  0x20   : > { %5204 = vsyncadd (%p4278_p9), [#allocation3], 4294967168  ;;  %p285_p13 = scmp.lt.s32.totalorder %s5316_s28, 1  ;;  %s10242_s0 = sld [smem:[#allocation60_spill]]  ;;  %v5234_v5 = vmov 20.0   ;;  %v291_v8 = vlaneseq  ;;  %v10245_v35 = vmov 0 }
  0x21   : > { %s9976_s23 = smov 127   ;;  %s9968_s29 = smov 1   ;;  %5125 = vrcp.f32 %v5234_v5  ;;  %v10252_v43 = vmov 0  ;;  %v10255_v45 = vmov 0  ;;  %v10260_v48 = vmov 0 }
  0x22   : > { %s286_s18 = scalar_select %p285_p13, %s5316_s28, 1  ;;  %v292_v10 = vand.u32 127, %v291_v8  ;;  %v10263_v60 = vmov 0  ;;  %v10265_v61 = vmov 0  ;;  %v10267_v62 = vmov 0 }
  0x23   : > { %s9998_s8 = smov 108   ;;  %s9972_s9 = smov 20   ;;  %v10270_v63 = vmov 0  ;;  %v10276_v8 = vmov 0  ;;  %v10302_v32 = vmov 0 }
  0x24   : > { %s4099_s19 = sshll.u32 %s286_s18, 2  ;;  %s9964_s13 = smov 107   ;;  %v294_v12 = vadd.s32 256, %v292_v10  ;;  %v293_v15 = vadd.s32 128, %v292_v10  ;;  %v296_v18 = vcvt.s32.f32 %v292_v10  ;;  %v295_v20 = vadd.s32 384, %v292_v10 }
  0x25   : > { %s9982_s14 = smov 109   ;;  %s10096_s15 = smov 19  }
  0x26   : > { %s288_s22 = scalar_lea.vmem %s10242_s0, %s4099_s19  ;;  %s10100_s16 = smov 21   ;;  %v298_v14 = vcvt.s32.f32 %v294_v12  ;;  %v297_v19 = vcvt.s32.f32 %v293_v15  ;;  %v299_v24 = vcvt.s32.f32 %v295_v20 }
  0x27   : > { %v5352_v0 = vld [vmem:[%s288_s22] sm:$0xf]  ;;  %v5126_v6 = vpop.eup %5125  ;;  %s9974_s17 = smov 2   ;;  %s9966_s18 = smov 42  }
  0x28   : > { %v377_v1 = vperm.slane %v5352_v0, 2  ;;  %v375_v2 = vperm.slane %v5352_v0, 0  ;;  %v378_v3 = vperm.slane %v5352_v0, 3  ;;  %v376_v4 = vperm.slane %v5352_v0, 1  ;;  %s10104_s19 = smov 41   ;;  %s10094_s20 = smov 40  }
  0x29   : > { %v301_v7 = vmul.f32 20.0, %v5126_v6  ;;  %vm305_vm0 = vweird.f32 %v5126_v6  ;;  %s10098_s21 = smov 39   ;;  %s9970_s22 = smov 38  }
  0x2a   : > { %383 = vrot.lane.b32.xlu1 %v377_v1, %s9976_s23  ;;  %379 = vrot.lane.b32.xlu0 %v375_v2, %s9976_s23  ;;  %s10886_s1 = sld [smem:[#allocation61_spill]]  ;;  %s10980_s0 = smov 40  }
  0x2b   : > { %420 = vrot.lane.b32.xlu2 %v375_v2, %s9968_s29  ;;  %v302_v9 = vsub.f32 1.0, %v301_v7  ;;  %s10922_s2 = sld [smem:[#allocation62_spill]]  ;;  %s10989_s5 = smov 86  }
  0x2c   : > { %s10990_s10 = smov 109   ;;  %s10991_s26 = smov 87  }
  0x2d   : > { %v303_v11 = vmul.f32 %v5126_v6, %v302_v9  ;;  %s11115_s3 = sld [smem:[#allocation63_spill]]  ;;  %s11213_s30 = smov 39  }
  0x2e   : > { %s11191_s4 = sld [smem:[#allocation64_spill]]  ;;  %s11214_s12 = smov 41  }
  0x2f   : > { %v304_v13 = vadd.f32 %v5126_v6, %v303_v11  ;;  %v10280_v11 = vmov 0 }
  0x31   : > { %v306_v16 = vsel %vm305_vm0, %v5126_v6, %v304_v13  ;;  %v10283_v13 = vmov 0 }
  0x32   : > { %385 = vrot.lane.b32.xlu1 %v378_v3, %s9976_s23  ;;  %381 = vrot.lane.b32.xlu0 %v376_v4, %s9976_s23  ;;  %v309_v17 = vmul.f32 %v306_v16, %v298_v14  ;;  %v307_v22 = vmul.f32 %v306_v16, %v296_v18  ;;  %v308_v23 = vmul.f32 %v306_v16, %v297_v19 }
  0x33   : > { %422 = vrot.lane.b32.xlu2 %v376_v4, %s9968_s29  ;;  %v310_v28 = vmul.f32 %v306_v16, %v299_v24 }
  0x34   : > { %v5387_v21 = vfloor.f32 %v309_v17  ;;  %v5390_v26 = vfloor.f32 %v307_v22  ;;  %v5392_v27 = vfloor.f32 %v308_v23 }
  0x35   : > { %v5409_v34 = vfloor.f32 %v310_v28 }
  0x36   : > { %v317_v25 = vmul.f32 20.0, %v5387_v21  ;;  %vm325_vm1 = vcmp.ge.f32.partialorder %v5387_v21, 2.0  ;;  %vm329_vm2 = vcmp.le.f32.partialorder %v5387_v21, 17.0  ;;  %v315_v30 = vmul.f32 20.0, %v5390_v26 }
  0x37   : > { %v316_v31 = vmul.f32 20.0, %v5392_v27  ;;  %vm5400_vm3 = vmand %vm325_vm1, %vm329_vm2  ;;  %vm323_vm5 = vcmp.ge.f32.partialorder %v5390_v26, 2.0  ;;  %vm327_vm6 = vcmp.le.f32.partialorder %v5390_v26, 17.0  ;;  %vm324_vm9 = vcmp.ge.f32.partialorder %v5392_v27, 2.0 }
  0x38   : > { %v5396_v29 = vsub.f32 %v298_v14, %v317_v25  ;;  %vm328_vm10 = vcmp.le.f32.partialorder %v5392_v27, 17.0  ;;  %v5424_v36 = vsub.f32 %v296_v18, %v315_v30  ;;  %vm5426_vm12 = vmand %vm323_vm5, %vm327_vm6  ;;  %v318_v40 = vmul.f32 20.0, %v5409_v34 }
  0x39   : > { %v5430_v38 = vsub.f32 %v297_v19, %v316_v31  ;;  %vm5432_vm13 = vmand %vm324_vm9, %vm328_vm10  ;;  %vm326_vm5 = vcmp.ge.f32.partialorder %v5409_v34, 2.0  ;;  %vm330_vm6 = vcmp.le.f32.partialorder %v5409_v34, 17.0 }
  0x3a   : > { %426 = vrot.lane.b32.xlu1 %v378_v3, %s9968_s29  ;;  %424 = vrot.lane.b32.xlu0 %v377_v1, %s9968_s29  ;;  %vm9858_vm4 = vcmp.ge.f32.partialorder %v5396_v29, 2.0  ;;  %vm9859_vm8 = vcmp.le.f32.partialorder %v5396_v29, 17.0  ;;  %vm9852_vm14 = vcmp.ge.f32.partialorder %v5424_v36, 2.0  ;;  %vm9854_vm2 = vcmp.le.f32.partialorder %v5424_v36, 17.0 }
  0x3b   : > { %456 = vrot.lane.b32.xlu2 %v375_v2, %s9998_s8  ;;  %vm341_vm7 = vmand %vm5400_vm3, %vm9858_vm4  ;;  %vm9853_vm15 = vcmp.ge.f32.partialorder %v5430_v38, 2.0  ;;  %v5459_v44 = vsub.f32 %v299_v24, %v318_v40  ;;  %vm9866_vm4 = vcmask 1039360   ;;  %v10305_v40 = vmov 0 }
  0x3c   : > { %vm5420_vm11 = vmand %vm341_vm7, %vm9859_vm8  ;;  %vm9855_vm7 = vcmp.le.f32.partialorder %v5430_v38, 17.0  ;;  %vm10275_vm8 = vcmp.eq.f32.partialorder %v5430_v38, 1.0 }
  0x3d   : > { %v10246_v35 = vsel %vm5420_vm11, 4294967295, %v10245_v35  ;;  %vm339_vm0 = vmand %vm5426_vm12, %vm9852_vm14 }
  0x3e   : > { %10247 = vst [vmem:[#allocation12_spill] sm:$0xff] %v10246_v35  ;;  %vm340_vm1 = vmand %vm5432_vm13, %vm9853_vm15  ;;  %vm9856_vm15 = vcmp.ge.f32.partialorder %v5459_v44, 2.0 }
  0x3f   : > { %vm5455_vm9 = vmand %vm339_vm0, %vm9854_vm2  ;;  %vm9857_vm2 = vcmp.le.f32.partialorder %v5459_v44, 17.0 }
  0x40   : > { %v10253_v43 = vsel %vm5455_vm9, 4294967295, %v10252_v43  ;;  %vm5463_vm10 = vmand %vm340_vm1, %vm9855_vm7  ;;  %vm9869_vm9 = vcmask 7168  }
  0x41   : > { %10254 = vst [vmem:[#allocation13_spill] sm:$0xff] %v10253_v43  ;;  %v10256_v45 = vsel %vm5463_vm10, 4294967295, %v10255_v45  ;;  %vm5469_vm14 = vmand %vm326_vm5, %vm330_vm6  ;;  %vm9860_vm5 = vcmp.eq.f32.partialorder %v5424_v36, 18.0  ;;  %vm9863_vm6 = vcmp.eq.f32.partialorder %v5430_v38, 18.0 }
  0x42   : > { %460 = vrot.lane.b32.xlu1 %v377_v1, %s9998_s8  ;;  %458 = vrot.lane.b32.xlu0 %v376_v4, %s9998_s8  ;;  %10257 = vst [vmem:[#allocation14_spill] sm:$0xff] %v10256_v45  ;;  %vm342_vm0 = vmand %vm5469_vm14, %vm9856_vm15  ;;  %vm9867_vm15 = vcmask 121856  }
  0x43   : > { %462 = vrot.lane.b32.xlu2 %v378_v3, %s9998_s8  ;;  %vm5481_vm1 = vmand %vm342_vm0, %vm9857_vm2  ;;  %vm9865_vm0 = vcmp.eq.f32.partialorder %v5396_v29, 1.0 }
  0x44   : > { %v10261_v48 = vsel %vm5481_vm1, 4294967295, %v10260_v48  ;;  %vm5504_vm7 = vmand %vm9860_vm5, %vm5426_vm12  ;;  %vm10296_vm1 = vcmp.ge.f32.partialorder %v5430_v38, 2.0 }
  0x45   : > { %10262 = vst [vmem:[#allocation15_spill] sm:$0xff] %v10261_v48  ;;  %v10264_v60 = vsel %vm5504_vm7, 4294967295, %v10263_v60  ;;  %vm5513_vm2 = vmand %vm9863_vm6, %vm5432_vm13  ;;  %vm10269_vm6 = vcmp.eq.f32.partialorder %v5459_v44, 1.0 }
  0x46   : > { %v10266_v61 = vsel %vm5513_vm2, 4294967295, %v10265_v61  ;;  %vm5522_vm5 = vmand %vm9865_vm0, %vm5400_vm3  ;;  %vm10272_vm0 = vcmp.eq.f32.partialorder %v5424_v36, 1.0 }
  0x47   : > { %v10268_v62 = vsel %vm5522_vm5, 4294967295, %v10267_v62  ;;  %vm5531_vm10 = vmand %vm10269_vm6, %vm5469_vm14 }
  0x48   : > { %v10271_v63 = vsel %vm5531_vm10, 4294967295, %v10270_v63  ;;  %vm5545_vm11 = vmand %vm10272_vm0, %vm5426_vm12  ;;  %vm10278_vm12 = vcmask 1039360   ;;  %vm10279_vm0 = vcmp.eq.f32.partialorder %v5396_v29, 18.0 }
  0x49   : > { %vm5573_vm6 = vmand %vm10279_vm0, %vm5400_vm3  ;;  %vm10285_vm3 = vcmp.le.f32.partialorder %v5396_v29, 17.0  ;;  %vm10286_vm0 = vcmp.ge.f32.partialorder %v5396_v29, 2.0 }
  0x4a   : > { %494 = vrot.lane.b32.xlu1 %v376_v4, %s9972_s9  ;;  %492 = vrot.lane.b32.xlu0 %v375_v2, %s9972_s9  ;;  %v10281_v11 = vsel %vm5573_vm6, 4294967295, %v10280_v11 }
  0x4b   : > { %496 = vrot.lane.b32.xlu2 %v377_v1, %s9972_s9 }
  0x52   : > { %527 = vrot.lane.b32.xlu1 %v376_v4, %s9964_s13  ;;  %525 = vrot.lane.b32.xlu0 %v375_v2, %s9964_s13 }
  0x53   : > { %529 = vrot.lane.b32.xlu2 %v377_v1, %s9964_s13 }
  0x5a   : > { %558 = vrot.lane.b32.xlu1 %v375_v2, %s9982_s14  ;;  %531 = vrot.lane.b32.xlu0 %v378_v3, %s9964_s13 }
  0x5b   : > { %560 = vrot.lane.b32.xlu2 %v376_v4, %s9982_s14 }
  0x62   : > { %564 = vrot.lane.b32.xlu1 %v378_v3, %s9982_s14  ;;  %562 = vrot.lane.b32.xlu0 %v377_v1, %s9982_s14 }
  0x63   : > { %592 = vrot.lane.b32.xlu2 %v375_v2, %s10096_s15 }
  0x6a   : > { %596 = vrot.lane.b32.xlu1 %v377_v1, %s10096_s15  ;;  %594 = vrot.lane.b32.xlu0 %v376_v4, %s10096_s15 }
  0x6b   : > { %626 = vrot.lane.b32.xlu2 %v375_v2, %s10100_s16 }
  0x72   : > { %630 = vrot.lane.b32.xlu1 %v377_v1, %s10100_s16  ;;  %628 = vrot.lane.b32.xlu0 %v376_v4, %s10100_s16  ;;  %v10273_v4 = vmov 0 }
  0x73   : > { %v10274_v4 = vsel %vm5545_vm11, 4294967295, %v10273_v4 }
  0x85   : > { %v5407_v33 = vpop.permute.xlu2 %420 }
  0x86   : > { %v5554_v6 = vsel %vm9869_vm9, 0.0, %v5407_v33 }
  0x87   : > { %v437_v14 = vsel %vm5504_vm7, %v5554_v6, 0.0 }
  0x8d   : > { %v5467_v46 = vpop.permute.xlu2 %422 }
  0x8e   : > { %v429_v10 = vsel %vm9869_vm9, %v5407_v33, %v5467_v46  ;;  %vm10289_vm9 = vcmp.le.f32.partialorder %v5459_v44, 17.0 }
  0x8f   : > { %v438_v18 = vsel %vm5513_vm2, %v429_v10, 0.0 }
  0x90   : > { %v5640_v39 = vrot.slane %v438_v18, 7 }
  0x95   : > { %v5485_v51 = vpop.permute.xlu2 %456 }
  0x9c   : > { %v384_v41 = vpop.permute.xlu1 %383  ;;  %v5448_v42 = vpop.permute.xlu0 %379 }
  0x9d   : > { %v463_v54 = vpop.permute.xlu2 %462 }
  0xa4   : > { %v386_v49 = vpop.permute.xlu1 %385  ;;  %v382_v50 = vpop.permute.xlu0 %381 }
  0xa5   : > { %v5491_v57 = vpop.permute.xlu2 %496  ;;  %v390_v3 = vsel %vm9866_vm4, %v384_v41, %v386_v49  ;;  %v396_v7 = vsel %vm9867_vm15, %v386_v49, 0.0  ;;  %vm5561_vm4 = vmand %vm10275_vm8, %vm5432_vm13  ;;  %v389_v9 = vsel %vm10278_vm12, %v382_v50, %v384_v41  ;;  %vm10282_vm8 = vcmp.eq.f32.partialorder %v5459_v44, 18.0 }
  0xa6   : > { %v10277_v8 = vsel %vm5561_vm4, 4294967295, %v10276_v8  ;;  %v399_v12 = vsel %vm5522_vm5, %v390_v3, 0.0  ;;  %vm5583_vm13 = vmand %vm10282_vm8, %vm5469_vm14  ;;  %v400_v15 = vsel %vm5531_vm10, %v396_v7, 0.0  ;;  %v398_v16 = vsel %vm5561_vm4, %v389_v9, 0.0 }
  0xa7   : > { %v10284_v13 = vsel %vm5583_vm13, 4294967295, %v10283_v13  ;;  %vm5598_vm15 = vmand %vm10286_vm0, %vm10285_vm3  ;;  %vm10290_vm12 = vcmp.ge.f32.partialorder %v5459_v44, 2.0  ;;  %v406_v20 = vrot.slane %v399_v12, 6  ;;  %vm10293_vm0 = vcmask 1039360  }
  0xa8   : > { %vm5609_vm4 = vmand %vm10290_vm12, %vm10289_vm9  ;;  %v388_v22 = vsel %vm10293_vm0, %v5448_v42, %v382_v50  ;;  %vm10294_vm14 = vcmask 883712   ;;  %vm10295_vm8 = vcmp.le.f32.partialorder %v5430_v38, 17.0  ;;  %vm9876_vm9 = vcmp.eq.f32.partialorder %v5392_v27, 1.0 }
  0xa9   : > { %vm5622_vm2 = vmand %vm10296_vm1, %vm10295_vm8  ;;  %v407_v25 = vrot.slane %v400_v15, 5  ;;  %v405_v28 = vrot.slane %v398_v16, 7  ;;  %vm10299_vm12 = vcmask 7168   ;;  %v10308_v42 = vmov 0 }
  0xaa   : > { %vm10300_vm3 = vmmov %vm10299_vm12  ;;  %vm10310_vm1 = vcmask 883712   ;;  %v397_v47 = vsel %vm5545_vm11, %v388_v22, 0.0  ;;  %vm10316_vm8 = vcmask 1040384   ;;  %vm10317_vm11 = vcmp.eq.f32.partialorder %v5387_v21, 18.0 }
  0xab   : > { %vm5657_vm5 = vmand %vm9876_vm9, %vm5622_vm2  ;;  %v10318_v3 = vmov 0  ;;  %v10322_v15 = vmov 0 }
  0xac   : > { %v427_v52 = vpop.permute.xlu1 %426  ;;  %v425_v53 = vpop.permute.xlu0 %424  ;;  %v10309_v42 = vsel %vm5657_vm5, 4294967295, %v10308_v42 }
  0xad   : > { %v5550_v5 = vpop.permute.xlu2 %529  ;;  %v430_v30 = vsel %vm10299_vm12, %v5467_v46, %v425_v53  ;;  %v431_v31 = vsel %vm10300_vm3, %v425_v53, %v427_v52  ;;  %vm10304_vm3 = vcmp.eq.f32.partialorder %v5409_v34, 18.0 }
  0xae   : > { %vm5648_vm12 = vmand %vm10304_vm3, %vm5609_vm4  ;;  %v439_v49 = vsel %vm5573_vm6, %v430_v30, 0.0  ;;  %v440_v50 = vsel %vm5583_vm13, %v431_v31, 0.0  ;;  %vm10311_vm3 = vcmp.le.f32.partialorder %v5424_v36, 17.0  ;;  %vm10315_vm4 = vcmask 1042434  }
  0xaf   : > { %v10306_v40 = vsel %vm5648_vm12, 4294967295, %v10305_v40  ;;  %vm5688_vm6 = vmand %vm10317_vm11, %vm5598_vm15  ;;  %v509_v7 = vsel %vm5648_vm12, %v5491_v57, 0.0  ;;  %vm10321_vm11 = vcmp.eq.f32.partialorder %v5392_v27, 18.0  ;;  %v446_v17 = vrot.slane %v439_v49, 6 }
  0xb0   : > { %v10319_v3 = vsel %vm5688_vm6, 4294967295, %v10318_v3  ;;  %v447_v18 = vrot.slane %v440_v50, 5 }
  0xb4   : > { %v5487_v55 = vpop.permute.xlu1 %460  ;;  %v5489_v56 = vpop.permute.xlu0 %458 }
  0xb5   : > { %v467_v23 = vsel %vm10294_vm14, %v5487_v55, %v463_v54  ;;  %vm10301_vm14 = vcmp.eq.f32.partialorder %v5387_v21, 1.0  ;;  %v466_v46 = vsel %vm10310_vm1, %v5489_v56, %v5487_v55  ;;  %v5680_v53 = vpop.permute.xlu2 %560  ;;  %v411_v54 = vsel %vm10315_vm4, %v406_v20, %v407_v25 }
  0xb6   : > { %vm5634_vm0 = vmand %vm10301_vm14, %vm5598_vm15  ;;  %vm10307_vm14 = vcmask 1014784   ;;  %v409_v55 = vsel %vm10316_vm8, %v397_v47, %v405_v28  ;;  %v474_v10 = vsel %vm5657_vm5, %v466_v46, 0.0  ;;  %vm10320_vm8 = vcmask 162816  }
  0xb7   : > { %v10303_v32 = vsel %vm5634_vm0, 4294967295, %v10302_v32  ;;  %v472_v41 = vsel %vm10307_vm14, %v467_v23, 0.0  ;;  %vm10312_vm14 = vcmp.ge.f32.partialorder %v5424_v36, 2.0  ;;  %vm5706_vm15 = vmand %vm10321_vm11, %vm5622_vm2  ;;  %v9910_v20 = vmov 0.0  }
  0xb8   : > { %vm5675_vm9 = vmand %vm10312_vm14, %vm10311_vm3  ;;  %vm9881_vm3 = vcmask 875520   ;;  %v475_v9 = vsel %vm5634_vm0, %v472_v41, 0.0  ;;  %v10323_v15 = vsel %vm5706_vm15, 4294967295, %v10322_v15  ;;  %vm10325_vm14 = vcmp.eq.f32.partialorder %v5390_v26, 1.0 }
  0xb9   : > { %vm10324_vm4 = vmmov %vm10320_vm8  ;;  %v5724_v22 = vrot.slane %v9910_v20, 5  ;;  %vm10328_vm2 = vcmask 883712   ;;  %vm10329_vm11 = vcmp.eq.f32.partialorder %v5390_v26, 18.0  ;;  %v10330_v23 = vmov 0 }
  0xba   : > { %vm5717_vm1 = vmand %vm10325_vm14, %vm5675_vm9  ;;  %v481_v24 = vrot.slane %v475_v9, 6  ;;  %v480_v25 = vrot.slane %v474_v10, 7  ;;  %v516_v41 = vrot.slane %v509_v7, 5  ;;  %v10340_v46 = vmov 0 }
  0xbc   : > { %v5493_v58 = vpop.permute.xlu1 %494  ;;  %v5495_v59 = vpop.permute.xlu0 %492 }
  0xbd   : > { %v500_v12 = vsel %vm10320_vm8, %v5493_v58, %v5491_v57  ;;  %v499_v16 = vsel %vm10324_vm4, %v5495_v59, %v5493_v58  ;;  %v10326_v57 = vmov 0  ;;  %v465_v58 = vsel %vm10328_vm2, %v5485_v51, %v5489_v56  ;;  %vm5733_vm4 = vmand %vm10329_vm11, %vm5675_vm9 }
  0xbe   : > { %v10327_v57 = vsel %vm5717_vm1, 4294967295, %v10326_v57  ;;  %v10331_v23 = vsel %vm5733_vm4, 4294967295, %v10330_v23  ;;  %v508_v28 = vsel %vm5688_vm6, %v500_v12, 0.0  ;;  %v507_v30 = vsel %vm5706_vm15, %v499_v16, 0.0 }
  0xbf   : > { %vm10332_vm2 = vcmp.eq.f32.partialorder %v5430_v38, 1.0  ;;  %v10334_v51 = vmov 0  ;;  %vm10337_vm9 = vcmask 1041408   ;;  %vm10338_vm11 = vcmp.eq.f32.partialorder %v5396_v29, 1.0 }
  0xc0   : > { %vm10339_vm8 = vcmp.eq.f32.partialorder %v5387_v21, 1.0  ;;  %vm10342_vm15 = vcmask 1006592   ;;  %vm10343_vm6 = vcmask 891904   ;;  %v473_v52 = vsel %vm5717_vm1, %v465_v58, 0.0 }
  0xc1   : > { %vm5754_vm14 = vmand %vm10339_vm8, %vm10338_vm11  ;;  %vm10347_vm8 = vcmp.eq.f32.partialorder %v5392_v27, 1.0  ;;  %v515_v9 = vrot.slane %v508_v28, 6  ;;  %v514_v12 = vrot.slane %v507_v30, 7 }
  0xc2   : > { %v10341_v46 = vsel %vm5754_vm14, 4294967295, %v10340_v46 }
  0xc4   : > { %v5536_v1 = vpop.permute.xlu1 %527  ;;  %v5538_v2 = vpop.permute.xlu0 %525 }
  0xcc   : > { %v5638_v33 = vpop.permute.xlu1 %558  ;;  %v532_v37 = vpop.permute.xlu0 %531 }
  0xcd   : > { %v536_v19 = vsel %vm9881_vm3, %v5550_v5, %v532_v37  ;;  %vm10333_vm3 = vcmp.eq.f32.partialorder %v5392_v27, 1.0  ;;  %v413_v37 = vsel %vm10337_vm9, %v409_v55, %v411_v54  ;;  %vm10346_vm9 = vcmp.eq.f32.partialorder %v5430_v38, 18.0 }
  0xce   : > { %vm5745_vm5 = vmand %vm10333_vm3, %vm10332_vm2  ;;  %v541_v47 = vsel %vm10342_vm15, %v536_v19, 0.0  ;;  %vm10344_vm3 = vcmask 1042434   ;;  %vm10345_vm2 = vcmask 875520   ;;  %v10348_v55 = vmov 0 }
  0xcf   : > { %v10335_v51 = vsel %vm5745_vm5, 4294967295, %v10334_v51  ;;  %v449_v50 = vsel %vm10344_vm3, %v446_v17, %v447_v18  ;;  %v535_v54 = vsel %vm10345_vm2, %v5536_v1, %v5550_v5  ;;  %vm5770_vm11 = vmand %vm10347_vm8, %vm10346_vm9  ;;  %vm10353_vm3 = vcmp.eq.f32.partialorder %v5396_v29, 18.0  ;;  %v593_v17 = vpop.permute.xlu2 %592 }
  0xd0   : > { %10336 = vst [vmem:[#allocation16_spill] sm:$0xff] %v10335_v51  ;;  %v10349_v55 = vsel %vm5770_vm11, 4294967295, %v10348_v55  ;;  %vm10351_vm15 = vmmov %vm10343_vm6  ;;  %vm10354_vm2 = vcmp.eq.f32.partialorder %v5387_v21, 1.0  ;;  %v10355_v5 = vmov 0  ;;  %vm10357_vm9 = vcmask 1022976  }
  0xd1   : > { %10350 = vst [vmem:[#allocation17_spill] sm:$0xff] %v10349_v55  ;;  %vm5782_vm1 = vmand %vm10354_vm2, %vm10353_vm3  ;;  %vm10358_vm8 = vcmask 1042434   ;;  %v415_v28 = vadd.f32 %v413_v37, %v5352_v0  ;;  %v543_v30 = vsel %vm5745_vm5, %v535_v54, 0.0  ;;  %vm10361_vm3 = vcmp.eq.f32.partialorder %v5459_v44, 1.0 }
  0xd2   : > { %v10356_v5 = vsel %vm5782_vm1, 4294967295, %v10355_v5  ;;  %v484_v18 = vsel %vm10358_vm8, %v481_v24, %v5724_v22  ;;  %vm10362_vm2 = vcmp.eq.f32.partialorder %v5409_v34, 18.0  ;;  %vm10365_vm8 = vcmask 1041408  }
  0xd4   : > { %v565_v56 = vpop.permute.xlu1 %564  ;;  %v563_v31 = vpop.permute.xlu0 %562 }
  0xd5   : > { %v569_v49 = vsel %vm10343_vm6, %v563_v31, %v565_v56  ;;  %v568_v7 = vsel %vm10351_vm15, %v5680_v53, %v563_v31  ;;  %vm10352_vm6 = vcmask 162816   ;;  %vm10359_vm15 = vcmask 1040384  }
  0xd6   : > { %v505_v10 = vsel %vm10352_vm6, 0.0, %v5495_v59  ;;  %v574_v16 = vsel %vm10357_vm9, %v569_v49, 0.0  ;;  %v483_v19 = vsel %vm10359_vm15, %v473_v52, %v480_v25  ;;  %v544_v59 = vsel %vm5754_vm14, %v541_v47, 0.0  ;;  %vm10360_vm6 = vmmov %vm10359_vm15 }
  0xd7   : > { %v448_v58 = vsel %vm10360_vm6, %v437_v14, %v5640_v39  ;;  %v576_v24 = vsel %vm5770_vm11, %v568_v7, 0.0  ;;  %vm5807_vm9 = vmand %vm10362_vm2, %vm10361_vm3  ;;  %v10363_v25 = vmov 0  ;;  %v506_v14 = vsel %vm5733_vm4, %v505_v10, 0.0 }
  0xd8   : > { %v10364_v25 = vsel %vm5807_vm9, 4294967295, %v10363_v25  ;;  %v450_v6 = vsel %vm10365_vm8, %v448_v58, %v449_v50  ;;  %v577_v0 = vsel %vm5782_vm1, %v574_v16, 0.0  ;;  %vm10366_vm6 = vcmp.eq.f32.partialorder %v5430_v38, 1.0  ;;  %vm10371_vm3 = vmmov %vm10365_vm8 }
  0xd9   : > { %vm10367_vm11 = vcmp.eq.f32.partialorder %v5392_v27, 18.0  ;;  %v10368_v39 = vmov 0  ;;  %v485_v56 = vsel %vm10371_vm3, %v483_v19, %v484_v18  ;;  %vm10372_vm2 = vcmask 1042434   ;;  %vm10373_vm8 = vmmov %vm10359_vm15 }
  0xda   : > { %vm5820_vm5 = vmand %vm10367_vm11, %vm10366_vm6  ;;  %v518_v31 = vsel %vm10372_vm2, %v515_v9, %v516_v41  ;;  %v517_v37 = vsel %vm10373_vm8, %v506_v14, %v514_v12  ;;  %v549_v47 = vrot.slane %v544_v59, 6  ;;  %vm10374_vm4 = vcmp.eq.f32.partialorder %v5396_v29, 1.0 }
  0xdb   : > { %v10369_v39 = vsel %vm5820_vm5, 4294967295, %v10368_v39  ;;  %vm10375_vm1 = vcmp.eq.f32.partialorder %v5387_v21, 18.0  ;;  %v10376_v49 = vmov 0  ;;  %v548_v50 = vrot.slane %v543_v30, 7 }
  0xdc   : > { %10370 = vst [vmem:[#allocation18_spill] sm:$0xff] %v10369_v39  ;;  %vm5831_vm15 = vmand %vm10375_vm1, %vm10374_vm4  ;;  %vm10378_vm11 = vcmp.eq.f32.partialorder %v5424_v36, 1.0  ;;  %vm10379_vm6 = vcmp.eq.f32.partialorder %v5390_v26, 1.0  ;;  %v10380_v52 = vmov 0  ;;  %vm10382_vm3 = vcmask 875520   ;;  %v597_v9 = vpop.permute.xlu1 %596  ;;  %v595_v10 = vpop.permute.xlu0 %594 }
  0xdd   : > { %v10377_v49 = vsel %vm5831_vm15, 4294967295, %v10376_v49  ;;  %vm5839_vm7 = vmand %vm10379_vm6, %vm10378_vm11  ;;  %v534_v41 = vsel %vm10382_vm3, %v5538_v2, %v5536_v1  ;;  %vm10383_vm2 = vcmask 891904   ;;  %v581_v7 = vrot.slane %v576_v24, 7 }
  0xde   : > { %v10381_v52 = vsel %vm5839_vm7, 4294967295, %v10380_v52  ;;  %v567_v54 = vsel %vm10383_vm2, %v5638_v33, %v5680_v53  ;;  %vm10384_vm1 = vcmp.eq.f32.partialorder %v5424_v36, 18.0  ;;  %vm10385_vm4 = vmmov %vm10379_vm6  ;;  %v10386_v12 = vmov 0 }
  0xdf   : > { %vm5853_vm8 = vmand %vm10385_vm4, %vm10384_vm1  ;;  %v582_v16 = vrot.slane %v577_v0, 6  ;;  %v609_v18 = vsel %vm5807_vm9, %v597_v9, 0.0  ;;  %vm10389_vm11 = vcmask 154624   ;;  %v452_v33 = vadd.f32 %v450_v6, %v415_v28 }
  0xe0   : > { %v10387_v12 = vsel %vm5853_vm8, 4294967295, %v10386_v12  ;;  %v599_v1 = vsel %vm10389_vm11, %v593_v17, %v595_v10  ;;  %vm10390_vm6 = vmmov %vm10389_vm11  ;;  %vm10392_vm2 = vcmask 1042434   ;;  %v616_v30 = vrot.slane %v609_v18, 5 }
  0xe1   : > { %10388 = vst [vmem:[#allocation19_spill] sm:$0xff] %v10387_v12  ;;  %v600_v2 = vsel %vm10390_vm6, %v595_v10, %v597_v9  ;;  %vm10391_vm3 = vmmov %vm10390_vm6  ;;  %v607_v19 = vsel %vm5820_vm5, %v599_v1, 0.0  ;;  %v551_v58 = vsel %vm10392_vm2, %v549_v47, %v5724_v22  ;;  %vm10393_vm1 = vcmp.eq.f32.partialorder %v5424_v36, 1.0 }
  0xe2   : > { %v605_v53 = vsel %vm10391_vm3, 0.0, %v593_v17  ;;  %v608_v59 = vsel %vm5831_vm15, %v600_v2, 0.0  ;;  %vm10394_vm4 = vcmp.eq.f32.partialorder %v5390_v26, 18.0  ;;  %v10395_v24 = vmov 0 }
  0xe3   : > { %vm5872_vm11 = vmand %vm10394_vm4, %vm10393_vm1  ;;  %v614_v28 = vrot.slane %v607_v19, 7  ;;  %v615_v17 = vrot.slane %v608_v59, 6  ;;  %v487_v6 = vadd.f32 %v485_v56, %v452_v33  ;;  %vm10398_vm6 = vcmask 1041408  }
  0xe4   : > { %v10396_v24 = vsel %vm5872_vm11, 4294967295, %v10395_v24  ;;  %v519_v14 = vsel %vm10398_vm6, %v517_v37, %v518_v31  ;;  %v542_v0 = vsel %vm5839_vm7, %v534_v41, 0.0  ;;  %v575_v47 = vsel %vm5853_vm8, %v567_v54, 0.0  ;;  %v627_v31 = vpop.permute.xlu2 %626  ;;  %vm10406_vm7 = vmmov %vm10398_vm6 }
  0xe5   : > { %10397 = vst [vmem:[#allocation20_spill] sm:$0xff] %v10396_v24  ;;  %vm10399_vm3 = vcmask 1040384   ;;  %vm10401_vm1 = vcmask 1042434   ;;  %vm10402_vm4 = vcmp.eq.f32.partialorder %v5459_v44, 18.0  ;;  %vm10403_vm5 = vcmp.eq.f32.partialorder %v5409_v34, 18.0 }
  0xe6   : > { %v550_v9 = vsel %vm10399_vm3, %v542_v0, %v548_v50  ;;  %vm10400_vm2 = vmmov %vm10399_vm3  ;;  %v584_v18 = vsel %vm10401_vm1, %v582_v16, %v5724_v22  ;;  %v10404_v56 = vmov 0  ;;  %v606_v50 = vsel %vm5872_vm11, %v605_v53, 0.0  ;;  %v629_v16 = vpop.permute.xlu0 %628 }
  0xe7   : > { %v583_v10 = vsel %vm10400_vm2, %v575_v47, %v581_v7  ;;  %vm5889_vm15 = vmand %vm10403_vm5, %vm10402_vm4  ;;  %v552_v37 = vsel %vm10406_vm7, %v550_v9, %v551_v58  ;;  %vm10407_vm3 = vcmp.eq.f32.partialorder %v5430_v38, 18.0  ;;  %vm10408_vm2 = vcmp.eq.f32.partialorder %v5392_v27, 18.0  ;;  %v631_v27 = vpop.permute.xlu1 %630 }
  0xe8   : > { %v10405_v56 = vsel %vm5889_vm15, 4294967295, %v10404_v56  ;;  %vm5900_vm1 = vmand %vm10408_vm2, %vm10407_vm3  ;;  %v10409_v22 = vmov 0  ;;  %v521_v34 = vadd.f32 %v519_v14, %v487_v6  ;;  %vm10412_vm5 = vcmask 1040384  }
  0xe9   : > { %v10410_v22 = vsel %vm5900_vm1, 4294967295, %v10409_v22  ;;  %v617_v44 = vsel %vm10412_vm5, %v606_v50, %v614_v28  ;;  %vm10413_vm4 = vcmask 1042434   ;;  %vm10414_vm6 = vcmp.eq.f32.partialorder %v5396_v29, 18.0 }
  0xea   : > { %10411 = vst [vmem:[#allocation21_spill] sm:$0xff] %v10410_v22  ;;  %v618_v41 = vsel %vm10413_vm4, %v615_v17, %v616_v30  ;;  %vm10415_vm7 = vcmp.eq.f32.partialorder %v5387_v21, 18.0  ;;  %v10416_v54 = vmov 0  ;;  %vm10419_vm11 = vcmask 1041408  }
  0xeb   : > { %vm5910_vm8 = vmand %vm10415_vm7, %vm10414_vm6  ;;  %v585_v38 = vsel %vm10419_vm11, %v583_v10, %v584_v18  ;;  %vm10420_vm3 = vcmask 171008   ;;  %v554_v1 = vadd.f32 %v552_v37, %v521_v34  ;;  %v643_v2 = vsel %vm5889_vm15, %v631_v27, 0.0 }
  0xec   : > { %v10417_v54 = vsel %vm5910_vm8, 4294967295, %v10416_v54  ;;  %v639_v7 = vsel %vm10420_vm3, 0.0, %v627_v31  ;;  %vm10421_vm2 = vcmp.eq.f32.partialorder %v5424_v36, 18.0  ;;  %vm10422_vm5 = vcmp.eq.f32.partialorder %v5390_v26, 18.0  ;;  %vm10426_vm6 = vmmov %vm10420_vm3 }
  0xed   : > { %10418 = vst [vmem:[#allocation22_spill] sm:$0xff] %v10417_v54  ;;  %vm5922_vm4 = vmand %vm10422_vm5, %vm10421_vm2  ;;  %v10423_v21 = vmov 0  ;;  %v633_v29 = vsel %vm10426_vm6, %v627_v31, %v629_v16  ;;  %v619_v53 = vsel %vm10419_vm11, %v617_v44, %v618_v41  ;;  %v650_v19 = vrot.slane %v643_v2, 5 }
  0xee   : > { %v10424_v21 = vsel %vm5922_vm4, 4294967295, %v10423_v21  ;;  %vm10427_vm7 = vmmov %vm10420_vm3  ;;  %v641_v59 = vsel %vm5900_vm1, %v633_v29, 0.0  ;;  %v587_v36 = vadd.f32 %v585_v38, %v554_v1  ;;  %v640_v28 = vsel %vm5922_vm4, %v639_v7, 0.0 }
  0xef   : > { %10425 = vst [vmem:[#allocation23_spill] sm:$0xff] %v10424_v21  ;;  %v634_v33 = vsel %vm10427_vm7, %v629_v16, %v631_v27  ;;  %v648_v30 = vrot.slane %v641_v59, 7  ;;  %vm10428_vm3 = vcmask 1040384   ;;  %vm10429_vm2 = vcmask 1042434   ;;  %vm10430_vm5 = vmmov %vm10419_vm11 }
  0xf0   : > { %v642_v58 = vsel %vm5910_vm8, %v634_v33, 0.0  ;;  %v621_v17 = vadd.f32 %v619_v53, %v587_v36  ;;  %vm10431_vm6 = vcmask 7168   ;;  %vm10432_vm7 = vcmask 121856  }
  0xf1   : > { %v649_v26 = vrot.slane %v642_v58, 6  ;;  %v651_v6 = vsel %vm10428_vm3, %v640_v28, %v648_v30  ;;  %vm10433_vm11 = vcmask 891904   ;;  %vm10434_vm3 = vcmask 171008  }
  0xf2   : > { %vm10443_vm1 = vcmask 883712  }
  0xf3   : > { %v652_v14 = vsel %vm10429_vm2, %v649_v26, %v650_v19  ;;  %vm10435_vm2 = vnez %v10261_v48 }
  0xf4   : > { %v653_v0 = vsel %vm10430_vm5, %v651_v6, %v652_v14  ;;  %vm10437_vm5 = vcmask 1022976  }
  0xf5   : > { %v655_v47 = vadd.f32 %v653_v0, %v621_v17 }
  0xf7   : > { %v657_v9 = vperm.slane %v655_v47, 0  ;;  %v658_v10 = vperm.slane %v655_v47, 1  ;;  %v659_v18 = vperm.slane %v655_v47, 2  ;;  %v699_v31 = vperm.slane %v655_v47, 3 }
  0xf9   : > { %664 = vrot.lane.b32.xlu1 %v659_v18, %s10100_s16  ;;  %662 = vrot.lane.b32.xlu0 %v658_v10, %s10100_s16 }
  0xfa   : > { %660 = vrot.lane.b32.xlu2 %v657_v9, %s10100_s16 }
 0x101   : > { %677 = vrot.lane.b32.xlu1 %v659_v18, %s9972_s9  ;;  %675 = vrot.lane.b32.xlu0 %v658_v10, %s9972_s9 }
 0x102   : > { %673 = vrot.lane.b32.xlu2 %v657_v9, %s9972_s9 }
 0x109   : > { %690 = vrot.lane.b32.xlu1 %v659_v18, %s10096_s15  ;;  %688 = vrot.lane.b32.xlu0 %v658_v10, %s10096_s15 }
 0x10a   : > { %686 = vrot.lane.b32.xlu2 %v657_v9, %s10096_s15 }
 0x111   : > { %704 = vrot.lane.b32.xlu1 %v659_v18, %s9968_s29  ;;  %702 = vrot.lane.b32.xlu0 %v658_v10, %s9968_s29 }
 0x112   : > { %700 = vrot.lane.b32.xlu2 %v657_v9, %s9968_s29 }
 0x119   : > { %718 = vrot.lane.b32.xlu1 %v658_v10, %s9976_s23  ;;  %716 = vrot.lane.b32.xlu0 %v657_v9, %s9976_s23 }
 0x11a   : > { %706 = vrot.lane.b32.xlu2 %v699_v31, %s9968_s29 }
 0x121   : > { %732 = vrot.lane.b32.xlu1 %v657_v9, %s9982_s14  ;;  %722 = vrot.lane.b32.xlu0 %v699_v31, %s9976_s23 }
 0x122   : > { %720 = vrot.lane.b32.xlu2 %v659_v18, %s9976_s23 }
 0x129   : > { %738 = vrot.lane.b32.xlu1 %v699_v31, %s9982_s14  ;;  %736 = vrot.lane.b32.xlu0 %v659_v18, %s9982_s14 }
 0x12a   : > { %734 = vrot.lane.b32.xlu2 %v658_v10, %s9982_s14 }
 0x131   : > { %751 = vrot.lane.b32.xlu1 %v659_v18, %s9998_s8  ;;  %749 = vrot.lane.b32.xlu0 %v658_v10, %s9998_s8 }
 0x132   : > { %747 = vrot.lane.b32.xlu2 %v657_v9, %s9998_s8 }
 0x139   : > { %764 = vrot.lane.b32.xlu1 %v658_v10, %s9964_s13  ;;  %762 = vrot.lane.b32.xlu0 %v657_v9, %s9964_s13 }
 0x13a   : > { %753 = vrot.lane.b32.xlu2 %v699_v31, %s9998_s8 }
 0x141   : > { %768 = vrot.lane.b32.xlu0 %v699_v31, %s9964_s13 }
 0x142   : > { %766 = vrot.lane.b32.xlu2 %v659_v18, %s9964_s13 }
 0x154   : > { %v5967_v37 = vpop.permute.xlu2 %660 }
 0x15c   : > { %v5969_v50 = vpop.permute.xlu2 %673 }
 0x164   : > { %v687_v34 = vpop.permute.xlu2 %686 }
 0x16b   : > { %v665_v44 = vpop.permute.xlu1 %664  ;;  %v663_v41 = vpop.permute.xlu0 %662 }
 0x16c   : > { %v701_v38 = vpop.permute.xlu2 %700  ;;  %v807_v10 = vsub.f32 0.0, %v665_v44 }
 0x173   : > { %v5971_v27 = vpop.permute.xlu1 %677  ;;  %v5973_v7 = vpop.permute.xlu0 %675 }
 0x174   : > { %v707_v16 = vpop.permute.xlu2 %706  ;;  %v811_v36 = vsub.f32 0.0, %v5971_v27 }
 0x176   : > { %v815_v0 = vmul.f32 2.0, %v811_v36 }
 0x178   : > { %v819_v20 = vadd.f32 %v815_v0, %v807_v10 }
 0x17b   : > { %v5975_v1 = vpop.permute.xlu1 %690  ;;  %v5977_v2 = vpop.permute.xlu0 %688 }
 0x17c   : > { %v721_v29 = vpop.permute.xlu2 %720  ;;  %v780_v47 = vsub.f32 %v5975_v1, %v665_v44  ;;  %v823_v18 = vsub.f32 0.0, %v5975_v1 }
 0x183   : > { %v705_v33 = vpop.permute.xlu1 %704  ;;  %v703_v53 = vpop.permute.xlu0 %702 }
 0x184   : > { %v5979_v58 = vpop.permute.xlu2 %734  ;;  %v710_v28 = vsel %vm10431_vm6, %v705_v33, %v707_v16  ;;  %v5992_v16 = vsel %vm10434_vm3, %v663_v41, %v665_v44  ;;  %vm10438_vm6 = vcmask 1039360  }
 0x18b   : > { %v719_v19 = vpop.permute.xlu1 %718  ;;  %v717_v59 = vpop.permute.xlu0 %716 }
 0x18c   : > { %v5986_v14 = vpop.permute.xlu2 %747 }
 0x193   : > { %v5982_v30 = vpop.permute.xlu1 %732  ;;  %v723_v26 = vpop.permute.xlu0 %722 }
 0x194   : > { %v731_v17 = vsel %vm10432_vm7, %v723_v26, 0.0  ;;  %vm10439_vm7 = vmmov %vm10438_vm6 }
 0x195   : > { %v784_v6 = vsub.f32 %v731_v17, %v710_v28  ;;  %v827_v28 = vadd.f32 %v823_v18, %v819_v20  ;;  %v725_v20 = vsel %vm10438_vm6, %v719_v19, %v721_v29  ;;  %vm10444_vm6 = vcmask 154624  }
 0x197   : > { %v788_v9 = vmul.f32 2.0, %v784_v6  ;;  %v831_v44 = vmul.f32 0.125, %v827_v28  ;;  %v6025_v28 = vsel %vm10444_vm6, 0.0, %v687_v34 }
 0x199   : > { %v792_v31 = vadd.f32 %v788_v9, %v780_v47 }
 0x19b   : > { %v803_v22 = vmul.f32 0.125, %v792_v31  ;;  %v739_v21 = vpop.permute.xlu1 %738  ;;  %v737_v39 = vpop.permute.xlu0 %736 }
 0x19c   : > { %v742_v24 = vsel %vm10433_vm11, %v737_v39, %v739_v21  ;;  %v754_v21 = vpop.permute.xlu2 %753  ;;  %vm10440_vm11 = vcmask 7168  }
 0x19d   : > { %v5996_v36 = vsel %vm10435_vm2, %v803_v22, 0.0  ;;  %v5999_v17 = vsel %vm10437_vm5, %v742_v24, 0.0  ;;  %v724_v22 = vsel %vm10439_vm7, %v717_v59, %v719_v19  ;;  %v715_v24 = vsel %vm10440_vm11, 0.0, %v701_v38  ;;  %vm10441_vm3 = vmmov %vm10440_vm11 }
 0x19e   : > { %10436 = vst [vmem:[#allocation24_spill] sm:$0xff] %v5996_v36  ;;  %898 = vrot.lane.b32.xlu0 %v5996_v36, %s9998_s8  ;;  %874 = vrot.lane.b32.xlu2 %v5996_v36, %s9968_s29  ;;  %v708_v0 = vsel %vm10441_vm3, %v701_v38, %v703_v53  ;;  %v781_v9 = vsub.f32 %v724_v22, %v715_v24  ;;  %vm10442_vm5 = vcmask 162816   ;;  %v6022_v19 = vsel %vm10435_vm2, %v831_v44, 0.0  ;;  %vm10445_vm7 = vmmov %vm10444_vm6 }
 0x19f   : > { %850 = vrot.lane.b32.xlu1 %v5996_v36, %s9976_s23  ;;  %v782_v47 = vsub.f32 %v725_v20, %v708_v0  ;;  %v679_v31 = vsel %vm10442_vm5, %v5969_v50, %v5973_v7  ;;  %v692_v38 = vsel %vm10445_vm7, %v687_v34, %v5977_v2  ;;  %vm10448_vm3 = vcmask 891904  }
 0x1a0   : > { %v785_v22 = vmul.f32 2.0, %v781_v9  ;;  %v741_v34 = vsel %vm10448_vm3, %v5979_v58, %v737_v39  ;;  %vm10449_vm5 = vcmask 883712   ;;  %vm10450_vm6 = vcmask 1039360  }
 0x1a1   : > { %v786_v20 = vmul.f32 2.0, %v782_v47  ;;  %v726_v9 = vsel %vm10450_vm6, %v721_v29, %v723_v26  ;;  %vm10451_vm7 = vcmask 162816   ;;  %v740_v51 = vsel %vm10448_vm3, %v5982_v30, %v5979_v58 }
 0x1a2   : > { %v680_v48 = vsel %vm10451_vm7, %v5973_v7, %v5971_v27  ;;  %vm10456_vm7 = vcmask 154624   ;;  %vm10460_vm3 = vcmask 1006592   ;;  %vm10474_vm2 = vcmask 883712  }
 0x1a3   : > { %v752_v10 = vpop.permute.xlu1 %751  ;;  %v6013_v18 = vpop.permute.xlu0 %749 }
 0x1a4   : > { %v756_v6 = vsel %vm10443_vm1, %v6013_v18, %v752_v10  ;;  %vm10446_vm1 = vcmask 171008   ;;  %v757_v24 = vsel %vm10449_vm5, %v752_v10, %v754_v21  ;;  %v767_v55 = vpop.permute.xlu2 %766  ;;  %vm10454_vm5 = vcmask 875520  }
 0x1a5   : > { %v809_v59 = vsub.f32 %v756_v6, %v679_v31  ;;  %v6037_v6 = vsel %vm10446_vm1, 0.0, %v5967_v37  ;;  %vm10447_vm11 = vmmov %vm10446_vm1  ;;  %vm10452_vm1 = vcmask 7168  }
 0x1a6   : > { %1238 = vrot.lane.b32.xlu0 %v6022_v19, %s9968_s29  ;;  %963 = vrot.lane.b32.xlu2 %v5996_v36, %s9982_s14  ;;  %v666_v44 = vsel %vm10447_vm11, %v5967_v37, %v663_v41  ;;  %v777_v0 = vsub.f32 %v6025_v28, %v6037_v6  ;;  %v709_v54 = vsel %vm10452_vm1, %v703_v53, %v705_v33  ;;  %vm10453_vm11 = vcmask 1014784   ;;  %vm10455_vm6 = vmmov %vm10454_vm5 }
 0x1a7   : > { %941 = vrot.lane.b32.xlu1 %v5996_v36, %s9964_s13  ;;  %v778_v47 = vsub.f32 %v692_v38, %v666_v44  ;;  %v813_v31 = vmul.f32 2.0, %v809_v59  ;;  %v805_v12 = vsub.f32 %v741_v34, %v666_v44  ;;  %v761_v39 = vsel %vm10453_vm11, %v757_v24, 0.0  ;;  %vm10457_vm1 = vmmov %vm10454_vm5 }
 0x1a8   : > { %v789_v41 = vadd.f32 %v785_v22, %v777_v0  ;;  %v783_v29 = vsub.f32 %v726_v9, %v709_v54  ;;  %v693_v54 = vsel %vm10456_vm7, %v5977_v2, %v5975_v1  ;;  %vm10458_vm11 = vnez %v10256_v45 }
 0x1a9   : > { %v790_v37 = vadd.f32 %v786_v20, %v778_v47  ;;  %v817_v27 = vadd.f32 %v813_v31, %v805_v12  ;;  %v810_v20 = vsub.f32 %v761_v39, %v680_v48  ;;  %v10463_v2 = vsub.f32 %v5999_v17, %v5992_v16 }
 0x1aa   : > { %v787_v58 = vmul.f32 2.0, %v783_v29  ;;  %vm10466_vm7 = vcmask 883712  }
 0x1ab   : > { %v765_v21 = vpop.permute.xlu1 %764  ;;  %v763_v10 = vpop.permute.xlu0 %762  ;;  %v814_v12 = vmul.f32 2.0, %v810_v20 }
 0x1ac   : > { %v771_v26 = vsel %vm10454_vm5, %v765_v21, %v767_v55  ;;  %v770_v59 = vsel %vm10455_vm6, %v763_v10, %v765_v21  ;;  %vm10461_vm5 = vnez %v10253_v43  ;;  %vm10464_vm6 = vnez %v10246_v35 }
 0x1ad   : > { %v794_v7 = vsub.f32 %v771_v26, %v741_v34  ;;  %v821_v33 = vsub.f32 %v771_v26, %v692_v38  ;;  %v793_v53 = vsub.f32 %v770_v59, %v740_v51  ;;  %v779_v38 = vsub.f32 %v693_v54, %v5992_v16 }
 0x1ae   : > { %1214 = vrot.lane.b32.xlu2 %v6022_v19, %s9976_s23  ;;  %v755_v16 = vsel %vm10466_vm7, %v5986_v14, %v6013_v18  ;;  %vm10470_vm7 = vcmask 7168  }
 0x1af   : > { %v797_v22 = vadd.f32 %v794_v7, %v790_v37  ;;  %v825_v44 = vadd.f32 %v821_v33, %v817_v27  ;;  %v796_v24 = vadd.f32 %v793_v53, %v789_v41  ;;  %1262 = vrot.lane.b32.xlu1 %v6022_v19, %s9998_s8  ;;  %v791_v47 = vadd.f32 %v787_v58, %v779_v38 }
 0x1b0   : > { %v818_v41 = vadd.f32 %v814_v12, %v10463_v2  ;;  %v804_v7 = vsub.f32 %v740_v51, %v6037_v6  ;;  %v820_v33 = vsub.f32 %v770_v59, %v6025_v28 }
 0x1b1   : > { %v801_v30 = vmul.f32 0.125, %v797_v22  ;;  %v800_v34 = vmul.f32 0.125, %v796_v24  ;;  %v829_v18 = vmul.f32 0.125, %v825_v44 }
 0x1b3   : > { %v769_v48 = vpop.permute.xlu0 %768  ;;  %v6068_v9 = vsel %vm10458_vm11, %v801_v30, 0.0  ;;  %v6073_v37 = vsel %vm10461_vm5, %v800_v34, 0.0  ;;  %v6144_v51 = vsel %vm10458_vm11, %v829_v18, 0.0 }
 0x1b4   : > { %v772_v0 = vsel %vm10457_vm1, %v767_v55, %v769_v48  ;;  %10459 = vst [vmem:[#allocation25_spill] sm:$0xff] %v6068_v9  ;;  %vm10467_vm1 = vcmask 162816  }
 0x1b5   : > { %v776_v31 = vsel %vm10460_vm3, %v772_v0, 0.0  ;;  %10462 = vst [vmem:[#allocation26_spill] sm:$0xff] %v6073_v37  ;;  %vm10469_vm3 = vcmask 121856  }
 0x1b6   : > { %v795_v1 = vsub.f32 %v776_v31, %v5999_v17  ;;  %v822_v39 = vsub.f32 %v776_v31, %v693_v54  ;;  %846 = vrot.lane.b32.xlu2 %v6068_v9, %s9976_s23  ;;  %v685_v17 = vsel %vm10467_vm1, 0.0, %v5969_v50  ;;  %10468 = vst [vmem:[#allocation28_spill] sm:$0xff] %v6144_v51  ;;  %vm10471_vm1 = vcmask 1039360  }
 0x1b7   : > { %844 = vrot.lane.b32.xlu1 %v6073_v37, %s9976_s23  ;;  %v808_v26 = vsub.f32 %v755_v16, %v685_v17  ;;  %vm10477_vm11 = vmmov %vm10471_vm1 }
 0x1b8   : > { %v798_v55 = vadd.f32 %v795_v1, %v791_v47  ;;  %v826_v21 = vadd.f32 %v822_v39, %v818_v41 }
 0x1b9   : > { %v812_v27 = vmul.f32 2.0, %v808_v26 }
 0x1ba   : > { %v802_v10 = vmul.f32 0.125, %v798_v55  ;;  %v830_v59 = vmul.f32 0.125, %v826_v21 }
 0x1bb   : > { %v816_v53 = vadd.f32 %v812_v27, %v804_v7 }
 0x1bc   : > { %v6085_v29 = vsel %vm10464_vm6, %v802_v10, 0.0  ;;  %v6162_v22 = vsel %vm10464_vm6, %v830_v59, 0.0  ;;  %vm10475_vm6 = vnez %v10281_v11 }
 0x1bd   : > { %10465 = vst [vmem:[#allocation27_spill] sm:$0xff] %v6085_v29  ;;  %848 = vrot.lane.b32.xlu0 %v6085_v29, %s9976_s23  ;;  %v824_v14 = vadd.f32 %v820_v33, %v816_v53 }
 0x1be   : > { %868 = vrot.lane.b32.xlu2 %v6073_v37, %s9968_s29 }
 0x1bf   : > { %872 = vrot.lane.b32.xlu1 %v6085_v29, %s9968_s29  ;;  %v828_v50 = vmul.f32 0.125, %v824_v14 }
 0x1c1   : > { %v6138_v20 = vsel %vm10461_vm5, %v828_v50, 0.0  ;;  %vm10478_vm5 = vcmask 875520  }
 0x1c5   : > { %870 = vrot.lane.b32.xlu0 %v6068_v9, %s9968_s29 }
 0x1c6   : > { %896 = vrot.lane.b32.xlu2 %v6085_v29, %s9998_s8 }
 0x1c7   : > { %894 = vrot.lane.b32.xlu1 %v6068_v9, %s9998_s8 }
 0x1cd   : > { %892 = vrot.lane.b32.xlu0 %v6073_v37, %s9998_s8 }
 0x1ce   : > { %916 = vrot.lane.b32.xlu2 %v6068_v9, %s9972_s9 }
 0x1cf   : > { %914 = vrot.lane.b32.xlu1 %v6073_v37, %s9972_s9 }
 0x1d5   : > { %918 = vrot.lane.b32.xlu0 %v6085_v29, %s9972_s9 }
 0x1d6   : > { %937 = vrot.lane.b32.xlu2 %v6068_v9, %s9964_s13 }
 0x1d7   : > { %935 = vrot.lane.b32.xlu1 %v6073_v37, %s9964_s13 }
 0x1dd   : > { %939 = vrot.lane.b32.xlu0 %v6085_v29, %s9964_s13 }
 0x1de   : > { %957 = vrot.lane.b32.xlu2 %v6073_v37, %s9982_s14 }
 0x1df   : > { %961 = vrot.lane.b32.xlu1 %v6085_v29, %s9982_s14 }
 0x1e5   : > { %959 = vrot.lane.b32.xlu0 %v6068_v9, %s9982_s14 }
 0x1e6   : > { %983 = vrot.lane.b32.xlu2 %v6085_v29, %s10096_s15 }
 0x1e7   : > { %981 = vrot.lane.b32.xlu1 %v6068_v9, %s10096_s15 }
 0x1ed   : > { %979 = vrot.lane.b32.xlu0 %v6073_v37, %s10096_s15 }
 0x1ee   : > { %1004 = vrot.lane.b32.xlu2 %v6085_v29, %s10100_s16 }
 0x1ef   : > { %1002 = vrot.lane.b32.xlu1 %v6068_v9, %s10100_s16 }
 0x1f5   : > { %1000 = vrot.lane.b32.xlu0 %v6073_v37, %s10100_s16 }
 0x1f6   : > { %1208 = vrot.lane.b32.xlu2 %v6138_v20, %s9976_s23 }
 0x1f7   : > { %1234 = vrot.lane.b32.xlu1 %v6144_v51, %s9968_s29 }
 0x1f8   : > { %v875_v28 = vpop.permute.xlu2 %874 }
 0x1fd   : > { %1210 = vrot.lane.b32.xlu0 %v6144_v51, %s9976_s23 }
 0x1fe   : > { %1258 = vrot.lane.b32.xlu2 %v6144_v51, %s9998_s8 }
 0x1ff   : > { %1256 = vrot.lane.b32.xlu1 %v6138_v20, %s9998_s8 }
 0x200   : > { %v6156_v6 = vpop.permute.xlu2 %963 }
 0x205   : > { %1232 = vrot.lane.b32.xlu0 %v6138_v20, %s9968_s29 }
 0x206   : > { %1278 = vrot.lane.b32.xlu2 %v6138_v20, %s9972_s9 }
 0x207   : > { %1212 = vrot.lane.b32.xlu1 %v6162_v22, %s9976_s23 }
 0x208   : > { %v6168_v44 = vpop.permute.xlu2 %1214 }
 0x20d   : > { %1280 = vrot.lane.b32.xlu0 %v6144_v51, %s9972_s9 }
 0x20e   : > { %1299 = vrot.lane.b32.xlu2 %v6138_v20, %s9964_s13 }
 0x20f   : > { %1282 = vrot.lane.b32.xlu1 %v6162_v22, %s9972_s9 }
 0x210   : > { %v6176_v24 = vpop.permute.xlu2 %846  ;;  %v899_v12 = vpop.permute.xlu0 %898 }
 0x211   : > { %v851_v54 = vpop.permute.xlu1 %850 }
 0x212   : > { %v859_v21 = vsel %vm10469_vm3, %v851_v54, 0.0  ;;  %vm10472_vm3 = vmmov %vm10470_vm7 }
 0x213   : > { %v863_v27 = vsel %vm5531_vm10, %v859_v21, 0.0 }
 0x214   : > { %v867_v33 = vadd.f32 %v863_v27, %v5996_v36 }
 0x215   : > { %1301 = vrot.lane.b32.xlu0 %v6144_v51, %s9964_s13 }
 0x216   : > { %1236 = vrot.lane.b32.xlu2 %v6162_v22, %s9968_s29 }
 0x217   : > { %1303 = vrot.lane.b32.xlu1 %v6162_v22, %s9964_s13 }
 0x218   : > { %v6184_v58 = vpop.permute.xlu2 %868  ;;  %v6200_v48 = vpop.permute.xlu0 %1238 }
 0x219   : > { %v942_v30 = vpop.permute.xlu1 %941 }
 0x21d   : > { %1260 = vrot.lane.b32.xlu0 %v6162_v22, %s9998_s8 }
 0x21e   : > { %1305 = vrot.lane.b32.xlu2 %v6022_v19, %s9964_s13 }
 0x21f   : > { %1323 = vrot.lane.b32.xlu1 %v6144_v51, %s9982_s14 }
 0x220   : > { %v6192_v34 = vpop.permute.xlu2 %896 }
 0x221   : > { %v6194_v38 = vpop.permute.xlu1 %1262 }
 0x225   : > { %1321 = vrot.lane.b32.xlu0 %v6138_v20, %s9982_s14 }
 0x226   : > { %1325 = vrot.lane.b32.xlu2 %v6162_v22, %s9982_s14 }
 0x227   : > { %1343 = vrot.lane.b32.xlu1 %v6138_v20, %s10096_s15 }
 0x228   : > { %v6204_v0 = vpop.permute.xlu2 %916 }
 0x229   : > { %v845_v47 = vpop.permute.xlu1 %844 }
 0x22d   : > { %1327 = vrot.lane.b32.xlu0 %v6022_v19, %s9982_s14 }
 0x22e   : > { %1345 = vrot.lane.b32.xlu2 %v6144_v51, %s10096_s15 }
 0x22f   : > { %1364 = vrot.lane.b32.xlu1 %v6138_v20, %s10100_s16  ;;  %v849_v31 = vpop.permute.xlu0 %848 }
 0x230   : > { %v6212_v1 = vpop.permute.xlu2 %937  ;;  %v854_v21 = vsel %vm10471_vm1, %v849_v31, %v851_v54  ;;  %v852_v54 = vsel %vm10471_vm1, %v845_v47, %v6176_v24  ;;  %vm10480_vm1 = vcmask 162816  }
 0x231   : > { %v873_v2 = vpop.permute.xlu1 %872 }
 0x232   : > { %v878_v17 = vsel %vm10470_vm7, %v873_v2, %v875_v28  ;;  %vm10473_vm7 = vnez %v10268_v62 }
 0x233   : > { %v887_v7 = vsel %vm5583_vm13, %v878_v17, 0.0  ;;  %vm10493_vm13 = vcmask 162816  }
 0x234   : > { %v891_v53 = vadd.f32 %v887_v7, %v867_v33  ;;  %v862_v33 = vsel %vm10473_vm7, %v854_v21, 0.0  ;;  %v853_v21 = vsel %vm10477_vm11, %v6176_v24, %v849_v31  ;;  %vm10483_vm11 = vnez %v10277_v8  ;;  %vm10494_vm10 = vmmov %vm10493_vm13 }
 0x235   : > { %1347 = vrot.lane.b32.xlu0 %v6162_v22, %s10096_s15  ;;  %v861_v24 = vsel %vm10483_vm11, %v853_v21, 0.0 }
 0x236   : > { %1366 = vrot.lane.b32.xlu2 %v6144_v51, %s10100_s16 }
 0x237   : > { %v871_v41 = vpop.permute.xlu0 %870 }
 0x238   : > { %v6218_v39 = vpop.permute.xlu2 %957  ;;  %v877_v7 = vsel %vm10472_vm3, %v871_v41, %v873_v2  ;;  %vm10476_vm3 = vcmask 1014784  }
 0x239   : > { %v895_v55 = vpop.permute.xlu1 %894 }
 0x23d   : > { %1368 = vrot.lane.b32.xlu0 %v6162_v22, %s10100_s16 }
 0x23f   : > { %v893_v10 = vpop.permute.xlu0 %892 }
 0x240   : > { %v6223_v16 = vpop.permute.xlu2 %983 }
 0x241   : > { %v915_v26 = vpop.permute.xlu1 %914  ;;  %v995_v28 = vsel %vm5807_vm9, %v6223_v16, 0.0 }
 0x247   : > { %v919_v14 = vpop.permute.xlu0 %918 }
 0x248   : > { %v930_v50 = vsel %vm5648_vm12, %v919_v14, 0.0  ;;  %v6233_v18 = vpop.permute.xlu2 %1004  ;;  %v921_v47 = vsel %vm10480_vm1, %v6204_v0, %v919_v14  ;;  %vm10486_vm1 = vnez %v10319_v3  ;;  %vm10492_vm12 = vcmask 1022976  }
 0x249   : > { %v934_v59 = vadd.f32 %v930_v50, %v891_v53  ;;  %v936_v35 = vpop.permute.xlu1 %935  ;;  %v1016_v17 = vsel %vm5889_vm15, %v6233_v18, 0.0  ;;  %v902_v53 = vsel %vm10474_vm2, %v6192_v34, %v899_v12  ;;  %vm10479_vm2 = vnez %v10274_v4 }
 0x24a   : > { %vm10481_vm15 = vcmask 7168   ;;  %v929_v14 = vsel %vm10486_vm1, %v921_v47, 0.0  ;;  %vm10497_vm1 = vnez %v10356_v5 }
 0x24b   : > { %v999_v45 = vadd.f32 %v995_v28, %v934_v59  ;;  %v866_v59 = vadd.f32 %v862_v33, %v6085_v29  ;;  %v906_v28 = vsel %vm10476_vm3, %v902_v53, 0.0  ;;  %vm10482_vm9 = vmmov %vm10481_vm15  ;;  %vm10485_vm3 = vcmask 883712  }
 0x24c   : > { %v883_v33 = vsel %vm10482_vm9, 0.0, %v6184_v58  ;;  %v909_v53 = vsel %vm5634_vm0, %v906_v28, 0.0  ;;  %vm10488_vm9 = vnez %v10266_v61  ;;  %v865_v28 = vadd.f32 %v861_v24, %v6068_v9 }
 0x24d   : > { %v1020_v27 = vadd.f32 %v1016_v17, %v999_v45  ;;  %v886_v45 = vsel %vm10475_vm6, %v877_v7, 0.0  ;;  %v860_v17 = vsel %vm10479_vm2, %v852_v54, 0.0  ;;  %v876_v7 = vsel %vm10481_vm15, %v6184_v58, %v871_v41 }
 0x24e   : > { %v890_v43 = vadd.f32 %v886_v45, %v866_v59  ;;  %v864_v31 = vadd.f32 %v860_v17, %v6073_v37  ;;  %v900_v54 = vsel %vm10485_vm3, %v893_v10, %v895_v55  ;;  %vm10487_vm15 = vcmask 891904  }
 0x24f   : > { %v940_v36 = vpop.permute.xlu0 %939  ;;  %1102 = vrot.lane.b32.xlu2 %v1020_v27, %s9982_s14  ;;  %1086 = vrot.lane.b32.xlu1 %v1020_v27, %s9976_s23  ;;  %v885_v58 = vsel %vm10488_vm9, %v876_v7, 0.0  ;;  %vm10502_vm6 = vnez %v10377_v49 }
 0x250   : > { %1070 = vrot.lane.b32.xlu0 %v1020_v27, %s9968_s29  ;;  %v6254_v50 = vpop.permute.xlu2 %1208  ;;  %v945_v12 = vsel %vm10478_vm5, %v940_v36, %v942_v30  ;;  %vm10484_vm5 = vcmask 1006592   ;;  %v912_v59 = vadd.f32 %v909_v53, %v890_v43  ;;  %v889_v7 = vadd.f32 %v885_v58, %v865_v28 }
 0x251   : > { %v962_v2 = vpop.permute.xlu1 %961  ;;  %v949_v30 = vsel %vm10484_vm5, %v945_v12, 0.0  ;;  %vm10489_vm5 = vmmov %vm10485_vm3  ;;  %vm10490_vm3 = vnez %v10264_v60  ;;  %v920_v53 = vsel %vm10493_vm13, %v915_v26, %v6204_v0  ;;  %vm10499_vm13 = vnez %v10323_v15 }
 0x252   : > { %v967_v41 = vsel %vm10487_vm15, %v962_v2, %v6156_v6  ;;  %v901_v10 = vsel %vm10489_vm5, %v895_v55, %v6192_v34  ;;  %v952_v21 = vsel %vm5754_vm14, %v949_v30, 0.0  ;;  %v884_v6 = vsel %vm10490_vm3, %v883_v33, 0.0 }
 0x253   : > { %vm10491_vm15 = vnez %v10327_v57  ;;  %v933_v47 = vadd.f32 %v929_v14, %v912_v59  ;;  %v971_v43 = vsel %vm10492_vm12, %v967_v41, 0.0  ;;  %v926_v34 = vsel %vm10494_vm10, 0.0, %v915_v26 }
 0x254   : > { %v907_v17 = vsel %vm10491_vm15, %v900_v54, 0.0  ;;  %vm10495_vm5 = vnez %v10309_v42  ;;  %vm10496_vm14 = vcmask 154624   ;;  %v974_v14 = vsel %vm10497_vm1, %v971_v43, 0.0 }
 0x255   : > { %v908_v24 = vsel %vm10495_vm5, %v901_v10, 0.0  ;;  %v955_v30 = vadd.f32 %v952_v21, %v933_v47  ;;  %vm10498_vm12 = vnez %v10331_v23  ;;  %v928_v0 = vsel %vm10499_vm13, %v920_v53, 0.0 }
 0x256   : > { %vm10500_vm10 = vcmask 875520   ;;  %v911_v58 = vadd.f32 %v908_v24, %v889_v7  ;;  %vm10510_vm15 = vcmask 171008   ;;  %v10515_v24 = vld [vmem:[#allocation22_spill] sm:$0xff] }
 0x257   : > { %v960_v45 = vpop.permute.xlu0 %959  ;;  %1132 = vrot.lane.b32.xlu1 %v1020_v27, %s9964_s13  ;;  %v943_v26 = vsel %vm10500_vm10, %v936_v35, %v6212_v1  ;;  %vm10501_vm0 = vmmov %vm10500_vm10  ;;  %v977_v28 = vadd.f32 %v974_v14, %v955_v30  ;;  %v10506_v35 = vld [vmem:[#allocation16_spill] sm:$0xff] }
 0x258   : > { %1117 = vrot.lane.b32.xlu0 %v1020_v27, %s9998_s8  ;;  %v888_v27 = vadd.f32 %v884_v6, %v864_v31  ;;  %v6297_v55 = vpop.permute.xlu2 %1258  ;;  %v927_v31 = vsel %vm10498_vm12, %v926_v34, 0.0  ;;  %v944_v41 = vsel %vm10501_vm0, %v6212_v1, %v940_v36  ;;  %vm10505_vm12 = vnez %v10381_v52 }
 0x259   : > { %v982_v12 = vpop.permute.xlu1 %981  ;;  %v950_v47 = vsel %vm10505_vm12, %v943_v26, 0.0  ;;  %vm10507_vm10 = vnez %v10506_v35  ;;  %vm10508_vm0 = vcmask 154624  }
 0x25a   : > { %v986_v33 = vsel %vm10496_vm14, %v982_v12, %v6223_v16  ;;  %v910_v54 = vadd.f32 %v907_v17, %v888_v27  ;;  %vm10503_vm14 = vcmask 891904   ;;  %v932_v17 = vadd.f32 %v928_v0, %v911_v58  ;;  %v10518_v0 = vld [vmem:[#allocation18_spill] sm:$0xff] }
 0x25b   : > { %v994_v16 = vsel %vm10502_vm6, %v986_v33, 0.0  ;;  %v965_v10 = vsel %vm10503_vm14, %v6218_v39, %v960_v45  ;;  %vm10504_vm1 = vmmov %vm10503_vm14  ;;  %v951_v43 = vsel %vm10507_vm10, %v944_v41, 0.0  ;;  %v10511_v39 = vld [vmem:[#allocation19_spill] sm:$0xff] }
 0x25c   : > { %v966_v21 = vsel %vm10504_vm1, %v960_v45, %v962_v2  ;;  %v931_v6 = vadd.f32 %v927_v31, %v910_v54  ;;  %v998_v1 = vadd.f32 %v994_v16, %v977_v28  ;;  %vm10509_vm6 = vmmov %vm10508_vm0  ;;  %vm10512_vm14 = vnez %v10511_v39  ;;  %v10513_v45 = vld [vmem:[#allocation17_spill] sm:$0xff]  ;;  %v10516_v31 = vld [vmem:[#allocation20_spill] sm:$0xff] }
 0x25d   : > { %v972_v2 = vsel %vm10512_vm14, %v965_v10, 0.0  ;;  %vm10514_vm1 = vnez %v10513_v45  ;;  %v954_v54 = vadd.f32 %v951_v43, %v932_v17 }
 0x25e   : > { %v973_v34 = vsel %vm10514_vm1, %v966_v21, 0.0  ;;  %v953_v33 = vadd.f32 %v950_v47, %v931_v6  ;;  %v10521_v6 = vld [vmem:[#allocation23_spill] sm:$0xff]  ;;  %v10522_v47 = vld [vmem:[#allocation21_spill] sm:$0xff] }
 0x25f   : > { %v980_v59 = vpop.permute.xlu0 %979  ;;  %v976_v58 = vadd.f32 %v973_v34, %v954_v54 }
 0x260   : > { %v985_v7 = vsel %vm10508_vm0, %v980_v59, %v982_v12  ;;  %v991_v27 = vsel %vm10509_vm6, 0.0, %v980_v59  ;;  %vm10517_vm0 = vnez %v10516_v31  ;;  %vm10519_vm6 = vnez %v10518_v0 }
 0x261   : > { %v1003_v36 = vpop.permute.xlu1 %1002  ;;  %v992_v12 = vsel %vm10517_vm0, %v991_v27, 0.0  ;;  %v993_v26 = vsel %vm10519_vm6, %v985_v7, 0.0  ;;  %v975_v41 = vadd.f32 %v972_v2, %v953_v33  ;;  %vm10523_vm0 = vnez %v10522_v47 }
 0x262   : > { %v1007_v53 = vsel %vm10510_vm15, %v1003_v36, %v6233_v18  ;;  %v6338_v18 = vpop.permute.xlu2 %1278  ;;  %v997_v28 = vadd.f32 %v993_v26, %v976_v58 }
 0x263   : > { %v1015_v30 = vsel %vm5910_vm8, %v1007_v53, 0.0  ;;  %v996_v59 = vadd.f32 %v992_v12, %v975_v41  ;;  %vm10520_vm8 = vmmov %vm10510_vm15 }
 0x264   : > { %v6332_v14 = vadd.f32 %v1015_v30, %v998_v1 }
 0x266   : > { %1028 = vrot.lane.b32.xlu2 %v6332_v14, %s10100_s16 }
 0x267   : > { %v1001_v16 = vpop.permute.xlu0 %1000 }
 0x268   : > { %v1006_v10 = vsel %vm10510_vm15, %v1001_v16, %v1003_v36  ;;  %v1012_v21 = vsel %vm10520_vm8, 0.0, %v1001_v16  ;;  %vm10524_vm8 = vcmask 1039360   ;;  %vm10525_vm15 = vcmask 7168  }
 0x269   : > { %v1013_v17 = vsel %vm5922_vm4, %v1012_v21, 0.0  ;;  %v1014_v43 = vsel %vm10523_vm0, %v1006_v10, 0.0  ;;  %v6348_v1 = vpop.permute.xlu1 %1234  ;;  %vm10528_vm4 = vcmask 162816  }
 0x26a   : > { %v6350_v7 = vadd.f32 %v1013_v17, %v996_v59  ;;  %v6352_v27 = vadd.f32 %v1014_v43, %v997_v28  ;;  %v1300_v36 = vpop.permute.xlu2 %1299 }
 0x26c   : > { %1026 = vrot.lane.b32.xlu1 %v6352_v27, %s10100_s16  ;;  %1024 = vrot.lane.b32.xlu0 %v6350_v7, %s10100_s16 }
 0x26e   : > { %1041 = vrot.lane.b32.xlu2 %v6332_v14, %s9972_s9 }
 0x26f   : > { %v1211_v53 = vpop.permute.xlu0 %1210 }
 0x271   : > { %v1257_v2 = vpop.permute.xlu1 %1256 }
 0x272   : > { %v6366_v30 = vpop.permute.xlu2 %1236 }
 0x274   : > { %1039 = vrot.lane.b32.xlu1 %v6352_v27, %s9972_s9  ;;  %1037 = vrot.lane.b32.xlu0 %v6350_v7, %s9972_s9 }
 0x276   : > { %1054 = vrot.lane.b32.xlu2 %v6332_v14, %s10096_s15 }
 0x277   : > { %v1233_v34 = vpop.permute.xlu0 %1232 }
 0x278   : > { %v1240_v28 = vsel %vm10525_vm15, %v1233_v34, %v6348_v1  ;;  %v1247_v9 = vsel %vm10525_vm15, 0.0, %v1233_v34 }
 0x279   : > { %v1213_v33 = vpop.permute.xlu1 %1212  ;;  %v1249_v8 = vsel %vm10488_vm9, %v1240_v28, 0.0  ;;  %v1248_v42 = vsel %vm10490_vm3, %v1247_v9, 0.0  ;;  %vm10532_vm3 = vcmask 891904  }
 0x27a   : > { %v6378_v26 = vpop.permute.xlu2 %1305  ;;  %v1217_v41 = vsel %vm10524_vm8, %v1211_v53, %v1213_v33 }
 0x27b   : > { %v1225_v16 = vsel %vm10483_vm11, %v1217_v41, 0.0  ;;  %vm10526_vm11 = vmmov %vm10524_vm8  ;;  %vm10527_vm8 = vcmask 883712  }
 0x27c   : > { %1052 = vrot.lane.b32.xlu1 %v6352_v27, %s10096_s15  ;;  %1050 = vrot.lane.b32.xlu0 %v6350_v7, %s10096_s15  ;;  %v1229_v10 = vadd.f32 %v1225_v16, %v6144_v51  ;;  %v1216_v43 = vsel %vm10526_vm11, %v6254_v50, %v1211_v53  ;;  %vm10531_vm9 = vmmov %vm10527_vm8 }
 0x27d   : > { %v1224_v28 = vsel %vm10479_vm2, %v1216_v43, 0.0  ;;  %vm10530_vm2 = vmmov %vm10526_vm11  ;;  %v1264_v60 = vsel %vm10531_vm9, %v1257_v2, %v6297_v55  ;;  %vm10535_vm11 = vcmask 162816   ;;  %vm10543_vm9 = vnez %v10303_v32 }
 0x27e   : > { %1068 = vrot.lane.b32.xlu2 %v6332_v14, %s9968_s29  ;;  %v1253_v41 = vadd.f32 %v1249_v8, %v1229_v10  ;;  %v1228_v53 = vadd.f32 %v1224_v28, %v6138_v20  ;;  %v1218_v4 = vsel %vm10530_vm2, %v1213_v33, %v6168_v44  ;;  %vm10541_vm2 = vnez %v10331_v23 }
 0x27f   : > { %v6374_v54 = vpop.permute.xlu0 %1280  ;;  %v1226_v43 = vsel %vm10473_vm7, %v1218_v4, 0.0  ;;  %vm10538_vm7 = vmmov %vm10525_vm15  ;;  %vm10539_vm15 = vcmask 1014784  }
 0x280   : > { %v1284_v37 = vsel %vm10528_vm4, %v6338_v18, %v6374_v54  ;;  %vm10529_vm4 = vcmask 875520   ;;  %v1252_v9 = vadd.f32 %v1248_v42, %v1228_v53  ;;  %v1241_v62 = vsel %vm10538_vm7, %v6348_v1, %v6366_v30 }
 0x281   : > { %v6376_v12 = vpop.permute.xlu1 %1282  ;;  %v1292_v50 = vsel %vm10499_vm13, %v1284_v37, 0.0  ;;  %vm10534_vm13 = vmmov %vm10527_vm8  ;;  %vm10554_vm7 = vcmask 1022976  }
 0x282   : > { %v6398_v21 = vpop.permute.xlu2 %1325 }
 0x284   : > { %1066 = vrot.lane.b32.xlu1 %v6352_v27, %s9968_s29  ;;  %1064 = vrot.lane.b32.xlu0 %v6350_v7, %s9968_s29 }
 0x286   : > { %1082 = vrot.lane.b32.xlu2 %v6352_v27, %s9976_s23 }
 0x287   : > { %v1302_v58 = vpop.permute.xlu0 %1301 }
 0x289   : > { %v6389_v59 = vpop.permute.xlu1 %1303 }
 0x28a   : > { %v1346_v10 = vpop.permute.xlu2 %1345 }
 0x28c   : > { %1080 = vrot.lane.b32.xlu1 %v6350_v7, %s9976_s23  ;;  %1084 = vrot.lane.b32.xlu0 %v6332_v14, %s9976_s23 }
 0x28e   : > { %1096 = vrot.lane.b32.xlu2 %v6350_v7, %s9982_s14 }
 0x28f   : > { %v1261_v17 = vpop.permute.xlu0 %1260 }
 0x290   : > { %v1265_v16 = vsel %vm10527_vm8, %v6297_v55, %v1261_v17  ;;  %v1290_v55 = vsel %vm10535_vm11, 0.0, %v6338_v18  ;;  %vm10536_vm8 = vmmov %vm10529_vm4 }
 0x291   : > { %v1272_v29 = vsel %vm10495_vm5, %v1265_v16, 0.0  ;;  %v1324_v51 = vpop.permute.xlu1 %1323  ;;  %vm10533_vm5 = vnez %v10327_v57  ;;  %v1307_v35 = vsel %vm10536_vm8, %v1300_v36, %v1302_v58  ;;  %v1230_v57 = vadd.f32 %v1226_v43, %v6162_v22 }
 0x292   : > { %v1275_v61 = vadd.f32 %v1272_v29, %v1253_v41  ;;  %v1308_v29 = vsel %vm10529_vm4, %v1302_v58, %v6389_v59  ;;  %v1330_v16 = vsel %vm10532_vm3, %v1324_v51, %v6398_v21  ;;  %v1271_v33 = vsel %vm10533_vm5, %v1264_v60, 0.0  ;;  %vm10540_vm4 = vmmov %vm10532_vm3 }
 0x293   : > { %v1315_v15 = vsel %vm10507_vm10, %v1308_v29, 0.0  ;;  %v1274_v2 = vadd.f32 %v1271_v33, %v1252_v9  ;;  %vm10537_vm10 = vcmask 154624   ;;  %v1314_v42 = vsel %vm10505_vm12, %v1307_v35, 0.0 }
 0x294   : > { %1100 = vrot.lane.b32.xlu1 %v6332_v14, %s9982_s14  ;;  %1098 = vrot.lane.b32.xlu0 %v6352_v27, %s9982_s14  ;;  %v1296_v34 = vadd.f32 %v1292_v50, %v1275_v61  ;;  %v1266_v61 = vsel %vm10534_vm13, %v1261_v17, %v6194_v38  ;;  %v1337_v38 = vsel %vm10514_vm1, %v1330_v16, 0.0  ;;  %v1291_v17 = vsel %vm10541_vm2, %v1290_v55, 0.0  ;;  %vm10544_vm3 = vmmov %vm10537_vm10 }
 0x295   : > { %v1270_v18 = vsel %vm10539_vm15, %v1266_v61, 0.0  ;;  %vm10542_vm1 = vnez %v10281_v11  ;;  %v1295_v53 = vadd.f32 %v1291_v17, %v1274_v2  ;;  %vm10545_vm12 = vcmask 171008   ;;  %vm10555_vm15 = vmmov %vm10544_vm3 }
 0x296   : > { %1115 = vrot.lane.b32.xlu2 %v6332_v14, %s9998_s8  ;;  %v1318_v41 = vadd.f32 %v1315_v15, %v1296_v34  ;;  %v1250_v45 = vsel %vm10542_vm1, %v1241_v62, 0.0  ;;  %v1367_v34 = vpop.permute.xlu2 %1366  ;;  %vm10547_vm5 = vmmov %vm10545_vm12  ;;  %vm10549_vm13 = vnez %v10516_v31  ;;  %vm10557_vm2 = vnez %v10356_v5 }
 0x297   : > { %v1322_v8 = vpop.permute.xlu0 %1321  ;;  %v1254_v29 = vadd.f32 %v1250_v45, %v1230_v57  ;;  %v1317_v4 = vadd.f32 %v1314_v42, %v1295_v53  ;;  %vm10558_vm1 = vnez %v10377_v49 }
 0x298   : > { %v1340_v36 = vadd.f32 %v1337_v38, %v1318_v41  ;;  %v1329_v58 = vsel %vm10540_vm4, %v1322_v8, %v1324_v51  ;;  %v1273_v51 = vsel %vm10543_vm9, %v1270_v18, 0.0  ;;  %vm10559_vm9 = vmmov %vm10547_vm5 }
 0x299   : > { %v1344_v37 = vpop.permute.xlu1 %1343  ;;  %v1336_v23 = vsel %vm10512_vm14, %v1329_v58, 0.0  ;;  %v1276_v32 = vadd.f32 %v1273_v51, %v1254_v29  ;;  %vm10548_vm14 = vmmov %vm10536_vm8  ;;  %vm10552_vm8 = vnez %v10521_v6 }
 0x29a   : > { %v1349_v28 = vsel %vm10537_vm10, %v1344_v37, %v1346_v10  ;;  %v1355_v52 = vsel %vm10544_vm3, 0.0, %v1344_v37  ;;  %v1339_v9 = vadd.f32 %v1336_v23, %v1317_v4  ;;  %v1309_v37 = vsel %vm10548_vm14, %v6389_v59, %v6378_v26 }
 0x29b   : > { %v1357_v1 = vsel %vm10519_vm6, %v1349_v28, 0.0  ;;  %vm10546_vm6 = vmmov %vm10535_vm11  ;;  %vm10551_vm11 = vnez %v10319_v3  ;;  %vm10553_vm10 = vcmask 1006592   ;;  %vm10560_vm3 = vnez %v10515_v24 }
 0x29c   : > { %1113 = vrot.lane.b32.xlu1 %v6352_v27, %s9998_s8  ;;  %1111 = vrot.lane.b32.xlu0 %v6350_v7, %s9998_s8  ;;  %v1361_v8 = vadd.f32 %v1357_v1, %v1340_v36  ;;  %v1285_v11 = vsel %vm10546_vm6, %v6374_v54, %v6376_v12  ;;  %v1356_v54 = vsel %vm10549_vm13, %v1355_v52, 0.0  ;;  %vm10562_vm6 = vcmask 7168  }
 0x29d   : > { %v1293_v43 = vsel %vm10551_vm11, %v1285_v11, 0.0  ;;  %v1360_v33 = vadd.f32 %v1356_v54, %v1339_v9  ;;  %v1242_v24 = vsel %vm10562_vm6, %v6366_v30, %v6200_v48  ;;  %vm10564_vm14 = vnez %v10284_v13 }
 0x29e   : > { %1128 = vrot.lane.b32.xlu2 %v6352_v27, %s9964_s13  ;;  %v1297_v16 = vadd.f32 %v1293_v43, %v1276_v32  ;;  %v1251_v57 = vsel %vm10564_vm14, %v1242_v24, 0.0  ;;  %vm10565_vm13 = vnez %v10306_v40  ;;  %vm10567_vm11 = vnez %v10405_v56 }
 0x29f   : > { %v1328_v50 = vpop.permute.xlu0 %1327  ;;  %v1294_v18 = vsel %vm10565_vm13, %v6376_v12, 0.0  ;;  %vm10578_vm6 = vcmask 171008  }
 0x2a0   : > { %vm10580_vm14 = vmmov %vm10578_vm6 }
 0x2a1   : > { %v1365_v27 = vpop.permute.xlu1 %1364  ;;  %vm10581_vm13 = vmmov %vm10578_vm6 }
 0x2a2   : > { %v1370_v0 = vsel %vm10545_vm12, %v1365_v27, %v1367_v34  ;;  %v1376_v15 = vsel %vm10547_vm5, 0.0, %v1365_v27  ;;  %vm10561_vm12 = vcmask 121856   ;;  %vm10563_vm5 = vnez %v10271_v63 }
 0x2a3   : > { %v1378_v60 = vsel %vm10523_vm0, %v1370_v0, 0.0  ;;  %vm10550_vm0 = vmmov %vm10540_vm4  ;;  %vm10556_vm4 = vnez %v10341_v46  ;;  %v1223_v49 = vsel %vm10561_vm12, %v6168_v44, 0.0 }
 0x2a4   : > { %v1382_v39 = vadd.f32 %v1378_v60, %v1361_v8  ;;  %1126 = vrot.lane.b32.xlu1 %v6350_v7, %s9964_s13  ;;  %1130 = vrot.lane.b32.xlu0 %v6332_v14, %s9964_s13  ;;  %v1331_v47 = vsel %vm10550_vm0, %v6398_v21, %v1328_v50  ;;  %v1377_v7 = vsel %vm10552_vm8, %v1376_v15, 0.0  ;;  %v1313_v14 = vsel %vm10553_vm10, %v1309_v37, 0.0 }
 0x2a5   : > { %v1335_v26 = vsel %vm10554_vm7, %v1331_v47, 0.0  ;;  %v1381_v31 = vadd.f32 %v1377_v7, %v1360_v33  ;;  %v1316_v21 = vsel %vm10556_vm4, %v1313_v14, 0.0  ;;  %v1227_v62 = vsel %vm10563_vm5, %v1223_v49, 0.0 }
 0x2a6   : > { %1390 = vrot.lane.b32.xlu2 %v1382_v39, %s10100_s16  ;;  %v1338_v3 = vsel %vm10557_vm2, %v1335_v26, 0.0  ;;  %v1319_v61 = vadd.f32 %v1316_v21, %v1297_v16  ;;  %v1231_v44 = vadd.f32 %v1227_v62, %v6022_v19  ;;  %vm10566_vm0 = vnez %v10364_v25 }
 0x2a7   : > { %v1348_v41 = vpop.permute.xlu0 %1347  ;;  %vm10568_vm8 = vcmask 883712   ;;  %vm10569_vm10 = vcmask 162816   ;;  %vm10570_vm7 = vcmask 1014784  }
 0x2a8   : > { %v1350_v59 = vsel %vm10555_vm15, %v1346_v10, %v1348_v41  ;;  %v1341_v55 = vadd.f32 %v1338_v3, %v1319_v61  ;;  %v1255_v36 = vadd.f32 %v1251_v57, %v1231_v44  ;;  %v1359_v63 = vsel %vm10566_vm0, %v1348_v41, 0.0  ;;  %vm10572_vm4 = vmmov %vm10568_vm8 }
 0x2a9   : > { %v1358_v6 = vsel %vm10558_vm1, %v1350_v59, 0.0  ;;  %v1103_v5 = vpop.permute.xlu2 %1102  ;;  %vm10571_vm15 = vcmask 891904   ;;  %vm10573_vm2 = vmmov %vm10572_vm4  ;;  %vm10582_vm0 = vcmask 154624  }
 0x2aa   : > { %v1362_v35 = vadd.f32 %v1358_v6, %v1341_v55  ;;  %v1298_v48 = vadd.f32 %v1294_v18, %v1255_v36  ;;  %vm10574_vm1 = vmmov %vm10569_vm10 }
 0x2ab   : > { %vm10577_vm12 = vmmov %vm10571_vm15 }
 0x2ac   : > { %1388 = vrot.lane.b32.xlu1 %v1381_v31, %s10100_s16  ;;  %v1363_v30 = vadd.f32 %v1359_v63, %v1298_v48  ;;  %vm10579_vm5 = vmmov %vm10577_vm12 }
 0x2ae   : > { %1403 = vrot.lane.b32.xlu2 %v1382_v39, %s9972_s9 }
 0x2af   : > { %v1369_v2 = vpop.permute.xlu0 %1368 }
 0x2b0   : > { %v1371_v28 = vsel %vm10559_vm9, %v1367_v34, %v1369_v2  ;;  %v1380_v13 = vsel %vm10567_vm11, %v1369_v2, 0.0  ;;  %vm10575_vm9 = vmmov %vm10574_vm1 }
 0x2b1   : > { %v1379_v46 = vsel %vm10560_vm3, %v1371_v28, 0.0  ;;  %v1384_v58 = vadd.f32 %v1380_v13, %v1363_v30  ;;  %vm10576_vm3 = vcmask 1022976   ;;  %vm10583_vm11 = vmmov %vm10582_vm0 }
 0x2b2   : > { %v1383_v10 = vadd.f32 %v1379_v46, %v1362_v35 }
 0x2b4   : > { %1401 = vrot.lane.b32.xlu1 %v1381_v31, %s9972_s9  ;;  %1392 = vrot.lane.b32.xlu0 %v1383_v10, %s10100_s16 }
 0x2b6   : > { %1416 = vrot.lane.b32.xlu2 %v1382_v39, %s10096_s15 }
 0x2bc   : > { %1414 = vrot.lane.b32.xlu1 %v1381_v31, %s10096_s15  ;;  %1405 = vrot.lane.b32.xlu0 %v1383_v10, %s9972_s9 }
 0x2be   : > { %1430 = vrot.lane.b32.xlu2 %v1382_v39, %s9982_s14 }
 0x2c0   : > { %v6526_v38 = vpop.permute.xlu2 %1028 }
 0x2c1   : > { %v6541_v40 = vpop.permute.xlu1 %1086 }
 0x2c2   : > { %v6543_v12 = vpop.permute.xlu0 %1070 }
 0x2c4   : > { %1428 = vrot.lane.b32.xlu1 %v1381_v31, %s9982_s14  ;;  %1418 = vrot.lane.b32.xlu0 %v1383_v10, %s10096_s15 }
 0x2c6   : > { %1443 = vrot.lane.b32.xlu2 %v1381_v31, %s9998_s8 }
 0x2c8   : > { %v6539_v17 = vpop.permute.xlu2 %1041 }
 0x2c9   : > { %v1133_v56 = vpop.permute.xlu1 %1132 }
 0x2ca   : > { %v1118_v42 = vpop.permute.xlu0 %1117 }
 0x2cc   : > { %1434 = vrot.lane.b32.xlu1 %v1384_v58, %s9982_s14  ;;  %1432 = vrot.lane.b32.xlu0 %v1383_v10, %s9982_s14 }
 0x2ce   : > { %1449 = vrot.lane.b32.xlu2 %v1384_v58, %s9998_s8 }
 0x2d0   : > { %v6550_v25 = vpop.permute.xlu2 %1054 }
 0x2d4   : > { %1447 = vrot.lane.b32.xlu1 %v1383_v10, %s9998_s8  ;;  %1445 = vrot.lane.b32.xlu0 %v1382_v39, %s9998_s8 }
 0x2d6   : > { %1462 = vrot.lane.b32.xlu2 %v1383_v10, %s9964_s13 }
 0x2d8   : > { %v6555_v45 = vpop.permute.xlu2 %1068 }
 0x2dc   : > { %1460 = vrot.lane.b32.xlu1 %v1382_v39, %s9964_s13  ;;  %1458 = vrot.lane.b32.xlu0 %v1381_v31, %s9964_s13 }
 0x2de   : > { %v1027_v1 = vpop.permute.xlu1 %1026  ;;  %v1025_v50 = vpop.permute.xlu0 %1024 }
 0x2df   : > { %v6587_v61 = vsel %vm10578_vm6, %v1027_v1, %v6526_v38  ;;  %v6593_v2 = vsel %vm10580_vm14, %v1025_v50, %v1027_v1  ;;  %v6596_v35 = vsel %vm10581_vm13, 0.0, %v1025_v50 }
 0x2e0   : > { %v6558_v51 = vpop.permute.xlu2 %1082 }
 0x2e4   : > { %1464 = vrot.lane.b32.xlu0 %v1384_v58, %s9964_s13  ;;  %s10090_s13 = smov 22  }
 0x2e6   : > { %v1040_v53 = vpop.permute.xlu1 %1039  ;;  %v1038_v29 = vpop.permute.xlu0 %1037 }
 0x2e7   : > { %v1049_v39 = vsel %vm10569_vm10, 0.0, %v1038_v29  ;;  %v1043_v14 = vsel %vm10574_vm1, %v1038_v29, %v1040_v53  ;;  %v1044_v33 = vsel %vm10575_vm9, %v1040_v53, %v6539_v17 }
 0x2e8   : > { %v1097_v27 = vpop.permute.xlu2 %1096 }
 0x2ee   : > { %v1053_v34 = vpop.permute.xlu1 %1052  ;;  %v1051_v23 = vpop.permute.xlu0 %1050 }
 0x2ef   : > { %v6602_v10 = vsel %vm10582_vm0, %v1053_v34, %v6550_v25 }
 0x2f0   : > { %v1116_v8 = vpop.permute.xlu2 %1115 }
 0x2f1   : > { %v1121_v15 = vsel %vm10568_vm8, %v1116_v8, %v1118_v42  ;;  %vm10584_vm8 = vcmask 875520  }
 0x2f2   : > { %v1125_v47 = vsel %vm10570_vm7, %v1121_v15, 0.0  ;;  %vm10585_vm10 = vmmov %vm10584_vm8 }
 0x2f3   : > { %v1174_v59 = vsub.f32 %v1125_v47, %v1044_v33  ;;  %vm10586_vm7 = vmmov %vm10584_vm8  ;;  %v10593_v47 = vld [vmem:[#allocation12_spill] sm:$0xff] }
 0x2f4   : > { %vm10594_vm9 = vnez %v10593_v47 }
 0x2f5   : > { %v1178_v49 = vmul.f32 2.0, %v1174_v59 }
 0x2f6   : > { %v6560_v4 = vpop.permute.xlu1 %1066  ;;  %v6562_v52 = vpop.permute.xlu0 %1064 }
 0x2f8   : > { %v1129_v9 = vpop.permute.xlu2 %1128 }
 0x2fe   : > { %v6564_v0 = vpop.permute.xlu1 %1080  ;;  %v6566_v11 = vpop.permute.xlu0 %1084 }
 0x300   : > { %v6577_v26 = vpop.permute.xlu2 %1390 }
 0x306   : > { %v1101_v60 = vpop.permute.xlu1 %1100  ;;  %v1099_v32 = vpop.permute.xlu0 %1098 }
 0x307   : > { %v1106_v43 = vsel %vm10571_vm15, %v1101_v60, %v1103_v5  ;;  %v6583_v3 = vsel %vm10577_vm12, %v1097_v27, %v1099_v32  ;;  %v6590_v6 = vsel %vm10579_vm5, %v1099_v32, %v1101_v60  ;;  %v6605_v5 = vsel %vm10583_vm11, 0.0, %v1051_v23  ;;  %vm10587_vm15 = vmmov %vm10582_vm0  ;;  %v10589_v32 = vld [vmem:[#allocation13_spill] sm:$0xff] }
 0x308   : > { %v6580_v21 = vsel %vm10576_vm3, %v1106_v43, 0.0  ;;  %v1168_v24 = vsub.f32 %v6583_v3, %v6596_v35  ;;  %v1169_v44 = vsub.f32 %v6590_v6, %v6593_v2  ;;  %v6619_v48 = vsel %vm10587_vm15, %v1051_v23, %v1053_v34 }
 0x309   : > { %v1170_v28 = vsub.f32 %v6580_v21, %v6587_v61  ;;  %vm10595_vm3 = vcmask 1040384   ;;  %vm10604_vm5 = vcmask 1039360   ;;  %vm10607_vm0 = vcmask 7168  }
 0x30a   : > { %vm10597_vm12 = vmmov %vm10595_vm3  ;;  %vm10135_vm15 = vcmask 1043456  }
 0x30b   : > { %v1182_v42 = vadd.f32 %v1178_v49, %v1170_v28  ;;  %vm10600_vm6 = vmmov %vm10595_vm3 }
 0x30c   : > { %vm10605_vm14 = vmmov %vm10604_vm5 }
 0x30d   : > { %vm10606_vm13 = vmmov %vm10595_vm3 }
 0x30e   : > { %v1114_v37 = vpop.permute.xlu1 %1113  ;;  %v1112_v54 = vpop.permute.xlu0 %1111  ;;  %vm10608_vm11 = vmmov %vm10607_vm0 }
 0x30f   : > { %v1120_v7 = vsel %vm10572_vm4, %v1114_v37, %v1116_v8  ;;  %v1119_v41 = vsel %vm10573_vm2, %v1112_v54, %v1114_v37  ;;  %vm10588_vm4 = vcmask 1006592   ;;  %vm10590_vm2 = vnez %v10589_v32  ;;  %v10591_v37 = vld [vmem:[#allocation14_spill] sm:$0xff] }
 0x310   : > { %v1172_v16 = vsub.f32 %v1119_v41, %v1049_v39  ;;  %v1173_v31 = vsub.f32 %v1120_v7, %v1043_v14  ;;  %vm10592_vm1 = vnez %v10591_v37 }
 0x312   : > { %v1176_v55 = vmul.f32 2.0, %v1172_v16  ;;  %v1177_v46 = vmul.f32 2.0, %v1173_v31 }
 0x314   : > { %v1180_v13 = vadd.f32 %v1176_v55, %v1168_v24  ;;  %v1181_v1 = vadd.f32 %v1177_v46, %v1169_v44 }
 0x316   : > { %v1127_v62 = vpop.permute.xlu1 %1126  ;;  %v1131_v57 = vpop.permute.xlu0 %1130 }
 0x317   : > { %v6612_v18 = vsel %vm10584_vm8, %v1127_v62, %v1129_v9  ;;  %v6615_v36 = vsel %vm10585_vm10, %v1129_v9, %v1131_v57  ;;  %v1136_v63 = vsel %vm10586_vm7, %v1131_v57, %v1133_v56  ;;  %v6630_v56 = vpop.permute.xlu2 %1403  ;;  %vm10609_vm8 = vmmov %vm10595_vm3  ;;  %vm10610_vm10 = vcmask 1041408  }
 0x318   : > { %v1184_v30 = vsub.f32 %v6612_v18, %v6605_v5  ;;  %v6624_v58 = vsel %vm10588_vm4, %v1136_v63, 0.0  ;;  %v1185_v50 = vsub.f32 %v6615_v36, %v6619_v48  ;;  %vm1625_vm7 = vcmask 1042432   ;;  %vm10611_vm4 = vmmov %vm10610_vm10 }
 0x319   : > { %v1186_v53 = vsub.f32 %v6624_v58, %v6602_v10 }
 0x31a   : > { %v1188_v29 = vadd.f32 %v1184_v30, %v1180_v13  ;;  %v1189_v34 = vadd.f32 %v1185_v50, %v1181_v1  ;;  %v1525_v50 = vrot.slane %v6138_v20, 7 }
 0x31b   : > { %v1190_v23 = vadd.f32 %v1186_v53, %v1182_v42  ;;  %v10601_v42 = vld [vmem:[#allocation26_spill] sm:$0xff]  ;;  %v10602_v53 = vld [vmem:[#allocation25_spill] sm:$0xff] }
 0x31c   : > { %v1192_v27 = vmul.f32 0.125, %v1188_v29  ;;  %v1193_v8 = vmul.f32 0.125, %v1189_v34  ;;  %v1505_v1 = vmul.f32 %v10601_v42, %v10601_v42  ;;  %v1506_v29 = vmul.f32 %v10602_v53, %v10602_v53 }
 0x31d   : > { %v1194_v60 = vmul.f32 0.125, %v1190_v23  ;;  %v10603_v23 = vld [vmem:[#allocation28_spill] sm:$0xff] }
 0x31e   : > { %v1200_v9 = vsel %vm10590_vm2, %v1192_v27, 0.0  ;;  %v6634_v15 = vpop.permute.xlu1 %1388  ;;  %v1201_v54 = vsel %vm10592_vm1, %v1193_v8, 0.0  ;;  %v1526_v27 = vrot.slane %v10603_v23, 7  ;;  %v1088_v8 = vsel %vm10604_vm5, %v6564_v0, %v6558_v51 }
 0x31f   : > { %v1521_v39 = vmul.f32 %v1200_v9, %v1200_v9  ;;  %v1202_v43 = vsel %vm10594_vm9, %v1194_v60, 0.0  ;;  %v1522_v7 = vmul.f32 %v1201_v54, %v1201_v54  ;;  %v6646_v59 = vpop.permute.xlu2 %1416  ;;  %v1089_v60 = vsel %vm10605_vm14, %v6558_v51, %v6566_v11 }
 0x320   : > { %v1523_v14 = vmul.f32 %v1202_v43, %v1202_v43  ;;  %v1072_v0 = vsel %vm10607_vm0, %v6562_v52, %v6560_v4  ;;  %v1538_v51 = vrot.slane %v1506_v29, 6  ;;  %vm10616_vm14 = vcmask 883712  }
 0x321   : > { %v1609_v41 = vrot.slane %v1521_v39, 7  ;;  %v1610_v16 = vrot.slane %v1522_v7, 7  ;;  %v1175_v39 = vsub.f32 0.0, %v6539_v17  ;;  %v1510_v7 = vmul.f32 %v10603_v23, %v10603_v23 }
 0x322   : > { %v1611_v28 = vrot.slane %v1523_v14, 7  ;;  %v1618_v17 = vsel %vm10609_vm8, %v10602_v53, %v1526_v27 }
 0x323   : > { %v6641_v33 = vsel %vm10595_vm3, %v1200_v9, %v1609_v41  ;;  %v6644_v31 = vsel %vm10597_vm12, %v1201_v54, %v1610_v16  ;;  %v1509_v9 = vmul.f32 %v6138_v20, %v6138_v20  ;;  %v1537_v54 = vrot.slane %v1505_v1, 6  ;;  %vm10612_vm3 = vmmov %vm10604_vm5 }
 0x324   : > { %10596 = vst [vmem:[#allocation16_spill] sm:$0xff] %v6641_v33  ;;  %v6650_v55 = vpack.i.bf16 %v6644_v31, %v6641_v33  ;;  %v6661_v24 = vsel %vm10600_vm6, %v1202_v43, %v1611_v28  ;;  %v1617_v43 = vsel %vm10606_vm13, %v10601_v42, %v1525_v50  ;;  %v1079_v41 = vsel %vm10608_vm11, 0.0, %v6562_v52  ;;  %vm10613_vm12 = vmmov %vm10607_vm0 }
 0x325   : > { %10598 = vst [vmem:[#allocation19_spill] sm:$0xff] %v6644_v31  ;;  %v6665_v62 = vpack.i.bf16 %v6661_v24, %v6644_v31  ;;  %v1145_v14 = vsub.f32 %v1088_v8, %v1079_v41  ;;  %v1146_v16 = vsub.f32 %v1089_v60, %v1072_v0  ;;  %v1513_v50 = vmul.f32 %v6138_v20, %v10601_v42  ;;  %vm10617_vm13 = vmmov %vm10616_vm14 }
 0x326   : > { %10599 = vst [vmem:[#allocation17_spill] sm:$0xff] %v6650_v55  ;;  %v6652_v46 = vpop.permute.xlu1 %1401  ;;  %v6654_v49 = vpop.permute.xlu0 %1392  ;;  %4349 = vrot.lane.b32.xlu1 %v6650_v55, %s9968_s29  ;;  %4344 = vrot.lane.b32.xlu0 %v6650_v55, %s9974_s17  ;;  %v1549_v31 = vrot.slane %v1509_v9, 5  ;;  %v1514_v55 = vmul.f32 %v10603_v23, %v10602_v53  ;;  %v1179_v52 = vmul.f32 2.0, %v1175_v39  ;;  %v1621_v29 = vsel %vm10610_vm10, %v1617_v43, %v1537_v54  ;;  %vm10621_vm8 = vmmov %vm10617_vm13 }
 0x327   : > { %v6671_v63 = vpop.permute.xlu2 %1430  ;;  %v1550_v27 = vrot.slane %v1510_v7, 5  ;;  %v1622_v8 = vsel %vm10611_vm4, %v1618_v17, %v1538_v51  ;;  %v1171_v60 = vsub.f32 0.0, %v6526_v38  ;;  %v1187_v20 = vsub.f32 0.0, %v6550_v25 }
 0x328   : > { %v1149_v42 = vmul.f32 2.0, %v1145_v14  ;;  %v1150_v9 = vmul.f32 2.0, %v1146_v16  ;;  %v1090_v53 = vsel %vm10612_vm3, %v6566_v11, %v6541_v40  ;;  %v1561_v23 = vrot.slane %v1513_v50, 4 }
 0x329   : > { %v1626_v39 = vsel %vm1625_vm7, %v1621_v29, %v1549_v31  ;;  %v1562_v0 = vrot.slane %v1514_v55, 4  ;;  %v1183_v43 = vadd.f32 %v1179_v52, %v1171_v60  ;;  %v1141_v7 = vsub.f32 %v6605_v5, %v6596_v35  ;;  %v10618_v29 = vld [vmem:[#allocation27_spill] sm:$0xff] }
 0x32a   : > { %v1142_v41 = vsub.f32 %v6619_v48, %v6593_v2  ;;  %v1157_v51 = vsub.f32 %v6612_v18, %v6583_v3  ;;  %v1073_v14 = vsel %vm10613_vm12, %v6560_v4, %v6555_v45  ;;  %v1627_v11 = vsel %vm1625_vm7, %v1622_v8, %v1550_v27 }
 0x32b   : > { %v1158_v31 = vsub.f32 %v6615_v36, %v6590_v6  ;;  %v1191_v55 = vadd.f32 %v1187_v20, %v1183_v43  ;;  %v1153_v16 = vadd.f32 %v1149_v42, %v1141_v7  ;;  %v1147_v17 = vsub.f32 %v1090_v53, %v1073_v14 }
 0x32c   : > { %v1154_v50 = vadd.f32 %v1150_v9, %v1142_v41  ;;  %vm10614_vm6 = vcmask 162816   ;;  %v6747_v6 = vsel %vm10135_vm15, %v1626_v39, %v1561_v23  ;;  %v6751_v27 = vmul.f32 %v10618_v29, %v10618_v29 }
 0x32d   : > { %v1407_v2 = vsel %vm10614_vm6, %v6652_v46, %v6630_v56  ;;  %vm10615_vm5 = vmmov %vm10614_vm6  ;;  %v1160_v36 = vadd.f32 %v1157_v51, %v1153_v16  ;;  %v1195_v60 = vmul.f32 0.125, %v1191_v55  ;;  %v1151_v20 = vmul.f32 2.0, %v1147_v17 }
 0x32e   : > { %v6667_v57 = vpop.permute.xlu1 %1414  ;;  %v6669_v44 = vpop.permute.xlu0 %1405  ;;  %4359 = vrot.lane.b32.xlu0 %v6665_v62, %s9966_s18  ;;  %v1413_v3 = vsel %vm10615_vm5, 0.0, %v6652_v46  ;;  %v6755_v46 = vmul.f32 %v6162_v22, %v6162_v22  ;;  %v1161_v8 = vadd.f32 %v1158_v31, %v1154_v50  ;;  %v6762_v42 = vmul.f32 %v6162_v22, %v10618_v29 }
 0x32f   : > { %v1444_v34 = vpop.permute.xlu2 %1443  ;;  %v1527_v9 = vrot.slane %v6162_v22, 7  ;;  %v1143_v53 = vsub.f32 %v6602_v10, %v6587_v61  ;;  %v1159_v23 = vsub.f32 %v6624_v58, %v6580_v21  ;;  %vm10619_vm0 = vcmask 891904  }
 0x330   : > { %vm10620_vm11 = vmmov %vm10619_vm0  ;;  %v1164_v43 = vmul.f32 0.125, %v1160_v36  ;;  %v1165_v22 = vmul.f32 0.125, %v1161_v8  ;;  %vm10622_vm10 = vcmask 171008   ;;  %vm10624_vm3 = vcmask 154624   ;;  %v10630_v8 = vld [vmem:[#allocation15_spill] sm:$0xff] }
 0x331   : > { %v1394_v61 = vsel %vm10622_vm10, %v6634_v15, %v6577_v26  ;;  %vm10623_vm4 = vmmov %vm10622_vm10  ;;  %v1155_v58 = vadd.f32 %v1151_v20, %v1143_v53  ;;  %vm10626_vm6 = vcmask 1014784   ;;  %vm10627_vm5 = vcmask 875520  }
 0x332   : > { %v1400_v21 = vsel %vm10623_vm4, 0.0, %v6634_v15  ;;  %vm10625_vm12 = vmmov %vm10624_vm3  ;;  %v1539_v53 = vrot.slane %v6751_v27, 6  ;;  %vm10632_vm10 = vcmask 1040384   ;;  %vm10083_vm4 = vcmask 1045504  }
 0x333   : > { %v1426_v31 = vsel %vm10625_vm12, 0.0, %v6667_v57  ;;  %vm10634_vm12 = vcmask 171008  }
 0x336   : > { %v6675_v13 = vpop.permute.xlu1 %1428  ;;  %v6677_v30 = vpop.permute.xlu0 %1418  ;;  %4369 = vrot.lane.b32.xlu0 %v6665_v62, %s10104_s19 }
 0x337   : > { %v1450_v54 = vpop.permute.xlu2 %1449  ;;  %v1436_v39 = vsel %vm10619_vm0, %v6675_v13, %v6671_v63  ;;  %v1420_v13 = vsel %vm10624_vm3, %v6667_v57, %v6646_v59  ;;  %v1197_v57 = vsel %vm10592_vm1, %v1165_v22, 0.0  ;;  %vm10633_vm3 = vcmask 1022976  }
 0x33e   : > { %v6707_v28 = vpop.permute.xlu1 %1434  ;;  %v6709_v1 = vpop.permute.xlu0 %1432  ;;  %4379 = vrot.lane.b32.xlu0 %v6665_v62, %s10094_s20 }
 0x33f   : > { %v1463_v10 = vpop.permute.xlu2 %1462 }
 0x346   : > { %v1448_v35 = vpop.permute.xlu1 %1447  ;;  %v1446_v5 = vpop.permute.xlu0 %1445  ;;  %4389 = vrot.lane.b32.xlu0 %v6665_v62, %s10098_s21 }
 0x347   : > { %v1451_v4 = vsel %vm10616_vm14, %v1444_v34, %v1446_v5  ;;  %v1452_v18 = vsel %vm10617_vm13, %v1446_v5, %v1448_v35  ;;  %v6758_v34 = vsel %vm10135_vm15, %v1627_v11, %v1562_v0  ;;  %v1437_v0 = vsel %vm10620_vm11, %v6671_v63, %v6709_v1  ;;  %vm10628_vm14 = vmmov %vm10627_vm5 }
 0x348   : > { %v1477_v48 = vsub.f32 %v1451_v4, %v1413_v3  ;;  %v1478_v52 = vsub.f32 %v1452_v18, %v1407_v2  ;;  %v1453_v7 = vsel %vm10621_vm8, %v1448_v35, %v1450_v54  ;;  %v1473_v63 = vsub.f32 %v1436_v39, %v1400_v21 }
 0x349   : > { %v1474_v14 = vsub.f32 %v1437_v0, %v1394_v61  ;;  %v1457_v55 = vsel %vm10626_vm6, %v1453_v7, 0.0  ;;  %v1196_v2 = vsel %vm10590_vm2, %v1164_v43, 0.0  ;;  %v1162_v3 = vadd.f32 %v1159_v23, %v1155_v58  ;;  %vm10635_vm6 = vmmov %vm10627_vm5 }
 0x34a   : > { %v1481_v41 = vmul.f32 2.0, %v1477_v48  ;;  %v1482_v51 = vmul.f32 2.0, %v1478_v52  ;;  %vm10629_vm13 = vcmask 162816   ;;  %v1438_v18 = vsel %vm10619_vm0, %v6709_v1, %v6707_v28 }
 0x34b   : > { %v1408_v4 = vsel %vm10629_vm13, %v6630_v56, %v6669_v44  ;;  %vm10631_vm11 = vnez %v10630_v8  ;;  %vm10011_vm8 = vcmask 1044480   ;;  %v1619_v23 = vsel %vm10632_vm10, %v10618_v29, %v1527_v9 }
 0x34c   : > { %v1486_v15 = vadd.f32 %v1482_v51, %v1474_v14  ;;  %v1485_v35 = vadd.f32 %v1481_v41, %v1473_v63  ;;  %v1479_v36 = vsub.f32 %v1457_v55, %v1408_v4  ;;  %v1203_v20 = vsel %vm10631_vm11, %v1195_v60, 0.0 }
 0x34d   : > { %v1573_v39 = vrot.slane %v1196_v2, 3  ;;  %v1574_v0 = vrot.slane %v1197_v57, 3  ;;  %v1166_v7 = vmul.f32 0.125, %v1162_v3  ;;  %v1442_v28 = vsel %vm10633_vm3, %v1438_v18, 0.0 }
 0x34e   : > { %v1461_v11 = vpop.permute.xlu1 %1460  ;;  %v1459_v54 = vpop.permute.xlu0 %1458  ;;  %4399 = vrot.lane.b32.xlu0 %v6665_v62, %s9970_s22  ;;  %v1395_v1 = vsel %vm10634_vm12, %v6577_v26, %v6654_v49  ;;  %v1483_v41 = vmul.f32 2.0, %v1479_v36  ;;  %vm10637_vm13 = vcmask 1006592   ;;  %vm10638_vm0 = vcmask 1041408  }
 0x34f   : > { %v1467_v16 = vsel %vm10627_vm5, %v1461_v11, %v1463_v10  ;;  %v1466_v17 = vsel %vm10628_vm14, %v1459_v54, %v1461_v11  ;;  %v1636_v21 = vsel %vm10011_vm8, %v6747_v6, %v1573_v39  ;;  %v1637_v26 = vsel %vm10011_vm8, %v6758_v34, %v1574_v0 }
 0x350   : > { %v1490_v50 = vsub.f32 %v1467_v16, %v1420_v13  ;;  %v1489_v5 = vsub.f32 %v1466_v17, %v1426_v31  ;;  %v1475_v58 = vsub.f32 %v1442_v28, %v1395_v1  ;;  %v1524_v31 = vmul.f32 %v1203_v20, %v1203_v20 }
 0x351   : > { %vm1645_vm5 = vcmask 1046528   ;;  %vm10636_vm14 = vcmask 154624   ;;  %vm10639_vm10 = vcmask 7168   ;;  %vm10640_vm3 = vcmask 121856  }
 0x352   : > { %v1494_v48 = vadd.f32 %v1490_v50, %v1486_v15  ;;  %v1493_v52 = vadd.f32 %v1489_v5, %v1485_v35  ;;  %v1421_v55 = vsel %vm10636_vm14, %v6646_v59, %v6677_v30  ;;  %v1551_v15 = vrot.slane %v6755_v46, 5  ;;  %vm10645_vm14 = vmmov %vm10638_vm0 }
 0x353   : > { %v1623_v50 = vsel %vm10638_vm0, %v1619_v23, %v1539_v53  ;;  %v1074_v59 = vsel %vm10639_vm10, %v6555_v45, %v6543_v12  ;;  %v1198_v5 = vsel %vm10594_vm9, %v1166_v7, 0.0  ;;  %v1095_v46 = vsel %vm10640_vm3, %v6541_v40, 0.0 }
 0x354   : > { %v1498_v43 = vmul.f32 0.125, %v1494_v48  ;;  %v1497_v56 = vmul.f32 0.125, %v1493_v52  ;;  %v1612_v3 = vrot.slane %v1524_v31, 7  ;;  %v1148_v12 = vsub.f32 %v1095_v46, %v1074_v59 }
 0x355   : > { %v1628_v45 = vsel %vm1625_vm7, %v1623_v50, %v1551_v15  ;;  %v1575_v18 = vrot.slane %v1198_v5, 3  ;;  %v1563_v36 = vrot.slane %v6762_v42, 4  ;;  %vm10641_vm12 = vcmask 1040384  }
 0x356   : > { %v1502_v60 = vsel %vm10592_vm1, %v1498_v43, 0.0  ;;  %v1501_v27 = vsel %vm10590_vm2, %v1497_v56, 0.0  ;;  %v1465_v29 = vpop.permute.xlu0 %1464  ;;  %4409 = vrot.lane.b32.xlu0 %v6665_v62, %s10090_s13  ;;  %v6858_v40 = vsel %vm10641_vm12, %v1203_v20, %v1612_v3  ;;  %v1152_v39 = vmul.f32 2.0, %v1148_v12 }
 0x357   : > { %v1518_v9 = vmul.f32 %v1502_v60, %v1197_v57  ;;  %v1586_v51 = vrot.slane %v1502_v60, 2  ;;  %v1517_v22 = vmul.f32 %v1501_v27, %v1196_v2  ;;  %v1585_v61 = vrot.slane %v1501_v27, 2  ;;  %10642 = vst [vmem:[#allocation22_spill] sm:$0xff] %v6858_v40 }
 0x358   : > { %v1468_v13 = vsel %vm10635_vm6, %v1463_v10, %v1465_v29  ;;  %v1487_v10 = vadd.f32 %v1483_v41, %v1475_v58  ;;  %v1480_v57 = vsub.f32 0.0, %v6669_v44  ;;  %v1633_v44 = vsel %vm10135_vm15, %v1628_v45, %v1563_v36  ;;  %v10643_v41 = vld [vmem:[#allocation24_spill] sm:$0xff]  ;;  %vm10644_vm6 = vmmov %vm10641_vm12 }
 0x359   : > { %v1598_v63 = vrot.slane %v1518_v9, 1  ;;  %v1642_v14 = vsel %vm10083_vm4, %v1637_v26, %v1586_v51  ;;  %v1597_v11 = vrot.slane %v1517_v22, 1  ;;  %v1641_v54 = vsel %vm10083_vm4, %v1636_v21, %v1585_v61 }
 0x35a   : > { %v1472_v6 = vsel %vm10637_vm13, %v1468_v13, 0.0  ;;  %v1484_v23 = vmul.f32 2.0, %v1480_v57  ;;  %v1638_v0 = vsel %vm10011_vm8, %v1633_v44, %v1575_v18  ;;  %v6864_v43 = vpack.i.bf16 %v6858_v40, %v6661_v24 }
 0x35b   : > { %v6828_v16 = vsel %vm1645_vm5, %v1642_v14, %v1598_v63  ;;  %v6831_v34 = vsel %vm1645_vm5, %v1641_v54, %v1597_v11  ;;  %v1491_v17 = vsub.f32 %v1472_v6, %v1421_v55  ;;  %v1476_v42 = vsub.f32 0.0, %v6654_v49 }
 0x35c   : > { %v6837_v35 = vpack.i.bf16 %v6828_v16, %v6831_v34  ;;  %v1492_v56 = vsub.f32 0.0, %v6677_v30  ;;  %v1144_v20 = vsub.f32 %v6550_v25, %v6526_v38  ;;  %v1508_v49 = vmul.f32 %v10643_v41, %v10643_v41 }
 0x35d   : > { %v1495_v2 = vadd.f32 %v1491_v17, %v1487_v10  ;;  %v1488_v1 = vadd.f32 %v1484_v23, %v1476_v42  ;;  %v1512_v29 = vmul.f32 %v6022_v19, %v6022_v19  ;;  %v1528_v38 = vrot.slane %v6022_v19, 7 }
 0x35e   : > { %4464 = vrot.lane.b32.xlu2 %v6837_v35, %s9968_s29  ;;  %4354 = vrot.lane.b32.xlu1 %v6837_v35, %s9966_s18  ;;  %v1156_v30 = vadd.f32 %v1152_v39, %v1144_v20  ;;  %v1540_v9 = vrot.slane %v1508_v49, 6  ;;  %v1516_v26 = vmul.f32 %v6022_v19, %v10643_v41  ;;  %vm10038_vm12 = vcmask 15360  }
 0x35f   : > { %v1499_v4 = vmul.f32 0.125, %v1495_v2  ;;  %4419 = vrot.lane.b32.xlu0 %v6665_v62, %s10100_s16  ;;  %v1496_v60 = vadd.f32 %v1492_v56, %v1488_v1  ;;  %v1620_v61 = vsel %vm10644_vm6, %v10643_v41, %v1528_v38  ;;  %v1552_v58 = vrot.slane %v1512_v29, 5 }
 0x360   : > { %v1167_v25 = vmul.f32 0.125, %v1156_v30  ;;  %v1624_v21 = vsel %vm10645_vm14, %v1620_v61, %v1540_v9  ;;  %v1564_v31 = vrot.slane %v1516_v26, 4  ;;  %vm10010_vm6 = vcmask 334848  }
 0x361   : > { %v1503_v48 = vsel %vm10594_vm9, %v1499_v4, 0.0  ;;  %v1500_v22 = vmul.f32 0.125, %v1496_v60  ;;  %v1629_v14 = vsel %vm1625_vm7, %v1624_v21, %v1552_v58  ;;  %vm10649_vm7 = vmmov %vm10639_vm10  ;;  %vm10036_vm14 = vcmask 326656  }
 0x362   : > { %v1519_v52 = vmul.f32 %v1503_v48, %v1198_v5  ;;  %v1587_v53 = vrot.slane %v1503_v48, 2  ;;  %v1199_v13 = vsel %vm10631_vm11, %v1167_v25, 0.0  ;;  %v1634_v19 = vsel %vm10135_vm15, %v1629_v14, %v1564_v31 }
 0x363   : > { %v1504_v63 = vsel %vm10631_vm11, %v1500_v22, 0.0  ;;  %v1576_v11 = vrot.slane %v1199_v13, 3 }
 0x364   : > { %v1599_v7 = vrot.slane %v1519_v52, 1  ;;  %v1643_v28 = vsel %vm10083_vm4, %v1638_v0, %v1587_v53  ;;  %v1520_v54 = vmul.f32 %v1504_v63, %v1199_v13  ;;  %v1588_v55 = vrot.slane %v1504_v63, 2 }
 0x365   : > { %v1639_v6 = vsel %vm10011_vm8, %v1634_v19, %v1576_v11 }
 0x366   : > { %4469 = vrot.lane.b32.xlu2 %v6864_v43, %s9968_s29  ;;  %4364 = vrot.lane.b32.xlu1 %v6837_v35, %s10104_s19  ;;  %v6880_v27 = vsel %vm1645_vm5, %v1643_v28, %v1599_v7  ;;  %v1600_v10 = vrot.slane %v1520_v54, 1  ;;  %v1644_v17 = vsel %vm10083_vm4, %v1639_v6, %v1588_v55 }
 0x367   : > { %4429 = vrot.lane.b32.xlu0 %v6665_v62, %s9972_s9  ;;  %v4473_v51 = vpack.i.bf16 %v6641_v33, %v6880_v27 }
 0x368   : > { %v6911_v15 = vsel %vm1645_vm5, %v1644_v17, %v1600_v10  ;;  %vm10650_vm5 = vmmov %vm10649_vm7  ;;  %v4743_v10 = vpack.i.bf16 %v6880_v27, %v6828_v16 }
 0x369   : > { %v6915_v50 = vpack.i.bf16 %v6911_v15, %v6880_v27  ;;  %vm10651_vm13 = vmmov %vm10650_vm5  ;;  %v7084_v19 = vpack.i.bf16 %v6858_v40, %v6911_v15 }
 0x36a   : > { %vm10652_vm0 = vmmov %vm10650_vm5 }
 0x36b   : > { %vm10660_vm10 = vmmov %vm10652_vm0 }
 0x36c   : > { %vm10661_vm3 = vmmov %vm10652_vm0 }
 0x36e   : > { %4474 = vrot.lane.b32.xlu2 %v4473_v51, %s9966_s18  ;;  %4374 = vrot.lane.b32.xlu1 %v6837_v35, %s10094_s20  ;;  %s10102_s18 = smov 18  }
 0x36f   : > { %4439 = vrot.lane.b32.xlu0 %v6665_v62, %s10096_s15 }
 0x376   : > { %4479 = vrot.lane.b32.xlu2 %v4473_v51, %s10104_s19  ;;  %4384 = vrot.lane.b32.xlu1 %v6837_v35, %s10098_s21 }
 0x377   : > { %4449 = vrot.lane.b32.xlu0 %v6665_v62, %s10102_s18  ;;  %v10646_v62 = vld [vmem:[#allocation17_spill] sm:$0xff] }
 0x37e   : > { %4484 = vrot.lane.b32.xlu2 %v4473_v51, %s10094_s20  ;;  %4394 = vrot.lane.b32.xlu1 %v6837_v35, %s9970_s22 }
 0x37f   : > { %4529 = vrot.lane.b32.xlu0 %v6915_v50, %s9968_s29  ;;  %s9978_s29 = smov 126  }
 0x386   : > { %4489 = vrot.lane.b32.xlu2 %v4473_v51, %s10098_s21  ;;  %4404 = vrot.lane.b32.xlu1 %v6837_v35, %s10090_s13 }
 0x387   : > { %4534 = vrot.lane.b32.xlu0 %v6837_v35, %s9976_s23 }
 0x38e   : > { %4494 = vrot.lane.b32.xlu2 %v4473_v51, %s9970_s22  ;;  %4414 = vrot.lane.b32.xlu1 %v6837_v35, %s10100_s16  ;;  %s9980_s22 = smov 110  }
 0x38f   : > { %4549 = vrot.lane.b32.xlu0 %v6864_v43, %s9976_s23 }
 0x396   : > { %4499 = vrot.lane.b32.xlu2 %v4473_v51, %s10090_s13  ;;  %4424 = vrot.lane.b32.xlu1 %v6837_v35, %s9972_s9 }
 0x397   : > { %4564 = vrot.lane.b32.xlu0 %v10646_v62, %s9978_s29 }
 0x398   : > { %v6937_v59 = vpop.permute.xlu0 %4344  ;;  %v6960_v3 = vpop.permute.xlu1 %4349 }
 0x399   : > { %10647 = vst [vmem:[#allocation20_spill] sm:$0xff] %v6937_v59  ;;  %v4352_v57 = vunpack.i.h.bf16 %v6960_v3  ;;  %v4351_v4 = vunpack.i.l.bf16 %v6960_v3  ;;  %v9985_v3 = vunpack.i.h.bf16 %v6937_v59 }
 0x39b   : > { %v1941_v45 = vsel %vm10649_vm7, 0.0, %v4351_v4  ;;  %v1935_v52 = vsel %vm10650_vm5, %v4351_v4, %v4352_v57  ;;  %vm10035_vm7 = vcmask 318464   ;;  %vm10012_vm5 = vcmask 343040  }
 0x39c   : > { %v2462_v39 = vrot.slane %v1941_v45, 2  ;;  %v2464_v42 = vrot.slane %v1935_v52, 2 }
 0x39e   : > { %4504 = vrot.lane.b32.xlu2 %v4473_v51, %s10100_s16  ;;  %4434 = vrot.lane.b32.xlu1 %v6837_v35, %s10096_s15 }
 0x39f   : > { %4579 = vrot.lane.b32.xlu0 %v6915_v50, %s9980_s22 }
 0x3a0   : > { %v6944_v5 = vpop.permute.xlu0 %4359 }
 0x3a1   : > { %10648 = vst [vmem:[#allocation18_spill] sm:$0xff] %v6944_v5 }
 0x3a6   : > { %4509 = vrot.lane.b32.xlu2 %v4473_v51, %s9972_s9  ;;  %4444 = vrot.lane.b32.xlu1 %v6837_v35, %s10102_s18  ;;  %s10653_s9 = smov 107  }
 0x3a7   : > { %4594 = vrot.lane.b32.xlu0 %v6837_v35, %s9982_s14 }
 0x3a8   : > { %v6951_v2 = vpop.permute.xlu0 %4369 }
 0x3ae   : > { %4514 = vrot.lane.b32.xlu2 %v4473_v51, %s10096_s15  ;;  %4454 = vrot.lane.b32.xlu1 %v6837_v35, %s9974_s17 }
 0x3af   : > { %4609 = vrot.lane.b32.xlu0 %v6864_v43, %s9982_s14 }
 0x3b0   : > { %v6958_v46 = vpop.permute.xlu0 %4379 }
 0x3b6   : > { %4519 = vrot.lane.b32.xlu2 %v4473_v51, %s10102_s18  ;;  %4459 = vrot.lane.b32.xlu1 %v6864_v43, %s9974_s17 }
 0x3b7   : > { %4624 = vrot.lane.b32.xlu0 %v10646_v62, %s9998_s8 }
 0x3b8   : > { %v6969_v12 = vpop.permute.xlu2 %4464  ;;  %v6972_v18 = vpop.permute.xlu0 %4389 }
 0x3b9   : > { %v4467_v36 = vunpack.i.h.bf16 %v6969_v12  ;;  %v4466_v48 = vunpack.i.l.bf16 %v6969_v12 }
 0x3bb   : > { %v6980_v53 = vsel %vm10651_vm13, 0.0, %v4466_v48  ;;  %v6985_v44 = vsel %vm10652_vm0, %v4466_v48, %v4467_v36  ;;  %v7116_v48 = vpack.i.bf16 %v6661_v24, %v6880_v27  ;;  %vm10065_vm13 = vcmask 310272  }
 0x3bc   : > { %v9987_v23 = vrot.slane %v6980_v53, 2  ;;  %v9986_v0 = vrot.slane %v6985_v44, 2 }
 0x3be   : > { %4524 = vrot.lane.b32.xlu2 %v6915_v50, %s9974_s17  ;;  %4539 = vrot.lane.b32.xlu1 %v6915_v50, %s9976_s23  ;;  %v2463_v56 = vsel %vm10083_vm4, %v9987_v23, %v2462_v39  ;;  %v2465_v7 = vsel %vm10083_vm4, %v9986_v0, %v2464_v42  ;;  %s10092_s17 = smov 106   ;;  %v4372_v39 = vunpack.i.h.bf16 %v6951_v2  ;;  %v4371_v42 = vunpack.i.l.bf16 %v6951_v2 }
 0x3bf   : > { %4639 = vrot.lane.b32.xlu0 %v6915_v50, %s10653_s9  ;;  %v2750_v28 = vpack.c.bf16 %v6831_v34, %v2463_v56  ;;  %v2751_v20 = vpack.c.bf16 %v6828_v16, %v2465_v7  ;;  %v9994_v2 = vunpack.i.h.bf16 %v6944_v5 }
 0x3c0   : > { %v7003_v1 = vpop.permute.xlu2 %4469  ;;  %v7005_v41 = vpop.permute.xlu0 %4399 }
 0x3c1   : > { %10654 = vst [vmem:[#allocation23_spill] sm:$0xff] %v7005_v41  ;;  %2812 = vmatpush.bf16.msra.mxu0 %v2750_v28  ;;  %2838 = vmatpush.bf16.msra.mxu2 %v2751_v20  ;;  %v4471_v63 = vunpack.i.l.bf16 %v7003_v1  ;;  %v4382_v28 = vunpack.i.h.bf16 %v6958_v46  ;;  %v9989_v20 = vunpack.i.l.bf16 %v6958_v46  ;;  %v10669_v8 = vunpack.i.h.bf16 %v7005_v41 }
 0x3c2   : > { %v10670_v47 = vunpack.i.l.bf16 %v7005_v41 }
 0x3c3   : > { %v1936_v55 = vsel %vm10660_vm10, %v4352_v57, %v4471_v63  ;;  %v4346_v57 = vunpack.i.l.bf16 %v6937_v59  ;;  %v7145_v52 = vsel %vm10036_vm14, %v9989_v20, %v4382_v28  ;;  %vm10039_vm10 = vcmask 179200  }
 0x3c4   : > { %v2466_v4 = vrot.slane %v1936_v55, 2  ;;  %v4392_v55 = vunpack.i.h.bf16 %v6972_v18  ;;  %10664 = vst [vmem:[#allocation29_spill] sm:$0xff] %v7145_v52  ;;  %v7188_v37 = vsel %vm10065_vm13, %v10670_v47, %v10669_v8 }
 0x3c5   : > { %v7125_v56 = vsel %vm10038_vm12, %v4346_v57, %v9985_v3  ;;  %v7128_v7 = vsel %vm10038_vm12, 0.0, %v4346_v57  ;;  %v7140_v3 = vsel %vm10010_vm6, %v4371_v42, %v4372_v39  ;;  %10671 = vst [vmem:[#allocation34_spill] sm:$0xff] %v7188_v37 }
 0x3c6   : > { %4544 = vrot.lane.b32.xlu2 %v10646_v62, %s9976_s23  ;;  %4554 = vrot.lane.b32.xlu1 %v6837_v35, %s9978_s29  ;;  %s10088_s23 = smov 88   ;;  %10663 = vst [vmem:[#allocation17_spill] sm:$0xff] %v7140_v3 }
 0x3c7   : > { %4654 = vrot.lane.b32.xlu0 %v6837_v35, %s10092_s17 }
 0x3c8   : > { %v7013_v49 = vpop.permute.xlu2 %4474  ;;  %v7015_v30 = vpop.permute.xlu0 %4409 }
 0x3c9   : > { %10655 = vst [vmem:[#allocation21_spill] sm:$0xff] %v7013_v49  ;;  %v4412_v57 = vunpack.i.h.bf16 %v7015_v30 }
 0x3ce   : > { %4559 = vrot.lane.b32.xlu2 %v6915_v50, %s9978_s29  ;;  %4569 = vrot.lane.b32.xlu1 %v6864_v43, %s9978_s29  ;;  %s10108_s29 = smov 87  }
 0x3cf   : > { %4669 = vrot.lane.b32.xlu0 %v6864_v43, %s10092_s17 }
 0x3d0   : > { %v7023_v60 = vpop.permute.xlu2 %4479  ;;  %v7025_v29 = vpop.permute.xlu1 %4354 }
 0x3d1   : > { %10656 = vst [vmem:[#allocation26_spill] sm:$0xff] %v7025_v29  ;;  %v7027_v9 = vpop.permute.xlu0 %4419  ;;  %v4482_v20 = vunpack.i.h.bf16 %v7023_v60 }
 0x3d2   : > { %v4422_v33 = vunpack.i.h.bf16 %v7027_v9 }
 0x3d6   : > { %4574 = vrot.lane.b32.xlu2 %v6837_v35, %s9980_s22  ;;  %4584 = vrot.lane.b32.xlu1 %v10646_v62, %s9980_s22 }
 0x3d7   : > { %4684 = vrot.lane.b32.xlu0 %v6837_v35, %s10088_s23 }
 0x3d8   : > { %v7035_v51 = vpop.permute.xlu2 %4484  ;;  %v7037_v38 = vpop.permute.xlu1 %4364 }
 0x3d9   : > { %v7039_v25 = vpop.permute.xlu0 %4429  ;;  %v4367_v8 = vunpack.i.h.bf16 %v7037_v38  ;;  %v4486_v32 = vunpack.i.l.bf16 %v7035_v51 }
 0x3da   : > { %v4432_v52 = vunpack.i.h.bf16 %v7039_v25 }
 0x3de   : > { %4589 = vrot.lane.b32.xlu2 %v6864_v43, %s9980_s22  ;;  %4599 = vrot.lane.b32.xlu1 %v6915_v50, %s9982_s14  ;;  %s10056_s22 = smov 89  }
 0x3df   : > { %4699 = vrot.lane.b32.xlu0 %v10646_v62, %s10108_s29 }
 0x3e0   : > { %v7047_v22 = vpop.permute.xlu2 %4489  ;;  %v7049_v61 = vpop.permute.xlu1 %4374 }
 0x3e1   : > { %10657 = vst [vmem:[#allocation25_spill] sm:$0xff] %v7047_v22  ;;  %v7051_v21 = vpop.permute.xlu0 %4439  ;;  %v4376_v40 = vunpack.i.l.bf16 %v7049_v61 }
 0x3e6   : > { %4604 = vrot.lane.b32.xlu2 %v10646_v62, %s9982_s14  ;;  %4614 = vrot.lane.b32.xlu1 %v6837_v35, %s9998_s8  ;;  %s10054_s14 = smov 90  }
 0x3e7   : > { %4714 = vrot.lane.b32.xlu0 %v6837_v35, %s10056_s22 }
 0x3e8   : > { %v7059_v26 = vpop.permute.xlu2 %4494  ;;  %v7061_v58 = vpop.permute.xlu1 %4384 }
 0x3e9   : > { %10658 = vst [vmem:[#allocation28_spill] sm:$0xff] %v7059_v26  ;;  %v7063_v13 = vpop.permute.xlu0 %4449 }
 0x3ee   : > { %4619 = vrot.lane.b32.xlu2 %v6915_v50, %s9998_s8  ;;  %4629 = vrot.lane.b32.xlu1 %v6864_v43, %s9998_s8  ;;  %s10106_s8 = smov 86  }
 0x3ef   : > { %4729 = vrot.lane.b32.xlu0 %v10646_v62, %s10054_s14 }
 0x3f0   : > { %v7072_v14 = vpop.permute.xlu2 %4499  ;;  %v7074_v11 = vpop.permute.xlu1 %4394 }
 0x3f1   : > { %10659 = vst [vmem:[#allocation27_spill] sm:$0xff] %v7074_v11  ;;  %v7076_v54 = vpop.permute.xlu0 %4529 }
 0x3f2   : > { %v9988_v31 = vunpack.i.l.bf16 %v7076_v54 }
 0x3f4   : > { %v7091_v6 = vsel %vm10661_vm3, %v4467_v36, %v9988_v31  ;;  %vm10678_vm3 = vcmask 171008  }
 0x3f5   : > { %10662 = vst [vmem:[#allocation24_spill] sm:$0xff] %v7091_v6  ;;  %v9984_v17 = vrot.slane %v7091_v6, 2 }
 0x3f6   : > { %4634 = vrot.lane.b32.xlu2 %v6837_v35, %s10653_s9  ;;  %4644 = vrot.lane.b32.xlu1 %v10646_v62, %s10653_s9 }
 0x3f7   : > { %4744 = vrot.lane.b32.xlu0 %v4743_v10, %s10054_s14  ;;  %v7108_v16 = vsel %vm10083_vm4, %v9984_v17, %v2466_v4  ;;  %v9990_v10 = vunpack.i.l.bf16 %v6972_v18  ;;  %v4472_v4 = vunpack.i.h.bf16 %v7003_v1  ;;  %v4361_v17 = vunpack.i.l.bf16 %v6944_v5 }
 0x3f8   : > { %v7110_v45 = vpop.permute.xlu2 %4504  ;;  %v7112_v36 = vpop.permute.xlu1 %4404  ;;  %v7178_v1 = vrot.slane %v4392_v55, 2  ;;  %v10680_v5 = vunpack.i.h.bf16 %v7025_v29 }
 0x3f9   : > { %v7158_v12 = vsel %vm10652_vm0, %v4471_v63, %v4472_v4  ;;  %v7163_v31 = vsel %vm10035_vm7, %v9990_v10, %v4392_v55  ;;  %v7173_v23 = vsel %vm10012_vm5, %v4361_v17, %v9994_v2  ;;  %v7175_v63 = vrot.slane %v4382_v28, 4 }
 0x3fa   : > { %10665 = vst [vmem:[#allocation30_spill] sm:$0xff] %v7163_v31  ;;  %v10672_v2 = vunpack.i.l.bf16 %v7015_v30  ;;  %v4481_v4 = vunpack.i.l.bf16 %v7023_v60  ;;  %v4366_v10 = vunpack.i.l.bf16 %v7037_v38  ;;  %vm10037_vm0 = vcmask 146432  }
 0x3fb   : > { %10666 = vst [vmem:[#allocation31_spill] sm:$0xff] %v7173_v23  ;;  %v1709_v23 = vsel %vm10010_vm6, 0.0, %v4482_v20 }
 0x3fc   : > { %10667 = vst [vmem:[#allocation32_spill] sm:$0xff] %v7175_v63  ;;  %v7194_v55 = vsel %vm10039_vm10, %v10672_v2, %v4412_v57  ;;  %v4487_v2 = vunpack.i.h.bf16 %v7035_v51  ;;  %v1704_v63 = vsel %vm10010_vm6, %v4482_v20, %v4371_v42  ;;  %v7216_v38 = vrot.slane %v4481_v4, 6 }
 0x3fd   : > { %10668 = vst [vmem:[#allocation33_spill] sm:$0xff] %v7178_v1  ;;  %v7207_v1 = vrot.slane %v4412_v57, 6  ;;  %v1708_v57 = vsel %vm10010_vm6, 0.0, %v4366_v10  ;;  %v10677_v42 = vunpack.i.l.bf16 %v7027_v9  ;;  %v1702_v47 = vsel %vm10010_vm6, %v4366_v10, %v4367_v8 }
 0x3fe   : > { %4649 = vrot.lane.b32.xlu2 %v6864_v43, %s10653_s9  ;;  %4659 = vrot.lane.b32.xlu1 %v6915_v50, %s10092_s17  ;;  %v2292_v43 = vrot.slane %v4372_v39, 6  ;;  %v4477_v39 = vunpack.i.h.bf16 %v7013_v49  ;;  %10673 = vst [vmem:[#allocation35_spill] sm:$0xff] %v7194_v55  ;;  %v2286_v37 = vrot.slane %v1709_v23, 6  ;;  %v10683_v55 = vunpack.i.l.bf16 %v6958_v46 }
 0x3ff   : > { %4759 = vrot.lane.b32.xlu0 %v7084_v19, %s10108_s29  ;;  %10674 = vst [vmem:[#allocation36_spill] sm:$0xff] %v7207_v1  ;;  %v7226_v20 = vsel %vm10678_vm3, %v10677_v42, %v4422_v33  ;;  %v2288_v42 = vrot.slane %v1704_v63, 6  ;;  %v1730_v10 = vsel %vm10036_vm14, 0.0, %v4487_v2  ;;  %v7248_v1 = vsel %vm10010_vm6, %v4367_v8, %v4481_v4 }
 0x400   : > { %v7166_v50 = vpop.permute.xlu2 %4509  ;;  %v7168_v0 = vpop.permute.xlu1 %4414  ;;  %v1688_v28 = vsel %vm10012_vm5, 0.0, %v4477_v39  ;;  %v1677_v60 = vsel %vm10012_vm5, %v4477_v39, %v4361_v17  ;;  %10675 = vst [vmem:[#allocation37_spill] sm:$0xff] %v7216_v38  ;;  %v10681_v17 = vunpack.i.l.bf16 %v7025_v29  ;;  %v1725_v51 = vsel %vm10036_vm14, %v4487_v2, %v10683_v55 }
 0x401   : > { %v7221_v39 = vpop.permute.xlu0 %4534  ;;  %10679 = vst [vmem:[#allocation39_spill] sm:$0xff] %v7226_v20  ;;  %v2282_v6 = vrot.slane %v1708_v57, 6  ;;  %v10685_v23 = vunpack.i.l.bf16 %v7039_v25  ;;  %vm10686_vm3 = vcmask 162816   ;;  %v7258_v63 = vrot.slane %v4432_v52, 2 }
 0x402   : > { %10676 = vst [vmem:[#allocation38_spill] sm:$0xff] %v7221_v39  ;;  %v7239_v49 = vsel %vm10012_vm5, %v10681_v17, %v10680_v5  ;;  %v7241_v39 = vrot.slane %v4422_v33, 4  ;;  %v2283_v17 = vrot.slane %v1702_v47, 6  ;;  %v4377_v33 = vunpack.i.h.bf16 %v7049_v61 }
 0x403   : > { %10682 = vst [vmem:[#allocation40_spill] sm:$0xff] %v7239_v49  ;;  %v7256_v46 = vsel %vm10686_vm3, %v10685_v23, %v4432_v52  ;;  %v7260_v55 = vrot.slane %v4486_v32, 4  ;;  %v4492_v4 = vunpack.i.h.bf16 %v7047_v22  ;;  %vm10690_vm6 = vcmask 1041408  }
 0x404   : > { %10684 = vst [vmem:[#allocation41_spill] sm:$0xff] %v7248_v1  ;;  %v7265_v8 = vsel %vm10690_vm6, %v7216_v38, %v2292_v43  ;;  %v2308_v2 = vrot.slane %v1730_v10, 4  ;;  %v2310_v57 = vrot.slane %v1725_v51, 4  ;;  %v4386_v61 = vunpack.i.l.bf16 %v7061_v58  ;;  %vm10692_vm3 = vmmov %vm10690_vm6 }
 0x405   : > { %10687 = vst [vmem:[#allocation42_spill] sm:$0xff] %v7256_v46  ;;  %v1729_v5 = vsel %vm10036_vm14, 0.0, %v4376_v40  ;;  %v4387_v23 = vunpack.i.h.bf16 %v7061_v58  ;;  %v2287_v52 = vsel %vm10692_vm3, %v2282_v6, %v2286_v37  ;;  %v1723_v51 = vsel %vm10036_vm14, %v4376_v40, %v4377_v33  ;;  %vm10693_vm6 = vmmov %vm10692_vm3 }
 0x406   : > { %4664 = vrot.lane.b32.xlu2 %v10646_v62, %s10092_s17  ;;  %4674 = vrot.lane.b32.xlu1 %v6837_v35, %s10106_s8  ;;  %10688 = vst [vmem:[#allocation43_spill] sm:$0xff] %v7258_v63  ;;  %v2289_v10 = vsel %vm10693_vm6, %v2283_v17, %v2288_v42  ;;  %vm10694_vm8 = vmmov %vm10692_vm3  ;;  %v1751_v1 = vsel %vm10035_vm7, 0.0, %v4492_v4  ;;  %v10697_v43 = vunpack.i.l.bf16 %v6972_v18  ;;  %v2304_v42 = vrot.slane %v1729_v5, 4  ;;  %s10976_s17 = smov 1  }
 0x407   : > { %10689 = vst [vmem:[#allocation44_spill] sm:$0xff] %v7260_v55  ;;  %v2543_v47 = vsel %vm10694_vm8, %v1688_v28, %v2282_v6  ;;  %vm10695_vm5 = vmmov %vm10692_vm3  ;;  %v4452_v6 = vunpack.i.h.bf16 %v7063_v13  ;;  %v1744_v58 = vsel %vm10035_vm7, %v4386_v61, %v4387_v23  ;;  %v2305_v46 = vrot.slane %v1723_v51, 4 }
 0x408   : > { %v7230_v3 = vpop.permute.xlu2 %4514  ;;  %v7232_v31 = vpop.permute.xlu1 %4424  ;;  %10691 = vst [vmem:[#allocation45_spill] sm:$0xff] %v7265_v8  ;;  %v7281_v8 = vsel %vm10695_vm5, %v1677_v60, %v2283_v17  ;;  %v1746_v40 = vsel %vm10035_vm7, %v4492_v4, %v10697_v43  ;;  %v1750_v60 = vsel %vm10035_vm7, 0.0, %v4386_v61  ;;  %v10699_v63 = vunpack.i.l.bf16 %v7025_v29 }
 0x409   : > { %10696 = vst [vmem:[#allocation46_spill] sm:$0xff] %v7281_v8  ;;  %v7296_v17 = vpop.permute.xlu0 %4549  ;;  %v2330_v18 = vrot.slane %v1751_v1, 2  ;;  %v4497_v5 = vunpack.i.h.bf16 %v7059_v26  ;;  %v4532_v4 = vunpack.i.h.bf16 %v7076_v54  ;;  %v2326_v28 = vrot.slane %v1750_v60, 2 }
 0x40a   : > { %10698 = vst [vmem:[#allocation47_spill] sm:$0xff] %v7296_v17  ;;  %v7302_v20 = vpack.c.bf16 %v2543_v47, %v10699_v63  ;;  %v2332_v59 = vrot.slane %v1746_v40, 2  ;;  %v10701_v17 = vunpack.i.h.bf16 %v7051_v21  ;;  %v10702_v55 = vunpack.i.l.bf16 %v7051_v21 }
 0x40b   : > { %vm10703_vm8 = vcmask 154624   ;;  %v7316_v63 = vsel %vm10036_vm14, %v4377_v33, %v4486_v32  ;;  %v10706_v1 = vunpack.i.l.bf16 %v7063_v13  ;;  %v4502_v51 = vunpack.i.h.bf16 %v7072_v14 }
 0x40c   : > { %10700 = vst [vmem:[#allocation48_spill] sm:$0xff] %v7302_v20  ;;  %v7313_v61 = vsel %vm10703_vm8, %v10702_v55, %v10701_v17  ;;  %v2327_v43 = vrot.slane %v1744_v58, 2  ;;  %v2309_v40 = vsel %vm10135_vm15, %v2304_v42, %v2308_v2  ;;  %v4396_v29 = vunpack.i.l.bf16 %v7074_v11 }
 0x40d   : > { %10704 = vst [vmem:[#allocation49_spill] sm:$0xff] %v7313_v61  ;;  %v7321_v47 = vsel %vm10037_vm0, %v10706_v1, %v4452_v6  ;;  %v7332_v32 = vsel %vm10135_vm15, %v2287_v52, %v2304_v42  ;;  %v2311_v33 = vsel %vm10135_vm15, %v2305_v46, %v2310_v57  ;;  %v7336_v55 = vsel %vm10065_vm13, 0.0, %v4497_v5 }
 0x40e   : > { %4679 = vrot.lane.b32.xlu2 %v10646_v62, %s10106_s8  ;;  %4689 = vrot.lane.b32.xlu1 %v10646_v62, %s10088_s23  ;;  %10705 = vst [vmem:[#allocation50_spill] sm:$0xff] %v7316_v63  ;;  %v10708_v2 = vunpack.i.l.bf16 %v7005_v41  ;;  %v7344_v17 = vsel %vm10135_vm15, %v2289_v10, %v2305_v46  ;;  %vm10711_vm5 = vcmask 7168   ;;  %v7351_v52 = vrot.slane %v4452_v6, 6 }
 0x40f   : > { %10707 = vst [vmem:[#allocation51_spill] sm:$0xff] %v7321_v47  ;;  %v10023_v42 = vunpack.i.l.bf16 %v7072_v14  ;;  %v10714_v46 = vunpack.i.l.bf16 %v7015_v30  ;;  %v2331_v10 = vsel %vm10083_vm4, %v2326_v28, %v2330_v18  ;;  %v7369_v6 = vsel %vm10083_vm4, %v2311_v33, %v2327_v43 }
 0x410   : > { %v7286_v38 = vpop.permute.xlu2 %4519  ;;  %v7288_v37 = vpop.permute.xlu1 %4434  ;;  %v7341_v58 = vsel %vm10065_vm13, %v4497_v5, %v10708_v2  ;;  %10709 = vst [vmem:[#allocation52_spill] sm:$0xff] %v7344_v17  ;;  %v7360_v5 = vsel %vm10083_vm4, %v2309_v40, %v2326_v28  ;;  %v10717_v30 = vunpack.i.h.bf16 %v7074_v11  ;;  %v4507_v18 = vunpack.i.h.bf16 %v7110_v45 }
 0x411   : > { %10713 = vst [vmem:[#allocation54_spill] sm:$0xff] %v7351_v52  ;;  %v7387_v33 = vpop.permute.xlu0 %4564  ;;  %v4522_v28 = vunpack.i.h.bf16 %v7286_v38  ;;  %v10719_v11 = vrot.slane %v7158_v12, 2  ;;  %vm10722_vm3 = vcmask 171008   ;;  %v10725_v26 = vunpack.i.l.bf16 %v7112_v36 }
 0x412   : > { %vm10724_vm6 = vmmov %vm10722_vm3  ;;  %v10737_v47 = vrot.slane %v7125_v56, 4 }
 0x413   : > { %v7434_v12 = vsel %vm10724_vm6, 0.0, %v4507_v18  ;;  %vm10729_vm8 = vmmov %vm10722_vm3  ;;  %vm10732_vm6 = vcmask 1041408  }
 0x416   : > { %4694 = vrot.lane.b32.xlu2 %v6837_v35, %s10108_s29  ;;  %4704 = vrot.lane.b32.xlu1 %v7116_v48, %s10106_s8  ;;  %v10710_v35 = vunpack.i.l.bf16 %v7076_v54  ;;  %v7365_v54 = vsel %vm10039_vm10, %v4502_v51, %v10714_v46  ;;  %v7383_v46 = vsel %vm10065_vm13, %v4396_v29, %v10717_v30 }
 0x418   : > { %v7349_v1 = vsel %vm10711_vm5, %v10710_v35, %v4532_v4  ;;  %v7355_v60 = vpop.permute.xlu2 %4524  ;;  %v7357_v63 = vpop.permute.xlu1 %4444  ;;  %v10715_v4 = vunpack.i.l.bf16 %v7047_v22  ;;  %v7377_v35 = vsel %vm10039_vm10, 0.0, %v4502_v51  ;;  %v10727_v51 = vunpack.i.l.bf16 %v7063_v13  ;;  %vm10730_vm5 = vmmov %vm10722_vm3 }
 0x419   : > { %10712 = vst [vmem:[#allocation53_spill] sm:$0xff] %v7349_v1  ;;  %v4446_v40 = vunpack.i.l.bf16 %v7357_v63  ;;  %v10723_v41 = vunpack.i.h.bf16 %v7357_v63  ;;  %v4426_v13 = vunpack.i.l.bf16 %v7232_v31 }
 0x41a   : > { %v7374_v2 = vsel %vm10035_vm7, %v4387_v23, %v10715_v4  ;;  %v7391_v23 = vsel %vm10083_vm4, %v2327_v43, %v2332_v59  ;;  %v7397_v4 = vrot.slane %v10023_v42, 6  ;;  %v7405_v59 = vpack.c.bf16 %v4396_v29, %v2331_v10 }
 0x41b   : > { %10716 = vst [vmem:[#allocation55_spill] sm:$0xff] %v7374_v2  ;;  %v4416_v42 = vunpack.i.l.bf16 %v7168_v0  ;;  %v1885_v30 = vsel %vm10037_vm0, 0.0, %v4446_v40  ;;  %v10720_v29 = vrot.slane %v7349_v1, 2  ;;  %v10721_v43 = vunpack.i.l.bf16 %v7027_v9 }
 0x41c   : > { %10718 = vst [vmem:[#allocation56_spill] sm:$0xff] %v7397_v4  ;;  %v4512_v9 = vunpack.i.h.bf16 %v7166_v50  ;;  %v10728_v4 = vunpack.i.h.bf16 %v7168_v0 }
 0x41d   : > { %v7421_v10 = vsel %vm10083_vm4, %v10720_v29, %v10719_v11  ;;  %v7426_v57 = vsel %vm10722_vm3, %v4507_v18, %v10721_v43  ;;  %v7439_v11 = vsel %vm10039_vm10, 0.0, %v10725_v26  ;;  %v1886_v43 = vsel %vm10037_vm0, 0.0, %v4522_v28 }
 0x41e   : > { %4709 = vrot.lane.b32.xlu2 %v7116_v48, %s10088_s23  ;;  %4719 = vrot.lane.b32.xlu1 %v10646_v62, %s10056_s22  ;;  %v1879_v62 = vsel %vm10037_vm0, %v4446_v40, %v10723_v41  ;;  %v1881_v41 = vsel %vm10037_vm0, %v4522_v28, %v10727_v51  ;;  %v2414_v40 = vrot.slane %v1885_v30, 6  ;;  %v2376_v26 = vrot.slane %v7426_v57, 4 }
 0x41f   : > { %v7456_v61 = vsel %vm10729_vm8, %v4416_v42, %v10728_v4  ;;  %v2415_v1 = vrot.slane %v1879_v62, 6  ;;  %v2418_v49 = vrot.slane %v1886_v43, 6  ;;  %vm10731_vm3 = vcmask 162816   ;;  %v7470_v62 = vpop.permute.xlu0 %4579  ;;  %vm10734_vm8 = vmmov %vm10732_vm6 }
 0x420   : > { %v7443_v29 = vpop.permute.xlu2 %4544  ;;  %v7445_v2 = vpop.permute.xlu1 %4454  ;;  %v1839_v57 = vsel %vm10731_vm3, 0.0, %v4512_v9  ;;  %v2420_v8 = vrot.slane %v1881_v41, 6  ;;  %vm10050_vm0 = vcmask 900096  }
 0x421   : > { %10726 = vst [vmem:[#allocation57_spill] sm:$0xff] %v7443_v29  ;;  %v10033_v18 = vunpack.i.h.bf16 %v7445_v2  ;;  %v4456_v22 = vunpack.i.l.bf16 %v7445_v2  ;;  %v7459_v29 = vsel %vm10730_vm5, 0.0, %v4416_v42  ;;  %v4517_v42 = vunpack.i.h.bf16 %v7230_v3  ;;  %vm10735_vm5 = vmmov %vm10731_vm3 }
 0x422   : > { %v2419_v43 = vsel %vm10732_vm6, %v2414_v40, %v2418_v49  ;;  %v1838_v20 = vsel %vm10735_vm5, 0.0, %v4426_v13  ;;  %v10736_v49 = vrot.slane %v6980_v53, 2  ;;  %vm10741_vm6 = vmmov %vm10731_vm3  ;;  %vm10742_vm5 = vcmask 154624  }
 0x423   : > { %v1914_v28 = vsel %vm10038_vm12, 0.0, %v4456_v22  ;;  %v1906_v51 = vsel %vm10038_vm12, %v4456_v22, %v10033_v18  ;;  %v10733_v22 = vrot.slane %v7128_v7, 4  ;;  %v2421_v18 = vsel %vm10734_vm8, %v2415_v1, %v2420_v8  ;;  %vm10743_vm7 = vmmov %vm10742_vm5 }
 0x424   : > { %v2436_v4 = vrot.slane %v1914_v28, 4  ;;  %v2437_v52 = vrot.slane %v1906_v51, 4  ;;  %vm10049_vm8 = vcmask 1031168   ;;  %vm7508_vm14 = vmneg %vm10743_vm7  ;;  %vm10040_vm7 = vmmov 1  }
 0x426   : > { %4724 = vrot.lane.b32.xlu2 %v7116_v48, %s10108_s29  ;;  %4734 = vrot.lane.b32.xlu1 %v7116_v48, %s10056_s22  ;;  %v2441_v41 = vsel %vm10135_vm15, %v2436_v4, %v10733_v22  ;;  %v2571_v28 = vsel %vm10135_vm15, %v2419_v43, %v2436_v4  ;;  %v2443_v30 = vsel %vm10135_vm15, %v2437_v52, %v10737_v47  ;;  %v10738_v4 = vrot.slane %v6985_v44, 2 }
 0x427   : > { %v2575_v51 = vsel %vm10083_vm4, %v2441_v41, %v10736_v49  ;;  %v2572_v48 = vsel %vm10135_vm15, %v2421_v18, %v2437_v52  ;;  %v10739_v43 = vunpack.i.h.bf16 %v7232_v31  ;;  %v10740_v41 = vunpack.i.l.bf16 %v7039_v25 }
 0x428   : > { %v7491_v17 = vpop.permute.xlu2 %4559  ;;  %v7493_v7 = vpop.permute.xlu1 %4459  ;;  %v2746_v22 = vpack.c.bf16 %v2575_v51, %v2571_v28  ;;  %v2576_v8 = vsel %vm10083_vm4, %v2443_v30, %v10738_v4  ;;  %v1865_v47 = vsel %vm10742_vm5, 0.0, %v4517_v42  ;;  %v4437_v52 = vunpack.i.h.bf16 %v7288_v37 }
 0x429   : > { %v1832_v53 = vsel %vm10731_vm3, %v4426_v13, %v10739_v43  ;;  %v1834_v56 = vsel %vm10741_vm6, %v4512_v9, %v10740_v41  ;;  %v4436_v18 = vunpack.i.l.bf16 %v7288_v37  ;;  %v10744_v44 = vmov 0  ;;  %vm10749_vm6 = vmmov %vm10742_vm5 }
 0x42a   : > { %v10745_v44 = vsel %vm7508_vm14, 4294967295, %v10744_v44  ;;  %v2392_v30 = vrot.slane %v1838_v20, 2  ;;  %2813 = vmatpush.bf16.msra.mxu0 %v2746_v22  ;;  %v2747_v13 = vpack.c.bf16 %v2576_v8, %v2572_v48  ;;  %vm10747_vm3 = vcmask 1041408  }
 0x42b   : > { %10746 = vst [vmem:[#allocation58_spill] sm:$0xff] %v10745_v44  ;;  %v2567_v25 = vsel %vm10747_vm3, %v1865_v47, %v2414_v40  ;;  %v10748_v9 = vunpack.i.l.bf16 %v7051_v21  ;;  %v2374_v49 = vrot.slane %v7434_v12, 4  ;;  %vm10750_vm5 = vmmov %vm10747_vm3  ;;  %v2393_v4 = vrot.slane %v1832_v53, 2 }
 0x42c   : > { %v10751_v43 = vunpack.i.h.bf16 %v7112_v36  ;;  %v10752_v41 = vunpack.i.l.bf16 %v7112_v36  ;;  %v10753_v22 = vunpack.i.l.bf16 %v7110_v45  ;;  %v2348_v40 = vrot.slane %v7439_v11, 6  ;;  %2839 = vmatpush.bf16.msra.mxu2 %v2747_v13  ;;  %vm4101_vm3 = vmpackc.low %vm10040_vm7, %vm7508_vm14 }
 0x42d   : > { %v1854_v28 = vsel %vm10749_vm6, %v4517_v42, %v10748_v9  ;;  %v2396_v8 = vrot.slane %v1839_v57, 2  ;;  %v4102_v42 = vpack.c.bf16 %v2567_v25, %v4436_v18  ;;  %v1852_v53 = vsel %vm10749_vm6, %v4436_v18, %v4437_v52  ;;  %v7548_v18 = vpop.permute.xlu0 %4594 }
 0x42e   : > { %v2568_v51 = vsel %vm10750_vm5, %v1854_v28, %v2415_v1  ;;  %v1792_v20 = vsel %vm10039_vm10, %v10752_v41, %v10751_v43  ;;  %v7525_v48 = vrot.slane %v10753_v22, 4  ;;  %v10754_v1 = vrot.slane %v7456_v61, 4  ;;  %4749 = vrot.lane.b32.xlu1 %v7084_v19, %s10106_s8 }
 0x42f   : > { %v10755_v47 = vrot.slane %v7459_v29, 4  ;;  %v2398_v57 = vrot.slane %v1834_v56, 2  ;;  %v10756_v13 = vpack.i.bf16 %v6831_v34, %v6661_v24  ;;  %v2743_v9 = vpack.c.bf16 %v2568_v51, %v1852_v53  ;;  %4103 = vmatpush.bf16.msk.msra.mxu0 %vm4101_vm3, %v4102_v42  ;;  %vm10760_vm3 = vmmov %vm10750_vm5 }
 0x430   : > { %v2377_v12 = vsel %vm10135_vm15, %v10754_v1, %v2376_v26  ;;  %v2397_v26 = vsel %vm10083_vm4, %v2392_v30, %v2396_v8  ;;  %v2349_v28 = vrot.slane %v1792_v20, 6  ;;  %v2752_v34 = vpack.c.bf16 %v6880_v27, %v7108_v16  ;;  %v7558_v20 = vpop.permute.xlu1 %4539  ;;  %vm10763_vm6 = vmmov %vm10760_vm3  ;;  %v10808_v16 = vld [vmem:[#allocation49_spill] sm:$0xff] }
 0x431   : > { %v2375_v11 = vsel %vm10135_vm15, %v10755_v47, %v2374_v49  ;;  %4739 = vrot.lane.b32.xlu2 %v10756_v13, %s10054_s14  ;;  %v2399_v49 = vsel %vm10083_vm4, %v2393_v4, %v2398_v57  ;;  %v2564_v56 = vsel %vm10083_vm4, %v2377_v12, %v2393_v4  ;;  %v2753_v43 = vpack.c.bf16 %v6911_v15, %v7421_v10 }
 0x432   : > { %v2563_v25 = vsel %vm10083_vm4, %v2375_v11, %v2392_v30  ;;  %v4567_v51 = vunpack.i.h.bf16 %v7387_v33  ;;  %v4566_v41 = vunpack.i.l.bf16 %v7387_v33  ;;  %2840 = vmatpush.bf16.msra.mxu2 %v2743_v9  ;;  %v4575_v30 = vpop.permute.xlu2 %4574  ;;  %v10757_v22 = vrot.slane %v7377_v35, 6  ;;  %v10803_v33 = vld [vmem:[#allocation40_spill] sm:$0xff] }
 0x433   : > { %v7566_v4 = vsel %vm10135_vm15, %v7525_v48, %v7241_v39  ;;  %v4582_v1 = vunpack.i.h.bf16 %v7470_v62  ;;  %v4581_v12 = vunpack.i.l.bf16 %v7470_v62  ;;  %v4577_v42 = vunpack.i.h.bf16 %v4575_v30 }
 0x434   : > { %v2353_v8 = vsel %vm10750_vm5, %v2348_v40, %v10757_v22  ;;  %v2738_v53 = vpack.c.bf16 %v2397_v26, %v2563_v25  ;;  %v2739_v47 = vpack.c.bf16 %v2399_v49, %v2564_v56  ;;  %v10758_v11 = vrot.slane %v7459_v29, 4 }
 0x435   : > { %v10759_v35 = vrot.slane %v7365_v54, 6  ;;  %v10761_v9 = vunpack.i.l.bf16 %v7072_v14  ;;  %v10762_v39 = vunpack.i.h.bf16 %v7112_v36  ;;  %v4511_v62 = vunpack.i.l.bf16 %v7166_v50 }
 0x436   : > { %v2559_v57 = vsel %vm10135_vm15, %v2353_v8, %v10758_v11  ;;  %v7585_v26 = vsel %vm10050_vm0, %v4577_v42, %v4581_v12  ;;  %2815 = vmatpush.bf16.msra.mxu0 %v2738_v53  ;;  %v2555_v29 = vsel %vm10763_vm6, %v7336_v55, %v2348_v40  ;;  %v10764_v54 = vrot.slane %v7456_v61, 4  ;;  %2841 = vmatpush.bf16.msra.mxu2 %v2739_v47  ;;  %vm7608_vm6 = vmneg %vm10065_vm13  ;;  %v10802_v40 = vld [vmem:[#allocation46_spill] sm:$0xff] }
 0x437   : > { %v2355_v13 = vsel %vm10760_vm3, %v2349_v28, %v10759_v35  ;;  %v7581_v22 = vsel %vm10039_vm10, %v10762_v39, %v10761_v9  ;;  %v10765_v14 = vunpack.i.l.bf16 %v7110_v45  ;;  %v10766_v36 = vunpack.i.h.bf16 %v7168_v0  ;;  %4764 = vrot.lane.b32.xlu1 %v7084_v19, %s10056_s22  ;;  %v7640_v39 = vpop.permute.xlu0 %4609  ;;  %s10973_s22 = smov 38  }
 0x438   : > { %v2560_v25 = vsel %vm10135_vm15, %v2355_v13, %v10764_v54  ;;  %vm10767_vm5 = vcmask 171008   ;;  %v1988_v50 = vsel %vm10049_vm8, %v4566_v41, %v4567_v51  ;;  %v4462_v56 = vunpack.i.h.bf16 %v7493_v7  ;;  %v4555_v9 = vpop.permute.xlu1 %4554 }
 0x439   : > { %v7597_v49 = vsel %vm10767_vm5, %v10766_v36, %v10765_v14  ;;  %v4461_v8 = vunpack.i.l.bf16 %v7493_v7  ;;  %v2015_v61 = vsel %vm10050_vm0, %v4581_v12, %v4582_v1  ;;  %v2734_v55 = vpack.c.bf16 %v2559_v57, %v2555_v29  ;;  %4754 = vrot.lane.b32.xlu2 %v7084_v19, %s10088_s23  ;;  %s10974_s23 = smov 110  }
 0x43a   : > { %v2556_v45 = vsel %vm10760_vm3, %v7341_v58, %v2349_v28  ;;  %v10768_v0 = vmov 0  ;;  %v4527_v41 = vunpack.i.h.bf16 %v7355_v60  ;;  %v4526_v53 = vunpack.i.l.bf16 %v7355_v60  ;;  %v7632_v13 = vpop.permute.xlu2 %4589  ;;  %vm4105_vm3 = vmpackc.low %vm7608_vm6, %vm10040_vm7 }
 0x43b   : > { %v10769_v0 = vsel %vm7608_vm6, 4294967295, %v10768_v0  ;;  %v4576_v11 = vunpack.i.l.bf16 %v4575_v30  ;;  %v2735_v7 = vpack.c.bf16 %v2560_v25, %v2556_v45  ;;  %v7619_v58 = vrot.slane %v4511_v62, 2  ;;  %2816 = vmatpush.bf16.msra.mxu0 %v2734_v55  ;;  %v10773_v30 = vld [vmem:[#allocation20_spill] sm:$0xff] }
 0x43c   : > { %10770 = vst [vmem:[#allocation59_spill] sm:$0xff] %v10769_v0  ;;  %v10044_v28 = vrot.slane %v7597_v49, 4  ;;  %v2506_v1 = vrot.slane %v1988_v50, 4  ;;  %v10771_v12 = vunpack.i.h.bf16 %v7232_v31  ;;  %vm10772_vm5 = vcmask 162816  }
 0x43d   : > { %v4521_v60 = vunpack.i.l.bf16 %v7286_v38  ;;  %v10774_v57 = vunpack.i.h.bf16 %v10773_v30  ;;  %v1911_v19 = vsel %vm10038_vm12, %v4461_v8, %v4462_v56  ;;  %2842 = vmatpush.bf16.msra.mxu2 %v2735_v7  ;;  %v7638_v31 = vsel %vm10049_vm8, %v2015_v61, 0.0 }
 0x43e   : > { %v7625_v47 = vsel %vm10772_vm5, %v10771_v12, %v4511_v62  ;;  %v4592_v38 = vunpack.i.h.bf16 %v7632_v13  ;;  %v10046_v62 = vunpack.i.l.bf16 %v7632_v13  ;;  %v4557_v29 = vunpack.i.h.bf16 %v4555_v9 }
 0x43f   : > { %v1910_v35 = vsel %vm10038_vm12, %v10774_v57, %v4461_v8  ;;  %v4556_v54 = vunpack.i.l.bf16 %v4555_v9  ;;  %v10775_v25 = vunpack.i.h.bf16 %v7357_v63  ;;  %vm10776_vm5 = vcmask 146432   ;;  %4107 = vmatpush.bf16.msk.msra.mxu0 %vm4105_vm3, %v7405_v59 }
 0x440   : > { %v7650_v36 = vsel %vm10050_vm0, %v4576_v11, %v4577_v42  ;;  %v10777_v50 = vunpack.i.h.bf16 %v7445_v2  ;;  %v1908_v8 = vsel %vm10038_vm12, %v4526_v53, %v4527_v41  ;;  %v10042_v61 = vunpack.i.h.bf16 %v7491_v17 }
 0x441   : > { %v7647_v14 = vsel %vm10776_vm5, %v10775_v25, %v4521_v60  ;;  %v4561_v55 = vunpack.i.l.bf16 %v7491_v17  ;;  %v2018_v63 = vsel %vm10050_vm0, %v10046_v62, %v4592_v38  ;;  %v7662_v45 = vsel %vm10049_vm8, %v4556_v54, %v4557_v29 }
 0x442   : > { %v1907_v56 = vsel %vm10038_vm12, %v10777_v50, %v4526_v53  ;;  %v2444_v42 = vrot.slane %v1910_v35, 4  ;;  %v2446_v11 = vrot.slane %v1911_v19, 4  ;;  %v10043_v2 = vrot.slane %v7662_v45, 4  ;;  %v10783_v19 = vld [vmem:[#allocation22_spill] sm:$0xff] }
 0x443   : > { %v10778_v41 = vpack.c.bf16 %v7383_v46, %v7391_v23  ;;  %v2022_v53 = vsel %vm10049_vm8, %v2018_v63, 0.0  ;;  %v2417_v7 = vrot.slane %v4521_v60, 6  ;;  %v10045_v12 = vrot.slane %v7650_v36, 2 }
 0x444   : > { %vm10779_vm5 = vcmask 343040   ;;  %v10780_v30 = vmov 0  ;;  %v2526_v59 = vrot.slane %v7638_v31, 2  ;;  %v2532_v57 = vrot.slane %v2022_v53, 2  ;;  %v10786_v31 = vld [vmem:[#allocation39_spill] sm:$0xff] }
 0x445   : > { %2843 = vmatpush.bf16.msra.mxu2 %v10778_v41  ;;  %vm7672_vm12 = vmneg %vm10779_vm5  ;;  %v2416_v35 = vrot.slane %v7647_v14, 6  ;;  %v10784_v46 = vpack.i.bf16 %v6911_v15, %v10783_v19  ;;  %v2438_v23 = vrot.slane %v1907_v56, 4  ;;  %v2439_v9 = vrot.slane %v1908_v8, 4  ;;  %v7712_v8 = vpop.permute.xlu1 %4569 }
 0x446   : > { %v10781_v30 = vsel %vm7672_vm12, 4294967295, %v10780_v30  ;;  %v2507_v60 = vsel %vm10135_vm15, %v10043_v2, %v2506_v1  ;;  %v4516_v38 = vunpack.i.l.bf16 %v7230_v3  ;;  %v10785_v54 = vpack.c.bf16 %v7360_v5, %v7332_v32  ;;  %v10788_v32 = vld [vmem:[#allocation52_spill] sm:$0xff]  ;;  %v7710_v1 = vpop.permute.xlu2 %4604  ;;  %vm7717_vm3 = vmpackc.low %vm10040_vm7, %vm7672_vm12 }
 0x447   : > { %10782 = vst [vmem:[#allocation20_spill] sm:$0xff] %v10781_v30  ;;  %4769 = vrot.lane.b32.xlu2 %v10784_v46, %s10054_s14  ;;  %v10787_v25 = vrot.slane %v10786_v31, 4  ;;  %v7697_v50 = vsel %vm10083_vm4, %v2507_v60, %v10045_v12  ;;  %v7700_v56 = vsel %vm10083_vm4, %v2526_v59, %v2532_v57  ;;  %v7705_v3 = vsel %vm10049_vm8, %v4561_v55, %v10042_v61  ;;  %s10971_s14 = smov 42  }
 0x448   : > { %2818 = vmatpush.bf16.msra.mxu0 %v10785_v54  ;;  %v10789_v5 = vpack.c.bf16 %v7369_v6, %v10788_v32  ;;  %v2445_v41 = vsel %vm10135_vm15, %v2438_v23, %v2444_v42  ;;  %v2447_v53 = vsel %vm10135_vm15, %v2439_v9, %v2446_v11  ;;  %v2394_v57 = vrot.slane %v7625_v47, 2  ;;  %v10795_v42 = vld [vmem:[#allocation54_spill] sm:$0xff] }
 0x449   : > { %v2379_v14 = vsel %vm10135_vm15, %v10044_v28, %v10787_v25  ;;  %v7725_v6 = vsel %vm10049_vm8, %v4557_v29, %v4561_v55  ;;  %v4607_v46 = vunpack.i.h.bf16 %v7710_v1  ;;  %v10048_v60 = vunpack.i.h.bf16 %v7712_v8  ;;  %v10792_v25 = vld [vmem:[#allocation51_spill] sm:$0xff]  ;;  %v7739_v55 = vpop.permute.xlu0 %4624 }
 0x44a   : > { %2844 = vmatpush.bf16.msra.mxu2 %v10789_v5  ;;  %v4571_v54 = vunpack.i.l.bf16 %v7712_v8  ;;  %v4611_v31 = vunpack.i.l.bf16 %v7640_v39  ;;  %v10793_v32 = vrot.slane %v10792_v25, 6  ;;  %vm10794_vm5 = vcmask 1041408  }
 0x44b   : > { %vm10796_vm10 = vmmov %vm10794_vm5  ;;  %v10797_v47 = vunpack.i.h.bf16 %v7051_v21  ;;  %v10047_v61 = vrot.slane %v7705_v3, 4  ;;  %v10804_v62 = vpack.c.bf16 %v10802_v40, %v10803_v33  ;;  %v4612_v10 = vunpack.i.h.bf16 %v7640_v39 }
 0x44c   : > { %v2423_v5 = vsel %vm10794_vm5, %v2416_v35, %v10793_v32  ;;  %v2425_v11 = vsel %vm10796_vm10, %v2417_v7, %v10795_v42  ;;  %vm10798_vm7 = vmmov %vm10794_vm5  ;;  %v1989_v2 = vsel %vm10049_vm8, %v4567_v51, %v4571_v54  ;;  %v1990_v25 = vsel %vm10049_vm8, %v4571_v54, %v10048_v60  ;;  %v10799_v32 = vld [vmem:[#allocation48_spill] sm:$0xff]  ;;  %v10805_v51 = vld [vmem:[#allocation53_spill] sm:$0xff] }
 0x44d   : > { %v2570_v29 = vsel %vm10798_vm7, %v10797_v47, %v2417_v7  ;;  %4111 = vmatpush.bf16.msk.msra.mxu0 %vm7717_vm3, %v10799_v32  ;;  %v10800_v42 = vld [vmem:[#allocation24_spill] sm:$0xff]  ;;  %v10051_v47 = vrot.slane %v7725_v6, 4  ;;  %v2508_v28 = vrot.slane %v1989_v2, 4  ;;  %v2510_v12 = vrot.slane %v1990_v25, 4  ;;  %vm10809_vm7 = vmmov %vm10794_vm5  ;;  %v10864_v60 = vld [vmem:[#allocation31_spill] sm:$0xff] }
 0x44e   : > { %v10801_v21 = vrot.slane %v10800_v42, 2  ;;  %2845 = vmatpush.bf16.msra.mxu2 %v10804_v62  ;;  %v10806_v54 = vrot.slane %v10805_v51, 2  ;;  %v2525_v32 = vrot.slane %v7585_v26, 2  ;;  %v2573_v2 = vsel %vm10135_vm15, %v2423_v5, %v2438_v23 }
 0x44f   : > { %vm10807_vm10 = vcmask 891904   ;;  %v2509_v26 = vsel %vm10135_vm15, %v10051_v47, %v2508_v28  ;;  %v2511_v15 = vsel %vm10135_vm15, %v10047_v61, %v2510_v12  ;;  %vm10810_vm3 = vcmask 154624   ;;  %v10858_v61 = vld [vmem:[#allocation32_spill] sm:$0xff] }
 0x450   : > { %v2577_v7 = vsel %vm10083_vm4, %v2445_v41, %v10801_v21  ;;  %v2578_v63 = vsel %vm10083_vm4, %v2447_v53, %v10806_v54  ;;  %v2574_v41 = vsel %vm10135_vm15, %v2425_v11, %v2439_v9  ;;  %v7773_v40 = vsel %vm10807_vm10, %v4607_v46, %v4611_v31  ;;  %v7790_v9 = vpop.permute.xlu2 %4619  ;;  %v10811_v53 = vld [vmem:[#allocation43_spill] sm:$0xff]  ;;  %v10812_v21 = vld [vmem:[#allocation42_spill] sm:$0xff]  ;;  %vm10814_vm5 = vmmov %vm10807_vm10 }
 0x451   : > { %2864 = vmatpush.bf16.msrb.mxu0 %v2752_v34  ;;  %v2748_v27 = vpack.c.bf16 %v2577_v7, %v2573_v2  ;;  %v2569_v34 = vsel %vm10809_vm7, %v10808_v16, %v2416_v35  ;;  %v7785_v62 = vsel %vm10083_vm4, %v2509_v26, %v2525_v32  ;;  %v7788_v23 = vsel %vm10083_vm4, %v2511_v15, %v2526_v59  ;;  %v4585_v35 = vpop.permute.xlu1 %4584 }
 0x452   : > { %2890 = vmatpush.bf16.msrb.mxu2 %v2753_v43  ;;  %v2749_v43 = vpack.c.bf16 %v2578_v63, %v2574_v41  ;;  %v1853_v28 = vsel %vm10810_vm3, %v4437_v52, %v4516_v38  ;;  %v2403_v12 = vsel %vm10083_vm4, %v7619_v58, %v10811_v53  ;;  %v2566_v39 = vsel %vm10083_vm4, %v7566_v4, %v7619_v58 }
 0x453   : > { %v4622_v5 = vunpack.i.h.bf16 %v7790_v9  ;;  %v4621_v11 = vunpack.i.l.bf16 %v7790_v9  ;;  %v4587_v25 = vunpack.i.h.bf16 %v4585_v35  ;;  %v4586_v37 = vunpack.i.l.bf16 %v4585_v35 }
 0x454   : > { %v2744_v42 = vpack.c.bf16 %v2569_v34, %v1853_v28  ;;  %v2745_v52 = vpack.c.bf16 %v2570_v29, %v4516_v38  ;;  %v10813_v7 = vrot.slane %v10812_v21, 2  ;;  %v2565_v51 = vsel %vm10083_vm4, %v2379_v14, %v2394_v57  ;;  %v10819_v14 = vld [vmem:[#allocation56_spill] sm:$0xff]  ;;  %v10821_v34 = vld [vmem:[#allocation35_spill] sm:$0xff] }
 0x455   : > { %2865 = vmatpush.bf16.msrb.mxu0 %v2748_v27  ;;  %v2044_v4 = vsel %vm10814_vm5, %v4611_v31, %v4612_v10  ;;  %vm10815_vm10 = vcmask 883712   ;;  %v10816_v54 = vunpack.i.l.bf16 %v7632_v13  ;;  %v2016_v2 = vsel %vm10050_vm0, %v4586_v37, %v4587_v25  ;;  %v10818_v27 = vld [vmem:[#allocation36_spill] sm:$0xff]  ;;  %v7823_v31 = vpop.permute.xlu0 %4639 }
 0x456   : > { %2891 = vmatpush.bf16.msrb.mxu2 %v2749_v43  ;;  %v2401_v33 = vsel %vm10083_vm4, %v2394_v57, %v10813_v7  ;;  %v2071_v58 = vsel %vm10815_vm10, %v4621_v11, %v4622_v5  ;;  %vm10817_vm7 = vcmask 1014784   ;;  %v2528_v41 = vrot.slane %v2016_v2, 2  ;;  %v10831_v21 = vld [vmem:[#allocation28_spill] sm:$0xff] }
 0x457   : > { %v2017_v63 = vsel %vm10050_vm0, %v4587_v25, %v10816_v54  ;;  %v7818_v38 = vsel %vm10817_vm7, %v2071_v58, 0.0  ;;  %vm10820_vm3 = vcmask 1041408   ;;  %v2741_v13 = vpack.c.bf16 %v2403_v12, %v2566_v39  ;;  %v10834_v54 = vld [vmem:[#allocation55_spill] sm:$0xff] }
 0x458   : > { %v2530_v29 = vrot.slane %v2017_v63, 2  ;;  %v2359_v57 = vsel %vm10820_vm3, %v10819_v14, %v10818_v27  ;;  %v2595_v16 = vrot.slane %v7818_v38, 6  ;;  %v10822_v26 = vrot.slane %v10821_v34, 6  ;;  %vm10824_vm5 = vmmov %vm10820_vm3 }
 0x459   : > { %2866 = vmatpush.bf16.msrb.mxu0 %v2744_v42  ;;  %v10823_v15 = vrot.slane %v7581_v22, 6  ;;  %v2562_v43 = vsel %vm10135_vm15, %v2359_v57, %v7525_v48  ;;  %v2740_v35 = vpack.c.bf16 %v2401_v33, %v2565_v51  ;;  %v10825_v28 = vrot.slane %v7650_v36, 2  ;;  %vm10828_vm7 = vmmov %vm10820_vm3  ;;  %v10829_v42 = vld [vmem:[#allocation25_spill] sm:$0xff]  ;;  %v4600_v33 = vpop.permute.xlu1 %4599  ;;  %v10832_v51 = vld [vmem:[#allocation23_spill] sm:$0xff] }
 0x45a   : > { %2892 = vmatpush.bf16.msrb.mxu2 %v2745_v52  ;;  %v7839_v5 = vsel %vm10083_vm4, %v2525_v32, %v2530_v29  ;;  %vm10826_vm10 = vcmask 1022976   ;;  %v10827_v39 = vrot.slane %v7597_v49, 4  ;;  %v10830_v32 = vunpack.i.l.bf16 %v10829_v42  ;;  %v7857_v49 = vpop.permute.xlu2 %4634  ;;  %v10836_v57 = vld [vmem:[#allocation34_spill] sm:$0xff] }
 0x45b   : > { %v2357_v10 = vsel %vm10824_vm5, %v10823_v15, %v10822_v26  ;;  %v7836_v53 = vsel %vm10083_vm4, %v10825_v28, %v2528_v41  ;;  %v2052_v12 = vsel %vm10826_vm10, %v2044_v4, 0.0  ;;  %v4496_v7 = vunpack.i.l.bf16 %v10831_v21  ;;  %vm10837_vm5 = vmmov %vm10820_vm3 }
 0x45c   : > { %v2561_v25 = vsel %vm10135_vm15, %v2357_v10, %v10827_v39  ;;  %v7852_v36 = vsel %vm10828_vm7, %v2052_v12, %v2595_v16  ;;  %v2329_v52 = vrot.slane %v10830_v32, 2  ;;  %v10833_v4 = vunpack.i.h.bf16 %v10832_v51  ;;  %v10838_v10 = vld [vmem:[#allocation27_spill] sm:$0xff]  ;;  %v10840_v12 = vld [vmem:[#allocation50_spill] sm:$0xff] }
 0x45d   : > { %2867 = vmatpush.bf16.msrb.mxu0 %v2740_v35  ;;  %v2328_v63 = vrot.slane %v10834_v54, 2  ;;  %v4597_v2 = vunpack.i.h.bf16 %v7548_v18  ;;  %v4602_v29 = vunpack.i.h.bf16 %v4600_v33  ;;  %v4601_v41 = vunpack.i.l.bf16 %v4600_v33  ;;  %v10845_v33 = vld [vmem:[#allocation26_spill] sm:$0xff] }
 0x45e   : > { %v2558_v58 = vsel %vm10820_vm3, %v10833_v4, %v10819_v14  ;;  %2893 = vmatpush.bf16.msrb.mxu2 %v2741_v13  ;;  %v10835_v27 = vmov %v10823_v15  ;;  %v10839_v35 = vunpack.i.h.bf16 %v10838_v10  ;;  %v2306_v14 = vrot.slane %v10840_v12, 4  ;;  %v10849_v54 = vld [vmem:[#allocation18_spill] sm:$0xff]  ;;  %v10853_v10 = vld [vmem:[#allocation17_spill] sm:$0xff] }
 0x45f   : > { %v2557_v34 = vsel %vm10837_vm5, %v10836_v57, %v10835_v27  ;;  %v2737_v15 = vpack.c.bf16 %v2562_v43, %v2558_v58  ;;  %v4642_v39 = vunpack.i.h.bf16 %v7823_v31  ;;  %v4641_v42 = vunpack.i.l.bf16 %v7823_v31  ;;  %v10848_v58 = vld [vmem:[#allocation37_spill] sm:$0xff] }
 0x460   : > { %v2736_v26 = vpack.c.bf16 %v2561_v25, %v2557_v34  ;;  %v1766_v28 = vsel %vm10065_vm13, %v10839_v35, %v4496_v7  ;;  %vm10841_vm10 = vcmask 891904   ;;  %v4627_v32 = vunpack.i.h.bf16 %v7739_v55  ;;  %v10843_v25 = vld [vmem:[#allocation21_spill] sm:$0xff]  ;;  %v10851_v34 = vld [vmem:[#allocation30_spill] sm:$0xff] }
 0x461   : > { %v7876_v13 = vsel %vm10841_vm10, %v4597_v2, %v4601_v41  ;;  %vm10842_vm7 = vmmov %vm10841_vm10  ;;  %v4626_v43 = vunpack.i.l.bf16 %v7739_v55  ;;  %v10844_v21 = vunpack.i.l.bf16 %v10843_v25  ;;  %v10846_v51 = vunpack.i.h.bf16 %v10845_v33  ;;  %v10855_v12 = vld [vmem:[#allocation41_spill] sm:$0xff]  ;;  %v10859_v33 = vld [vmem:[#allocation44_spill] sm:$0xff] }
 0x462   : > { %v7879_v22 = vsel %vm10842_vm7, %v4601_v41, %v4602_v29  ;;  %2868 = vmatpush.bf16.msrb.mxu0 %v2736_v26  ;;  %vm10847_vm3 = vcmask 343040   ;;  %v10850_v27 = vunpack.i.h.bf16 %v10849_v54  ;;  %2894 = vmatpush.bf16.msrb.mxu2 %v2737_v15  ;;  %v10852_v29 = vrot.slane %v10851_v34, 2  ;;  %vm10857_vm10 = vmmov %vm10837_vm5 }
 0x463   : > { %v1676_v4 = vsel %vm10847_vm3, %v10846_v51, %v10844_v21  ;;  %v10854_v35 = vrot.slane %v10853_v10, 6  ;;  %v10856_v26 = vrot.slane %v10855_v12, 6  ;;  %v2315_v21 = vsel %vm10135_vm15, %v10859_v33, %v10858_v61  ;;  %vm10865_vm7 = vmmov %vm10837_vm5 }
 0x464   : > { %v2546_v57 = vsel %vm10837_vm5, %v10850_v27, %v10848_v58  ;;  %v2335_v41 = vsel %vm10083_vm4, %v2328_v63, %v10852_v29  ;;  %v10860_v58 = vld [vmem:[#allocation33_spill] sm:$0xff]  ;;  %vm10866_vm3 = vcmask 875520   ;;  %vm10867_vm5 = vcmask 883712  }
 0x465   : > { %v2291_v59 = vsel %vm10857_vm10, %v10856_v26, %v10854_v35  ;;  %v2732_v54 = vpack.c.bf16 %v1766_v28, %v2335_v41  ;;  %v2337_v15 = vsel %vm10083_vm4, %v2329_v52, %v10860_v58  ;;  %v10861_v27 = vld [vmem:[#allocation29_spill] sm:$0xff]  ;;  %v10863_v10 = vmov %v10856_v26  ;;  %v7917_v26 = vpop.permute.xlu0 %4654 }
 0x466   : > { %v10862_v34 = vrot.slane %v10861_v27, 4  ;;  %v2545_v35 = vsel %vm10865_vm7, %v10864_v60, %v10863_v10  ;;  %v2097_v61 = vsel %vm10866_vm3, %v4641_v42, %v4642_v39  ;;  %v2733_v51 = vpack.c.bf16 %v4496_v7, %v2337_v15  ;;  %v4650_v60 = vpop.permute.xlu2 %4649  ;;  %vm10870_vm7 = vmmov %vm10866_vm3 }
 0x467   : > { %v2554_v41 = vsel %vm10083_vm4, %v2315_v21, %v2329_v52  ;;  %v4596_v58 = vunpack.i.l.bf16 %v7548_v18  ;;  %v2072_v12 = vsel %vm10867_vm5, %v4626_v43, %v4627_v32  ;;  %v4606_v27 = vunpack.i.l.bf16 %v7710_v1  ;;  %2869 = vmatpush.bf16.msrb.mxu0 %v2732_v54  ;;  %v10868_v52 = vld [vmem:[#allocation45_spill] sm:$0xff]  ;;  %vm10871_vm3 = vmmov %vm10867_vm5 }
 0x468   : > { %v2313_v29 = vsel %vm10135_vm15, %v2306_v14, %v10862_v34  ;;  %v4615_v34 = vpop.permute.xlu1 %4614  ;;  %v2549_v39 = vsel %vm10135_vm15, %v2291_v59, %v2306_v14  ;;  %2895 = vmatpush.bf16.msrb.mxu2 %v2733_v51  ;;  %v4652_v10 = vunpack.i.h.bf16 %v4650_v60  ;;  %v4651_v7 = vunpack.i.l.bf16 %v4650_v60  ;;  %vm10872_vm5 = vmmov %vm10871_vm3 }
 0x469   : > { %v2553_v28 = vsel %vm10083_vm4, %v2313_v29, %v2328_v63  ;;  %v4617_v15 = vunpack.i.h.bf16 %v4615_v34  ;;  %v4616_v63 = vunpack.i.l.bf16 %v4615_v34  ;;  %v2550_v18 = vsel %vm10135_vm15, %v10868_v52, %v10859_v33 }
 0x46a   : > { %v2728_v29 = vpack.c.bf16 %v2553_v28, %v2549_v39  ;;  %v2724_v21 = vpack.c.bf16 %v2545_v35, %v1676_v4  ;;  %vm10869_vm10 = vcmask 1006592   ;;  %v2100_v48 = vsel %vm10870_vm7, %v4651_v7, %v4652_v10 }
 0x46b   : > { %v2103_v43 = vsel %vm10869_vm10, %v2097_v61, 0.0  ;;  %v2070_v54 = vsel %vm10871_vm3, %v4617_v15, %v4621_v11  ;;  %v2069_v59 = vsel %vm10872_vm5, %v4616_v63, %v4617_v15  ;;  %v2729_v14 = vpack.c.bf16 %v2554_v41, %v2550_v18  ;;  %vm10873_vm8 = vmmov %vm10869_vm10 }
 0x46c   : > { %v2597_v51 = vrot.slane %v2072_v12, 6  ;;  %v2104_v60 = vsel %vm10873_vm8, %v2100_v48, 0.0  ;;  %v2594_v28 = vrot.slane %v2070_v54, 6  ;;  %v2593_v34 = vrot.slane %v2069_v59, 6  ;;  %2870 = vmatpush.bf16.msrb.mxu0 %v2728_v29 }
 0x46d   : > { %v2622_v39 = vrot.slane %v2104_v60, 4  ;;  %2896 = vmatpush.bf16.msrb.mxu2 %v2729_v14  ;;  %vm10874_vm0 = vcmask 891904   ;;  %v2616_v33 = vrot.slane %v2103_v43, 4  ;;  %v10061_v11 = vunpack.i.h.bf16 %v7857_v49  ;;  %v7963_v10 = vpop.permute.xlu0 %4669 }
 0x46e   : > { %v7938_v4 = vsel %vm10874_vm0, %v4596_v58, %v4597_v2  ;;  %vm10875_vm10 = vmmov %vm10874_vm0  ;;  %vm10876_vm7 = vcmask 1041408   ;;  %v10879_v2 = vunpack.i.l.bf16 %v10843_v25  ;;  %v7961_v12 = vpop.permute.xlu2 %4664  ;;  %vm10880_vm0 = vcmask 875520  }
 0x46f   : > { %v2042_v9 = vsel %vm10875_vm10, %v4606_v27, %v4607_v46  ;;  %v7945_v35 = vsel %vm10876_vm7, %v2593_v34, %v2597_v51  ;;  %vm10877_vm3 = vmmov %vm10876_vm7  ;;  %v2623_v58 = vsel %vm10135_vm15, %v2616_v33, %v2622_v39  ;;  %v2096_v25 = vsel %vm10880_vm0, %v10061_v11, %v4641_v42 }
 0x470   : > { %v7948_v48 = vsel %vm10877_vm3, %v2042_v9, %v2593_v34  ;;  %vm10878_vm8 = vmmov %vm10877_vm3  ;;  %v2725_v41 = vpack.c.bf16 %v2546_v57, %v10879_v2  ;;  %2871 = vmatpush.bf16.msrb.mxu0 %v2724_v21  ;;  %v4630_v27 = vpop.permute.xlu1 %4629  ;;  %vm10882_vm7 = vcmask 1014784   ;;  %v2615_v18 = vrot.slane %v2096_v25, 4 }
 0x471   : > { %v7952_v61 = vsel %vm10878_vm8, %v7773_v40, %v2594_v28  ;;  %v4632_v40 = vunpack.i.h.bf16 %v4630_v27  ;;  %v4631_v15 = vunpack.i.l.bf16 %v4630_v27  ;;  %vm10881_vm10 = vmmov %vm10872_vm5  ;;  %v4672_v14 = vunpack.i.h.bf16 %v7963_v10 }
 0x472   : > { %2897 = vmatpush.bf16.msrb.mxu2 %v2725_v41  ;;  %vm10883_vm8 = vmmov %vm10877_vm3  ;;  %v10053_v51 = vunpack.i.l.bf16 %v7963_v10  ;;  %vm10079_vm0 = vcmask 867328   ;;  %v10063_v39 = vunpack.i.h.bf16 %v7917_v26  ;;  %vm10887_vm13 = vcmask 1044480  }
 0x473   : > { %v2073_v57 = vsel %vm10872_vm5, %v4627_v32, %v4631_v15  ;;  %v2074_v63 = vsel %vm10881_vm10, %v4631_v15, %v4632_v40  ;;  %vm10884_vm5 = vcmask 875520   ;;  %vm10066_vm10 = vcmask 998400  }
 0x474   : > { %v2078_v29 = vsel %vm10882_vm7, %v2074_v63, 0.0  ;;  %v2599_v52 = vrot.slane %v2073_v57, 6  ;;  %vm10075_vm7 = vcmask 703488  }
 0x475   : > { %v2601_v21 = vrot.slane %v2078_v29, 6  ;;  %v7992_v60 = vpop.permute.xlu0 %4684 }
 0x476   : > { %v2600_v43 = vsel %vm10877_vm3, %v2594_v28, %v2599_v52  ;;  %v7982_v42 = vpop.permute.xlu2 %4679  ;;  %vm10080_vm3 = vcmask 719872  }
 0x477   : > { %v7977_v54 = vsel %vm10135_vm15, %v2600_v43, %v2615_v18  ;;  %v2602_v31 = vsel %vm10883_vm8, %v2595_v16, %v2601_v21  ;;  %v2127_v16 = vsel %vm10079_vm0, %v10053_v51, %v4672_v14  ;;  %v4682_v52 = vunpack.i.h.bf16 %v7982_v42 }
 0x478   : > { %v7984_v55 = vpop.permute.xlu1 %4644  ;;  %v7987_v32 = vsel %vm10135_vm15, %v2602_v31, %v2616_v33  ;;  %v2132_v41 = vsel %vm10066_vm10, %v2127_v16, 0.0  ;;  %v4681_v43 = vunpack.i.l.bf16 %v7982_v42  ;;  %vm10885_vm8 = vcmask 1044480  }
 0x479   : > { %v4647_v59 = vunpack.i.h.bf16 %v7984_v55  ;;  %v2642_v25 = vrot.slane %v2132_v41, 2 }
 0x47a   : > { %v2268_v41 = vsel %vm10075_vm7, %v4681_v43, %v4682_v52 }
 0x47b   : > { %v2099_v38 = vsel %vm10884_vm5, %v4647_v59, %v4651_v7  ;;  %vm10074_vm5 = vcmask 711680  }
 0x47c   : > { %v2620_v9 = vrot.slane %v2099_v38, 4 }
 0x47d   : > { %v4700_v57 = vpop.permute.xlu0 %4699 }
 0x47e   : > { %v8000_v28 = vpop.permute.xlu2 %4694  ;;  %v2621_v29 = vsel %vm10135_vm15, %v2615_v18, %v2620_v9 }
 0x480   : > { %v4660_v34 = vpop.permute.xlu1 %4659 }
 0x481   : > { %v4662_v33 = vunpack.i.h.bf16 %v4660_v34  ;;  %v4661_v2 = vunpack.i.l.bf16 %v4660_v34  ;;  %v4702_v34 = vunpack.i.h.bf16 %v4700_v57 }
 0x483   : > { %v8007_v27 = vsel %vm10079_vm0, %v10063_v39, %v4661_v2  ;;  %v2124_v7 = vsel %vm10079_vm0, %v4661_v2, %v4662_v33 }
 0x484   : > { %v2131_v40 = vsel %vm10066_vm10, %v2124_v7, 0.0  ;;  %v10052_v15 = vrot.slane %v8007_v27, 2  ;;  %vm10081_vm10 = vcmask 736256  }
 0x485   : > { %v2637_v63 = vrot.slane %v2131_v40, 2  ;;  %v4687_v40 = vunpack.i.h.bf16 %v7992_v60  ;;  %v8041_v47 = vpop.permute.xlu0 %4714 }
 0x486   : > { %v8017_v21 = vsel %vm10083_vm4, %v2621_v29, %v10052_v15  ;;  %v8028_v16 = vpop.permute.xlu2 %4709 }
 0x487   : > { %v8023_v14 = vsel %vm10083_vm4, %v2637_v63, %v2642_v25  ;;  %v8026_v38 = vsel %vm10083_vm4, %v2623_v58, %v2637_v63  ;;  %v4686_v58 = vunpack.i.l.bf16 %v7992_v60  ;;  %v4697_v25 = vunpack.i.h.bf16 %v8000_v28 }
 0x488   : > { %v4675_v18 = vpop.permute.xlu1 %4674  ;;  %v4696_v63 = vunpack.i.l.bf16 %v8000_v28  ;;  %v10058_v28 = vunpack.i.h.bf16 %v8028_v16 }
 0x489   : > { %v4677_v9 = vunpack.i.h.bf16 %v4675_v18  ;;  %v4676_v33 = vunpack.i.l.bf16 %v4675_v18  ;;  %v4701_v18 = vunpack.i.l.bf16 %v4700_v57 }
 0x48a   : > { %v2237_v46 = vsel %vm10074_vm5, %v4696_v63, %v4697_v25 }
 0x48b   : > { %v2265_v2 = vsel %vm10075_vm7, %v4676_v33, %v4677_v9  ;;  %v2240_v31 = vsel %vm10074_vm5, %v4701_v18, %v4702_v34  ;;  %v2686_v1 = vrot.slane %v2237_v46, 2 }
 0x48c   : > { %v2782_v7 = vpack.c.bf16 %v2268_v41, %v2265_v2  ;;  %v8046_v2 = vsel %vm10080_vm3, %v4686_v58, %v4687_v40  ;;  %v2689_v15 = vrot.slane %v2240_v31, 2 }
 0x48e   : > { %v2801_v29 = vsel %vm10885_vm8, %v2782_v7, 0  ;;  %v8043_v33 = vpop.permute.xlu2 %4724  ;;  %v10060_v7 = vunpack.i.l.bf16 %v8028_v16  ;;  %v2690_v11 = vsel %vm10083_vm4, %v2686_v1, %v2689_v15  ;;  %vm10087_vm8 = vcmask 728064  }
 0x48f   : > { %2825 = vmatpush.bf16.msra.mxu1 %v2801_v29  ;;  %v10059_v57 = vunpack.i.h.bf16 %v8043_v33  ;;  %v10062_v29 = vunpack.i.l.bf16 %v8043_v33 }
 0x490   : > { %v4690_v43 = vpop.permute.xlu1 %4689  ;;  %v8062_v51 = vsel %vm10080_vm3, %v4687_v40, %v10060_v7 }
 0x491   : > { %v4692_v60 = vunpack.i.h.bf16 %v4690_v43  ;;  %v4691_v41 = vunpack.i.l.bf16 %v4690_v43  ;;  %v10064_v43 = vrot.slane %v8046_v2, 4  ;;  %v2241_v18 = vsel %vm10074_vm5, %v4702_v34, %v10059_v57 }
 0x492   : > { %v2238_v46 = vsel %vm10074_vm5, %v4697_v25, %v10062_v29  ;;  %v8086_v25 = vpop.permute.xlu0 %4729 }
 0x493   : > { %v2213_v37 = vsel %vm10080_vm3, %v4692_v60, %v10058_v28  ;;  %v2212_v58 = vsel %vm10080_vm3, %v4691_v41, %v4692_v60  ;;  %v8070_v28 = vld [vmem:[%s10886_s1] sm:$0xff]  ;;  %v2687_v29 = vrot.slane %v2238_v46, 2  ;;  %v4656_v46 = vunpack.i.l.bf16 %v7917_v26  ;;  %s10985_s1 = smov 19  }
 0x494   : > { %v2672_v63 = vrot.slane %v2212_v58, 4  ;;  %v2674_v60 = vrot.slane %v2213_v37, 4  ;;  %v2792_v40 = vunpack.c.l.b16 %v8070_v28  ;;  %v10069_v58 = vrot.slane %v8062_v51, 4 }
 0x495   : > { %v2691_v37 = vrot.slane %v2241_v18, 2  ;;  %v4716_v18 = vunpack.i.l.bf16 %v8041_v47 }
 0x496   : > { %v2673_v31 = vsel %vm10135_vm15, %v10064_v43, %v2672_v63  ;;  %v8088_v63 = vpack.c.b16 %v2792_v40, %v2792_v40  ;;  %v4667_v40 = vunpack.i.h.bf16 %v7961_v12 }
 0x497   : > { %v2719_v34 = vsel %vm10083_vm4, %v2673_v31, %v2686_v1  ;;  %v2675_v1 = vsel %vm10135_vm15, %v10069_v58, %v2674_v60  ;;  %v2692_v42 = vsel %vm10083_vm4, %v2687_v29, %v2691_v37  ;;  %v4732_v60 = vunpack.i.h.bf16 %v8086_v25 }
 0x498   : > { %v8079_v41 = vpop.permute.xlu1 %4704  ;;  %v2778_v39 = vpack.c.bf16 %v2690_v11, %v2719_v34  ;;  %2846 = vmatmul.bf16.vlgmr.msra.gmra.mxu2 %v8088_v63  ;;  %v4717_v11 = vunpack.i.h.bf16 %v8041_v47  ;;  %2820 = vmatmul.bf16.vlgmr.msra.gmra.mxu0 %v8088_v63  ;;  %v4731_v47 = vunpack.i.l.bf16 %v8086_v25  ;;  %v4666_v34 = vunpack.i.l.bf16 %v7961_v12 }
 0x499   : > { %v10067_v57 = vunpack.i.h.bf16 %v8079_v41  ;;  %v10068_v7 = vunpack.i.l.bf16 %v8079_v41 }
 0x49a   : > { %2826 = vmatpush.bf16.msra.mxu1 %v2778_v39  ;;  %v4636_v39 = vunpack.i.l.bf16 %v7857_v49  ;;  %v2125_v58 = vsel %vm10079_vm0, %v4666_v34, %v4667_v40  ;;  %v8123_v30 = vpop.permute.xlu0 %4744  ;;  %v2153_v0 = vsel %vm10081_vm10, %v4731_v47, %v4732_v60 }
 0x49b   : > { %v2266_v43 = vsel %vm10075_vm7, %v4677_v9, %v10068_v7  ;;  %v2269_v31 = vsel %vm10075_vm7, %v4682_v52, %v10067_v57  ;;  %v2720_v52 = vsel %vm10083_vm4, %v2675_v1, %v2687_v29  ;;  %v2181_v29 = vsel %vm10087_vm8, %v4716_v18, %v4717_v11 }
 0x49c   : > { %v2783_v15 = vpack.c.bf16 %v2269_v31, %v2266_v43  ;;  %v4646_v43 = vunpack.i.l.bf16 %v7984_v55  ;;  %v8115_v31 = vpop.permute.xlu2 %4739  ;;  %v2779_v57 = vpack.c.bf16 %v2692_v42, %v2720_v52  ;;  %v2652_v25 = vrot.slane %v2181_v29, 6  ;;  %v10892_v52 = vld [vmem:[#allocation57_spill] sm:$0xff] }
 0x49d   : > { %v10889_v18 = vunpack.i.h.bf16 %v7917_v26  ;;  %v10890_v42 = vunpack.i.h.bf16 %v7857_v49  ;;  %v2638_v29 = vrot.slane %v2125_v58, 2  ;;  %v10895_v26 = vrot.slane %v8046_v2, 4 }
 0x49e   : > { %v2804_v9 = vsel %vm10887_vm13, %v2783_v15, 0  ;;  %vm10888_vm13 = vcmask 875520   ;;  %v4546_v49 = vunpack.i.l.bf16 %v10892_v52 }
 0x49f   : > { %2851 = vmatpush.bf16.msra.mxu3 %v2804_v9  ;;  %v2098_v9 = vsel %vm10888_vm13, %v4646_v43, %v4647_v59  ;;  %vm10891_vm5 = vmmov %vm10888_vm13  ;;  %v4742_v59 = vunpack.i.h.bf16 %v8115_v31  ;;  %vm10893_vm13 = vcmask 1041408  }
 0x4a0   : > { %v4720_v37 = vpop.permute.xlu1 %4719  ;;  %v2095_v55 = vsel %vm10891_vm5, %v4636_v39, %v10890_v42  ;;  %v2618_v43 = vrot.slane %v2098_v9, 4  ;;  %vm10894_vm7 = vmmov %vm10893_vm13 }
 0x4a1   : > { %v4722_v1 = vunpack.i.h.bf16 %v4720_v37  ;;  %v4721_v15 = vunpack.i.l.bf16 %v4720_v37  ;;  %v2122_v37 = vsel %vm10079_vm0, %v4656_v46, %v10889_v18  ;;  %v2713_v47 = vsel %vm10894_vm7, %v2153_v0, %v2652_v25  ;;  %v10896_v0 = vld [vmem:[#allocation38_spill] sm:$0xff]  ;;  %vm10901_vm5 = vmmov %vm10893_vm13 }
 0x4a2   : > { %v2614_v39 = vrot.slane %v2095_v55, 4  ;;  %v4536_v2 = vunpack.i.l.bf16 %v10896_v0  ;;  %v10897_v55 = vunpack.i.l.bf16 %v7963_v10  ;;  %vm10899_vm7 = vcmask 1039360  }
 0x4a3   : > { %v2184_v7 = vsel %vm10087_vm8, %v4721_v15, %v4722_v1  ;;  %2852 = vmatpush.bf16.msra.mxu3 %v2779_v57  ;;  %v2635_v15 = vrot.slane %v2122_v37, 2 }
 0x4a4   : > { %v2655_v12 = vrot.slane %v2184_v7, 6  ;;  %v4746_v7 = vunpack.i.l.bf16 %v8123_v30  ;;  %v2619_v37 = vsel %vm10135_vm15, %v2614_v39, %v2618_v43 }
 0x4a6   : > { %v2656_v34 = vsel %vm10893_vm13, %v2652_v25, %v2655_v12  ;;  %v2150_v57 = vsel %vm10081_vm10, %v4742_v59, %v4746_v7  ;;  %v10898_v25 = vunpack.i.h.bf16 %v10892_v52  ;;  %vm10902_vm13 = vmmov %vm10901_vm5 }
 0x4a7   : > { %v2716_v46 = vsel %vm10135_vm15, %v2656_v34, %v10895_v26  ;;  %v4755_v34 = vpop.permute.xlu2 %4754 }
 0x4a8   : > { %v8141_v18 = vpop.permute.xlu1 %4734  ;;  %v2774_v42 = vpack.c.bf16 %v2716_v46, %v2713_v47  ;;  %v2126_v47 = vsel %vm10079_vm0, %v4667_v40, %v10897_v55  ;;  %v2639_v46 = vsel %vm10083_vm4, %v2635_v15, %v2638_v29  ;;  %2898 = vmatmul.bf16.vlgmr.msrb.gmra.mxu2 %v8088_v63  ;;  %v4757_v10 = vunpack.i.h.bf16 %v4755_v34  ;;  %2872 = vmatmul.bf16.vlgmr.msrb.gmra.mxu0 %v8088_v63 }
 0x4a9   : > { %v4737_v12 = vunpack.i.h.bf16 %v8141_v18  ;;  %v10078_v58 = vunpack.i.l.bf16 %v8141_v18  ;;  %v2770_v44 = vpack.c.bf16 %v2150_v57, %v2639_v46  ;;  %v4756_v40 = vunpack.i.l.bf16 %v4755_v34 }
 0x4aa   : > { %2827 = vmatpush.bf16.msra.mxu1 %v2774_v42  ;;  %v1961_v42 = vsel %vm10899_vm7, %v4546_v49, %v10898_v25  ;;  %v2709_v55 = vsel %vm10083_vm4, %v2619_v37, %v2635_v15  ;;  %v4747_v29 = vunpack.i.h.bf16 %v8123_v30  ;;  %v2705_v34 = vsel %vm10135_vm15, %v7945_v35, %v2614_v39 }
 0x4ab   : > { %v2182_v26 = vsel %vm10087_vm8, %v4717_v11, %v10078_v58  ;;  %v2185_v59 = vsel %vm10087_vm8, %v4722_v1, %v4737_v12  ;;  %v10900_v11 = vunpack.i.l.bf16 %v8115_v31  ;;  %v2640_v1 = vrot.slane %v2126_v47, 2 }
 0x4ac   : > { %v2653_v9 = vrot.slane %v2182_v26, 6  ;;  %v2657_v43 = vrot.slane %v2185_v59, 6  ;;  %v2484_v25 = vrot.slane %v1961_v42, 6  ;;  %v4760_v26 = vpop.permute.xlu0 %4759  ;;  %v10903_v15 = vrot.slane %v8062_v51, 4 }
 0x4ad   : > { %v2154_v58 = vsel %vm10081_vm10, %v4732_v60, %v10900_v11  ;;  %v10904_v60 = vunpack.i.h.bf16 %v10896_v0  ;;  %vm10082_vm0 = vcmask 850944   ;;  %v10905_v46 = vrot.slane %v8007_v27, 2 }
 0x4ae   : > { %2828 = vmatpush.bf16.msra.mxu1 %v2770_v44  ;;  %v2658_v49 = vsel %vm10901_vm5, %v2653_v9, %v2657_v43  ;;  %v2714_v57 = vsel %vm10902_vm13, %v2154_v58, %v2653_v9  ;;  %v2766_v44 = vpack.c.bf16 %v2709_v55, %v2705_v34  ;;  %v10906_v58 = vunpack.i.l.bf16 %v8028_v16 }
 0x4af   : > { %v2717_v37 = vsel %vm10135_vm15, %v2658_v49, %v10903_v15  ;;  %v1958_v63 = vsel %vm10899_vm7, %v4536_v2, %v10904_v60  ;;  %v2641_v9 = vsel %vm10083_vm4, %v10905_v46, %v2640_v1  ;;  %v10907_v51 = vunpack.i.h.bf16 %v8028_v16 }
 0x4b0   : > { %v4750_v47 = vpop.permute.xlu1 %4749  ;;  %v2775_v59 = vpack.c.bf16 %v2717_v37, %v2714_v57  ;;  %v2211_v35 = vsel %vm10080_vm3, %v10906_v58, %v4756_v40  ;;  %v4541_v2 = vunpack.i.l.bf16 %v7558_v20  ;;  %v4762_v11 = vunpack.i.h.bf16 %v4760_v26 }
 0x4b1   : > { %v2214_v39 = vsel %vm10080_vm3, %v10907_v51, %v4757_v10  ;;  %v4752_v42 = vunpack.i.h.bf16 %v4750_v47  ;;  %v4751_v43 = vunpack.i.l.bf16 %v4750_v47  ;;  %v2151_v27 = vsel %vm10081_vm10, %v4746_v7, %v4747_v29  ;;  %v4770_v51 = vpop.permute.xlu2 %4769 }
 0x4b2   : > { %2829 = vmatpush.bf16.msra.mxu1 %v2766_v44  ;;  %2853 = vmatpush.bf16.msra.mxu3 %v2775_v59  ;;  %v2480_v55 = vrot.slane %v1958_v63, 6  ;;  %v4761_v1 = vunpack.i.l.bf16 %v4760_v26  ;;  %v2771_v49 = vpack.c.bf16 %v2151_v27, %v2641_v9  ;;  %vm10086_vm5 = vcmask 834560   ;;  %v10917_v44 = vld [vmem:[#allocation47_spill] sm:$0xff] }
 0x4b3   : > { %v8194_v40 = vsel %vm10082_vm0, %v2211_v35, 0.0  ;;  %v2219_v16 = vsel %vm10082_vm0, %v2214_v39, 0.0  ;;  %v10908_v10 = vunpack.i.l.bf16 %v8079_v41  ;;  %vm10909_vm13 = vcmask 703488  }
 0x4b4   : > { %v10910_v34 = vunpack.i.h.bf16 %v8079_v41  ;;  %vm10911_vm7 = vmmov %vm10909_vm13  ;;  %v5253_v37 = vmov 0   ;;  %v10912_v7 = vunpack.i.h.bf16 %v8043_v33  ;;  %vm10913_vm3 = vcmask 711680  }
 0x4b5   : > { %v2267_v57 = vsel %vm10909_vm13, %v10908_v10, %v4751_v43  ;;  %4773 = vset.pattern.permute.xlu0 %v5253_v37  ;;  %4964 = vset.pattern.permute.xlu2 %v5253_v37  ;;  %v10914_v60 = vunpack.i.l.bf16 %v8043_v33  ;;  %vm10915_vm10 = vmmov %vm10913_vm3  ;;  %vm10916_vm0 = vcmask 1041408   ;;  %vm10085_vm4 = vcmask 842752   ;;  %v10925_v43 = vld [vmem:[#allocation16_spill] sm:$0xff] }
 0x4b6   : > { %v2270_v15 = vsel %vm10911_vm7, %v10910_v34, %v4752_v42  ;;  %v2242_v26 = vsel %vm10913_vm3, %v10912_v7, %v4762_v11  ;;  %v2485_v47 = vsel %vm10916_vm0, %v2480_v55, %v2484_v25  ;;  %v4551_v59 = vunpack.i.l.bf16 %v10917_v44  ;;  %2854 = vmatpush.bf16.msra.mxu3 %v2771_v49 }
 0x4b7   : > { %v2239_v63 = vsel %vm10915_vm10, %v10914_v60, %v4761_v1  ;;  %v10918_v41 = vpack.c.bf16 %v7948_v48, %v7938_v4  ;;  %v10919_v46 = vrot.slane %v7662_v45, 4  ;;  %v10920_v33 = vunpack.i.h.bf16 %v10896_v0  ;;  %v1655_v45 = vld [vmem:[%s10922_s2] sm:$0xff]  ;;  %s10988_s2 = smov 90  }
 0x4b8   : > { %vm10921_vm3 = vcmask 1039360   ;;  %v2671_v25 = vrot.slane %v8194_v40, 4  ;;  %v2676_v35 = vrot.slane %v2219_v16, 4  ;;  %v2278_v39 = vsel %vm10086_vm5, %v2267_v57, 0.0  ;;  %v4765_v42 = vpop.permute.xlu1 %4764  ;;  %2788 = vperm.xlu0 %4773, %v1655_v45  }
 0x4b9   : > { %2830 = vmatpush.bf16.msra.mxu1 %v10918_v41  ;;  %v2583_v9 = vsel %vm10135_vm15, %v2485_v47, %v10919_v46  ;;  %v1959_v58 = vsel %vm10921_vm3, %v10920_v33, %v4541_v2  ;;  %v2279_v4 = vsel %vm10086_vm5, %v2270_v15, 0.0  ;;  %v10923_v48 = vunpack.i.h.bf16 %v10892_v52  ;;  %vm10924_vm0 = vmmov %vm10921_vm3 }
 0x4ba   : > { %vm10926_vm10 = vcmask 1041408   ;;  %v2246_v27 = vsel %vm10085_vm4, %v2239_v63, 0.0  ;;  %v2247_v1 = vsel %vm10085_vm4, %v2242_v26, 0.0  ;;  %vm10084_vm13 = vcmask 859136  }
 0x4bb   : > { %v1962_v0 = vsel %vm10924_vm0, %v10923_v48, %v4551_v59  ;;  %v2579_v11 = vsel %vm10926_vm10, %v10925_v43, %v2480_v55  ;;  %v4767_v49 = vunpack.i.h.bf16 %v4765_v42  ;;  %v4766_v40 = vunpack.i.l.bf16 %v4765_v42  ;;  %vm10937_vm4 = vmmov %vm10926_vm10 }
 0x4bc   : > { %v2793_v16 = vunpack.c.h.b16 %v8070_v28  ;;  %v4771_v10 = vunpack.i.l.bf16 %v4770_v51  ;;  %v10927_v52 = vpack.c.bf16 %v7836_v53, %v7697_v50  ;;  %v10928_v57 = vpack.c.bf16 %v8017_v21, %v7977_v54 }
 0x4bd   : > { %v2754_v55 = vpack.c.bf16 %v2583_v9, %v2579_v11  ;;  %v2784_v34 = vpack.c.bf16 %v2279_v4, %v2278_v39  ;;  %v2481_v15 = vrot.slane %v1959_v58, 6  ;;  %v10929_v37 = vunpack.i.l.bf16 %v8141_v18 }
 0x4be   : > { %2831 = vmatpush.bf16.msra.mxu1 %v10927_v52  ;;  %2855 = vmatpush.bf16.msra.mxu3 %v10928_v57  ;;  %v2186_v28 = vsel %vm10087_vm8, %v4737_v12, %v4767_v49  ;;  %v2677_v26 = vsel %vm10135_vm15, %v2671_v25, %v2676_v35  ;;  %v2688_v60 = vrot.slane %v2246_v27, 2  ;;  %v2693_v53 = vrot.slane %v2247_v1, 2 }
 0x4bf   : > { %v2183_v7 = vsel %vm10087_vm8, %v10929_v37, %v4766_v40  ;;  %v2191_v50 = vsel %vm10084_vm13, %v2186_v28, 0.0  ;;  %v10930_v21 = vmov 0.0   ;;  %v2486_v47 = vrot.slane %v1962_v0, 6  ;;  %v10943_v40 = vld [vmem:[#allocation19_spill] sm:$0xff] }
 0x4c0   : > { %v2190_v54 = vsel %vm10084_vm13, %v2183_v7, 0.0  ;;  %v2617_v63 = vrot.slane %v10930_v21, 4  ;;  %v2659_v41 = vrot.slane %v2191_v50, 6  ;;  %v8254_v46 = vpack.c.b16 %v2793_v16, %v2793_v16 }
 0x4c1   : > { %v2654_v9 = vrot.slane %v2190_v54, 6  ;;  %v10931_v18 = vpack.c.bf16 %v7952_v61, %v7876_v13  ;;  %vm10932_vm7 = vcmask 1044480   ;;  %vm10933_vm3 = vcmask 1045504  }
 0x4c2   : > { %2832 = vmatpush.bf16.msra.mxu1 %v2754_v55  ;;  %v2807_v12 = vsel %vm10932_vm7, %v2784_v34, 0  ;;  %v2721_v33 = vsel %vm10933_vm3, %v2677_v26, %v2688_v60  ;;  %v10934_v58 = vunpack.i.l.bf16 %v8115_v31  ;;  %vm10935_vm0 = vcmask 736256   ;;  %vm10936_vm13 = vmmov %vm10933_vm3 }
 0x4c3   : > { %2856 = vmatpush.bf16.msra.mxu3 %v10931_v18  ;;  %v8265_v39 = vrot.slane %v10930_v21, 2  ;;  %v2660_v4 = vsel %vm10926_vm10, %v2654_v9, %v2659_v41  ;;  %v2694_v45 = vsel %vm10936_vm13, %v2688_v60, %v2693_v53  ;;  %v2487_v48 = vsel %vm10937_vm4, %v2481_v15, %v2486_v47  ;;  %vm10938_vm5 = vmmov %vm10933_vm3 }
 0x4c4   : > { %v2155_v35 = vsel %vm10935_vm0, %v10934_v58, %v4771_v10  ;;  %v2596_v61 = vrot.slane %v10930_v21, 6  ;;  %v2780_v0 = vpack.c.bf16 %v2694_v45, %v2721_v33  ;;  %v10939_v31 = vrot.slane %v7725_v6, 4  ;;  %vm10945_vm13 = vmmov %vm10937_vm4 }
 0x4c5   : > { %v2712_v13 = vsel %vm10938_vm5, %v2617_v63, %v8265_v39  ;;  %vm10940_vm7 = vcmask 998400   ;;  %vm10941_vm3 = vcmask 867328   ;;  %v4772_v11 = vunpack.i.h.bf16 %v4770_v51  ;;  %vm10944_vm5 = vmmov %vm10937_vm4 }
 0x4c6   : > { %2877 = vmatpush.bf16.msrb.mxu1 %v2807_v12  ;;  %v2584_v42 = vsel %vm10135_vm15, %v2487_v48, %v10939_v31  ;;  %v2163_v43 = vsel %vm10941_vm3, %v2155_v35, 0.0  ;;  %v10942_v27 = vpack.c.bf16 %v7839_v5, %v7785_v62  ;;  %v2718_v49 = vsel %vm10135_vm15, %v2660_v4, %v2671_v25  ;;  %vm8289_vm0 = vmneg %vm10945_vm13 }
 0x4c7   : > { %4112 = vmatmul.msk.bf16.vlgmr.msra.gmra.mxu1 %vm10940_vm7, %v8254_v46  ;;  %v2715_v1 = vsel %vm10937_vm4, %v2163_v43, %v2654_v9  ;;  %v2580_v6 = vsel %vm10944_vm5, %v10943_v40, %v2481_v15  ;;  %v2781_v16 = vpack.c.bf16 %v8265_v39, %v2712_v13  ;;  %v2708_v52 = vsel %vm10135_vm15, %v2596_v61, %v2617_v63 }
 0x4c8   : > { %2857 = vmatpush.bf16.msra.mxu3 %v10942_v27  ;;  %v2755_v10 = vpack.c.bf16 %v2584_v42, %v2580_v6  ;;  %v2776_v57 = vpack.c.bf16 %v2718_v49, %v2715_v1  ;;  %vm10948_vm10 = vcmask 736256   ;;  %vm10949_vm7 = vmmov 1  }
 0x4c9   : > { %v2152_v62 = vsel %vm10948_vm10, %v4747_v29, %v4772_v11  ;;  %vm4114_vm4 = vmpackc.low %vm10941_vm3, %vm10949_vm7  ;;  %v4123_v5 = vpack.c.bf16 %v2708_v52, %v2596_v61  ;;  %v4542_v25 = vunpack.i.h.bf16 %v7558_v20  ;;  %vm10950_vm13 = vcmask 998400  }
 0x4ca   : > { %2878 = vmatpush.bf16.msrb.mxu1 %v2780_v0  ;;  %vm4122_vm5 = vmpackc.low %vm10949_vm7, %vm8289_vm0  ;;  %v4115_v55 = vpack.c.bf16 %v2152_v62, %v8023_v14  ;;  %v4552_v30 = vunpack.i.h.bf16 %v10917_v44  ;;  %vm10120_vm10 = vcmask 113664   ;;  %v2773_v29 = vpack.c.bf16 0.0, %v8265_v39 }
 0x4cb   : > { %v10951_v34 = vunpack.i.h.bf16 %v7712_v8  ;;  %vm10952_vm3 = vcmask 1039360   ;;  %v10954_v14 = vunpack.i.h.bf16 %v7491_v17  ;;  %v10955_v60 = vpack.c.bf16 %v8026_v38, %v7987_v32 }
 0x4cc   : > { %2858 = vmatpush.bf16.msra.mxu3 %v2755_v10  ;;  %v1960_v37 = vsel %vm10952_vm3, %v4541_v2, %v4542_v25  ;;  %v2769_v8 = vpack.c.bf16 %v2712_v13, %v2708_v52  ;;  %v10959_v53 = vpack.c.bf16 %v7852_v36, %v7879_v22  ;;  %v4127_v32 = vpack.c.bf16 %v2596_v61, %v10930_v21 }
 0x4cd   : > { %v1995_v15 = vsel %vm10120_vm10, %v10951_v34, 0.0  ;;  %v1994_v28 = vsel %vm10120_vm10, %v10954_v14, 0.0  ;;  %v2482_v50 = vrot.slane %v1960_v37, 6  ;;  %vm10960_vm8 = vcmask 1041408  }
 0x4ce   : > { %2879 = vmatpush.bf16.msrb.mxu1 %v2776_v57  ;;  %v2512_v26 = vrot.slane %v1995_v15, 4  ;;  %v2505_v44 = vrot.slane %v1994_v28, 4  ;;  %v10962_v41 = vrot.slane %v7705_v3, 4  ;;  %v10964_v21 = vpack.c.bf16 %v7700_v56, %v7788_v23 }
 0x4cf   : > { %4113 = vmatmul.msk.bf16.vlgmr.msra.gmra.mxu3 %vm10950_vm13, %v8254_v46  ;;  %vm10953_vm13 = vmmov %vm10952_vm3  ;;  %vm11027_vm10 = vcmask 703488  }
 0x4d0   : > { %2904 = vmatpush.bf16.msrb.mxu3 %v2781_v16  ;;  %v1963_v7 = vsel %vm10953_vm13, %v4551_v59, %v4552_v30  ;;  %v2513_v54 = vsel %vm10135_vm15, %v2505_v44, %v2512_v26 }
 0x4d1   : > { %v2488_v2 = vrot.slane %v1963_v7, 6 }
 0x4d2   : > { %4116 = vmatpush.bf16.msk.msrb.mxu1 %vm4114_vm4, %v4115_v55  ;;  %vm10956_vm4 = vcmask 121856  }
 0x4d3   : > { %v1966_v20 = vsel %vm10956_vm4, %v4542_v25, 0.0  ;;  %vm10958_vm13 = vmmov %vm10956_vm4  ;;  %v2489_v38 = vsel %vm10960_vm8, %v2482_v50, %v2488_v2 }
 0x4d4   : > { %4124 = vmatpush.bf16.msk.msrb.mxu3 %vm4122_vm5, %v4123_v5  ;;  %vm10957_vm5 = vcmask 1022976   ;;  %v1967_v59 = vsel %vm10958_vm13, %v4552_v30, 0.0  ;;  %v2483_v17 = vrot.slane %v1966_v20, 6  ;;  %vm4126_vm4 = vmpackc.low %vm8289_vm0, %vm10949_vm7  ;;  %v2585_v36 = vsel %vm10135_vm15, %v2489_v38, %v10962_v41 }
 0x4d5   : > { %vm4117_vm3 = vmpackc.low %vm10949_vm7, %vm10957_vm5  ;;  %v2490_v63 = vrot.slane %v1967_v59, 6  ;;  %vm10967_vm13 = vcmask 998400  }
 0x4d6   : > { %2881 = vmatpush.bf16.msrb.mxu1 %v10955_v60  ;;  %vm10961_vm5 = vmmov %vm10960_vm8 }
 0x4d7   : > { %v2581_v47 = vsel %vm10961_vm5, %v6661_v24, %v2482_v50  ;;  %vm10965_vm8 = vmmov %vm10961_vm5 }
 0x4d8   : > { %2906 = vmatpush.bf16.msrb.mxu3 %v2773_v29  ;;  %v2491_v9 = vsel %vm10965_vm8, %v2483_v17, %v2490_v63  ;;  %v2756_v18 = vpack.c.bf16 %v2585_v36, %v2581_v47  ;;  %vm10966_vm0 = vmmov %vm10961_vm5  ;;  %vm10994_vm8 = vcmask 343040  }
 0x4d9   : > { %v2582_v24 = vsel %vm10966_vm0, %v10783_v19, %v2483_v17  ;;  %v2586_v3 = vsel %vm10135_vm15, %v2491_v9, %v2505_v44  ;;  %vm10968_vm5 = vmmov %vm10967_vm13  ;;  %vm10995_vm0 = vcmask 334848  }
 0x4da   : > { %4119 = vmatpush.bf16.msk.msrb.mxu1 %vm4117_vm3, %v10959_v53  ;;  %vm10963_vm3 = vcmask 1045504   ;;  %v2757_v33 = vpack.c.bf16 %v2586_v3, %v2582_v24 }
 0x4db   : > { %v2590_v22 = vsel %vm10963_vm3, %v2513_v54, %v8265_v39  ;;  %vm10993_vm3 = vcmask 318464  }
 0x4dc   : > { %2907 = vmatpush.bf16.msrb.mxu3 %v2769_v8  ;;  %v2761_v12 = vpack.c.bf16 %v8265_v39, %v2590_v22 }
 0x4de   : > { %2883 = vmatpush.bf16.msrb.mxu1 %v10964_v21 }
 0x4e0   : > { %4128 = vmatpush.bf16.msk.msrb.mxu3 %vm4126_vm4, %v4127_v32  ;;  %vm10992_vm4 = vcmask 326656  }
 0x4e2   : > { %2884 = vmatpush.bf16.msrb.mxu1 %v2756_v18 }
 0x4e4   : > { %2909 = vmatpush.bf16.msrb.mxu3 %v2761_v12 }
 0x4e5   : > { %4120 = vmatmul.msk.bf16.vlgmr.msrb.gmra.mxu1 %vm10967_vm13, %v8254_v46  ;;  %vm10996_vm13 = vmmov %vm10994_vm8 }
 0x4e8   : > { %2910 = vmatpush.bf16.msrb.mxu3 %v2757_v33 }
 0x4eb   : > { %4129 = vmatmul.msk.bf16.vlgmr.msrb.gmra.mxu3 %vm10968_vm5, %v8254_v46  ;;  %vm10998_vm5 = vcmask 154624  }
 0x515   : > { %v2821_v56 = vpop.f32.mrf.mxu0 }
 0x51b   : > { %v2847_v23 = vpop.f32.mrf.mxu2 }
 0x51d   : > { %v2823_v58 = vpop.f32.mrf.mxu0 }
 0x523   : > { %v2849_v35 = vpop.f32.mrf.mxu2 }
 0x525   : > { %v2873_v39 = vpop.f32.mrf.mxu0 }
 0x52a   : > { %v2789_v13 = vpop.permute.xlu0 %2788 }
 0x52b   : > { %v2899_v4 = vpop.f32.mrf.mxu2  ;;  %v2822_v61 = vadd.f32 %v2821_v56, %v2789_v13  ;;  %v2848_v42 = vadd.f32 %v2847_v23, %v2789_v13  ;;  %v2874_v52 = vadd.f32 %v2873_v39, %v2789_v13 }
 0x52c   : > { %v2900_v15 = vadd.f32 %v2899_v4, %v2789_v13 }
 0x52d   : > { %v2875_v45 = vpop.f32.mrf.mxu0 }
 0x533   : > { %v2901_v19 = vpop.f32.mrf.mxu2 }
 0x544   : > { %v2834_v48 = vpop.f32.mrf.mxu1 }
 0x545   : > { %v8354_v31 = vadd.f32 %v2834_v48, %v2822_v61 }
 0x547   : > { %v2916_v43 = vmax.f32 %v8354_v31, 0.0 }
 0x549   : > { %v2928_v1 = vsel %vm10590_vm2, %v2916_v43, 0.0 }
 0x54c   : > { %v2836_v0 = vpop.f32.mrf.mxu1 }
 0x552   : > { %v2860_v11 = vpop.f32.mrf.mxu3 }
 0x553   : > { %v8357_v27 = vadd.f32 %v2860_v11, %v2848_v42 }
 0x555   : > { %v10112_v49 = vmax.f32 %v8357_v27, 0.0 }
 0x557   : > { %v2929_v6 = vsel %vm10592_vm1, %v10112_v49, 0.0 }
 0x558   : > { %v4789_v16 = vpack.i.bf16 %v2929_v6, %v2928_v1 }
 0x55a   : > { %v2862_v10 = vpop.f32.mrf.mxu3  ;;  %4790 = vrot.lane.b32.xlu2 %v4789_v16, %s10098_s21  ;;  %4785 = vrot.lane.b32.xlu0 %v4789_v16, %s10094_s20  ;;  %s10977_s20 = smov 126  }
 0x55b   : > { %4775 = vrot.lane.b32.xlu1 %v4789_v16, %s10971_s14 }
 0x562   : > { %v2886_v57 = vpop.f32.mrf.mxu1  ;;  %4805 = vrot.lane.b32.xlu2 %v4789_v16, %s10100_s16  ;;  %4800 = vrot.lane.b32.xlu0 %v4789_v16, %s10090_s13  ;;  %s10975_s13 = smov 20  }
 0x563   : > { %v8371_v51 = vadd.f32 %v2886_v57, %v2874_v52  ;;  %4780 = vrot.lane.b32.xlu1 %v4789_v16, %s10104_s19 }
 0x565   : > { %v10111_v62 = vmax.f32 %v8371_v51, 0.0 }
 0x567   : > { %v2930_v25 = vsel %vm10594_vm9, %v10111_v62, 0.0 }
 0x568   : > { %v4884_v30 = vpack.i.bf16 %v2930_v25, %v2929_v6 }
 0x56a   : > { %v2888_v55 = vpop.f32.mrf.mxu1  ;;  %4820 = vrot.lane.b32.xlu2 %v4789_v16, %s10102_s18  ;;  %4815 = vrot.lane.b32.xlu0 %v4789_v16, %s10096_s15  ;;  %s10978_s15 = smov 127  }
 0x56b   : > { %4795 = vrot.lane.b32.xlu1 %v4789_v16, %s10973_s22 }
 0x56e   : > { %v2912_v29 = vpop.f32.mrf.mxu3 }
 0x56f   : > { %v8402_v37 = vadd.f32 %v2912_v29, %v2900_v15 }
 0x571   : > { %v10113_v7 = vmax.f32 %v8402_v37, 0.0 }
 0x572   : > { %4830 = vrot.lane.b32.xlu2 %v4789_v16, %s10974_s23  ;;  %2980 = vrot.lane.b32.xlu0 %v2930_v25, %s10098_s21  ;;  %s10979_s21 = smov 2  }
 0x573   : > { %4810 = vrot.lane.b32.xlu1 %v4789_v16, %s10975_s13  ;;  %v2931_v28 = vsel %vm10631_vm11, %v10113_v7, 0.0 }
 0x574   : > { %v4899_v26 = vpack.i.bf16 %v2931_v28, %v2930_v25  ;;  %v4904_v60 = vpack.i.bf16 %v2931_v28, %v2928_v1 }
 0x576   : > { %v2914_v34 = vpop.f32.mrf.mxu3 }
 0x57a   : > { %4845 = vrot.lane.b32.xlu2 %v4789_v16, %s10976_s17  ;;  %3019 = vrot.lane.b32.xlu0 %v2930_v25, %s10100_s16  ;;  %s10981_s16 = smov 106  }
 0x57b   : > { %4825 = vrot.lane.b32.xlu1 %v4789_v16, %s10977_s20 }
 0x582   : > { %2941 = vrot.lane.b32.xlu2 %v2930_v25, %s10971_s14  ;;  %3058 = vrot.lane.b32.xlu0 %v2930_v25, %s10102_s18  ;;  %s10982_s18 = smov 22  }
 0x583   : > { %4835 = vrot.lane.b32.xlu1 %v4789_v16, %s10978_s15 }
 0x58a   : > { %2954 = vrot.lane.b32.xlu2 %v2930_v25, %s10104_s19  ;;  %4850 = vrot.lane.b32.xlu0 %v4884_v30, %s10106_s8  ;;  %s10983_s19 = smov 88   ;;  %s10984_s8 = smov 108  }
 0x58b   : > { %4840 = vrot.lane.b32.xlu1 %v4789_v16, %s10979_s21 }
 0x592   : > { %2993 = vrot.lane.b32.xlu2 %v2930_v25, %s10973_s22  ;;  %4860 = vrot.lane.b32.xlu0 %v4884_v30, %s10108_s29  ;;  %s10987_s29 = smov 89  }
 0x593   : > { %2967 = vrot.lane.b32.xlu1 %v2930_v25, %s10980_s0 }
 0x59a   : > { %3032 = vrot.lane.b32.xlu2 %v2930_v25, %s10975_s13  ;;  %4880 = vrot.lane.b32.xlu0 %v4884_v30, %s10981_s16 }
 0x59b   : > { %3006 = vrot.lane.b32.xlu1 %v2930_v25, %s10982_s18 }
 0x5a2   : > { %4855 = vrot.lane.b32.xlu2 %v4884_v30, %s10983_s19  ;;  %4890 = vrot.lane.b32.xlu0 %v4884_v30, %s10984_s8 }
 0x5a3   : > { %3045 = vrot.lane.b32.xlu1 %v2930_v25, %s10985_s1 }
 0x5aa   : > { %4870 = vrot.lane.b32.xlu2 %v4884_v30, %s10987_s29  ;;  %4900 = vrot.lane.b32.xlu0 %v4899_v26, %s10974_s23 }
 0x5ab   : > { %4865 = vrot.lane.b32.xlu1 %v4884_v30, %s10988_s2 }
 0x5b2   : > { %4875 = vrot.lane.b32.xlu2 %v4884_v30, %s10653_s9  ;;  %4910 = vrot.lane.b32.xlu0 %v4899_v26, %s10978_s15 }
 0x5b3   : > { %4905 = vrot.lane.b32.xlu1 %v4904_v60, %s10989_s5 }
 0x5b4   : > { %v4791_v8 = vpop.permute.xlu2 %4790 }
 0x5b5   : > { %v4793_v2 = vunpack.i.h.bf16 %v4791_v8  ;;  %v4792_v44 = vunpack.i.l.bf16 %v4791_v8 }
 0x5b7   : > { %v8447_v47 = vsel %vm10993_vm3, %v4792_v44, %v4793_v2  ;;  %vm11000_vm3 = vcmask 310272  }
 0x5ba   : > { %4885 = vrot.lane.b32.xlu2 %v4884_v30, %s10990_s10  ;;  %4915 = vrot.lane.b32.xlu0 %v4904_v60, %s10983_s19 }
 0x5bb   : > { %4920 = vrot.lane.b32.xlu1 %v4904_v60, %s10991_s26 }
 0x5bc   : > { %v8421_v50 = vpop.permute.xlu2 %4805 }
 0x5bd   : > { %v4808_v57 = vunpack.i.h.bf16 %v8421_v50  ;;  %v10125_v25 = vunpack.i.l.bf16 %v8421_v50 }
 0x5c2   : > { %4895 = vrot.lane.b32.xlu2 %v4899_v26, %s10977_s20  ;;  %4935 = vrot.lane.b32.xlu0 %v4899_v26, %s10979_s21 }
 0x5c3   : > { %4925 = vrot.lane.b32.xlu1 %v4904_v60, %s10988_s2 }
 0x5c4   : > { %v8426_v20 = vpop.permute.xlu2 %4820 }
 0x5c5   : > { %v4823_v23 = vunpack.i.h.bf16 %v8426_v20  ;;  %v4822_v58 = vunpack.i.l.bf16 %v8426_v20  ;;  %v11045_v20 = vmov 0 }
 0x5ca   : > { %4930 = vrot.lane.b32.xlu2 %v4904_v60, %s10987_s29  ;;  %4955 = vrot.lane.b32.xlu0 %v4904_v60, %s10990_s10 }
 0x5cb   : > { %4940 = vrot.lane.b32.xlu1 %v4899_v26, %s10976_s17 }
 0x5cc   : > { %v8431_v59 = vpop.permute.xlu2 %4830  ;;  %v8433_v17 = vpop.permute.xlu0 %4785 }
 0x5cd   : > { %v10132_v53 = vunpack.i.h.bf16 %v8433_v17  ;;  %v4787_v32 = vunpack.i.l.bf16 %v8433_v17  ;;  %v8437_v38 = vpop.permute.xlu1 %4775 }
 0x5ce   : > { %v4778_v36 = vunpack.i.h.bf16 %v8437_v38  ;;  %v10119_v22 = vunpack.i.l.bf16 %v8437_v38 }
 0x5cf   : > { %v8439_v54 = vpack.c.bf16 %v4792_v44, %v4787_v32  ;;  %v8444_v63 = vsel %vm10992_vm4, %v4787_v32, %v10132_v53  ;;  %vm10999_vm4 = vcmask 146432  }
 0x5d0   : > { %v8466_v3 = vsel %vm10994_vm8, %v10119_v22, %v4778_v36  ;;  %v8504_v1 = vsel %vm10999_vm4, %v4822_v58, %v4823_v23  ;;  %vm11001_vm8 = vcmask 179200   ;;  %vm11005_vm4 = vcmask 162816  }
 0x5d1   : > { %v11024_v22 = vmov 0 }
 0x5d2   : > { %4950 = vrot.lane.b32.xlu2 %v4904_v60, %s10981_s16 }
 0x5d3   : > { %4945 = vrot.lane.b32.xlu1 %v4904_v60, %s10653_s9 }
 0x5d4   : > { %v8455_v21 = vpop.permute.xlu2 %4845  ;;  %v8457_v9 = vpop.permute.xlu0 %4800 }
 0x5d5   : > { %v8459_v18 = vpop.permute.xlu1 %4780  ;;  %v10121_v35 = vunpack.i.h.bf16 %v8457_v9  ;;  %v10122_v39 = vunpack.i.l.bf16 %v8457_v9 }
 0x5d6   : > { %v4783_v12 = vunpack.i.h.bf16 %v8459_v18  ;;  %v10115_v24 = vunpack.i.l.bf16 %v8459_v18 }
 0x5d7   : > { %v8518_v10 = vsel %vm11001_vm8, %v10122_v39, %v10121_v35 }
 0x5d8   : > { %v8471_v33 = vsel %vm10995_vm0, %v10115_v24, %v4783_v12 }
 0x5db   : > { %4960 = vrot.lane.b32.xlu1 %v4904_v60, %s10984_s8 }
 0x5dc   : > { %v8480_v4 = vpop.permute.xlu2 %2941  ;;  %v8482_v45 = vpop.permute.xlu0 %4815 }
 0x5dd   : > { %v8486_v19 = vsel %vm10996_vm13, %v4778_v36, %v8480_v4  ;;  %v10114_v48 = vunpack.i.h.bf16 %v8482_v45  ;;  %v4817_v13 = vunpack.i.l.bf16 %v8482_v45  ;;  %v8490_v61 = vpop.permute.xlu1 %4795  ;;  %vm11003_vm13 = vcmask 318464  }
 0x5de   : > { %10997 = vst [vmem:[#allocation22_spill] sm:$0xff] %v8486_v19  ;;  %v4798_v0 = vunpack.i.h.bf16 %v8490_v61  ;;  %v10123_v42 = vunpack.i.l.bf16 %v8490_v61  ;;  %v10116_v36 = vunpack.i.h.bf16 %v8431_v59 }
 0x5df   : > { %v8499_v11 = vsel %vm10998_vm5, %v4817_v13, %v10114_v48  ;;  %vm11004_vm5 = vcmask 171008  }
 0x5e0   : > { %v8511_v16 = vsel %vm11000_vm3, %v10123_v42, %v4798_v0  ;;  %v8547_v44 = vsel %vm11004_vm5, %v10125_v25, %v4808_v57  ;;  %vm11006_vm8 = vmmov %vm11004_vm5 }
 0x5e1   : > { %vm11009_vm5 = vmmov %vm11005_vm4 }
 0x5e4   : > { %v8524_v55 = vpop.permute.xlu2 %2954  ;;  %v8526_v30 = vpop.permute.xlu0 %2980 }
 0x5e5   : > { %v8530_v29 = vsel %vm10995_vm0, %v4783_v12, %v8524_v55  ;;  %v8536_v15 = vsel %vm11003_vm13, %v4793_v2, %v8526_v30  ;;  %v8538_v28 = vpop.permute.xlu1 %4810  ;;  %v4832_v12 = vunpack.i.l.bf16 %v8431_v59  ;;  %vm11007_vm0 = vcmask 900096  }
 0x5e6   : > { %11002 = vst [vmem:[#allocation39_spill] sm:$0xff] %v8530_v29  ;;  %v4813_v60 = vunpack.i.h.bf16 %v8538_v28  ;;  %v10124_v8 = vunpack.i.l.bf16 %v8538_v28  ;;  %vm11008_vm13 = vcmask 1031168  }
 0x5e7   : > { %v3140_v6 = vsel %vm11007_vm0, %v4832_v12, %v10116_v36  ;;  %vm11015_vm0 = vcmask 7168  }
 0x5e8   : > { %v8552_v32 = vsel %vm11005_vm4, %v10124_v8, %v4813_v60  ;;  %vm11010_vm4 = vcmask 146432   ;;  %v11048_v8 = vunpack.i.l.bf16 %v8421_v50  ;;  %v11055_v50 = vunpack.i.l.bf16 %v8490_v61 }
 0x5ec   : > { %v8558_v26 = vpop.permute.xlu2 %2993  ;;  %v8560_v34 = vpop.permute.xlu0 %3019 }
 0x5ed   : > { %v8564_v62 = vsel %vm11000_vm3, %v4798_v0, %v8558_v26  ;;  %v8568_v56 = vsel %vm11006_vm8, %v4808_v57, %v8560_v34  ;;  %v8570_v41 = vpop.permute.xlu1 %4825  ;;  %vm11011_vm3 = vcmask 1039360   ;;  %vm8606_vm8 = vmpackc.low %vm10949_vm7, %vm10590_vm2  ;;  %vm11033_vm2 = vcmask 171008  }
 0x5ee   : > { %v10118_v52 = vunpack.i.h.bf16 %v8570_v41  ;;  %v4827_v2 = vunpack.i.l.bf16 %v8570_v41 }
 0x5f0   : > { %v3124_v49 = vsel %vm11008_vm13, %v4827_v2, %v10118_v52  ;;  %vm8615_vm13 = vmneg %vm11015_vm0 }
 0x5f1   : > { %v3310_v0 = vpack.c.bf16 %v3140_v6, %v3124_v49  ;;  %v11016_v49 = vmov 0 }
 0x5f2   : > { %v11017_v49 = vsel %vm8615_vm13, 4294967295, %v11016_v49 }
 0x5f3   : > { %3355 = vmatpush.bf16.msra.mxu3 %v3310_v0  ;;  %v11012_v0 = vmov 0  ;;  %11018 = vst [vmem:[#allocation51_spill] sm:$0xff] %v11017_v49 }
 0x5f4   : > { %v8580_v7 = vpop.permute.xlu2 %3032  ;;  %v8582_v57 = vpop.permute.xlu0 %3058  ;;  %v11013_v0 = vsel %vm8606_vm8, 4294967295, %v11012_v0 }
 0x5f5   : > { %v8586_v48 = vsel %vm11009_vm5, %v4813_v60, %v8580_v7  ;;  %v8592_v12 = vsel %vm11010_vm4, %v4823_v23, %v8582_v57  ;;  %v8594_v36 = vpop.permute.xlu1 %4835  ;;  %11014 = vst [vmem:[#allocation52_spill] sm:$0xff] %v11013_v0  ;;  %vm11019_vm5 = vcmask 15360  }
 0x5f6   : > { %v10117_v6 = vunpack.i.h.bf16 %v8594_v36  ;;  %v4837_v2 = vunpack.i.l.bf16 %v8594_v36  ;;  %vm8624_vm4 = vmneg %vm11019_vm5 }
 0x5f7   : > { %vm10134_vm5 = vmpackc.low %vm8615_vm13, %vm8624_vm4 }
 0x5f8   : > { %v3108_v60 = vsel %vm11011_vm3, %v4837_v2, %v10117_v6  ;;  %v11020_v6 = vmov 0  ;;  %vm11023_vm3 = vcmask 146432  }
 0x5f9   : > { %v4131_v23 = vpack.c.bf16 %v3108_v60, %v2916_v43  ;;  %v11021_v6 = vsel %vm8624_vm4, 4294967295, %v11020_v6  ;;  %vm8635_vm0 = vmneg %vm11023_vm3 }
 0x5fa   : > { %11022 = vst [vmem:[#allocation54_spill] sm:$0xff] %v11021_v6  ;;  %v11025_v22 = vsel %vm8635_vm0, 4294967295, %v11024_v22  ;;  %vm8670_vm3 = vmneg %vm11033_vm2  ;;  %vm11038_vm2 = vcmask 326656  }
 0x5fb   : > { %4132 = vmatpush.bf16.msk.msra.mxu3 %vm8606_vm8, %v4131_v23  ;;  %v10128_v23 = vunpack.i.l.bf16 %v8455_v21  ;;  %11026 = vst [vmem:[#allocation48_spill] sm:$0xff] %v11025_v22 }
 0x5fc   : > { %v8619_v24 = vpop.permute.xlu2 %4855  ;;  %v8621_v2 = vpop.permute.xlu0 %4850 }
 0x5fd   : > { %v10131_v31 = vunpack.i.h.bf16 %v8621_v2  ;;  %v10127_v43 = vunpack.i.l.bf16 %v8621_v2  ;;  %v8630_v60 = vpop.permute.xlu1 %4840 }
 0x5fe   : > { %v10130_v52 = vunpack.i.l.bf16 %v8630_v60 }
 0x5ff   : > { %v3276_v35 = vsel %vm11027_vm10, %v10127_v43, %v10131_v31  ;;  %vm11029_vm10 = vcmask 162816   ;;  %v11030_v43 = vmov 0 }
 0x600   : > { %v4136_v39 = vpack.c.bf16 %v10128_v23, %v10130_v52  ;;  %v3327_v42 = vpack.c.bf16 %v3276_v35, %v3276_v35  ;;  %vm8663_vm8 = vmneg %vm11029_vm10  ;;  %v11034_v52 = vmov 0 }
 0x601   : > { %v11031_v43 = vsel %vm8663_vm8, 4294967295, %v11030_v43  ;;  %v11035_v52 = vsel %vm8670_vm3, 4294967295, %v11034_v52  ;;  %vm11039_vm10 = vmpackc.low %vm8635_vm0, %vm7508_vm14 }
 0x602   : > { %4137 = vmatpush.bf16.msk.msra.mxu3 %vm10134_vm5, %v4136_v39  ;;  %v3348_v25 = vsel %vm10135_vm15, %v3327_v42, 0  ;;  %11032 = vst [vmem:[#allocation24_spill] sm:$0xff] %v11031_v43  ;;  %v4141_v39 = vpack.c.bf16 %v4822_v58, %v4817_v13  ;;  %vm10140_vm5 = vmpackc.low %vm8663_vm8, %vm8670_vm3  ;;  %v11040_v58 = vunpack.i.h.bf16 %v8619_v24  ;;  %v11041_v13 = vunpack.i.l.bf16 %v8619_v24 }
 0x603   : > { %3397 = vmatpush.bf16.msra.mxu2 %v3348_v25  ;;  %11036 = vst [vmem:[#allocation46_spill] sm:$0xff] %v11035_v52  ;;  %v11037_v25 = vunpack.i.h.bf16 %v8433_v17  ;;  %vm11043_vm15 = vcmask 711680   ;;  %v11049_v17 = vunpack.i.l.bf16 %v8538_v28  ;;  %v11056_v28 = vunpack.i.l.bf16 %v8457_v9 }
 0x604   : > { %v8678_v42 = vpop.permute.xlu2 %4870  ;;  %v8680_v31 = vpop.permute.xlu0 %4860  ;;  %vm11063_vm8 = vcmask 334848  }
 0x605   : > { %v10145_v53 = vunpack.i.h.bf16 %v8680_v31  ;;  %v10142_v35 = vunpack.i.l.bf16 %v8680_v31  ;;  %v8684_v23 = vpop.permute.xlu1 %2967  ;;  %v4146_v22 = vpack.c.bf16 %v11049_v17, %v11048_v8  ;;  %v4151_v8 = vpack.c.bf16 %v11056_v28, %v11055_v50 }
 0x606   : > { %v8690_v6 = vsel %vm11038_vm2, %v11037_v25, %v8684_v23  ;;  %4142 = vmatpush.bf16.msk.msra.mxu3 %vm11039_vm10, %v4141_v39  ;;  %vm11042_vm2 = vcmask 719872   ;;  %vm11044_vm10 = vcmask 179200   ;;  %v11085_v29 = vunpack.i.l.bf16 %v8678_v42 }
 0x607   : > { %v3246_v25 = vsel %vm11042_vm2, %v11041_v13, %v11040_v58  ;;  %v3261_v39 = vsel %vm11043_vm15, %v10142_v35, %v10145_v53  ;;  %vm8716_vm14 = vmneg %vm11044_vm10  ;;  %vm11051_vm2 = vcmask 318464   ;;  %v11052_v13 = vmov 0 }
 0x608   : > { %v11046_v20 = vsel %vm8716_vm14, 4294967295, %v11045_v20  ;;  %v3324_v49 = vpack.c.bf16 %v3261_v39, %v3246_v25  ;;  %vm10144_vm15 = vmpackc.low %vm8716_vm14, %vm7608_vm6  ;;  %v11061_v39 = vunpack.i.h.bf16 %v8457_v9  ;;  %v11064_v9 = vmov 0 }
 0x609   : > { %11047 = vst [vmem:[#allocation40_spill] sm:$0xff] %v11046_v20  ;;  %vm8734_vm10 = vmneg %vm11051_vm2  ;;  %vm11062_vm2 = vcmask 179200  }
 0x60a   : > { %4147 = vmatpush.bf16.msk.msra.mxu3 %vm10140_vm5, %v4146_v22  ;;  %3398 = vmatpush.bf16.msra.mxu2 %v3324_v49  ;;  %v11053_v13 = vsel %vm8734_vm10, 4294967295, %v11052_v13  ;;  %vm11057_vm5 = vcmask 326656   ;;  %v11058_v22 = vmov 0 }
 0x60b   : > { %11054 = vst [vmem:[#allocation53_spill] sm:$0xff] %v11053_v13  ;;  %vm8747_vm3 = vmneg %vm11057_vm5 }
 0x60c   : > { %v8742_v17 = vpop.permute.xlu2 %4875  ;;  %v8744_v25 = vpop.permute.xlu0 %4880  ;;  %v11059_v22 = vsel %vm8747_vm3, 4294967295, %v11058_v22  ;;  %vm10153_vm5 = vmpackc.low %vm8734_vm10, %vm8747_vm3  ;;  %vm11114_vm3 = vcmask 834560   ;;  %vm11130_vm10 = vcmask 842752  }
 0x60d   : > { %11060 = vst [vmem:[#allocation49_spill] sm:$0xff] %v11059_v22  ;;  %v8751_v49 = vpop.permute.xlu1 %3006  ;;  %v11070_v22 = vunpack.i.h.bf16 %v8482_v45 }
 0x60e   : > { %v8757_v35 = vsel %vm11062_vm2, %v11061_v39, %v8751_v49  ;;  %4152 = vmatpush.bf16.msk.msra.mxu3 %vm10144_vm15, %v4151_v8  ;;  %vm8773_vm2 = vmneg %vm11063_vm8  ;;  %v11068_v8 = vunpack.i.l.bf16 %v8437_v38  ;;  %v11069_v39 = vunpack.i.l.bf16 %v8459_v18  ;;  %vm11071_vm8 = vcmask 154624  }
 0x60f   : > { %v11065_v9 = vsel %vm8773_vm2, 4294967295, %v11064_v9  ;;  %vm10152_vm15 = vmpackc.low %vm8773_vm2, %vm7672_vm12  ;;  %vm11080_vm12 = vcmask 900096   ;;  %vm11086_vm2 = vcmask 728064  }
 0x610   : > { %11066 = vst [vmem:[#allocation43_spill] sm:$0xff] %v11065_v9  ;;  %v4161_v50 = vpack.c.bf16 %v11069_v39, %v11068_v8  ;;  %v11076_v8 = vunpack.i.h.bf16 %v8570_v41  ;;  %v11079_v39 = vunpack.i.h.bf16 %v8431_v59  ;;  %v11087_v59 = vunpack.i.h.bf16 %v8742_v17 }
 0x612   : > { %4157 = vmatpush.bf16.msk.msra.mxu3 %vm10153_vm5, %v8439_v54  ;;  %vm11077_vm5 = vcmask 1031168  }
 0x614   : > { %v8791_v61 = vpop.permute.xlu2 %4885  ;;  %v8793_v53 = vpop.permute.xlu0 %4890 }
 0x615   : > { %v8795_v58 = vpop.permute.xlu1 %3045 }
 0x616   : > { %v8801_v54 = vsel %vm11071_vm8, %v11070_v22, %v8795_v58  ;;  %4162 = vmatpush.bf16.msk.msra.mxu3 %vm10152_vm15, %v4161_v50  ;;  %vm11072_vm8 = vcmask 113664   ;;  %v11073_v22 = vmov 0 }
 0x617   : > { %vm8829_vm15 = vmpackc.low %vm10949_vm7, %vm11072_vm8  ;;  %vm11083_vm8 = vcmask 736256  }
 0x618   : > { %v11074_v22 = vsel %vm8829_vm15, 4294967295, %v11073_v22 }
 0x619   : > { %11075 = vst [vmem:[#allocation42_spill] sm:$0xff] %v11074_v22  ;;  %v11101_v22 = vunpack.i.h.bf16 %v8594_v36 }
 0x61c   : > { %v8815_v13 = vpop.permute.xlu2 %4895  ;;  %v8817_v9 = vpop.permute.xlu0 %4900 }
 0x61d   : > { %v10160_v50 = vunpack.i.h.bf16 %v8815_v13  ;;  %v10163_v38 = vunpack.i.l.bf16 %v8815_v13  ;;  %v8823_v20 = vpop.permute.xlu1 %4865  ;;  %v11078_v52 = vunpack.i.l.bf16 %v8817_v9 }
 0x61e   : > { %v11081_v0 = vunpack.i.h.bf16 %v8823_v20  ;;  %v11082_v46 = vunpack.i.l.bf16 %v8823_v20 }
 0x61f   : > { %v4188_v28 = vpack.c.bf16 0.0, %v10160_v50  ;;  %v3125_v18 = vsel %vm11077_vm5, %v11076_v8, %v10163_v38  ;;  %v3141_v45 = vsel %vm11080_vm12, %v11079_v39, %v11078_v52  ;;  %v11084_v50 = vunpack.i.h.bf16 %v8678_v42 }
 0x620   : > { %v3311_v43 = vpack.c.bf16 %v3141_v45, %v3125_v18  ;;  %v3216_v19 = vsel %vm11083_vm8, %v11082_v46, %v11081_v0  ;;  %v11088_v52 = vunpack.i.l.bf16 %v8742_v17  ;;  %vm11089_vm12 = vcmask 875520  }
 0x621   : > { %v3231_v41 = vsel %vm11086_vm2, %v11085_v29, %v11084_v50  ;;  %4189 = vmatpush.bf16.msk.msrb.mxu3 %vm8829_vm15, %v4188_v28  ;;  %v11090_v39 = vunpack.i.h.bf16 %v8744_v25  ;;  %v11091_v46 = vunpack.i.l.bf16 %v8744_v25  ;;  %vm11092_vm5 = vcmask 867328  }
 0x622   : > { %v3321_v8 = vpack.c.bf16 %v3231_v41, %v3216_v19  ;;  %v3186_v18 = vsel %vm11089_vm12, %v11088_v52, %v11087_v59  ;;  %v10170_v50 = vunpack.i.h.bf16 %v8793_v53  ;;  %v10166_v19 = vunpack.i.l.bf16 %v8793_v53  ;;  %3381 = vmatpush.bf16.msra.mxu1 %v3311_v43 }
 0x623   : > { %v3201_v0 = vsel %vm11092_vm5, %v11091_v46, %v11090_v39  ;;  %vm11093_vm2 = vcmask 121856   ;;  %v11094_v43 = vmov 0  ;;  %v11097_v28 = vunpack.i.l.bf16 %v8791_v61 }
 0x624   : > { %3399 = vmatpush.bf16.msra.mxu2 %v3321_v8  ;;  %v8872_v41 = vpop.permute.xlu0 %4910  ;;  %v3318_v38 = vpack.c.bf16 %v3201_v0, %v3186_v18  ;;  %vm8880_vm8 = vmpackc.low %vm11093_vm2, %vm10631_vm11  ;;  %v11096_v8 = vunpack.i.h.bf16 %v8791_v61  ;;  %vm11098_vm12 = vcmask 891904   ;;  %vm11099_vm5 = vcmask 883712  }
 0x625   : > { %v10167_v52 = vunpack.i.h.bf16 %v8872_v41  ;;  %v10169_v39 = vunpack.i.l.bf16 %v8872_v41  ;;  %v4906_v46 = vpop.permute.xlu1 %4905  ;;  %v11095_v43 = vsel %vm8880_vm8, 4294967295, %v11094_v43  ;;  %v3171_v18 = vsel %vm11099_vm5, %v10166_v19, %v10170_v50 }
 0x626   : > { %v4908_v45 = vunpack.i.h.bf16 %v4906_v46  ;;  %v4907_v29 = vunpack.i.l.bf16 %v4906_v46  ;;  %v3156_v59 = vsel %vm11098_vm12, %v11097_v28, %v11096_v8  ;;  %v11100_v0 = vmax.f32 %v8402_v37, 0.0  ;;  %vm8906_vm12 = vmpackc.low %vm10949_vm7, %vm10592_vm1 }
 0x627   : > { %vm11102_vm2 = vcmask 1039360   ;;  %v11103_v28 = vmov 0  ;;  %v11106_v8 = vmax.f32 %v8357_v27, 0.0  ;;  %v11107_v19 = vunpack.i.h.bf16 %v8621_v2 }
 0x628   : > { %v4191_v46 = vpack.c.bf16 %v10167_v52, %v11100_v0  ;;  %v3109_v14 = vsel %vm11102_vm2, %v11101_v22, %v10169_v39  ;;  %3400 = vmatpush.bf16.msra.mxu2 %v3318_v38  ;;  %v11104_v28 = vsel %vm8906_vm12, 4294967295, %v11103_v28  ;;  %vm11108_vm5 = vcmask 703488  }
 0x629   : > { %11105 = vst [vmem:[#allocation36_spill] sm:$0xff] %v11104_v28  ;;  %v4165_v37 = vpack.c.bf16 %v3109_v14, %v11106_v8  ;;  %v3277_v0 = vsel %vm11108_vm5, %v11107_v19, %v4908_v45  ;;  %v11109_v52 = vunpack.i.l.bf16 %v8621_v2  ;;  %vm11110_vm15 = vmmov %vm11108_vm5  ;;  %v11111_v38 = vunpack.i.h.bf16 %v8630_v60  ;;  %v2932_v45 = vld [vmem:[%s11115_s3] sm:$0xff]  ;;  %s11215_s3 = smov 18  }
 0x62a   : > { %v11112_v22 = vunpack.i.l.bf16 %v8630_v60  ;;  %vm11113_vm2 = vcmask 15360   ;;  %4192 = vmatpush.bf16.msk.msrb.mxu3 %vm8880_vm8, %v4191_v46  ;;  %v3315_v50 = vpack.c.bf16 %v3171_v18, %v3156_v59  ;;  %v3281_v14 = vsel %vm11114_vm3, %v3277_v0, 0.0 }
 0x62b   : > { %v3275_v36 = vsel %vm11110_vm15, %v4907_v29, %v11109_v52  ;;  %4166 = vmatpush.bf16.msk.msra.mxu1 %vm8906_vm12, %v4165_v37  ;;  %v3328_v2 = vpack.c.bf16 %v3281_v14, %v3281_v14  ;;  %v11116_v29 = vunpack.i.h.bf16 %v8455_v21  ;;  %v11117_v19 = vunpack.i.l.bf16 %v8455_v21 }
 0x62c   : > { %v3076_v39 = vsel %vm11113_vm2, %v11112_v22, %v11111_v38  ;;  %v3326_v27 = vpack.c.bf16 %v3275_v36, %v3275_v36  ;;  %vm11118_vm15 = vcmask 7168   ;;  %v3335_v8 = vunpack.c.l.b16 %v2932_v45  ;;  %3401 = vmatpush.bf16.msra.mxu2 %v3315_v50  ;;  %v4916_v0 = vpop.permute.xlu0 %4915 }
 0x62d   : > { %v3092_v52 = vsel %vm11118_vm15, %v11117_v19, %v11116_v29  ;;  %v3336_v46 = vunpack.c.h.b16 %v2932_v45  ;;  %vm11119_vm5 = vcmask 1043456   ;;  %vm10180_vm2 = vcmask 588800   ;;  %v4921_v28 = vpop.permute.xlu1 %4920 }
 0x62e   : > { %v3345_v59 = vsel %vm11119_vm5, %v3326_v27, 0  ;;  %v3303_v18 = vpack.c.bf16 %v3092_v52, %v3076_v39  ;;  %vm11120_vm3 = vmmov %vm11119_vm5  ;;  %v8938_v38 = vpack.c.b16 %v3335_v8, %v3335_v8  ;;  %v4918_v22 = vunpack.i.h.bf16 %v4916_v0 }
 0x62f   : > { %3371 = vmatpush.bf16.msra.mxu0 %v3345_v59  ;;  %v3351_v36 = vsel %vm11120_vm3, %v3328_v2, 0  ;;  %v8940_v37 = vpack.c.b16 %v3336_v46, %v3336_v46  ;;  %v4917_v14 = vunpack.i.l.bf16 %v4916_v0  ;;  %v4923_v29 = vunpack.i.h.bf16 %v4921_v28 }
 0x630   : > { %3423 = vmatpush.bf16.msrb.mxu2 %v3351_v36  ;;  %v4922_v19 = vunpack.i.l.bf16 %v4921_v28  ;;  %3383 = vmatpush.bf16.msra.mxu1 %v3303_v18  ;;  %v11121_v50 = vunpack.i.h.bf16 %v8619_v24  ;;  %vm11122_vm15 = vcmask 719872   ;;  %v11123_v27 = vunpack.i.l.bf16 %v8619_v24  ;;  %v4931_v24 = vpop.permute.xlu2 %4930 }
 0x631   : > { %3363 = vmatmul.bf16.vlgmr.msra.gmra.mxu3 %v8938_v38  ;;  %vm11124_vm5 = vmmov %vm11122_vm15  ;;  %4167 = vmatmul.msk.bf16.vlgmr.msra.gmra.mxu2 %vm10180_vm2, %v8940_v37  ;;  %v11125_v2 = vunpack.i.h.bf16 %v8680_v31  ;;  %vm11126_vm3 = vcmask 711680   ;;  %v11127_v28 = vunpack.i.l.bf16 %v8680_v31  ;;  %vm11129_vm8 = vcmask 850944  }
 0x632   : > { %v3247_v39 = vsel %vm11122_vm15, %v11121_v50, %v4918_v22  ;;  %v3245_v45 = vsel %vm11124_vm5, %v4917_v14, %v11123_v27  ;;  %vm11128_vm12 = vmmov %vm11126_vm3  ;;  %v11133_v0 = vpack.c.bf16 %v8504_v1, %v8499_v11  ;;  %v4933_v31 = vunpack.i.h.bf16 %v4931_v24 }
 0x633   : > { %v3262_v52 = vsel %vm11126_vm3, %v11125_v2, %v4923_v29  ;;  %v3260_v8 = vsel %vm11128_vm12, %v4922_v19, %v11127_v28  ;;  %vm8959_vm6 = vmpackc.low %vm11130_vm10, %vm11129_vm8  ;;  %v4932_v36 = vunpack.i.l.bf16 %v4931_v24  ;;  %v11134_v19 = vpack.c.bf16 %v8552_v32, %v8547_v44 }
 0x634   : > { %v4175_v59 = vpack.c.bf16 %v3262_v52, %v3247_v39  ;;  %v3323_v18 = vpack.c.bf16 %v3260_v8, %v3245_v45  ;;  %3384 = vmatpush.bf16.msra.mxu1 %v11133_v0  ;;  %v11135_v50 = vunpack.i.h.bf16 %v8678_v42  ;;  %vm11136_vm10 = vcmask 728064   ;;  %v8989_v32 = vpop.permute.xlu0 %4935 }
 0x635   : > { %v4926_v22 = vpop.permute.xlu1 %4925  ;;  %v11137_v11 = vunpack.i.h.bf16 %v8823_v20  ;;  %vm11138_vm8 = vcmask 736256   ;;  %v11139_v27 = vunpack.i.l.bf16 %v8823_v20  ;;  %v11141_v2 = vunpack.i.l.bf16 %v8678_v42  ;;  %vm11142_vm15 = vmmov %vm11136_vm10 }
 0x636   : > { %3372 = vmatpush.bf16.msra.mxu0 %v3323_v18  ;;  %4176 = vmatpush.bf16.msk.msrb.mxu2 %vm8959_vm6, %v4175_v59  ;;  %v4928_v14 = vunpack.i.h.bf16 %v4926_v22  ;;  %v4927_v29 = vunpack.i.l.bf16 %v4926_v22  ;;  %v3232_v39 = vsel %vm11136_vm10, %v11135_v50, %v4933_v31  ;;  %vm11140_vm12 = vmmov %vm11138_vm8  ;;  %vm11143_vm5 = vcmask 867328  }
 0x637   : > { %v3230_v52 = vsel %vm11142_vm15, %v4932_v36, %v11141_v2  ;;  %vm11144_vm3 = vcmask 859136   ;;  %v11145_v44 = vmov 0  ;;  %v11147_v24 = vpack.c.bf16 %v8518_v10, %v8511_v16 }
 0x638   : > { %3385 = vmatpush.bf16.msra.mxu1 %v11134_v19  ;;  %v3217_v1 = vsel %vm11138_vm8, %v11137_v11, %v4928_v14  ;;  %v3215_v45 = vsel %vm11140_vm12, %v4927_v29, %v11139_v27  ;;  %vm8985_vm2 = vmpackc.low %vm11144_vm3, %vm11143_vm5  ;;  %v4938_v42 = vunpack.i.h.bf16 %v8989_v32  ;;  %v4937_v20 = vunpack.i.l.bf16 %v8989_v32  ;;  %v4951_v36 = vpop.permute.xlu2 %4950  ;;  %v11209_v32 = vld [vmem:[#allocation22_spill] sm:$0xff] }
 0x639   : > { %v11146_v44 = vsel %vm8985_vm2, 4294967295, %v11145_v44  ;;  %v4178_v28 = vpack.c.bf16 %v3232_v39, %v3217_v1  ;;  %v3320_v8 = vpack.c.bf16 %v3230_v52, %v3215_v45  ;;  %v11148_v31 = vpack.c.bf16 %v8447_v47, %v8444_v63  ;;  %vm11153_vm12 = vmmov %vm11143_vm5 }
 0x63a   : > { %vm11149_vm10 = vcmask 15360   ;;  %vm11150_vm8 = vcmask 7168   ;;  %v11151_v14 = vpack.c.bf16 %v8471_v33, %v8466_v3  ;;  %v10184_v29 = vmov 0.0|0.0   ;;  %vm11159_vm3 = vmmov %vm11153_vm12 }
 0x63b   : > { %3373 = vmatpush.bf16.msra.mxu0 %v3320_v8  ;;  %4179 = vmatpush.bf16.msk.msrb.mxu2 %vm8985_vm2, %v4178_v28  ;;  %v3078_v16 = vsel %vm11149_vm10, %v4937_v20, %v4938_v42  ;;  %v4953_v19 = vunpack.i.h.bf16 %v4951_v36  ;;  %v4952_v50 = vunpack.i.l.bf16 %v4951_v36  ;;  %v3301_v63 = vpack.c.bf16 %v8582_v57, %v8795_v58 }
 0x63c   : > { %3386 = vmatpush.bf16.msra.mxu1 %v11147_v24  ;;  %v11152_v1 = vunpack.i.h.bf16 %v8744_v25  ;;  %v11154_v33 = vunpack.i.h.bf16 %v8742_v17  ;;  %vm11155_vm15 = vcmask 875520   ;;  %v11156_v45 = vunpack.i.l.bf16 %v8742_v17  ;;  %v4956_v28 = vpop.permute.xlu0 %4955 }
 0x63d   : > { %v8998_v59 = vpop.permute.xlu1 %4940  ;;  %vm11157_vm5 = vmmov %vm11155_vm15  ;;  %v11158_v57 = vunpack.i.l.bf16 %v8744_v25  ;;  %vm11160_vm10 = vcmask 1006592   ;;  %v11162_v52 = vmov 0  ;;  %v4903_v42 = vunpack.i.h.bf16 %v8817_v9 }
 0x63e   : > { %v4943_v18 = vunpack.i.h.bf16 %v8998_v59  ;;  %v4942_v0 = vunpack.i.l.bf16 %v8998_v59  ;;  %v3202_v3 = vsel %vm11153_vm12, %v11152_v1, %v4953_v19  ;;  %v4958_v17 = vunpack.i.h.bf16 %v4956_v28 }
 0x63f   : > { %v3200_v58 = vsel %vm11159_vm3, %v4952_v50, %v11158_v57  ;;  %v4957_v59 = vunpack.i.l.bf16 %v4956_v28  ;;  %v11165_v25 = vpack.c.bf16 %v8580_v7, %v8560_v34  ;;  %v11167_v36 = vunpack.i.l.bf16 %v8815_v13 }
 0x640   : > { %3387 = vmatpush.bf16.msra.mxu1 %v11148_v31  ;;  %v3094_v10 = vsel %vm11150_vm8, %v4942_v0, %v4943_v18  ;;  %vm11161_vm8 = vcmask 998400   ;;  %vm11168_vm12 = vcmask 1031168   ;;  %v11171_v50 = vunpack.i.h.bf16 %v8791_v61 }
 0x641   : > { %v3305_v22 = vpack.c.bf16 %v3094_v10, %v3078_v16  ;;  %vm9030_vm2 = vmpackc.low %vm11161_vm8, %vm11160_vm10  ;;  %v11166_v10 = vunpack.i.h.bf16 %v8815_v13  ;;  %v11173_v7 = vunpack.i.h.bf16 %v8793_v53  ;;  %vm11174_vm3 = vcmask 883712  }
 0x642   : > { %v11163_v52 = vsel %vm9030_vm2, 4294967295, %v11162_v52  ;;  %v11176_v13 = vunpack.i.l.bf16 %v8791_v61  ;;  %vm11179_vm8 = vmmov %vm11174_vm3  ;;  %v11182_v1 = vmov 0  ;;  %v11188_v61 = vunpack.i.h.bf16 %v8872_v41 }
 0x643   : > { %3435 = vmatpush.bf16.msrb.mxu3 %v3305_v22  ;;  %11164 = vst [vmem:[#allocation56_spill] sm:$0xff] %v11163_v52  ;;  %v3126_v22 = vsel %vm11168_vm12, %v11167_v36, %v11166_v10  ;;  %vm11180_vm12 = vcmask 1022976   ;;  %v11196_v57 = vmax.f32 %v8371_v51, 0.0  ;;  %v11201_v28 = vpack.c.bf16 %v8524_v55, %v8480_v4 }
 0x644   : > { %3388 = vmatpush.bf16.msra.mxu1 %v11151_v14  ;;  %v11169_v14 = vunpack.i.l.bf16 %v8817_v9  ;;  %v11178_v9 = vunpack.i.l.bf16 %v8793_v53  ;;  %v11189_v53 = vunpack.i.l.bf16 %v8872_v41  ;;  %v11202_v51 = vunpack.i.h.bf16 %v8630_v60 }
 0x645   : > { %v4946_v47 = vpop.permute.xlu1 %4945  ;;  %v11205_v4 = vpack.c.bf16 %v8586_v48, %v8568_v56  ;;  %v11206_v55 = vpack.c.bf16 %v8757_v35, %v8564_v62  ;;  %v11207_v60 = vpack.c.bf16 %v8536_v15, %v8690_v6 }
 0x646   : > { %v4948_v39 = vunpack.i.h.bf16 %v4946_v47  ;;  %v4947_v11 = vunpack.i.l.bf16 %v4946_v47  ;;  %v11175_v47 = vpack.c.bf16 %v8751_v49, %v8558_v26 }
 0x647   : > { %3389 = vmatmul.bf16.vlgmr.msra.gmra.mxu1 %v8938_v38  ;;  %3436 = vmatpush.bf16.msrb.mxu3 %v3301_v63 }
 0x648   : > { %3453 = vmatpush.bf16.msrb.mxu1 %v10184_v29  ;;  %v3187_v27 = vsel %vm11155_vm15, %v11154_v33, %v4948_v39  ;;  %v3185_v2 = vsel %vm11157_vm5, %v4947_v11, %v11156_v45  ;;  %vm11170_vm15 = vcmask 900096   ;;  %vm11172_vm5 = vcmask 891904   ;;  %v2933_v45 = vld [vmem:[%s11191_s4] sm:$0xff]  ;;  %s11216_s4 = smov 21  }
 0x649   : > { %v4181_v8 = vpack.c.bf16 %v3202_v3, %v3187_v27  ;;  %v3317_v24 = vpack.c.bf16 %v3200_v58, %v3185_v2  ;;  %v3142_v19 = vsel %vm11170_vm15, %v11169_v14, %v4903_v42  ;;  %v3157_v63 = vsel %vm11172_vm5, %v11171_v50, %v4958_v17  ;;  %vm11177_vm10 = vmmov %vm11172_vm5  ;;  %3331 = vperm.xlu2 %4964, %v2933_v45  }
 0x64a   : > { %v3155_v39 = vsel %vm11177_vm10, %v4957_v59, %v11176_v13  ;;  %vm11181_vm15 = vcmask 1014784   ;;  %vm11185_vm5 = vcmask 1031168   ;;  %v4169_v49 = vpack.c.bf16 %v3142_v19, %v3126_v22 }
 0x64b   : > { %3374 = vmatpush.bf16.msra.mxu0 %v3317_v24  ;;  %4182 = vmatpush.bf16.msk.msrb.mxu2 %vm9030_vm2, %v4181_v8  ;;  %vm9065_vm2 = vmpackc.low %vm11181_vm15, %vm11180_vm12  ;;  %vm11190_vm10 = vcmask 1039360   ;;  %v11192_v2 = vpack.c.bf16 %v8526_v30, %v8684_v23  ;;  %vm11195_vm12 = vcmask 588800   ;;  %v11199_v30 = vunpack.i.h.bf16 %v8455_v21 }
 0x64c   : > { %3437 = vmatpush.bf16.msrb.mxu3 %v11165_v25  ;;  %v11183_v1 = vsel %vm9065_vm2, 4294967295, %v11182_v1  ;;  %v3110_v27 = vsel %vm11190_vm10, %v11189_v53, %v11188_v61  ;;  %vm11197_vm15 = vmmov %vm11195_vm12  ;;  %vm11200_vm10 = vcmask 7168   ;;  %v11204_v21 = vpack.c.bf16 %v8592_v12, %v8801_v54 }
 0x64d   : > { %v4961_v18 = vpop.permute.xlu1 %4960  ;;  %11184 = vst [vmem:[#allocation35_spill] sm:$0xff] %v11183_v1  ;;  %v4172_v58 = vpack.c.bf16 %v3110_v27, %v11196_v57  ;;  %v3093_v23 = vsel %vm11200_vm10, %v11199_v30, %v4942_v0 }
 0x64e   : > { %v4963_v31 = vunpack.i.h.bf16 %v4961_v18  ;;  %v4962_v16 = vunpack.i.l.bf16 %v4961_v18 }
 0x650   : > { %v3172_v34 = vsel %vm11174_vm3, %v11173_v7, %v4963_v31  ;;  %3438 = vmatpush.bf16.msrb.mxu3 %v11175_v47  ;;  %v3170_v11 = vsel %vm11179_vm8, %v4962_v16, %v11178_v9  ;;  %vm9071_vm3 = vmpackc.low %vm11185_vm5, %vm10949_vm7  ;;  %v11211_v16 = vld [vmem:[#allocation13_spill] sm:$0xff] }
 0x651   : > { %v4184_v3 = vpack.c.bf16 %v3172_v34, %v3157_v63  ;;  %v3314_v33 = vpack.c.bf16 %v3170_v11, %v3155_v39  ;;  %vm9093_vm8 = vmpackc.low %vm10949_vm7, %vm10594_vm9  ;;  %vm11203_vm7 = vcmask 15360  }
 0x652   : > { %vm11198_vm5 = vmmov %vm11195_vm12  ;;  %v3077_v8 = vsel %vm11203_vm7, %v11202_v51, %v4937_v20  ;;  %vm11220_vm7 = vcmask 318464  }
 0x653   : > { %3375 = vmatpush.bf16.msra.mxu0 %v3314_v33  ;;  %4185 = vmatpush.bf16.msk.msrb.mxu2 %vm9065_vm2, %v4184_v3  ;;  %v3304_v24 = vpack.c.bf16 %v3093_v23, %v3077_v8 }
 0x654   : > { %3439 = vmatpush.bf16.msrb.mxu3 %v11192_v2 }
 0x656   : > { %4163 = vmatmul.msk.bf16.vlgmr.msra.gmra.mxu0 %vm11197_vm15, %v8940_v37  ;;  %4186 = vmatmul.msk.bf16.vlgmr.msrb.gmra.mxu2 %vm11198_vm5, %v8940_v37  ;;  %vm11218_vm15 = vcmask 334848   ;;  %vm11219_vm5 = vcmask 343040  }
 0x657   : > { %4170 = vmatpush.bf16.msk.msrb.mxu0 %vm9071_vm3, %v4169_v49  ;;  %4193 = vmatmul.msk.bf16.vlgmr.msrb.gmra.mxu1 %vm11195_vm12, %v8940_v37  ;;  %v11208_v37 = vld [vmem:[#allocation39_spill] sm:$0xff]  ;;  %vm11212_vm12 = vnez %v11211_v16 }
 0x658   : > { %3440 = vmatpush.bf16.msrb.mxu3 %v11201_v28  ;;  %v11210_v20 = vpack.c.bf16 %v11208_v37, %v11209_v32  ;;  %v3468_v37 = vld [vmem:[%s9850_s6] sm:$0xff] }
 0x65b   : > { %4173 = vmatpush.bf16.msk.msrb.mxu0 %vm9093_vm8, %v4172_v58  ;;  %3441 = vmatmul.bf16.vlgmr.msrb.gmra.mxu3 %v8938_v38 }
 0x65f   : > { %3409 = vmatpush.bf16.msrb.mxu0 %v3304_v24 }
 0x663   : > { %3410 = vmatpush.bf16.msrb.mxu0 %v11204_v21 }
 0x667   : > { %3411 = vmatpush.bf16.msrb.mxu0 %v11205_v4 }
 0x66b   : > { %3412 = vmatpush.bf16.msrb.mxu0 %v11206_v55 }
 0x66f   : > { %3413 = vmatpush.bf16.msrb.mxu0 %v11207_v60 }
 0x673   : > { %3414 = vmatpush.bf16.msrb.mxu0 %v11210_v20 }
 0x676   : > { %3415 = vmatmul.bf16.vlgmr.msrb.gmra.mxu0 %v8938_v38 }
 0x6a3   : > { %v3332_v48 = vpop.permute.xlu2 %3331 }
 0x6b4   : > { %v3364_v12 = vpop.f32.mrf.mxu3  ;;  %v3403_v54 = vpop.f32.mrf.mxu2 }
 0x6b5   : > { %v3365_v35 = vadd.f32 %v3364_v12, %v3332_v48 }
 0x6bc   : > { %v3366_v0 = vpop.f32.mrf.mxu3  ;;  %v3405_v42 = vpop.f32.mrf.mxu2 }
 0x6c4   : > { %v3390_v56 = vpop.f32.mrf.mxu1 }
 0x6c5   : > { %v3391_v17 = vadd.f32 %v3390_v56, %v3332_v48 }
 0x6c7   : > { %v9135_v62 = vadd.f32 %v3403_v54, %v3391_v17 }
 0x6c9   : > { %v10186_v15 = vmax.f32 %v9135_v62, 0.0 }
 0x6cb   : > { %v3464_v38 = vsel %vm10592_vm1, %v10186_v15, 0.0 }
 0x6cc   : > { %v3392_v59 = vpop.f32.mrf.mxu1 }
 0x6d3   : > { %v3377_v25 = vpop.f32.mrf.mxu0 }
 0x6d4   : > { %v3455_v6 = vpop.f32.mrf.mxu1  ;;  %v9138_v18 = vadd.f32 %v3377_v25, %v3365_v35 }
 0x6d6   : > { %v3459_v31 = vmax.f32 %v9138_v18, 0.0 }
 0x6d8   : > { %v9149_v10 = vsel %vm11212_vm12, %v3459_v31, 0.0 }
 0x6d9   : > { %3757 = vrot.lane.b32.xlu2 %v9149_v10, %s10987_s29  ;;  %3742 = vrot.lane.b32.xlu1 %v9149_v10, %s10988_s2  ;;  %v4965_v36 = vpack.i.bf16 %v3464_v38, %v9149_v10  ;;  %v3429_v22 = vpop.f32.mrf.mxu2 }
 0x6db   : > { %v3379_v19 = vpop.f32.mrf.mxu0  ;;  %4966 = vrot.lane.b32.xlu0 %v4965_v36, %s10971_s14 }
 0x6dc   : > { %v3457_v14 = vpop.f32.mrf.mxu1 }
 0x6de   : > { %v3442_v50 = vpop.f32.mrf.mxu3 }
 0x6df   : > { %v3443_v63 = vadd.f32 %v3442_v50, %v3332_v48 }
 0x6e1   : > { %v9157_v7 = vadd.f32 %v3455_v6, %v3443_v63  ;;  %3727 = vrot.lane.b32.xlu2 %v9149_v10, %s10981_s16  ;;  %3712 = vrot.lane.b32.xlu1 %v9149_v10, %s10653_s9  ;;  %v3431_v34 = vpop.f32.mrf.mxu2 }
 0x6e3   : > { %4981 = vrot.lane.b32.xlu0 %v4965_v36, %s11213_s30  ;;  %v10188_v61 = vmax.f32 %v9157_v7, 0.0 }
 0x6e5   : > { %v9203_v27 = vsel %vm10631_vm11, %v10188_v61, 0.0 }
 0x6e6   : > { %v3444_v47 = vpop.f32.mrf.mxu3  ;;  %v5105_v58 = vpack.i.bf16 %v9203_v27, %v9149_v10 }
 0x6e9   : > { %4976 = vrot.lane.b32.xlu1 %v4965_v36, %s10980_s0  ;;  %4971 = vrot.lane.b32.xlu2 %v4965_v36, %s11214_s12 }
 0x6eb   : > { %4991 = vrot.lane.b32.xlu0 %v4965_v36, %s10974_s23 }
 0x6f1   : > { %4996 = vrot.lane.b32.xlu1 %v4965_v36, %s10978_s15  ;;  %4986 = vrot.lane.b32.xlu2 %v4965_v36, %s10977_s20 }
 0x6f3   : > { %v3416_v13 = vpop.f32.mrf.mxu0  ;;  %5016 = vrot.lane.b32.xlu0 %v4965_v36, %s11215_s3 }
 0x6f4   : > { %v3417_v39 = vadd.f32 %v3416_v13, %v3332_v48 }
 0x6f6   : > { %v9172_v11 = vadd.f32 %v3429_v22, %v3417_v39  ;;  %v11228_v39 = vld [vmem:[#allocation52_spill] sm:$0xff] }
 0x6f8   : > { %v10183_v3 = vmax.f32 %v9172_v11, 0.0 }
 0x6f9   : > { %5001 = vrot.lane.b32.xlu1 %v4965_v36, %s10979_s21  ;;  %5006 = vrot.lane.b32.xlu2 %v4965_v36, %s10976_s17 }
 0x6fa   : > { %v3465_v33 = vsel %vm10594_vm9, %v10183_v3, 0.0 }
 0x6fb   : > { %v3418_v9 = vpop.f32.mrf.mxu0  ;;  %5036 = vrot.lane.b32.xlu0 %v4965_v36, %s10982_s18  ;;  %v5055_v49 = vpack.i.bf16 %v3465_v33, %v3464_v38  ;;  %v5090_v45 = vpack.i.bf16 %v9203_v27, %v3465_v33 }
 0x701   : > { %5021 = vrot.lane.b32.xlu1 %v4965_v36, %s11216_s4  ;;  %5011 = vrot.lane.b32.xlu2 %v4965_v36, %s10985_s1 }
 0x703   : > { %3489 = vrot.lane.b32.xlu0 %v3465_v33, %s11214_s12 }
 0x709   : > { %3476 = vrot.lane.b32.xlu1 %v3465_v33, %s10971_s14  ;;  %5026 = vrot.lane.b32.xlu2 %v4965_v36, %s10975_s13 }
 0x70b   : > { %5056 = vrot.lane.b32.xlu0 %v5055_v49, %s10988_s2 }
 0x711   : > { %3515 = vrot.lane.b32.xlu1 %v3465_v33, %s11213_s30  ;;  %5031 = vrot.lane.b32.xlu2 %v4965_v36, %s10973_s22 }
 0x713   : > { %5071 = vrot.lane.b32.xlu0 %v5055_v49, %s10981_s16 }
 0x719   : > { %5041 = vrot.lane.b32.xlu1 %v5055_v49, %s10989_s5  ;;  %3502 = vrot.lane.b32.xlu2 %v3465_v33, %s10980_s0 }
 0x71b   : > { %5076 = vrot.lane.b32.xlu0 %v5055_v49, %s10990_s10 }
 0x721   : > { %5046 = vrot.lane.b32.xlu1 %v5055_v49, %s10983_s19  ;;  %5051 = vrot.lane.b32.xlu2 %v5055_v49, %s10991_s26 }
 0x723   : > { %3593 = vrot.lane.b32.xlu0 %v3465_v33, %s11215_s3 }
 0x729   : > { %5061 = vrot.lane.b32.xlu1 %v5055_v49, %s10987_s29  ;;  %5066 = vrot.lane.b32.xlu2 %v5055_v49, %s10653_s9 }
 0x72b   : > { %3554 = vrot.lane.b32.xlu0 %v3465_v33, %s11216_s4 }
 0x731   : > { %5081 = vrot.lane.b32.xlu1 %v5055_v49, %s10984_s8  ;;  %3580 = vrot.lane.b32.xlu2 %v3465_v33, %s10985_s1 }
 0x733   : > { %v9208_v2 = vpop.permute.xlu2 %3757  ;;  %5091 = vrot.lane.b32.xlu0 %v5090_v45, %s10974_s23 }
 0x739   : > { %3567 = vrot.lane.b32.xlu1 %v3465_v33, %s10975_s13  ;;  %5086 = vrot.lane.b32.xlu2 %v5090_v45, %s10977_s20 }
 0x73b   : > { %v9213_v57 = vpop.permute.xlu2 %3727  ;;  %5096 = vrot.lane.b32.xlu0 %v5090_v45, %s10978_s15 }
 0x741   : > { %5106 = vrot.lane.b32.xlu1 %v5105_v58, %s10983_s19  ;;  %3682 = vrot.lane.b32.xlu2 %v9149_v10, %s10990_s10 }
 0x743   : > { %v9221_v30 = vpop.permute.xlu2 %4971  ;;  %5101 = vrot.lane.b32.xlu0 %v5105_v58, %s10989_s5  ;;  %s4263_s5 = sshll.u32 %s5316_s28, 5 }
 0x744   : > { %v4974_v23 = vunpack.i.h.bf16 %v9221_v30  ;;  %v10198_v28 = vunpack.i.l.bf16 %v9221_v30  ;;  %s4016_s23 = scalar_lea.hbm %s9851_s7, %s4263_s5 }
 0x746   : > { %v9231_v51 = vsel %vm11218_vm15, %v10198_v28, %v4974_v23  ;;  %vm11221_vm15 = vcmask 154624  }
 0x749   : > { %5121 = vrot.lane.b32.xlu1 %v5090_v45, %s10976_s17  ;;  %5111 = vrot.lane.b32.xlu2 %v5105_v58, %s10991_s26  ;;  %s5177_s17 = scalar_lea.hbm %s9851_s7, 64 }
 0x74b   : > { %v9235_v8 = vpop.permute.xlu1 %3742  ;;  %v9237_v24 = vpop.permute.xlu2 %4986  ;;  %5116 = vrot.lane.b32.xlu0 %v5090_v45, %s10979_s21 }
 0x74c   : > { %v10191_v59 = vunpack.i.h.bf16 %v9237_v24  ;;  %v4988_v35 = vunpack.i.l.bf16 %v9237_v24 }
 0x74d   : > { %v9240_v21 = vpop.permute.xlu0 %4966 }
 0x74e   : > { %v4969_v4 = vunpack.i.h.bf16 %v9240_v21  ;;  %v4968_v55 = vunpack.i.l.bf16 %v9240_v21 }
 0x750   : > { %v9249_v60 = vsel %vm11219_vm5, %v4968_v55, %v4969_v4  ;;  %vm11222_vm5 = vcmask 326656  }
 0x751   : > { %3528 = vrot.lane.b32.xlu1 %v3465_v33, %s10973_s22  ;;  %3541 = vrot.lane.b32.xlu2 %v3465_v33, %s10982_s18 }
 0x753   : > { %v9255_v32 = vpop.permute.xlu1 %3712  ;;  %v9257_v20 = vpop.permute.xlu2 %5006  ;;  %3697 = vrot.lane.b32.xlu0 %v9149_v10, %s10984_s8 }
 0x754   : > { %v10185_v12 = vunpack.i.h.bf16 %v9257_v20  ;;  %v5008_v54 = vunpack.i.l.bf16 %v9257_v20 }
 0x755   : > { %v9263_v0 = vpop.permute.xlu0 %4981 }
 0x756   : > { %v10195_v42 = vunpack.i.h.bf16 %v9263_v0  ;;  %v4983_v56 = vunpack.i.l.bf16 %v9263_v0  ;;  %v9270_v48 = vsel %vm11200_vm10, %v5008_v54, %v10185_v12  ;;  %vm11223_vm10 = vcmask 1031168  }
 0x757   : > { %v3659_v47 = vsel %vm11223_vm10, %v4988_v35, %v10191_v59  ;;  %vm11227_vm10 = vcmask 146432  }
 0x758   : > { %v9277_v17 = vsel %vm11220_vm7, %v4983_v56, %v10195_v42  ;;  %vm11224_vm7 = vcmask 900096  }
 0x759   : > { %3763 = vrot.lane.b32.xlu1 %v9203_v27, %s10987_s29  ;;  %3718 = vrot.lane.b32.xlu2 %v9203_v27, %s10653_s9 }
 0x75b   : > { %v9285_v6 = vpop.permute.xlu1 %4976  ;;  %v9287_v25 = vpop.permute.xlu2 %5011  ;;  %3748 = vrot.lane.b32.xlu0 %v9203_v27, %s10988_s2  ;;  %s282_s2 = sand.u32 1, %s5215_s25  }
 0x75c   : > { %v4979_v38 = vunpack.i.h.bf16 %v9285_v6  ;;  %v4978_v10 = vunpack.i.l.bf16 %v9285_v6  ;;  %v10193_v36 = vunpack.i.h.bf16 %v9287_v25  ;;  %v5013_v22 = vunpack.i.l.bf16 %v9287_v25  ;;  %s4098_s3 = sshll.u32 %s282_s2, 5  ;;  %s4005_s28 = scalar_lea.sflag [#allocation4], %s282_s2 }
 0x75d   : > { %v9295_v14 = vpop.permute.xlu0 %4991  ;;  %s284_s4 = scalar_lea.vmem [#allocation5], %s4098_s3 }
 0x75e   : > { %v10190_v19 = vunpack.i.h.bf16 %v9295_v14  ;;  %v4993_v50 = vunpack.i.l.bf16 %v9295_v14  ;;  %v9302_v63 = vsel %vm11221_vm15, %v5013_v22, %v10193_v36  ;;  %v9307_v34 = vsel %vm11222_vm5, %v4978_v10, %v4979_v38  ;;  %s4018_s29 = sshll.u32 %s284_s4, 4  ;;  %s4019_s29 = int_to_ptr.vmem [resolvable:$true] %s4018_s29 }
 0x75f   : > { %vm11225_vm15 = vcmask 1039360   ;;  %vm11226_vm5 = vcmask 162816  }
 0x760   : > { %v3675_v13 = vsel %vm11224_vm7, %v4993_v50, %v10190_v19  ;;  %vm11229_vm7 = vnez %v11228_v39 }
 0x761   : > { %v3845_v9 = vpack.c.bf16 %v3675_v13, %v3659_v47  ;;  %3688 = vrot.lane.b32.xlu1 %v9203_v27, %s10990_s10  ;;  %3703 = vrot.lane.b32.xlu2 %v9203_v27, %s10984_s8  ;;  %s4020_s8 = sshll.u32 %s4016_s23, 4  ;;  %s4021_s8 = int_to_ptr.hbm [resolvable:$true] %s4020_s8 }
 0x762   : > { %s5171_s9 = sshra.s32 %s4021_s8, 4  ;;  %s5172_s9 = int_to_ptr.hbm [resolvable:$true] %s5171_s9 }
 0x763   : > { %v9321_v33 = vpop.permute.xlu1 %4996  ;;  %v9323_v49 = vpop.permute.xlu2 %5026  ;;  %3733 = vrot.lane.b32.xlu0 %v9203_v27, %s10981_s16  ;;  %3887 = vmatpush.bf16.msra.mxu2 %v3845_v9  ;;  %s5173_s13 = scalar_lea.hbm %s5172_s9, 32  ;;  %p5178_p3 = scmp.lt.s32.totalorder %s5172_s9, %s9851_s7 }
 0x764   : > { %v10187_v45 = vunpack.i.h.bf16 %v9321_v33  ;;  %v4998_v58 = vunpack.i.l.bf16 %v9321_v33  ;;  %v10189_v35 = vunpack.i.h.bf16 %v9323_v49  ;;  %v5028_v50 = vunpack.i.l.bf16 %v9323_v49  ;;  %p5174_p0 = scmp.ne.s32.totalorder %s5172_s9, %s5173_s13  ;;  %p5179_p4 = scmp.lt.s32.totalorder %s5177_s17, %s5173_s13 }
 0x765   : > { %v9331_v47 = vpop.permute.xlu0 %5016 }
 0x766   : > { %v3643_v13 = vsel %vm11225_vm15, %v4998_v58, %v10187_v45  ;;  %v10192_v3 = vunpack.i.h.bf16 %v9331_v47  ;;  %v5018_v29 = vunpack.i.l.bf16 %v9331_v47  ;;  %v9341_v27 = vsel %vm11226_vm5, %v5028_v50, %v10189_v35  ;;  %p5175_p1 = pnand %p5174_p0, %p5333_p5  ;;  %p5180_p7 = por %p5179_p4, %p5178_p3 }
 0x767   : > { %v4195_v9 = vpack.c.bf16 %v3643_v13, %v3459_v31  ;;  %vm11230_vm15 = vcmask 15360   ;;  %vm11231_vm5 = vcmask 310272  }
 0x768   : > { %v9351_v58 = vsel %vm11227_vm10, %v5018_v29, %v10192_v3  ;;  %vm11234_vm10 = vmpackc.low %vm8615_vm13, %vm8624_vm4  ;;  %vm11237_vm13 = vcmask 326656   ;;  %p5176_p2 = pneg %p5175_p1 }
 0x769   : > { %4196 = vmatpush.bf16.msk.msra.mxu2 %vm11229_vm7, %v4195_v9  ;;  %vm11235_vm7 = vcmask 179200  }
 0x76a   : > { %p5181_p8 = pnand %p5180_p7, %p5176_p2 }
 0x76b   : > { %v9357_v15 = vpop.permute.xlu1 %5001  ;;  %v9359_v45 = vpop.permute.xlu2 %5031  ;;  %3866 = vperm.xlu0 %4773, %v3468_v37  }
 0x76c   : > { %v10194_v18 = vunpack.i.h.bf16 %v9357_v15  ;;  %v5003_v31 = vunpack.i.l.bf16 %v9357_v15  ;;  %v10196_v13 = vunpack.i.h.bf16 %v9359_v45  ;;  %v5033_v61 = vunpack.i.l.bf16 %v9359_v45 }
 0x76d   : > { %v9365_v35 = vpop.permute.xlu0 %5036 }
 0x76e   : > { %v4200_v39 = vpack.c.bf16 %v5008_v54, %v5003_v31  ;;  %v10197_v9 = vunpack.i.h.bf16 %v9365_v35  ;;  %v5038_v12 = vunpack.i.l.bf16 %v9365_v35  ;;  %v9372_v19 = vsel %vm11230_vm15, %v5003_v31, %v10194_v18  ;;  %v11256_v54 = vld [vmem:[#allocation59_spill] sm:$0xff] }
 0x76f   : > { %v9379_v59 = vsel %vm11231_vm5, %v5033_v61, %v10196_v13  ;;  %v4205_v18 = vpack.c.bf16 %v5018_v29, %v5013_v22  ;;  %vm11244_vm5 = vcmask 334848  }
 0x770   : > { %4201 = vmatpush.bf16.msk.msra.mxu2 %vm11234_vm10, %v4200_v39  ;;  %v9389_v36 = vsel %vm11235_vm7, %v5038_v12, %v10197_v9  ;;  %v11240_v9 = vld [vmem:[#allocation58_spill] sm:$0xff]  ;;  %vm11246_vm10 = vcmask 171008  }
 0x771   : > { %vm11241_vm4 = vnez %v11240_v9  ;;  %v11247_v9 = vld [vmem:[#allocation24_spill] sm:$0xff] }
 0x772   : > { %vm11242_vm15 = vmpackc.low %vm8635_vm0, %vm11241_vm4  ;;  %vm11248_vm0 = vnez %v11247_v9  ;;  %vm11253_vm4 = vcmask 343040   ;;  %v9443_v9 = vld [vmem:[#allocation2] sm:$0xff] }
 0x773   : > { %v9393_v37 = vpop.permute.xlu1 %5021  ;;  %v9395_v42 = vpop.permute.xlu2 %3502 }
 0x774   : > { %11236 = vst [vmem:[#allocation25_spill] sm:$0xff] %v9395_v42  ;;  %v10199_v13 = vunpack.i.h.bf16 %v9393_v37  ;;  %v5023_v3 = vunpack.i.l.bf16 %v9393_v37  ;;  %v9401_v39 = vsel %vm11237_vm13, %v4979_v38, %v9395_v42  ;;  %4206 = vmatpush.bf16.msk.msra.mxu2 %vm11242_vm15, %v4205_v18  ;;  %v11249_v18 = vld [vmem:[#allocation46_spill] sm:$0xff]  ;;  %vm11257_vm15 = vnez %v11256_v54  ;;  %v11261_v54 = vld [vmem:[#allocation49_spill] sm:$0xff] }
 0x775   : > { %11238 = vst [vmem:[#allocation28_spill] sm:$0xff] %v9401_v39  ;;  %v9408_v31 = vpop.permute.xlu0 %3489  ;;  %vm11250_vm7 = vnez %v11249_v18  ;;  %v11259_v18 = vld [vmem:[#allocation53_spill] sm:$0xff] }
 0x776   : > { %11243 = vst [vmem:[#allocation23_spill] sm:$0xff] %v9408_v31  ;;  %v4210_v29 = vpack.c.bf16 %v5028_v50, %v5023_v3  ;;  %v9414_v22 = vsel %vm11244_vm5, %v4974_v23, %v9408_v31  ;;  %v9419_v38 = vsel %vm11246_vm10, %v5023_v3, %v10199_v13  ;;  %vm11251_vm13 = vmpackc.low %vm11248_vm0, %vm11250_vm7  ;;  %v4215_v50 = vpack.c.bf16 %v5038_v12, %v5033_v61 }
 0x777   : > { %11245 = vst [vmem:[#allocation55_spill] sm:$0xff] %v9414_v22  ;;  %vm11258_vm5 = vmpackc.low %vm8716_vm14, %vm11257_vm15  ;;  %v3870_v13 = vunpack.c.l.b16 %v9443_v9  ;;  %vm11260_vm10 = vnez %v11259_v18  ;;  %vm11262_vm14 = vnez %v11261_v54  ;;  %vm11267_vm7 = vcmask 318464   ;;  %v11269_v54 = vld [vmem:[#allocation43_spill] sm:$0xff] }
 0x778   : > { %4211 = vmatpush.bf16.msk.msra.mxu2 %vm11251_vm13, %v4210_v29  ;;  %vm11263_vm0 = vmpackc.low %vm11260_vm10, %vm11262_vm14  ;;  %vm11270_vm13 = vnez %v11269_v54  ;;  %vm11275_vm10 = vcmask 1043456   ;;  %vm11277_vm14 = vcmask 154624  }
 0x779   : > { %v9467_v6 = vpack.c.b16 %v3870_v13, %v3870_v13 }
 0x77b   : > { %v9428_v28 = vpop.permute.xlu1 %3476  ;;  %v9453_v29 = vpop.permute.xlu2 %5051 }
 0x77c   : > { %11252 = vst [vmem:[#allocation34_spill] sm:$0xff] %v9428_v28  ;;  %v9434_v23 = vsel %vm11253_vm4, %v4969_v4, %v9428_v28  ;;  %4216 = vmatpush.bf16.msk.msra.mxu2 %vm11258_vm5, %v4215_v50  ;;  %v4220_v4 = vpack.c.bf16 %v4983_v56, %v4978_v10  ;;  %v11264_v50 = vunpack.i.l.bf16 %v9221_v30  ;;  %v11266_v56 = vunpack.i.h.bf16 %v9263_v0 }
 0x77d   : > { %11254 = vst [vmem:[#allocation27_spill] sm:$0xff] %v9434_v23  ;;  %v9447_v12 = vpop.permute.xlu0 %5056  ;;  %vm11274_vm5 = vcmask 703488   ;;  %v10211_v30 = vunpack.i.h.bf16 %v9453_v29  ;;  %v11296_v28 = vunpack.i.h.bf16 %v9237_v24  ;;  %v11303_v24 = vunpack.i.h.bf16 %v9393_v37 }
 0x77e   : > { %v4225_v61 = vpack.c.bf16 %v11264_v50, %v4968_v55 }
 0x780   : > { %4221 = vmatpush.bf16.msk.msra.mxu2 %vm11263_vm0, %v4220_v4  ;;  %v11271_v4 = vld [vmem:[#allocation20_spill] sm:$0xff]  ;;  %vm11280_vm0 = vcmask 146432  }
 0x781   : > { %vm11272_vm4 = vnez %v11271_v4 }
 0x782   : > { %vm11273_vm15 = vmpackc.low %vm11270_vm13, %vm11272_vm4  ;;  %vm11284_vm13 = vcmask 711680   ;;  %vm11285_vm4 = vcmask 736256  }
 0x783   : > { %v9465_v3 = vpop.permute.xlu1 %3515  ;;  %v9487_v55 = vpop.permute.xlu2 %5066 }
 0x784   : > { %11265 = vst [vmem:[#allocation50_spill] sm:$0xff] %v9465_v3  ;;  %v9473_v10 = vsel %vm11267_vm7, %v11266_v56, %v9465_v3  ;;  %4226 = vmatpush.bf16.msk.msra.mxu2 %vm11273_vm15, %v4225_v61  ;;  %vm11282_vm7 = vcmask 719872   ;;  %vm11286_vm15 = vcmask 728064  }
 0x785   : > { %11268 = vst [vmem:[#allocation21_spill] sm:$0xff] %v9473_v10  ;;  %v9484_v21 = vpop.permute.xlu0 %5071 }
 0x786   : > { %v10219_v10 = vunpack.i.l.bf16 %v9484_v21 }
 0x787   : > { %3895 = vmatmul.bf16.vlgmr.msra.gmra.mxu2 %v9467_v6 }
 0x78b   : > { %v9489_v0 = vpop.permute.xlu1 %5041  ;;  %v9503_v5 = vpop.permute.xlu2 %3580  ;;  %v11373_v26 = vld [vmem:[#allocation50_spill] sm:$0xff] }
 0x78c   : > { %v10204_v13 = vunpack.i.h.bf16 %v9489_v0  ;;  %v10203_v50 = vunpack.i.l.bf16 %v9489_v0 }
 0x78d   : > { %v9493_v56 = vpop.permute.xlu0 %5076 }
 0x78e   : > { %v3811_v61 = vsel %vm11274_vm5, %v10203_v50, %v10204_v13  ;;  %v10218_v13 = vunpack.i.h.bf16 %v9484_v21  ;;  %vm11287_vm5 = vcmask 867328  }
 0x78f   : > { %v3862_v54 = vpack.c.bf16 %v3811_v61, %v3811_v61  ;;  %v11276_v61 = vunpack.i.h.bf16 %v9287_v25  ;;  %v11283_v25 = vunpack.i.l.bf16 %v9453_v29 }
 0x791   : > { %v3882_v4 = vsel %vm11275_vm10, %v3862_v54, 0  ;;  %v9515_v54 = vsel %vm11277_vm14, %v11276_v61, %v9503_v5  ;;  %v3796_v61 = vsel %vm11284_vm13, %v11283_v25, %v10211_v30  ;;  %v3736_v25 = vsel %vm11287_vm5, %v10219_v10, %v10218_v13 }
 0x792   : > { %3929 = vmatpush.bf16.msra.mxu3 %v3882_v4  ;;  %11278 = vst [vmem:[#allocation26_spill] sm:$0xff] %v9515_v54  ;;  %v11279_v4 = vunpack.i.h.bf16 %v9331_v47  ;;  %v10213_v47 = vunpack.i.h.bf16 %v9447_v12  ;;  %v11289_v54 = vunpack.i.l.bf16 %v9487_v55  ;;  %vm11290_vm10 = vcmask 875520  }
 0x793   : > { %v9505_v53 = vpop.permute.xlu1 %5046  ;;  %vm11293_vm14 = vcmask 891904   ;;  %vm11300_vm13 = vcmask 900096   ;;  %vm11306_vm5 = vcmask 162816  }
 0x794   : > { %v10208_v40 = vunpack.i.h.bf16 %v9505_v53  ;;  %v10209_v16 = vunpack.i.l.bf16 %v9505_v53 }
 0x795   : > { %v9509_v23 = vpop.permute.xlu0 %3593 }
 0x796   : > { %v9521_v50 = vsel %vm11280_vm0, %v11279_v4, %v9509_v23  ;;  %v3781_v18 = vsel %vm11282_vm7, %v10209_v16, %v10208_v40  ;;  %v10214_v4 = vunpack.i.l.bf16 %v9447_v12  ;;  %vm11294_vm0 = vcmask 883712  }
 0x797   : > { %11281 = vst [vmem:[#allocation37_spill] sm:$0xff] %v9521_v50  ;;  %v3859_v22 = vpack.c.bf16 %v3796_v61, %v3781_v18  ;;  %v9562_v18 = vpop.permute.xlu2 %5086  ;;  %vm11297_vm7 = vcmask 1031168  }
 0x798   : > { %v10228_v13 = vunpack.i.h.bf16 %v9562_v18  ;;  %v11295_v50 = vunpack.i.l.bf16 %v9562_v18 }
 0x799   : > { %3930 = vmatpush.bf16.msra.mxu3 %v3859_v22  ;;  %v3751_v22 = vsel %vm11285_vm4, %v10214_v4, %v10213_v47  ;;  %v11288_v4 = vunpack.i.h.bf16 %v9487_v55 }
 0x79a   : > { %v3660_v31 = vsel %vm11297_vm7, %v11296_v28, %v11295_v50 }
 0x79b   : > { %v9537_v39 = vpop.permute.xlu1 %5061 }
 0x79c   : > { %v10216_v40 = vunpack.i.h.bf16 %v9537_v39  ;;  %v10217_v16 = vunpack.i.l.bf16 %v9537_v39 }
 0x79d   : > { %v9543_v1 = vpop.permute.xlu0 %3554 }
 0x79e   : > { %v3766_v61 = vsel %vm11286_vm15, %v10217_v16, %v10216_v40  ;;  %v3721_v40 = vsel %vm11290_vm10, %v11289_v54, %v11288_v4  ;;  %v11291_v54 = vunpack.i.h.bf16 %v9493_v56  ;;  %vm11304_vm15 = vcmask 171008  }
 0x79f   : > { %v3856_v30 = vpack.c.bf16 %v3766_v61, %v3751_v22  ;;  %v3871_v22 = vunpack.c.h.b16 %v9443_v9  ;;  %v3853_v16 = vpack.c.bf16 %v3736_v25, %v3721_v40  ;;  %v11292_v9 = vunpack.i.l.bf16 %v9493_v56 }
 0x7a0   : > { %v9615_v28 = vsel %vm11304_vm15, %v11303_v24, %v9543_v1  ;;  %vm11307_vm10 = vcmask 588800   ;;  %vm11320_vm15 = vcmask 834560  }
 0x7a1   : > { %3931 = vmatpush.bf16.msra.mxu3 %v3856_v30  ;;  %v3691_v4 = vsel %vm11293_vm14, %v11292_v9, %v11291_v54  ;;  %v9591_v10 = vpack.c.b16 %v3871_v22, %v3871_v22  ;;  %v11299_v9 = vunpack.i.h.bf16 %v9295_v14  ;;  %v11305_v14 = vunpack.i.h.bf16 %v9323_v49 }
 0x7a2   : > { %vm11310_vm14 = vcmask 1039360  }
 0x7a3   : > { %v9572_v61 = vpop.permute.xlu1 %5081 }
 0x7a4   : > { %v10225_v30 = vunpack.i.h.bf16 %v9572_v61  ;;  %v5083_v52 = vunpack.i.l.bf16 %v9572_v61 }
 0x7a5   : > { %v9578_v47 = vpop.permute.xlu0 %5091  ;;  %3932 = vmatpush.bf16.msra.mxu3 %v3853_v16  ;;  %v4252_v16 = vpack.c.bf16 0.0, %v10228_v13 }
 0x7a6   : > { %v3706_v40 = vsel %vm11294_vm0, %v5083_v52, %v10225_v30  ;;  %v11298_v54 = vunpack.i.l.bf16 %v9578_v47  ;;  %vm11312_vm0 = vnez %v11095_v43  ;;  %v11318_v43 = vunpack.i.l.bf16 %v9489_v0 }
 0x7a7   : > { %v3850_v25 = vpack.c.bf16 %v3706_v40, %v3691_v4  ;;  %v11301_v4 = vld [vmem:[#allocation42_spill] sm:$0xff]  ;;  %v9609_v40 = vpop.permute.xlu2 %3682 }
 0x7a8   : > { %v3676_v42 = vsel %vm11300_vm13, %v11299_v9, %v11298_v54  ;;  %vm11302_vm4 = vnez %v11301_v4  ;;  %v11311_v9 = vmax.f32 %v9135_v62, 0.0  ;;  %v11316_v62 = vunpack.i.h.bf16 %v9489_v0 }
 0x7a9   : > { %v3846_v3 = vpack.c.bf16 %v3676_v42, %v3660_v31  ;;  %3933 = vmatpush.bf16.msra.mxu3 %v3850_v25  ;;  %v11308_v25 = vmax.f32 %v9157_v7, 0.0  ;;  %vm11317_vm13 = vcmask 703488   ;;  %v11325_v0 = vunpack.i.h.bf16 %v9505_v53 }
 0x7ab   : > { %v9607_v22 = vpop.permute.xlu1 %3567  ;;  %3913 = vmatpush.bf16.msra.mxu0 %v3846_v3 }
 0x7ac   : > { %v9621_v42 = vsel %vm11306_vm5, %v11305_v14, %v9607_v22  ;;  %4231 = vmatmul.msk.bf16.vlgmr.msra.gmra.mxu3 %vm11307_vm10, %v9591_v10  ;;  %v11313_v14 = vld [vmem:[#allocation36_spill] sm:$0xff]  ;;  %vm11322_vm5 = vcmask 1043456   ;;  %vm11324_vm10 = vcmask 719872  }
 0x7ad   : > { %4253 = vmatpush.bf16.msk.msrb.mxu3 %vm11302_vm4, %v4252_v16  ;;  %v9627_v3 = vpop.permute.xlu0 %5096  ;;  %v11309_v16 = vunpack.i.h.bf16 %v9321_v33  ;;  %vm11314_vm7 = vnez %v11313_v14  ;;  %v11315_v33 = vpack.c.bf16 %v9270_v48, %v9372_v19  ;;  %vm11319_vm4 = vmmov %vm11317_vm13  ;;  %v11321_v48 = vpack.c.bf16 %v9351_v58, %v9302_v63 }
 0x7ae   : > { %v10226_v50 = vunpack.i.h.bf16 %v9627_v3  ;;  %v10227_v37 = vunpack.i.l.bf16 %v9627_v3  ;;  %v11328_v63 = vunpack.i.l.bf16 %v9453_v29 }
 0x7af   : > { %v5112_v31 = vpop.permute.xlu2 %5111 }
 0x7b0   : > { %v4255_v49 = vpack.c.bf16 %v10226_v50, %v11308_v25  ;;  %v3644_v54 = vsel %vm11310_vm14, %v11309_v16, %v10227_v37  ;;  %v5114_v37 = vunpack.i.h.bf16 %v5112_v31  ;;  %vm11326_vm14 = vmmov %vm11324_vm10 }
 0x7b1   : > { %v4229_v4 = vpack.c.bf16 %v3644_v54, %v11311_v9  ;;  %v5113_v9 = vunpack.i.l.bf16 %v5112_v31 }
 0x7b2   : > { %4256 = vmatpush.bf16.msk.msrb.mxu3 %vm11312_vm0, %v4255_v49  ;;  %vm11327_vm0 = vmmov %vm11322_vm5 }
 0x7b3   : > { %v5107_v24 = vpop.permute.xlu1 %5106  ;;  %4230 = vmatpush.bf16.msk.msra.mxu0 %vm11314_vm7, %v4229_v4  ;;  %vm11329_vm7 = vcmask 711680  }
 0x7b4   : > { %v5108_v50 = vunpack.i.l.bf16 %v5107_v24  ;;  %v5109_v16 = vunpack.i.h.bf16 %v5107_v24  ;;  %v11323_v24 = vunpack.i.l.bf16 %v9505_v53  ;;  %v3795_v58 = vsel %vm11329_vm7, %v5113_v9, %v11328_v63 }
 0x7b5   : > { %v5102_v7 = vpop.permute.xlu0 %5101 }
 0x7b6   : > { %v5104_v30 = vunpack.i.h.bf16 %v5102_v7  ;;  %v5103_v25 = vunpack.i.l.bf16 %v5102_v7 }
 0x7b7   : > { %3915 = vmatpush.bf16.msra.mxu0 %v11315_v33 }
 0x7b8   : > { %v3812_v54 = vsel %vm11317_vm13, %v11316_v62, %v5104_v30  ;;  %v3810_v49 = vsel %vm11319_vm4, %v5103_v25, %v11318_v43  ;;  %v3780_v30 = vsel %vm11324_vm10, %v5108_v50, %v11323_v24  ;;  %v3782_v25 = vsel %vm11326_vm14, %v11325_v0, %v5109_v16  ;;  %vm11331_vm13 = vmmov %vm11329_vm7 }
 0x7b9   : > { %v3861_v4 = vpack.c.bf16 %v3810_v49, %v3810_v49  ;;  %v3816_v14 = vsel %vm11320_vm15, %v3812_v54, 0.0  ;;  %v11330_v43 = vunpack.i.h.bf16 %v9453_v29  ;;  %v3858_v53 = vpack.c.bf16 %v3795_v58, %v3780_v30 }
 0x7ba   : > { %v3863_v7 = vpack.c.bf16 %v3816_v14, %v3816_v14  ;;  %v11333_v16 = vunpack.i.l.bf16 %v9537_v39  ;;  %vm11334_vm4 = vcmask 728064   ;;  %vm11335_vm15 = vcmask 15360  }
 0x7bb   : > { %v5122_v13 = vpop.permute.xlu1 %5121  ;;  %3916 = vmatpush.bf16.msra.mxu0 %v11321_v48  ;;  %v3879_v19 = vsel %vm11322_vm5, %v3861_v4, 0  ;;  %v3797_v49 = vsel %vm11331_vm13, %v11330_v43, %v5114_v37  ;;  %vm11336_vm5 = vcmask 7168   ;;  %v11337_v37 = vunpack.i.h.bf16 %v9357_v15  ;;  %vm11338_vm10 = vmmov %vm11335_vm15 }
 0x7bc   : > { %v5124_v33 = vunpack.i.h.bf16 %v5122_v13  ;;  %v5123_v62 = vunpack.i.l.bf16 %v5122_v13  ;;  %3903 = vmatpush.bf16.msra.mxu1 %v3879_v19  ;;  %v3885_v31 = vsel %vm11327_vm0, %v3863_v7, 0  ;;  %v4239_v14 = vpack.c.bf16 %v3797_v49, %v3782_v25  ;;  %vm11340_vm14 = vmmov %vm11336_vm5 }
 0x7bd   : > { %v5117_v54 = vpop.permute.xlu0 %5116  ;;  %3955 = vmatpush.bf16.msrb.mxu2 %v3885_v31  ;;  %v11332_v13 = vpack.c.bf16 %v9341_v27, %v9419_v38  ;;  %v3765_v7 = vsel %vm11334_vm4, %v9208_v2, %v11333_v16  ;;  %v11339_v19 = vunpack.i.h.bf16 %v9257_v20  ;;  %v3542_v27 = vpop.permute.xlu2 %3541  ;;  %v11341_v2 = vunpack.i.l.bf16 %v9447_v12 }
 0x7be   : > { %v5119_v50 = vunpack.i.h.bf16 %v5117_v54  ;;  %v5118_v4 = vunpack.i.l.bf16 %v5117_v54  ;;  %v3629_v29 = vsel %vm11336_vm5, %v5123_v62, %v5124_v33  ;;  %vm11342_vm0 = vcmask 736256  }
 0x7bf   : > { %3917 = vmatpush.bf16.msra.mxu0 %v11332_v13  ;;  %v3628_v24 = vsel %vm11340_vm14, %v11339_v19, %v5123_v62  ;;  %v3750_v30 = vsel %vm11342_vm0, %v9235_v8, %v11341_v2  ;;  %v11343_v15 = vpack.c.bf16 %v9389_v36, %v9379_v59  ;;  %v11344_v20 = vunpack.i.l.bf16 %v9484_v21 }
 0x7c0   : > { %3904 = vmatpush.bf16.msra.mxu1 %v3858_v53  ;;  %v3613_v9 = vsel %vm11335_vm15, %v5118_v4, %v5119_v50  ;;  %v3612_v48 = vsel %vm11338_vm10, %v11337_v37, %v5118_v4  ;;  %v3855_v25 = vpack.c.bf16 %v3765_v7, %v3750_v30  ;;  %vm11345_vm7 = vcmask 867328  }
 0x7c1   : > { %4240 = vmatpush.bf16.msk.msrb.mxu2 %vm8959_vm6, %v4239_v14  ;;  %v3840_v38 = vpack.c.bf16 %v3629_v29, %v3613_v9  ;;  %v3839_v0 = vpack.c.bf16 %v3628_v24, %v3612_v48  ;;  %v3735_v46 = vsel %vm11345_vm7, %v9213_v57, %v11344_v20  ;;  %v5094_v62 = vunpack.i.h.bf16 %v9578_v47 }
 0x7c2   : > { %v11346_v31 = vunpack.i.h.bf16 %v9365_v35  ;;  %vm11347_vm6 = vcmask 179200   ;;  %v11348_v8 = vunpack.i.h.bf16 %v9359_v45  ;;  %vm11349_vm13 = vcmask 310272  }
 0x7c3   : > { %v3529_v33 = vpop.permute.xlu1 %3528  ;;  %3918 = vmatpush.bf16.msra.mxu0 %v11343_v15  ;;  %3967 = vmatpush.bf16.msrb.mxu3 %v3840_v38  ;;  %v3836_v59 = vpack.c.bf16 %v9509_v23, %v9503_v5  ;;  %v11350_v43 = vunpack.i.l.bf16 %v9487_v55  ;;  %vm11351_vm4 = vcmask 875520   ;;  %vm11352_vm15 = vcmask 883712  }
 0x7c4   : > { %v3544_v54 = vsel %vm11347_vm6, %v11346_v31, %v3542_v27  ;;  %v3531_v63 = vsel %vm11349_vm13, %v11348_v8, %v3529_v33  ;;  %3905 = vmatpush.bf16.msra.mxu1 %v3855_v25  ;;  %v11353_v45 = vpack.c.bf16 %v9277_v17, %v9307_v34  ;;  %v11354_v50 = vunpack.i.l.bf16 %v9578_v47 }
 0x7c5   : > { %v3827_v36 = vpack.c.bf16 %v3544_v54, %v3531_v63  ;;  %v3698_v58 = vpop.permute.xlu0 %3697  ;;  %v3720_v57 = vsel %vm11351_vm4, %v9255_v32, %v11350_v43  ;;  %vm11355_vm5 = vcmask 900096   ;;  %v11356_v23 = vunpack.i.l.bf16 %v9493_v56  ;;  %v11398_v43 = vld [vmem:[#allocation55_spill] sm:$0xff] }
 0x7c6   : > { %v3852_v49 = vpack.c.bf16 %v3735_v46, %v3720_v57  ;;  %v3705_v35 = vsel %vm11352_vm15, %v3698_v58, %v5083_v52  ;;  %v3677_v5 = vsel %vm11355_vm5, %v11354_v50, %v5094_v62  ;;  %vm11357_vm10 = vcmask 891904   ;;  %v11384_v62 = vld [vmem:[#allocation37_spill] sm:$0xff]  ;;  %v11399_v57 = vld [vmem:[#allocation27_spill] sm:$0xff] }
 0x7c7   : > { %3919 = vmatpush.bf16.msra.mxu0 %v11353_v45  ;;  %3968 = vmatpush.bf16.msrb.mxu3 %v3836_v59  ;;  %v3690_v32 = vsel %vm11357_vm10, %v9609_v40, %v11356_v23  ;;  %v3832_v4 = vpack.c.bf16 %v9607_v22, %v9543_v1  ;;  %v11358_v52 = vunpack.i.h.bf16 %v9562_v18  ;;  %v11359_v53 = vunpack.i.l.bf16 %v9562_v18  ;;  %v3719_v18 = vpop.permute.xlu2 %3718  ;;  %v11396_v59 = vld [vmem:[#allocation28_spill] sm:$0xff] }
 0x7c8   : > { %3906 = vmatpush.bf16.msra.mxu1 %v3852_v49  ;;  %vm11360_vm14 = vcmask 1031168   ;;  %v3849_v34 = vpack.c.bf16 %v3705_v35, %v3690_v32  ;;  %v11361_v13 = vpack.c.bf16 %v9231_v51, %v9249_v60  ;;  %v11362_v16 = vunpack.i.h.bf16 %v9627_v3 }
 0x7c9   : > { %v3661_v17 = vsel %vm11360_vm14, %v11359_v53, %v11358_v52  ;;  %v11363_v40 = vunpack.i.l.bf16 %v9627_v3  ;;  %vm11364_vm0 = vcmask 1039360   ;;  %v11365_v22 = vmov 0.0|0.0  }
 0x7ca   : > { %v4233_v14 = vpack.c.bf16 %v3677_v5, %v3661_v17  ;;  %v3828_v7 = vpack.c.bf16 %v3542_v27, %v3529_v33  ;;  %v11366_v29 = vunpack.i.h.bf16 %v9537_v39  ;;  %vm11367_vm7 = vcmask 728064   ;;  %v11374_v39 = vld [vmem:[#allocation25_spill] sm:$0xff]  ;;  %v11379_v33 = vld [vmem:[#allocation23_spill] sm:$0xff] }
 0x7cb   : > { %v3764_v47 = vpop.permute.xlu1 %3763  ;;  %3920 = vmatpush.bf16.msra.mxu0 %v11361_v13  ;;  %3969 = vmatpush.bf16.msrb.mxu3 %v3832_v4  ;;  %v3645_v1 = vsel %vm11364_vm0, %v11363_v40, %v11362_v16  ;;  %v11368_v60 = vunpack.i.h.bf16 %v9447_v12  ;;  %vm11369_vm6 = vcmask 736256   ;;  %v11370_v3 = vmax.f32 %v9172_v11, 0.0 }
 0x7cc   : > { %3907 = vmatpush.bf16.msra.mxu1 %v3849_v34  ;;  %v3767_v51 = vsel %vm11367_vm7, %v11366_v29, %v3764_v47  ;;  %vm11371_vm13 = vcmask 588800   ;;  %v11375_v12 = vpack.c.bf16 %v11373_v26, %v11374_v39  ;;  %v11376_v11 = vunpack.i.h.bf16 %v9487_v55  ;;  %v11387_v55 = vld [vmem:[#allocation56_spill] sm:$0xff] }
 0x7cd   : > { %v3749_v9 = vpop.permute.xlu0 %3748  ;;  %v4236_v48 = vpack.c.bf16 %v3645_v1, %v11370_v3  ;;  %v11377_v2 = vunpack.i.h.bf16 %v9484_v21  ;;  %vm11378_vm15 = vcmask 867328   ;;  %v11382_v20 = vunpack.i.h.bf16 %v9493_v56  ;;  %vm11393_vm14 = vmmov %vm11371_vm13 }
 0x7ce   : > { %v3752_v37 = vsel %vm11369_vm6, %v11368_v60, %v3749_v9  ;;  %3921 = vmatmul.bf16.vlgmr.msra.gmra.mxu0 %v9467_v6  ;;  %v3722_v38 = vsel %vm11351_vm4, %v11376_v11, %v3719_v18  ;;  %vm11388_vm5 = vnez %v11387_v55  ;;  %v11389_v21 = vunpack.i.h.bf16 %v9572_v61  ;;  %vm11394_vm0 = vmmov %vm11371_vm13  ;;  %v11395_v61 = vld [vmem:[#allocation21_spill] sm:$0xff] }
 0x7cf   : > { %3985 = vmatpush.bf16.msrb.mxu0 %v11365_v22  ;;  %v4242_v19 = vpack.c.bf16 %v3767_v51, %v3752_v37  ;;  %4227 = vmatmul.msk.bf16.vlgmr.msra.gmra.mxu1 %vm11371_vm13, %v9591_v10  ;;  %v3704_v41 = vpop.permute.xlu2 %3703  ;;  %v11391_v56 = vpack.c.bf16 %v9621_v42, %v9615_v28  ;;  %v11397_v58 = vpack.c.bf16 %v11395_v61, %v11396_v59 }
 0x7d0   : > { %4234 = vmatpush.bf16.msk.msrb.mxu1 %vm9071_vm3, %v4233_v14  ;;  %3970 = vmatpush.bf16.msrb.mxu3 %v3828_v7  ;;  %vm11372_vm3 = vnez %v11146_v44  ;;  %v11380_v44 = vld [vmem:[#allocation34_spill] sm:$0xff]  ;;  %v11400_v49 = vpack.c.bf16 %v11398_v43, %v11399_v57 }
 0x7d1   : > { %4243 = vmatpush.bf16.msk.msrb.mxu2 %vm11372_vm3, %v4242_v19  ;;  %v11381_v15 = vpack.c.bf16 %v11379_v33, %v11380_v44 }
 0x7d3   : > { %v3689_v24 = vpop.permute.xlu1 %3688 }
 0x7d4   : > { %4237 = vmatpush.bf16.msk.msrb.mxu1 %vm9093_vm8, %v4236_v48  ;;  %3971 = vmatpush.bf16.msrb.mxu3 %v11375_v12  ;;  %vm11383_vm8 = vmmov %vm11357_vm10  ;;  %vm11390_vm10 = vcmask 883712  }
 0x7d5   : > { %v3734_v27 = vpop.permute.xlu0 %3733  ;;  %v3692_v46 = vsel %vm11383_vm8, %v11382_v20, %v3689_v24  ;;  %v3707_v54 = vsel %vm11390_vm10, %v11389_v21, %v3704_v41 }
 0x7d6   : > { %v3737_v30 = vsel %vm11378_vm15, %v11377_v2, %v3734_v27  ;;  %v4248_v8 = vpack.c.bf16 %v3707_v54, %v3692_v46 }
 0x7d7   : > { %v4245_v25 = vpack.c.bf16 %v3737_v30, %v3722_v38 }
 0x7d8   : > { %3941 = vmatpush.bf16.msrb.mxu1 %v3839_v0  ;;  %3972 = vmatpush.bf16.msrb.mxu3 %v11381_v15  ;;  %v11385_v0 = vld [vmem:[#allocation26_spill] sm:$0xff] }
 0x7d9   : > { %v11386_v31 = vpack.c.bf16 %v11384_v62, %v11385_v0  ;;  %4246 = vmatpush.bf16.msk.msrb.mxu2 %vm11388_vm5, %v4245_v25 }
 0x7db   : > { %3973 = vmatmul.bf16.vlgmr.msrb.gmra.mxu3 %v9467_v6 }
 0x7dc   : > { %3942 = vmatpush.bf16.msrb.mxu1 %v11386_v31 }
 0x7dd   : > { %4249 = vmatpush.bf16.msk.msrb.mxu2 %vm9065_vm2, %v4248_v8  ;;  %v3867_v50 = vpop.permute.xlu0 %3866  ;;  %vm4002_vm2 = vcmask 130048  }
 0x7de   : > { %4257 = vmatmul.msk.bf16.vlgmr.msrb.gmra.mxu0 %vm11393_vm14, %v9591_v10 }
 0x7e0   : > { %3943 = vmatpush.bf16.msrb.mxu1 %v11391_v56  ;;  %4250 = vmatmul.msk.bf16.vlgmr.msrb.gmra.mxu2 %vm11394_vm0, %v9591_v10 }
 0x7e4   : > { %3944 = vmatpush.bf16.msrb.mxu1 %v3827_v36 }
 0x7e8   : > { %3945 = vmatpush.bf16.msrb.mxu1 %v11397_v58 }
 0x7ec   : > { %3946 = vmatpush.bf16.msrb.mxu1 %v11400_v49 }
 0x7ef   : > { %3947 = vmatmul.bf16.vlgmr.msrb.gmra.mxu1 %v9467_v6 }
 0x80a   : > { %v3896_v28 = vpop.f32.mrf.mxu2 }
 0x80b   : > { %v3897_v5 = vadd.f32 %v3896_v28, %v3867_v50 }
 0x812   : > { %v3898_v42 = vpop.f32.mrf.mxu2 }
 0x82f   : > { %v3935_v35 = vpop.f32.mrf.mxu3 }
 0x837   : > { %v3937_v45 = vpop.f32.mrf.mxu3 }
 0x84b   : > { %v3922_v23 = vpop.f32.mrf.mxu0 }
 0x84c   : > { %v3923_v10 = vadd.f32 %v3922_v23, %v3867_v50  ;;  %v3909_v36 = vpop.f32.mrf.mxu1 }
 0x84d   : > { %v3910_v32 = vadd.f32 %v3909_v36, %v3897_v5 }
 0x84e   : > { %v3936_v4 = vadd.f32 %v3935_v35, %v3923_v10 }
 0x84f   : > { %v3991_v52 = vmax.f32 %v3910_v32, 0.0 }
 0x850   : > { %v3992_v53 = vmax.f32 %v3936_v4, 0.0 }
 0x851   : > { %v3995_v34 = vsel %vm11212_vm12, %v3991_v52, 0.0 }
 0x852   : > { %3999 = vst [vmem:[%s284_s4] sm:$0xff] %v3995_v34  ;;  %v3996_v14 = vsel %vm10592_vm1, %v3992_v53, 0.0 }
 0x853   : > { %4000 = vst [vmem:[%s284_s4 + $0x8] sm:$0xff] %v3996_v14  ;;  %v3924_v47 = vpop.f32.mrf.mxu0 }
 0x854   : > { %v3911_v13 = vpop.f32.mrf.mxu1 }
 0x85b   : > { %v3987_v16 = vpop.f32.mrf.mxu0 }
 0x85e   : > { %v3974_v40 = vpop.f32.mrf.mxu3 }
 0x85f   : > { %v3975_v1 = vadd.f32 %v3974_v40, %v3867_v50 }
 0x861   : > { %v3988_v22 = vadd.f32 %v3987_v16, %v3975_v1 }
 0x863   : > { %v3994_v18 = vmax.f32 %v3988_v22, 0.0  ;;  %v3961_v7 = vpop.f32.mrf.mxu2  ;;  %v3989_v9 = vpop.f32.mrf.mxu0 }
 0x865   : > { %v3998_v51 = vsel %vm10631_vm11, %v3994_v18, 0.0 }
 0x866   : > { %4003 = vst.msk [vmem:[%s284_s4 + $0x18] sm:$0xff] %vm4002_vm2, %v3998_v51  ;;  %v3976_v60 = vpop.f32.mrf.mxu3 }
 0x86b   : > { %v3963_v48 = vpop.f32.mrf.mxu2 }
 0x86c   : > { %v3948_v37 = vpop.f32.mrf.mxu1 }
 0x86d   : > { %v3949_v3 = vadd.f32 %v3948_v37, %v3867_v50 }
 0x86f   : > { %v3962_v19 = vadd.f32 %v3961_v7, %v3949_v3 }
 0x871   : > { %v3993_v26 = vmax.f32 %v3962_v19, 0.0 }
 0x873   : > { %v3997_v12 = vsel %vm10594_vm9, %v3993_v26, 0.0 }
 0x874   : > { %4001 = vst [vmem:[%s284_s4 + $0x10] sm:$0xff] %v3997_v12  ;;  %v3950_v24 = vpop.f32.mrf.mxu1 }
 0x875   : > { %5184 = shalt.err (!%p5181_p8)
}
 0x876   : > { %4268 = dma.vmem_to_hbm [thread:$0]  (%p5333_p5), %s4019_s29, 512, %s4021_s8, %s4005_s28  }
 0x877 PF: > { %p4280_p9 = scmp.ge.s32.totalorder %s5223_s27, 2  ;;  %s4032_s21 = sand.u32 1, %s5211_s24  }
 0x878   : > { %s4033_s14 = scalar_lea.sflag [#allocation4], %s4032_s21 }
 0x879   : > { %p4275_p10 = pnand %p4280_p9, %p5337_p6 }
 0x87b   : > { %p4276_p11 = pneg %p4275_p10 }
 0x87d   : > { %5206 = dma.done.wait (%p4276_p11), %s4033_s14, 512  }
 0x87e   : > { %5208 = vsyncadd (%p4276_p11), %s4033_s14, 4294966784  ;;  %s11406_s27 = sld [smem:[#allocation9_spill]]  ;;  %s11409_s24 = smov %s5215_s25 }
 0x87f   : > { %s11407_s22 = sld [smem:[#allocation8_spill]] }
 0x880   : > { %s11408_s26 = sld [smem:[#allocation10_spill]] }
 0x884   : > { %p18_p12 = scmp.ge.s32.totalorder %s11406_s27, 4  }
 0x885   : > { %s11410_s25 = smov %s11407_s22 }
 0x886   :  { %20 = sbr.rel (!%p18_p12) target bundleno = 11 (0xb), region = 88 }
 0x88b   :  { %4039 = vsyncpa [#allocation3], 1 }
 0x88c   :  { %4041 = vsyncpa [#allocation3 + $0x1], 1 }
 0x88d   :  { %4042 = vsyncpa [#allocation4], 1 }
 0x88e   :  { %4044 = vsyncpa [#allocation4 + $0x1], 1 }

</bundles_post_ra>
